<compile_context>
chip_gen: v5e
topology: v5e:2x2
jax: 0.10.0
libtpu: 0.0.40
codegen_flags: <defaults>
</compile_context>

<pallas_src>
import functools

import jax
import jax.numpy as jnp
from jax.experimental import pallas as pl
from jax.experimental.pallas import tpu as pltpu


def _upsample_kernel(x_ref, w_ref, b_ref, a_ref, o_ref, xpad_ref, *,
                     Cout, K, P, Hph, Wph):
    # x_ref   : (1, Cin, H, W)          VMEM, unpadded NCHW input (one batch elem)
    # w_ref   : (Cin*Cout*K*K,)         SMEM, flat ConvTranspose2d weights
    # b_ref   : (Cout,)                 SMEM, bias
    # a_ref   : (Cout,)                 SMEM, PReLU per-channel slopes
    # o_ref   : (1, Hph, 4*Cout*Wph)    VMEM, lane-dense phase slab (one batch elem)
    # xpad_ref: (Cin, H+2P, W+2P)       VMEM scratch, zero-padded input
    _, Cin, H, W = x_ref.shape
    Q = P + 1

    # --- fused zero-padding (replaces wrapper jnp.pad HBM pass) ---
    xpad_ref[...] = jnp.zeros_like(xpad_ref)
    for ci in range(Cin):
        xpad_ref[ci, P:P + H, P:P + W] = x_ref[0, ci].astype(jnp.float32)

    # --- 4 polyphase planes, all computed in this single grid step ---
    for rh in range(2):
        for rw in range(2):
            phase = 2 * rh + rw
            # Cout small f32 accumulators (~3 vregs each) -> no spills.
            accs = [jnp.zeros((Hph, Wph), jnp.float32) for _ in range(Cout)]
            for ci in range(Cin):
                xi = xpad_ref[ci]                      # one (Hp,Wp) load per (phase, ci)
                for q in range(Q):
                    kh = 2 * q + rh
                    if kh >= K:                        # statically-zero tap: skip
                        continue
                    for s in range(Q):
                        kw = 2 * s + rw
                        if kw >= K:                    # statically-zero tap: skip
                            continue
                        r0, c0 = P - q, P - s
                        xs = xi[r0:r0 + Hph, c0:c0 + Wph]   # in-register shifted window
                        for co in range(Cout):
                            widx = ((ci * Cout + co) * K + kh) * K + kw
                            accs[co] = accs[co] + xs * w_ref[widx]
            # bias + PReLU, written into the lane-dense (Hph, 4*Cout*Wph) slab.
            for co in range(Cout):
                y = accs[co] + b_ref[co]
                y = jnp.where(y > 0, y, a_ref[co] * y)      # PReLU
                col = (phase * Cout + co) * Wph
                o_ref[0, :, col:col + Wph] = y.astype(o_ref.dtype)


def upsample_forward(x_nchw, w, b, alpha, stride=2):
    """ConvTranspose2d(in, out, K, stride=2)(x) followed by PReLU(out). NCHW in/out."""
    assert stride == 2, "polyphase kernel is specialized for stride=2"
    N, Cin, H, W = x_nchw.shape
    _, Cout, K, _ = w.shape
    Ho = (H - 1) * stride + K
    Wo = (W - 1) * stride + K
    P = (K - 1) // 2             # input padding (1 for K=3)
    Hph = (Ho - 1) // 2 + 1      # rows per phase plane
    Wph = (Wo - 1) // 2 + 1      # cols per phase plane
    Hp, Wp = H + 2 * P, W + 2 * P
    CW = Cout * Wph

    w_flat = w.reshape(-1).astype(jnp.float32)   # only valid taps are read (statically)
    b32 = b.astype(jnp.float32)
    a32 = alpha.astype(jnp.float32)

    phases = pl.pallas_call(
        functools.partial(_upsample_kernel, Cout=Cout, K=K, P=P, Hph=Hph, Wph=Wph),
        out_shape=jax.ShapeDtypeStruct((N, Hph, 4 * CW), x_nchw.dtype),
        grid=(N,),
        in_specs=[
            pl.BlockSpec((1, Cin, H, W), lambda n: (n, 0, 0, 0)),
            pl.BlockSpec(memory_space=pltpu.MemorySpace.SMEM),   # weights
            pl.BlockSpec(memory_space=pltpu.MemorySpace.SMEM),   # bias
            pl.BlockSpec(memory_space=pltpu.MemorySpace.SMEM),   # PReLU alpha
        ],
        out_specs=pl.BlockSpec((1, Hph, 4 * CW), lambda n: (n, 0, 0)),
        scratch_shapes=[pltpu.VMEM((Cin, Hp, Wp), jnp.float32)],
        compiler_params=pltpu.CompilerParams(
            dimension_semantics=("parallel",)),
    )(x_nchw, w_flat, b32, a32)

    # Interleave phase planes into NCHW: out[:, co, 2m+rh, 2l+rw] = slab[m, ((2rh+rw)*Cout+co)*Wph + l].
    ph = phases.reshape(N, Hph, 2, 2, Cout, Wph)            # (n, m, rh, rw, co, l)
    out = jnp.transpose(ph, (0, 4, 1, 2, 5, 3)).reshape(N, Cout, 2 * Hph, 2 * Wph)
    return out[:, :, :Ho, :Wo]


def ref_upsample(x, w, b, alpha, stride=2):
    """Pure-JAX reference: ConvTranspose2d(stride=2) + PReLU, NCHW."""
    N, Cin, H, W = x.shape
    _, Cout, K, _ = w.shape
    Ho = (H - 1) * stride + K
    Wo = (W - 1) * stride + K
    out = jnp.zeros((N, Cout, Ho, Wo), jnp.float32)
    for kh in range(K):
        for kw in range(K):
            contrib = jnp.einsum('nchw,cd->ndhw', x, w[:, :, kh, kw])
            out = out.at[:, :,
                         kh:kh + stride * (H - 1) + 1:stride,
                         kw:kw + stride * (W - 1) + 1:stride].add(contrib)
    out = out + b[None, :, None, None]
    return jnp.where(out > 0, out, alpha[None, :, None, None] * out)


if __name__ == "__main__":
    # Small shapes consistent with the module: batch=2, in_dim=4, out_dim=8, 16x16, K=3.
    N, in_dim, out_dim, H, W, K = 2, 4, 8, 16, 16, 3

    key = jax.random.PRNGKey(0)
    kx, kw, kb = jax.random.split(key, 3)

    x = jax.random.normal(kx, (N, in_dim, H, W), dtype=jnp.float32)
    # Deterministic synthetic parameters (shapes from nn.ConvTranspose2d / nn.PReLU init):
    w = jax.random.uniform(kw, (in_dim, out_dim, K, K), jnp.float32, -0.3, 0.3)
    b = jax.random.uniform(kb, (out_dim,), jnp.float32, -0.1, 0.1)
    alpha = jnp.full((out_dim,), 0.25, dtype=jnp.float32)  # PReLU default slope

    fwd = jax.jit(upsample_forward)   # jit so the final reshape/transpose/slice fuses
    y = jax.block_until_ready(fwd(x, w, b, alpha))
    y_ref = jax.block_until_ready(ref_upsample(x, w, b, alpha))

    assert y.shape == (N, out_dim, (H - 1) * 2 + K, (W - 1) * 2 + K), y.shape
    assert jnp.allclose(y, y_ref, atol=1e-4, rtol=1e-4), float(jnp.max(jnp.abs(y - y_ref)))

    print("KERNEL_OK")
</pallas_src>

<mosaic_0001>
module attributes {stable_mosaic.version = 11 : i64} {
  func.func @_upsample_kernel(%arg0: i32, %arg1: memref<1x4x16x16xf32, #tpu.memory_space<vmem>>, %arg2: memref<288xf32, #tpu.memory_space<smem>>, %arg3: memref<8xf32, #tpu.memory_space<smem>>, %arg4: memref<8xf32, #tpu.memory_space<smem>>, %arg5: memref<1x17x544xf32, #tpu.memory_space<vmem>>, %arg6: memref<4x18x18xf32, #tpu.memory_space<vmem>>) attributes {dimension_semantics = [#tpu.dimension_semantics<parallel>], iteration_bounds = array<i64: 2>, scalar_prefetch = 0 : i64, scratch_operands = 1 : i64, tpu.core_type = #tpu.core_type<tc>, window_params = [{transform_indices = @transform_0, window_bounds = array<i64: 1, 4, 16, 16>}, {transform_indices = @transform_1, window_bounds = array<i64: 288>}, {transform_indices = @transform_2, window_bounds = array<i64: 8>}, {transform_indices = @transform_3, window_bounds = array<i64: 8>}, {transform_indices = @transform_4, window_bounds = array<i64: 1, 17, 544>}]} {
    %cst = arith.constant 0.000000e+00 : f32
    %0 = vector.broadcast %cst : f32 to vector<4x18x18xf32>
    %c0 = arith.constant 0 : index
    %c0_0 = arith.constant 0 : index
    %c0_1 = arith.constant 0 : index
    %1 = vector.load %arg6[%c0, %c0_0, %c0_1] : memref<4x18x18xf32, #tpu.memory_space<vmem>>, vector<4x18x18xf32>
    tpu.vector_store %arg6[%c0, %c0_0, %c0_1], %0 {strides = array<i32>} : memref<4x18x18xf32, #tpu.memory_space<vmem>>, vector<4x18x18xf32>,
    %c0_2 = arith.constant 0 : index
    %c0_3 = arith.constant 0 : index
    %c0_4 = arith.constant 0 : index
    %c0_5 = arith.constant 0 : index
    %2 = vector.load %arg1[%c0_2, %c0_3, %c0_4, %c0_5] : memref<1x4x16x16xf32, #tpu.memory_space<vmem>>, vector<1x1x16x16xf32>
    %3 = vector.shape_cast %2 : vector<1x1x16x16xf32> to vector<16x16xf32>
    %c0_6 = arith.constant 0 : index
    %c1 = arith.constant 1 : index
    %c1_7 = arith.constant 1 : index
    %4 = vector.load %arg6[%c0_6, %c1, %c1_7] : memref<4x18x18xf32, #tpu.memory_space<vmem>>, vector<1x16x16xf32>
    %5 = vector.shape_cast %4 : vector<1x16x16xf32> to vector<16x16xf32>
    %6 = vector.shape_cast %3 : vector<16x16xf32> to vector<1x16x16xf32>
    tpu.vector_store %arg6[%c0_6, %c1, %c1_7], %6 {strides = array<i32>} : memref<4x18x18xf32, #tpu.memory_space<vmem>>, vector<1x16x16xf32>,
    %c0_8 = arith.constant 0 : index
    %c1_9 = arith.constant 1 : index
    %c0_10 = arith.constant 0 : index
    %c0_11 = arith.constant 0 : index
    %7 = vector.load %arg1[%c0_8, %c1_9, %c0_10, %c0_11] : memref<1x4x16x16xf32, #tpu.memory_space<vmem>>, vector<1x1x16x16xf32>
    %8 = vector.shape_cast %7 : vector<1x1x16x16xf32> to vector<16x16xf32>
    %c1_12 = arith.constant 1 : index
    %c1_13 = arith.constant 1 : index
    %c1_14 = arith.constant 1 : index
    %9 = vector.load %arg6[%c1_12, %c1_13, %c1_14] : memref<4x18x18xf32, #tpu.memory_space<vmem>>, vector<1x16x16xf32>
    %10 = vector.shape_cast %9 : vector<1x16x16xf32> to vector<16x16xf32>
    %11 = vector.shape_cast %8 : vector<16x16xf32> to vector<1x16x16xf32>
    tpu.vector_store %arg6[%c1_12, %c1_13, %c1_14], %11 {strides = array<i32>} : memref<4x18x18xf32, #tpu.memory_space<vmem>>, vector<1x16x16xf32>,
    %c0_15 = arith.constant 0 : index
    %c2 = arith.constant 2 : index
    %c0_16 = arith.constant 0 : index
    %c0_17 = arith.constant 0 : index
    %12 = vector.load %arg1[%c0_15, %c2, %c0_16, %c0_17] : memref<1x4x16x16xf32, #tpu.memory_space<vmem>>, vector<1x1x16x16xf32>
    %13 = vector.shape_cast %12 : vector<1x1x16x16xf32> to vector<16x16xf32>
    %c2_18 = arith.constant 2 : index
    %c1_19 = arith.constant 1 : index
    %c1_20 = arith.constant 1 : index
    %14 = vector.load %arg6[%c2_18, %c1_19, %c1_20] : memref<4x18x18xf32, #tpu.memory_space<vmem>>, vector<1x16x16xf32>
    %15 = vector.shape_cast %14 : vector<1x16x16xf32> to vector<16x16xf32>
    %16 = vector.shape_cast %13 : vector<16x16xf32> to vector<1x16x16xf32>
    tpu.vector_store %arg6[%c2_18, %c1_19, %c1_20], %16 {strides = array<i32>} : memref<4x18x18xf32, #tpu.memory_space<vmem>>, vector<1x16x16xf32>,
    %c0_21 = arith.constant 0 : index
    %c3 = arith.constant 3 : index
    %c0_22 = arith.constant 0 : index
    %c0_23 = arith.constant 0 : index
    %17 = vector.load %arg1[%c0_21, %c3, %c0_22, %c0_23] : memref<1x4x16x16xf32, #tpu.memory_space<vmem>>, vector<1x1x16x16xf32>
    %18 = vector.shape_cast %17 : vector<1x1x16x16xf32> to vector<16x16xf32>
    %c3_24 = arith.constant 3 : index
    %c1_25 = arith.constant 1 : index
    %c1_26 = arith.constant 1 : index
    %19 = vector.load %arg6[%c3_24, %c1_25, %c1_26] : memref<4x18x18xf32, #tpu.memory_space<vmem>>, vector<1x16x16xf32>
    %20 = vector.shape_cast %19 : vector<1x16x16xf32> to vector<16x16xf32>
    %21 = vector.shape_cast %18 : vector<16x16xf32> to vector<1x16x16xf32>
    tpu.vector_store %arg6[%c3_24, %c1_25, %c1_26], %21 {strides = array<i32>} : memref<4x18x18xf32, #tpu.memory_space<vmem>>, vector<1x16x16xf32>,
    %cst_27 = arith.constant 0.000000e+00 : f32
    %22 = vector.broadcast %cst_27 : f32 to vector<17x17xf32>
    %cst_28 = arith.constant 0.000000e+00 : f32
    %23 = vector.broadcast %cst_28 : f32 to vector<17x17xf32>
    %cst_29 = arith.constant 0.000000e+00 : f32
    %24 = vector.broadcast %cst_29 : f32 to vector<17x17xf32>
    %cst_30 = arith.constant 0.000000e+00 : f32
    %25 = vector.broadcast %cst_30 : f32 to vector<17x17xf32>
    %cst_31 = arith.constant 0.000000e+00 : f32
    %26 = vector.broadcast %cst_31 : f32 to vector<17x17xf32>
    %cst_32 = arith.constant 0.000000e+00 : f32
    %27 = vector.broadcast %cst_32 : f32 to vector<17x17xf32>
    %cst_33 = arith.constant 0.000000e+00 : f32
    %28 = vector.broadcast %cst_33 : f32 to vector<17x17xf32>
    %cst_34 = arith.constant 0.000000e+00 : f32
    %29 = vector.broadcast %cst_34 : f32 to vector<17x17xf32>
    %c0_35 = arith.constant 0 : index
    %c0_36 = arith.constant 0 : index
    %c0_37 = arith.constant 0 : index
    %30 = vector.load %arg6[%c0_35, %c0_36, %c0_37] : memref<4x18x18xf32, #tpu.memory_space<vmem>>, vector<1x18x18xf32>
    %31 = vector.shape_cast %30 : vector<1x18x18xf32> to vector<18x18xf32>
    %32 = vector.extract_strided_slice %31 {offsets = [1, 1], sizes = [17, 17], strides = [1, 1]} : vector<18x18xf32> to vector<17x17xf32>
    %c0_38 = arith.constant 0 : index
    %33 = memref.load %arg2[%c0_38] : memref<288xf32, #tpu.memory_space<smem>>
    %34 = vector.broadcast %33 : f32 to vector<17x17xf32>
    %35 = arith.mulf %32, %34 : vector<17x17xf32>
    %36 = arith.addf %22, %35 : vector<17x17xf32>
    %c9 = arith.constant 9 : index
    %37 = memref.load %arg2[%c9] : memref<288xf32, #tpu.memory_space<smem>>
    %38 = vector.broadcast %37 : f32 to vector<17x17xf32>
    %39 = arith.mulf %32, %38 : vector<17x17xf32>
    %40 = arith.addf %23, %39 : vector<17x17xf32>
    %c18 = arith.constant 18 : index
    %41 = memref.load %arg2[%c18] : memref<288xf32, #tpu.memory_space<smem>>
    %42 = vector.broadcast %41 : f32 to vector<17x17xf32>
    %43 = arith.mulf %32, %42 : vector<17x17xf32>
    %44 = arith.addf %24, %43 : vector<17x17xf32>
    %c27 = arith.constant 27 : index
    %45 = memref.load %arg2[%c27] : memref<288xf32, #tpu.memory_space<smem>>
    %46 = vector.broadcast %45 : f32 to vector<17x17xf32>
    %47 = arith.mulf %32, %46 : vector<17x17xf32>
    %48 = arith.addf %25, %47 : vector<17x17xf32>
    %c36 = arith.constant 36 : index
    %49 = memref.load %arg2[%c36] : memref<288xf32, #tpu.memory_space<smem>>
    %50 = vector.broadcast %49 : f32 to vector<17x17xf32>
    %51 = arith.mulf %32, %50 : vector<17x17xf32>
    %52 = arith.addf %26, %51 : vector<17x17xf32>
    %c45 = arith.constant 45 : index
    %53 = memref.load %arg2[%c45] : memref<288xf32, #tpu.memory_space<smem>>
    %54 = vector.broadcast %53 : f32 to vector<17x17xf32>
    %55 = arith.mulf %32, %54 : vector<17x17xf32>
    %56 = arith.addf %27, %55 : vector<17x17xf32>
    %c54 = arith.constant 54 : index
    %57 = memref.load %arg2[%c54] : memref<288xf32, #tpu.memory_space<smem>>
    %58 = vector.broadcast %57 : f32 to vector<17x17xf32>
    %59 = arith.mulf %32, %58 : vector<17x17xf32>
    %60 = arith.addf %28, %59 : vector<17x17xf32>
    %c63 = arith.constant 63 : index
    %61 = memref.load %arg2[%c63] : memref<288xf32, #tpu.memory_space<smem>>
    %62 = vector.broadcast %61 : f32 to vector<17x17xf32>
    %63 = arith.mulf %32, %62 : vector<17x17xf32>
    %64 = arith.addf %29, %63 : vector<17x17xf32>
    %65 = vector.extract_strided_slice %31 {offsets = [1, 0], sizes = [17, 17], strides = [1, 1]} : vector<18x18xf32> to vector<17x17xf32>
    %c2_39 = arith.constant 2 : index
    %66 = memref.load %arg2[%c2_39] : memref<288xf32, #tpu.memory_space<smem>>
    %67 = vector.broadcast %66 : f32 to vector<17x17xf32>
    %68 = arith.mulf %65, %67 : vector<17x17xf32>
    %69 = arith.addf %36, %68 : vector<17x17xf32>
    %c11 = arith.constant 11 : index
    %70 = memref.load %arg2[%c11] : memref<288xf32, #tpu.memory_space<smem>>
    %71 = vector.broadcast %70 : f32 to vector<17x17xf32>
    %72 = arith.mulf %65, %71 : vector<17x17xf32>
    %73 = arith.addf %40, %72 : vector<17x17xf32>
    %c20 = arith.constant 20 : index
    %74 = memref.load %arg2[%c20] : memref<288xf32, #tpu.memory_space<smem>>
    %75 = vector.broadcast %74 : f32 to vector<17x17xf32>
    %76 = arith.mulf %65, %75 : vector<17x17xf32>
    %77 = arith.addf %44, %76 : vector<17x17xf32>
    %c29 = arith.constant 29 : index
    %78 = memref.load %arg2[%c29] : memref<288xf32, #tpu.memory_space<smem>>
    %79 = vector.broadcast %78 : f32 to vector<17x17xf32>
    %80 = arith.mulf %65, %79 : vector<17x17xf32>
    %81 = arith.addf %48, %80 : vector<17x17xf32>
    %c38 = arith.constant 38 : index
    %82 = memref.load %arg2[%c38] : memref<288xf32, #tpu.memory_space<smem>>
    %83 = vector.broadcast %82 : f32 to vector<17x17xf32>
    %84 = arith.mulf %65, %83 : vector<17x17xf32>
    %85 = arith.addf %52, %84 : vector<17x17xf32>
    %c47 = arith.constant 47 : index
    %86 = memref.load %arg2[%c47] : memref<288xf32, #tpu.memory_space<smem>>
    %87 = vector.broadcast %86 : f32 to vector<17x17xf32>
    %88 = arith.mulf %65, %87 : vector<17x17xf32>
    %89 = arith.addf %56, %88 : vector<17x17xf32>
    %c56 = arith.constant 56 : index
    %90 = memref.load %arg2[%c56] : memref<288xf32, #tpu.memory_space<smem>>
    %91 = vector.broadcast %90 : f32 to vector<17x17xf32>
    %92 = arith.mulf %65, %91 : vector<17x17xf32>
    %93 = arith.addf %60, %92 : vector<17x17xf32>
    %c65 = arith.constant 65 : index
    %94 = memref.load %arg2[%c65] : memref<288xf32, #tpu.memory_space<smem>>
    %95 = vector.broadcast %94 : f32 to vector<17x17xf32>
    %96 = arith.mulf %65, %95 : vector<17x17xf32>
    %97 = arith.addf %64, %96 : vector<17x17xf32>
    %98 = vector.extract_strided_slice %31 {offsets = [0, 1], sizes = [17, 17], strides = [1, 1]} : vector<18x18xf32> to vector<17x17xf32>
    %c6 = arith.constant 6 : index
    %99 = memref.load %arg2[%c6] : memref<288xf32, #tpu.memory_space<smem>>
    %100 = vector.broadcast %99 : f32 to vector<17x17xf32>
    %101 = arith.mulf %98, %100 : vector<17x17xf32>
    %102 = arith.addf %69, %101 : vector<17x17xf32>
    %c15 = arith.constant 15 : index
    %103 = memref.load %arg2[%c15] : memref<288xf32, #tpu.memory_space<smem>>
    %104 = vector.broadcast %103 : f32 to vector<17x17xf32>
    %105 = arith.mulf %98, %104 : vector<17x17xf32>
    %106 = arith.addf %73, %105 : vector<17x17xf32>
    %c24 = arith.constant 24 : index
    %107 = memref.load %arg2[%c24] : memref<288xf32, #tpu.memory_space<smem>>
    %108 = vector.broadcast %107 : f32 to vector<17x17xf32>
    %109 = arith.mulf %98, %108 : vector<17x17xf32>
    %110 = arith.addf %77, %109 : vector<17x17xf32>
    %c33 = arith.constant 33 : index
    %111 = memref.load %arg2[%c33] : memref<288xf32, #tpu.memory_space<smem>>
    %112 = vector.broadcast %111 : f32 to vector<17x17xf32>
    %113 = arith.mulf %98, %112 : vector<17x17xf32>
    %114 = arith.addf %81, %113 : vector<17x17xf32>
    %c42 = arith.constant 42 : index
    %115 = memref.load %arg2[%c42] : memref<288xf32, #tpu.memory_space<smem>>
    %116 = vector.broadcast %115 : f32 to vector<17x17xf32>
    %117 = arith.mulf %98, %116 : vector<17x17xf32>
    %118 = arith.addf %85, %117 : vector<17x17xf32>
    %c51 = arith.constant 51 : index
    %119 = memref.load %arg2[%c51] : memref<288xf32, #tpu.memory_space<smem>>
    %120 = vector.broadcast %119 : f32 to vector<17x17xf32>
    %121 = arith.mulf %98, %120 : vector<17x17xf32>
    %122 = arith.addf %89, %121 : vector<17x17xf32>
    %c60 = arith.constant 60 : index
    %123 = memref.load %arg2[%c60] : memref<288xf32, #tpu.memory_space<smem>>
    %124 = vector.broadcast %123 : f32 to vector<17x17xf32>
    %125 = arith.mulf %98, %124 : vector<17x17xf32>
    %126 = arith.addf %93, %125 : vector<17x17xf32>
    %c69 = arith.constant 69 : index
    %127 = memref.load %arg2[%c69] : memref<288xf32, #tpu.memory_space<smem>>
    %128 = vector.broadcast %127 : f32 to vector<17x17xf32>
    %129 = arith.mulf %98, %128 : vector<17x17xf32>
    %130 = arith.addf %97, %129 : vector<17x17xf32>
    %131 = vector.extract_strided_slice %31 {offsets = [0, 0], sizes = [17, 17], strides = [1, 1]} : vector<18x18xf32> to vector<17x17xf32>
    %c8 = arith.constant 8 : index
    %132 = memref.load %arg2[%c8] : memref<288xf32, #tpu.memory_space<smem>>
    %133 = vector.broadcast %132 : f32 to vector<17x17xf32>
    %134 = arith.mulf %131, %133 : vector<17x17xf32>
    %135 = arith.addf %102, %134 : vector<17x17xf32>
    %c17 = arith.constant 17 : index
    %136 = memref.load %arg2[%c17] : memref<288xf32, #tpu.memory_space<smem>>
    %137 = vector.broadcast %136 : f32 to vector<17x17xf32>
    %138 = arith.mulf %131, %137 : vector<17x17xf32>
    %139 = arith.addf %106, %138 : vector<17x17xf32>
    %c26 = arith.constant 26 : index
    %140 = memref.load %arg2[%c26] : memref<288xf32, #tpu.memory_space<smem>>
    %141 = vector.broadcast %140 : f32 to vector<17x17xf32>
    %142 = arith.mulf %131, %141 : vector<17x17xf32>
    %143 = arith.addf %110, %142 : vector<17x17xf32>
    %c35 = arith.constant 35 : index
    %144 = memref.load %arg2[%c35] : memref<288xf32, #tpu.memory_space<smem>>
    %145 = vector.broadcast %144 : f32 to vector<17x17xf32>
    %146 = arith.mulf %131, %145 : vector<17x17xf32>
    %147 = arith.addf %114, %146 : vector<17x17xf32>
    %c44 = arith.constant 44 : index
    %148 = memref.load %arg2[%c44] : memref<288xf32, #tpu.memory_space<smem>>
    %149 = vector.broadcast %148 : f32 to vector<17x17xf32>
    %150 = arith.mulf %131, %149 : vector<17x17xf32>
    %151 = arith.addf %118, %150 : vector<17x17xf32>
    %c53 = arith.constant 53 : index
    %152 = memref.load %arg2[%c53] : memref<288xf32, #tpu.memory_space<smem>>
    %153 = vector.broadcast %152 : f32 to vector<17x17xf32>
    %154 = arith.mulf %131, %153 : vector<17x17xf32>
    %155 = arith.addf %122, %154 : vector<17x17xf32>
    %c62 = arith.constant 62 : index
    %156 = memref.load %arg2[%c62] : memref<288xf32, #tpu.memory_space<smem>>
    %157 = vector.broadcast %156 : f32 to vector<17x17xf32>
    %158 = arith.mulf %131, %157 : vector<17x17xf32>
    %159 = arith.addf %126, %158 : vector<17x17xf32>
    %c71 = arith.constant 71 : index
    %160 = memref.load %arg2[%c71] : memref<288xf32, #tpu.memory_space<smem>>
    %161 = vector.broadcast %160 : f32 to vector<17x17xf32>
    %162 = arith.mulf %131, %161 : vector<17x17xf32>
    %163 = arith.addf %130, %162 : vector<17x17xf32>
    %c1_40 = arith.constant 1 : index
    %c0_41 = arith.constant 0 : index
    %c0_42 = arith.constant 0 : index
    %164 = vector.load %arg6[%c1_40, %c0_41, %c0_42] : memref<4x18x18xf32, #tpu.memory_space<vmem>>, vector<1x18x18xf32>
    %165 = vector.shape_cast %164 : vector<1x18x18xf32> to vector<18x18xf32>
    %166 = vector.extract_strided_slice %165 {offsets = [1, 1], sizes = [17, 17], strides = [1, 1]} : vector<18x18xf32> to vector<17x17xf32>
    %c72 = arith.constant 72 : index
    %167 = memref.load %arg2[%c72] : memref<288xf32, #tpu.memory_space<smem>>
    %168 = vector.broadcast %167 : f32 to vector<17x17xf32>
    %169 = arith.mulf %166, %168 : vector<17x17xf32>
    %170 = arith.addf %135, %169 : vector<17x17xf32>
    %c81 = arith.constant 81 : index
    %171 = memref.load %arg2[%c81] : memref<288xf32, #tpu.memory_space<smem>>
    %172 = vector.broadcast %171 : f32 to vector<17x17xf32>
    %173 = arith.mulf %166, %172 : vector<17x17xf32>
    %174 = arith.addf %139, %173 : vector<17x17xf32>
    %c90 = arith.constant 90 : index
    %175 = memref.load %arg2[%c90] : memref<288xf32, #tpu.memory_space<smem>>
    %176 = vector.broadcast %175 : f32 to vector<17x17xf32>
    %177 = arith.mulf %166, %176 : vector<17x17xf32>
    %178 = arith.addf %143, %177 : vector<17x17xf32>
    %c99 = arith.constant 99 : index
    %179 = memref.load %arg2[%c99] : memref<288xf32, #tpu.memory_space<smem>>
    %180 = vector.broadcast %179 : f32 to vector<17x17xf32>
    %181 = arith.mulf %166, %180 : vector<17x17xf32>
    %182 = arith.addf %147, %181 : vector<17x17xf32>
    %c108 = arith.constant 108 : index
    %183 = memref.load %arg2[%c108] : memref<288xf32, #tpu.memory_space<smem>>
    %184 = vector.broadcast %183 : f32 to vector<17x17xf32>
    %185 = arith.mulf %166, %184 : vector<17x17xf32>
    %186 = arith.addf %151, %185 : vector<17x17xf32>
    %c117 = arith.constant 117 : index
    %187 = memref.load %arg2[%c117] : memref<288xf32, #tpu.memory_space<smem>>
    %188 = vector.broadcast %187 : f32 to vector<17x17xf32>
    %189 = arith.mulf %166, %188 : vector<17x17xf32>
    %190 = arith.addf %155, %189 : vector<17x17xf32>
    %c126 = arith.constant 126 : index
    %191 = memref.load %arg2[%c126] : memref<288xf32, #tpu.memory_space<smem>>
    %192 = vector.broadcast %191 : f32 to vector<17x17xf32>
    %193 = arith.mulf %166, %192 : vector<17x17xf32>
    %194 = arith.addf %159, %193 : vector<17x17xf32>
    %c135 = arith.constant 135 : index
    %195 = memref.load %arg2[%c135] : memref<288xf32, #tpu.memory_space<smem>>
    %196 = vector.broadcast %195 : f32 to vector<17x17xf32>
    %197 = arith.mulf %166, %196 : vector<17x17xf32>
    %198 = arith.addf %163, %197 : vector<17x17xf32>
    %199 = vector.extract_strided_slice %165 {offsets = [1, 0], sizes = [17, 17], strides = [1, 1]} : vector<18x18xf32> to vector<17x17xf32>
    %c74 = arith.constant 74 : index
    %200 = memref.load %arg2[%c74] : memref<288xf32, #tpu.memory_space<smem>>
    %201 = vector.broadcast %200 : f32 to vector<17x17xf32>
    %202 = arith.mulf %199, %201 : vector<17x17xf32>
    %203 = arith.addf %170, %202 : vector<17x17xf32>
    %c83 = arith.constant 83 : index
    %204 = memref.load %arg2[%c83] : memref<288xf32, #tpu.memory_space<smem>>
    %205 = vector.broadcast %204 : f32 to vector<17x17xf32>
    %206 = arith.mulf %199, %205 : vector<17x17xf32>
    %207 = arith.addf %174, %206 : vector<17x17xf32>
    %c92 = arith.constant 92 : index
    %208 = memref.load %arg2[%c92] : memref<288xf32, #tpu.memory_space<smem>>
    %209 = vector.broadcast %208 : f32 to vector<17x17xf32>
    %210 = arith.mulf %199, %209 : vector<17x17xf32>
    %211 = arith.addf %178, %210 : vector<17x17xf32>
    %c101 = arith.constant 101 : index
    %212 = memref.load %arg2[%c101] : memref<288xf32, #tpu.memory_space<smem>>
    %213 = vector.broadcast %212 : f32 to vector<17x17xf32>
    %214 = arith.mulf %199, %213 : vector<17x17xf32>
    %215 = arith.addf %182, %214 : vector<17x17xf32>
    %c110 = arith.constant 110 : index
    %216 = memref.load %arg2[%c110] : memref<288xf32, #tpu.memory_space<smem>>
    %217 = vector.broadcast %216 : f32 to vector<17x17xf32>
    %218 = arith.mulf %199, %217 : vector<17x17xf32>
    %219 = arith.addf %186, %218 : vector<17x17xf32>
    %c119 = arith.constant 119 : index
    %220 = memref.load %arg2[%c119] : memref<288xf32, #tpu.memory_space<smem>>
    %221 = vector.broadcast %220 : f32 to vector<17x17xf32>
    %222 = arith.mulf %199, %221 : vector<17x17xf32>
    %223 = arith.addf %190, %222 : vector<17x17xf32>
    %c128 = arith.constant 128 : index
    %224 = memref.load %arg2[%c128] : memref<288xf32, #tpu.memory_space<smem>>
    %225 = vector.broadcast %224 : f32 to vector<17x17xf32>
    %226 = arith.mulf %199, %225 : vector<17x17xf32>
    %227 = arith.addf %194, %226 : vector<17x17xf32>
    %c137 = arith.constant 137 : index
    %228 = memref.load %arg2[%c137] : memref<288xf32, #tpu.memory_space<smem>>
    %229 = vector.broadcast %228 : f32 to vector<17x17xf32>
    %230 = arith.mulf %199, %229 : vector<17x17xf32>
    %231 = arith.addf %198, %230 : vector<17x17xf32>
    %232 = vector.extract_strided_slice %165 {offsets = [0, 1], sizes = [17, 17], strides = [1, 1]} : vector<18x18xf32> to vector<17x17xf32>
    %c78 = arith.constant 78 : index
    %233 = memref.load %arg2[%c78] : memref<288xf32, #tpu.memory_space<smem>>
    %234 = vector.broadcast %233 : f32 to vector<17x17xf32>
    %235 = arith.mulf %232, %234 : vector<17x17xf32>
    %236 = arith.addf %203, %235 : vector<17x17xf32>
    %c87 = arith.constant 87 : index
    %237 = memref.load %arg2[%c87] : memref<288xf32, #tpu.memory_space<smem>>
    %238 = vector.broadcast %237 : f32 to vector<17x17xf32>
    %239 = arith.mulf %232, %238 : vector<17x17xf32>
    %240 = arith.addf %207, %239 : vector<17x17xf32>
    %c96 = arith.constant 96 : index
    %241 = memref.load %arg2[%c96] : memref<288xf32, #tpu.memory_space<smem>>
    %242 = vector.broadcast %241 : f32 to vector<17x17xf32>
    %243 = arith.mulf %232, %242 : vector<17x17xf32>
    %244 = arith.addf %211, %243 : vector<17x17xf32>
    %c105 = arith.constant 105 : index
    %245 = memref.load %arg2[%c105] : memref<288xf32, #tpu.memory_space<smem>>
    %246 = vector.broadcast %245 : f32 to vector<17x17xf32>
    %247 = arith.mulf %232, %246 : vector<17x17xf32>
    %248 = arith.addf %215, %247 : vector<17x17xf32>
    %c114 = arith.constant 114 : index
    %249 = memref.load %arg2[%c114] : memref<288xf32, #tpu.memory_space<smem>>
    %250 = vector.broadcast %249 : f32 to vector<17x17xf32>
    %251 = arith.mulf %232, %250 : vector<17x17xf32>
    %252 = arith.addf %219, %251 : vector<17x17xf32>
    %c123 = arith.constant 123 : index
    %253 = memref.load %arg2[%c123] : memref<288xf32, #tpu.memory_space<smem>>
    %254 = vector.broadcast %253 : f32 to vector<17x17xf32>
    %255 = arith.mulf %232, %254 : vector<17x17xf32>
    %256 = arith.addf %223, %255 : vector<17x17xf32>
    %c132 = arith.constant 132 : index
    %257 = memref.load %arg2[%c132] : memref<288xf32, #tpu.memory_space<smem>>
    %258 = vector.broadcast %257 : f32 to vector<17x17xf32>
    %259 = arith.mulf %232, %258 : vector<17x17xf32>
    %260 = arith.addf %227, %259 : vector<17x17xf32>
    %c141 = arith.constant 141 : index
    %261 = memref.load %arg2[%c141] : memref<288xf32, #tpu.memory_space<smem>>
    %262 = vector.broadcast %261 : f32 to vector<17x17xf32>
    %263 = arith.mulf %232, %262 : vector<17x17xf32>
    %264 = arith.addf %231, %263 : vector<17x17xf32>
    %265 = vector.extract_strided_slice %165 {offsets = [0, 0], sizes = [17, 17], strides = [1, 1]} : vector<18x18xf32> to vector<17x17xf32>
    %c80 = arith.constant 80 : index
    %266 = memref.load %arg2[%c80] : memref<288xf32, #tpu.memory_space<smem>>
    %267 = vector.broadcast %266 : f32 to vector<17x17xf32>
    %268 = arith.mulf %265, %267 : vector<17x17xf32>
    %269 = arith.addf %236, %268 : vector<17x17xf32>
    %c89 = arith.constant 89 : index
    %270 = memref.load %arg2[%c89] : memref<288xf32, #tpu.memory_space<smem>>
    %271 = vector.broadcast %270 : f32 to vector<17x17xf32>
    %272 = arith.mulf %265, %271 : vector<17x17xf32>
    %273 = arith.addf %240, %272 : vector<17x17xf32>
    %c98 = arith.constant 98 : index
    %274 = memref.load %arg2[%c98] : memref<288xf32, #tpu.memory_space<smem>>
    %275 = vector.broadcast %274 : f32 to vector<17x17xf32>
    %276 = arith.mulf %265, %275 : vector<17x17xf32>
    %277 = arith.addf %244, %276 : vector<17x17xf32>
    %c107 = arith.constant 107 : index
    %278 = memref.load %arg2[%c107] : memref<288xf32, #tpu.memory_space<smem>>
    %279 = vector.broadcast %278 : f32 to vector<17x17xf32>
    %280 = arith.mulf %265, %279 : vector<17x17xf32>
    %281 = arith.addf %248, %280 : vector<17x17xf32>
    %c116 = arith.constant 116 : index
    %282 = memref.load %arg2[%c116] : memref<288xf32, #tpu.memory_space<smem>>
    %283 = vector.broadcast %282 : f32 to vector<17x17xf32>
    %284 = arith.mulf %265, %283 : vector<17x17xf32>
    %285 = arith.addf %252, %284 : vector<17x17xf32>
    %c125 = arith.constant 125 : index
    %286 = memref.load %arg2[%c125] : memref<288xf32, #tpu.memory_space<smem>>
    %287 = vector.broadcast %286 : f32 to vector<17x17xf32>
    %288 = arith.mulf %265, %287 : vector<17x17xf32>
    %289 = arith.addf %256, %288 : vector<17x17xf32>
    %c134 = arith.constant 134 : index
    %290 = memref.load %arg2[%c134] : memref<288xf32, #tpu.memory_space<smem>>
    %291 = vector.broadcast %290 : f32 to vector<17x17xf32>
    %292 = arith.mulf %265, %291 : vector<17x17xf32>
    %293 = arith.addf %260, %292 : vector<17x17xf32>
    %c143 = arith.constant 143 : index
    %294 = memref.load %arg2[%c143] : memref<288xf32, #tpu.memory_space<smem>>
    %295 = vector.broadcast %294 : f32 to vector<17x17xf32>
    %296 = arith.mulf %265, %295 : vector<17x17xf32>
    %297 = arith.addf %264, %296 : vector<17x17xf32>
    %c2_43 = arith.constant 2 : index
    %c0_44 = arith.constant 0 : index
    %c0_45 = arith.constant 0 : index
    %298 = vector.load %arg6[%c2_43, %c0_44, %c0_45] : memref<4x18x18xf32, #tpu.memory_space<vmem>>, vector<1x18x18xf32>
    %299 = vector.shape_cast %298 : vector<1x18x18xf32> to vector<18x18xf32>
    %300 = vector.extract_strided_slice %299 {offsets = [1, 1], sizes = [17, 17], strides = [1, 1]} : vector<18x18xf32> to vector<17x17xf32>
    %c144 = arith.constant 144 : index
    %301 = memref.load %arg2[%c144] : memref<288xf32, #tpu.memory_space<smem>>
    %302 = vector.broadcast %301 : f32 to vector<17x17xf32>
    %303 = arith.mulf %300, %302 : vector<17x17xf32>
    %304 = arith.addf %269, %303 : vector<17x17xf32>
    %c153 = arith.constant 153 : index
    %305 = memref.load %arg2[%c153] : memref<288xf32, #tpu.memory_space<smem>>
    %306 = vector.broadcast %305 : f32 to vector<17x17xf32>
    %307 = arith.mulf %300, %306 : vector<17x17xf32>
    %308 = arith.addf %273, %307 : vector<17x17xf32>
    %c162 = arith.constant 162 : index
    %309 = memref.load %arg2[%c162] : memref<288xf32, #tpu.memory_space<smem>>
    %310 = vector.broadcast %309 : f32 to vector<17x17xf32>
    %311 = arith.mulf %300, %310 : vector<17x17xf32>
    %312 = arith.addf %277, %311 : vector<17x17xf32>
    %c171 = arith.constant 171 : index
    %313 = memref.load %arg2[%c171] : memref<288xf32, #tpu.memory_space<smem>>
    %314 = vector.broadcast %313 : f32 to vector<17x17xf32>
    %315 = arith.mulf %300, %314 : vector<17x17xf32>
    %316 = arith.addf %281, %315 : vector<17x17xf32>
    %c180 = arith.constant 180 : index
    %317 = memref.load %arg2[%c180] : memref<288xf32, #tpu.memory_space<smem>>
    %318 = vector.broadcast %317 : f32 to vector<17x17xf32>
    %319 = arith.mulf %300, %318 : vector<17x17xf32>
    %320 = arith.addf %285, %319 : vector<17x17xf32>
    %c189 = arith.constant 189 : index
    %321 = memref.load %arg2[%c189] : memref<288xf32, #tpu.memory_space<smem>>
    %322 = vector.broadcast %321 : f32 to vector<17x17xf32>
    %323 = arith.mulf %300, %322 : vector<17x17xf32>
    %324 = arith.addf %289, %323 : vector<17x17xf32>
    %c198 = arith.constant 198 : index
    %325 = memref.load %arg2[%c198] : memref<288xf32, #tpu.memory_space<smem>>
    %326 = vector.broadcast %325 : f32 to vector<17x17xf32>
    %327 = arith.mulf %300, %326 : vector<17x17xf32>
    %328 = arith.addf %293, %327 : vector<17x17xf32>
    %c207 = arith.constant 207 : index
    %329 = memref.load %arg2[%c207] : memref<288xf32, #tpu.memory_space<smem>>
    %330 = vector.broadcast %329 : f32 to vector<17x17xf32>
    %331 = arith.mulf %300, %330 : vector<17x17xf32>
    %332 = arith.addf %297, %331 : vector<17x17xf32>
    %333 = vector.extract_strided_slice %299 {offsets = [1, 0], sizes = [17, 17], strides = [1, 1]} : vector<18x18xf32> to vector<17x17xf32>
    %c146 = arith.constant 146 : index
    %334 = memref.load %arg2[%c146] : memref<288xf32, #tpu.memory_space<smem>>
    %335 = vector.broadcast %334 : f32 to vector<17x17xf32>
    %336 = arith.mulf %333, %335 : vector<17x17xf32>
    %337 = arith.addf %304, %336 : vector<17x17xf32>
    %c155 = arith.constant 155 : index
    %338 = memref.load %arg2[%c155] : memref<288xf32, #tpu.memory_space<smem>>
    %339 = vector.broadcast %338 : f32 to vector<17x17xf32>
    %340 = arith.mulf %333, %339 : vector<17x17xf32>
    %341 = arith.addf %308, %340 : vector<17x17xf32>
    %c164 = arith.constant 164 : index
    %342 = memref.load %arg2[%c164] : memref<288xf32, #tpu.memory_space<smem>>
    %343 = vector.broadcast %342 : f32 to vector<17x17xf32>
    %344 = arith.mulf %333, %343 : vector<17x17xf32>
    %345 = arith.addf %312, %344 : vector<17x17xf32>
    %c173 = arith.constant 173 : index
    %346 = memref.load %arg2[%c173] : memref<288xf32, #tpu.memory_space<smem>>
    %347 = vector.broadcast %346 : f32 to vector<17x17xf32>
    %348 = arith.mulf %333, %347 : vector<17x17xf32>
    %349 = arith.addf %316, %348 : vector<17x17xf32>
    %c182 = arith.constant 182 : index
    %350 = memref.load %arg2[%c182] : memref<288xf32, #tpu.memory_space<smem>>
    %351 = vector.broadcast %350 : f32 to vector<17x17xf32>
    %352 = arith.mulf %333, %351 : vector<17x17xf32>
    %353 = arith.addf %320, %352 : vector<17x17xf32>
    %c191 = arith.constant 191 : index
    %354 = memref.load %arg2[%c191] : memref<288xf32, #tpu.memory_space<smem>>
    %355 = vector.broadcast %354 : f32 to vector<17x17xf32>
    %356 = arith.mulf %333, %355 : vector<17x17xf32>
    %357 = arith.addf %324, %356 : vector<17x17xf32>
    %c200 = arith.constant 200 : index
    %358 = memref.load %arg2[%c200] : memref<288xf32, #tpu.memory_space<smem>>
    %359 = vector.broadcast %358 : f32 to vector<17x17xf32>
    %360 = arith.mulf %333, %359 : vector<17x17xf32>
    %361 = arith.addf %328, %360 : vector<17x17xf32>
    %c209 = arith.constant 209 : index
    %362 = memref.load %arg2[%c209] : memref<288xf32, #tpu.memory_space<smem>>
    %363 = vector.broadcast %362 : f32 to vector<17x17xf32>
    %364 = arith.mulf %333, %363 : vector<17x17xf32>
    %365 = arith.addf %332, %364 : vector<17x17xf32>
    %366 = vector.extract_strided_slice %299 {offsets = [0, 1], sizes = [17, 17], strides = [1, 1]} : vector<18x18xf32> to vector<17x17xf32>
    %c150 = arith.constant 150 : index
    %367 = memref.load %arg2[%c150] : memref<288xf32, #tpu.memory_space<smem>>
    %368 = vector.broadcast %367 : f32 to vector<17x17xf32>
    %369 = arith.mulf %366, %368 : vector<17x17xf32>
    %370 = arith.addf %337, %369 : vector<17x17xf32>
    %c159 = arith.constant 159 : index
    %371 = memref.load %arg2[%c159] : memref<288xf32, #tpu.memory_space<smem>>
    %372 = vector.broadcast %371 : f32 to vector<17x17xf32>
    %373 = arith.mulf %366, %372 : vector<17x17xf32>
    %374 = arith.addf %341, %373 : vector<17x17xf32>
    %c168 = arith.constant 168 : index
    %375 = memref.load %arg2[%c168] : memref<288xf32, #tpu.memory_space<smem>>
    %376 = vector.broadcast %375 : f32 to vector<17x17xf32>
    %377 = arith.mulf %366, %376 : vector<17x17xf32>
    %378 = arith.addf %345, %377 : vector<17x17xf32>
    %c177 = arith.constant 177 : index
    %379 = memref.load %arg2[%c177] : memref<288xf32, #tpu.memory_space<smem>>
    %380 = vector.broadcast %379 : f32 to vector<17x17xf32>
    %381 = arith.mulf %366, %380 : vector<17x17xf32>
    %382 = arith.addf %349, %381 : vector<17x17xf32>
    %c186 = arith.constant 186 : index
    %383 = memref.load %arg2[%c186] : memref<288xf32, #tpu.memory_space<smem>>
    %384 = vector.broadcast %383 : f32 to vector<17x17xf32>
    %385 = arith.mulf %366, %384 : vector<17x17xf32>
    %386 = arith.addf %353, %385 : vector<17x17xf32>
    %c195 = arith.constant 195 : index
    %387 = memref.load %arg2[%c195] : memref<288xf32, #tpu.memory_space<smem>>
    %388 = vector.broadcast %387 : f32 to vector<17x17xf32>
    %389 = arith.mulf %366, %388 : vector<17x17xf32>
    %390 = arith.addf %357, %389 : vector<17x17xf32>
    %c204 = arith.constant 204 : index
    %391 = memref.load %arg2[%c204] : memref<288xf32, #tpu.memory_space<smem>>
    %392 = vector.broadcast %391 : f32 to vector<17x17xf32>
    %393 = arith.mulf %366, %392 : vector<17x17xf32>
    %394 = arith.addf %361, %393 : vector<17x17xf32>
    %c213 = arith.constant 213 : index
    %395 = memref.load %arg2[%c213] : memref<288xf32, #tpu.memory_space<smem>>
    %396 = vector.broadcast %395 : f32 to vector<17x17xf32>
    %397 = arith.mulf %366, %396 : vector<17x17xf32>
    %398 = arith.addf %365, %397 : vector<17x17xf32>
    %399 = vector.extract_strided_slice %299 {offsets = [0, 0], sizes = [17, 17], strides = [1, 1]} : vector<18x18xf32> to vector<17x17xf32>
    %c152 = arith.constant 152 : index
    %400 = memref.load %arg2[%c152] : memref<288xf32, #tpu.memory_space<smem>>
    %401 = vector.broadcast %400 : f32 to vector<17x17xf32>
    %402 = arith.mulf %399, %401 : vector<17x17xf32>
    %403 = arith.addf %370, %402 : vector<17x17xf32>
    %c161 = arith.constant 161 : index
    %404 = memref.load %arg2[%c161] : memref<288xf32, #tpu.memory_space<smem>>
    %405 = vector.broadcast %404 : f32 to vector<17x17xf32>
    %406 = arith.mulf %399, %405 : vector<17x17xf32>
    %407 = arith.addf %374, %406 : vector<17x17xf32>
    %c170 = arith.constant 170 : index
    %408 = memref.load %arg2[%c170] : memref<288xf32, #tpu.memory_space<smem>>
    %409 = vector.broadcast %408 : f32 to vector<17x17xf32>
    %410 = arith.mulf %399, %409 : vector<17x17xf32>
    %411 = arith.addf %378, %410 : vector<17x17xf32>
    %c179 = arith.constant 179 : index
    %412 = memref.load %arg2[%c179] : memref<288xf32, #tpu.memory_space<smem>>
    %413 = vector.broadcast %412 : f32 to vector<17x17xf32>
    %414 = arith.mulf %399, %413 : vector<17x17xf32>
    %415 = arith.addf %382, %414 : vector<17x17xf32>
    %c188 = arith.constant 188 : index
    %416 = memref.load %arg2[%c188] : memref<288xf32, #tpu.memory_space<smem>>
    %417 = vector.broadcast %416 : f32 to vector<17x17xf32>
    %418 = arith.mulf %399, %417 : vector<17x17xf32>
    %419 = arith.addf %386, %418 : vector<17x17xf32>
    %c197 = arith.constant 197 : index
    %420 = memref.load %arg2[%c197] : memref<288xf32, #tpu.memory_space<smem>>
    %421 = vector.broadcast %420 : f32 to vector<17x17xf32>
    %422 = arith.mulf %399, %421 : vector<17x17xf32>
    %423 = arith.addf %390, %422 : vector<17x17xf32>
    %c206 = arith.constant 206 : index
    %424 = memref.load %arg2[%c206] : memref<288xf32, #tpu.memory_space<smem>>
    %425 = vector.broadcast %424 : f32 to vector<17x17xf32>
    %426 = arith.mulf %399, %425 : vector<17x17xf32>
    %427 = arith.addf %394, %426 : vector<17x17xf32>
    %c215 = arith.constant 215 : index
    %428 = memref.load %arg2[%c215] : memref<288xf32, #tpu.memory_space<smem>>
    %429 = vector.broadcast %428 : f32 to vector<17x17xf32>
    %430 = arith.mulf %399, %429 : vector<17x17xf32>
    %431 = arith.addf %398, %430 : vector<17x17xf32>
    %c3_46 = arith.constant 3 : index
    %c0_47 = arith.constant 0 : index
    %c0_48 = arith.constant 0 : index
    %432 = vector.load %arg6[%c3_46, %c0_47, %c0_48] : memref<4x18x18xf32, #tpu.memory_space<vmem>>, vector<1x18x18xf32>
    %433 = vector.shape_cast %432 : vector<1x18x18xf32> to vector<18x18xf32>
    %434 = vector.extract_strided_slice %433 {offsets = [1, 1], sizes = [17, 17], strides = [1, 1]} : vector<18x18xf32> to vector<17x17xf32>
    %c216 = arith.constant 216 : index
    %435 = memref.load %arg2[%c216] : memref<288xf32, #tpu.memory_space<smem>>
    %436 = vector.broadcast %435 : f32 to vector<17x17xf32>
    %437 = arith.mulf %434, %436 : vector<17x17xf32>
    %438 = arith.addf %403, %437 : vector<17x17xf32>
    %c225 = arith.constant 225 : index
    %439 = memref.load %arg2[%c225] : memref<288xf32, #tpu.memory_space<smem>>
    %440 = vector.broadcast %439 : f32 to vector<17x17xf32>
    %441 = arith.mulf %434, %440 : vector<17x17xf32>
    %442 = arith.addf %407, %441 : vector<17x17xf32>
    %c234 = arith.constant 234 : index
    %443 = memref.load %arg2[%c234] : memref<288xf32, #tpu.memory_space<smem>>
    %444 = vector.broadcast %443 : f32 to vector<17x17xf32>
    %445 = arith.mulf %434, %444 : vector<17x17xf32>
    %446 = arith.addf %411, %445 : vector<17x17xf32>
    %c243 = arith.constant 243 : index
    %447 = memref.load %arg2[%c243] : memref<288xf32, #tpu.memory_space<smem>>
    %448 = vector.broadcast %447 : f32 to vector<17x17xf32>
    %449 = arith.mulf %434, %448 : vector<17x17xf32>
    %450 = arith.addf %415, %449 : vector<17x17xf32>
    %c252 = arith.constant 252 : index
    %451 = memref.load %arg2[%c252] : memref<288xf32, #tpu.memory_space<smem>>
    %452 = vector.broadcast %451 : f32 to vector<17x17xf32>
    %453 = arith.mulf %434, %452 : vector<17x17xf32>
    %454 = arith.addf %419, %453 : vector<17x17xf32>
    %c261 = arith.constant 261 : index
    %455 = memref.load %arg2[%c261] : memref<288xf32, #tpu.memory_space<smem>>
    %456 = vector.broadcast %455 : f32 to vector<17x17xf32>
    %457 = arith.mulf %434, %456 : vector<17x17xf32>
    %458 = arith.addf %423, %457 : vector<17x17xf32>
    %c270 = arith.constant 270 : index
    %459 = memref.load %arg2[%c270] : memref<288xf32, #tpu.memory_space<smem>>
    %460 = vector.broadcast %459 : f32 to vector<17x17xf32>
    %461 = arith.mulf %434, %460 : vector<17x17xf32>
    %462 = arith.addf %427, %461 : vector<17x17xf32>
    %c279 = arith.constant 279 : index
    %463 = memref.load %arg2[%c279] : memref<288xf32, #tpu.memory_space<smem>>
    %464 = vector.broadcast %463 : f32 to vector<17x17xf32>
    %465 = arith.mulf %434, %464 : vector<17x17xf32>
    %466 = arith.addf %431, %465 : vector<17x17xf32>
    %467 = vector.extract_strided_slice %433 {offsets = [1, 0], sizes = [17, 17], strides = [1, 1]} : vector<18x18xf32> to vector<17x17xf32>
    %c218 = arith.constant 218 : index
    %468 = memref.load %arg2[%c218] : memref<288xf32, #tpu.memory_space<smem>>
    %469 = vector.broadcast %468 : f32 to vector<17x17xf32>
    %470 = arith.mulf %467, %469 : vector<17x17xf32>
    %471 = arith.addf %438, %470 : vector<17x17xf32>
    %c227 = arith.constant 227 : index
    %472 = memref.load %arg2[%c227] : memref<288xf32, #tpu.memory_space<smem>>
    %473 = vector.broadcast %472 : f32 to vector<17x17xf32>
    %474 = arith.mulf %467, %473 : vector<17x17xf32>
    %475 = arith.addf %442, %474 : vector<17x17xf32>
    %c236 = arith.constant 236 : index
    %476 = memref.load %arg2[%c236] : memref<288xf32, #tpu.memory_space<smem>>
    %477 = vector.broadcast %476 : f32 to vector<17x17xf32>
    %478 = arith.mulf %467, %477 : vector<17x17xf32>
    %479 = arith.addf %446, %478 : vector<17x17xf32>
    %c245 = arith.constant 245 : index
    %480 = memref.load %arg2[%c245] : memref<288xf32, #tpu.memory_space<smem>>
    %481 = vector.broadcast %480 : f32 to vector<17x17xf32>
    %482 = arith.mulf %467, %481 : vector<17x17xf32>
    %483 = arith.addf %450, %482 : vector<17x17xf32>
    %c254 = arith.constant 254 : index
    %484 = memref.load %arg2[%c254] : memref<288xf32, #tpu.memory_space<smem>>
    %485 = vector.broadcast %484 : f32 to vector<17x17xf32>
    %486 = arith.mulf %467, %485 : vector<17x17xf32>
    %487 = arith.addf %454, %486 : vector<17x17xf32>
    %c263 = arith.constant 263 : index
    %488 = memref.load %arg2[%c263] : memref<288xf32, #tpu.memory_space<smem>>
    %489 = vector.broadcast %488 : f32 to vector<17x17xf32>
    %490 = arith.mulf %467, %489 : vector<17x17xf32>
    %491 = arith.addf %458, %490 : vector<17x17xf32>
    %c272 = arith.constant 272 : index
    %492 = memref.load %arg2[%c272] : memref<288xf32, #tpu.memory_space<smem>>
    %493 = vector.broadcast %492 : f32 to vector<17x17xf32>
    %494 = arith.mulf %467, %493 : vector<17x17xf32>
    %495 = arith.addf %462, %494 : vector<17x17xf32>
    %c281 = arith.constant 281 : index
    %496 = memref.load %arg2[%c281] : memref<288xf32, #tpu.memory_space<smem>>
    %497 = vector.broadcast %496 : f32 to vector<17x17xf32>
    %498 = arith.mulf %467, %497 : vector<17x17xf32>
    %499 = arith.addf %466, %498 : vector<17x17xf32>
    %500 = vector.extract_strided_slice %433 {offsets = [0, 1], sizes = [17, 17], strides = [1, 1]} : vector<18x18xf32> to vector<17x17xf32>
    %c222 = arith.constant 222 : index
    %501 = memref.load %arg2[%c222] : memref<288xf32, #tpu.memory_space<smem>>
    %502 = vector.broadcast %501 : f32 to vector<17x17xf32>
    %503 = arith.mulf %500, %502 : vector<17x17xf32>
    %504 = arith.addf %471, %503 : vector<17x17xf32>
    %c231 = arith.constant 231 : index
    %505 = memref.load %arg2[%c231] : memref<288xf32, #tpu.memory_space<smem>>
    %506 = vector.broadcast %505 : f32 to vector<17x17xf32>
    %507 = arith.mulf %500, %506 : vector<17x17xf32>
    %508 = arith.addf %475, %507 : vector<17x17xf32>
    %c240 = arith.constant 240 : index
    %509 = memref.load %arg2[%c240] : memref<288xf32, #tpu.memory_space<smem>>
    %510 = vector.broadcast %509 : f32 to vector<17x17xf32>
    %511 = arith.mulf %500, %510 : vector<17x17xf32>
    %512 = arith.addf %479, %511 : vector<17x17xf32>
    %c249 = arith.constant 249 : index
    %513 = memref.load %arg2[%c249] : memref<288xf32, #tpu.memory_space<smem>>
    %514 = vector.broadcast %513 : f32 to vector<17x17xf32>
    %515 = arith.mulf %500, %514 : vector<17x17xf32>
    %516 = arith.addf %483, %515 : vector<17x17xf32>
    %c258 = arith.constant 258 : index
    %517 = memref.load %arg2[%c258] : memref<288xf32, #tpu.memory_space<smem>>
    %518 = vector.broadcast %517 : f32 to vector<17x17xf32>
    %519 = arith.mulf %500, %518 : vector<17x17xf32>
    %520 = arith.addf %487, %519 : vector<17x17xf32>
    %c267 = arith.constant 267 : index
    %521 = memref.load %arg2[%c267] : memref<288xf32, #tpu.memory_space<smem>>
    %522 = vector.broadcast %521 : f32 to vector<17x17xf32>
    %523 = arith.mulf %500, %522 : vector<17x17xf32>
    %524 = arith.addf %491, %523 : vector<17x17xf32>
    %c276 = arith.constant 276 : index
    %525 = memref.load %arg2[%c276] : memref<288xf32, #tpu.memory_space<smem>>
    %526 = vector.broadcast %525 : f32 to vector<17x17xf32>
    %527 = arith.mulf %500, %526 : vector<17x17xf32>
    %528 = arith.addf %495, %527 : vector<17x17xf32>
    %c285 = arith.constant 285 : index
    %529 = memref.load %arg2[%c285] : memref<288xf32, #tpu.memory_space<smem>>
    %530 = vector.broadcast %529 : f32 to vector<17x17xf32>
    %531 = arith.mulf %500, %530 : vector<17x17xf32>
    %532 = arith.addf %499, %531 : vector<17x17xf32>
    %533 = vector.extract_strided_slice %433 {offsets = [0, 0], sizes = [17, 17], strides = [1, 1]} : vector<18x18xf32> to vector<17x17xf32>
    %c224 = arith.constant 224 : index
    %534 = memref.load %arg2[%c224] : memref<288xf32, #tpu.memory_space<smem>>
    %535 = vector.broadcast %534 : f32 to vector<17x17xf32>
    %536 = arith.mulf %533, %535 : vector<17x17xf32>
    %537 = arith.addf %504, %536 : vector<17x17xf32>
    %c233 = arith.constant 233 : index
    %538 = memref.load %arg2[%c233] : memref<288xf32, #tpu.memory_space<smem>>
    %539 = vector.broadcast %538 : f32 to vector<17x17xf32>
    %540 = arith.mulf %533, %539 : vector<17x17xf32>
    %541 = arith.addf %508, %540 : vector<17x17xf32>
    %c242 = arith.constant 242 : index
    %542 = memref.load %arg2[%c242] : memref<288xf32, #tpu.memory_space<smem>>
    %543 = vector.broadcast %542 : f32 to vector<17x17xf32>
    %544 = arith.mulf %533, %543 : vector<17x17xf32>
    %545 = arith.addf %512, %544 : vector<17x17xf32>
    %c251 = arith.constant 251 : index
    %546 = memref.load %arg2[%c251] : memref<288xf32, #tpu.memory_space<smem>>
    %547 = vector.broadcast %546 : f32 to vector<17x17xf32>
    %548 = arith.mulf %533, %547 : vector<17x17xf32>
    %549 = arith.addf %516, %548 : vector<17x17xf32>
    %c260 = arith.constant 260 : index
    %550 = memref.load %arg2[%c260] : memref<288xf32, #tpu.memory_space<smem>>
    %551 = vector.broadcast %550 : f32 to vector<17x17xf32>
    %552 = arith.mulf %533, %551 : vector<17x17xf32>
    %553 = arith.addf %520, %552 : vector<17x17xf32>
    %c269 = arith.constant 269 : index
    %554 = memref.load %arg2[%c269] : memref<288xf32, #tpu.memory_space<smem>>
    %555 = vector.broadcast %554 : f32 to vector<17x17xf32>
    %556 = arith.mulf %533, %555 : vector<17x17xf32>
    %557 = arith.addf %524, %556 : vector<17x17xf32>
    %c278 = arith.constant 278 : index
    %558 = memref.load %arg2[%c278] : memref<288xf32, #tpu.memory_space<smem>>
    %559 = vector.broadcast %558 : f32 to vector<17x17xf32>
    %560 = arith.mulf %533, %559 : vector<17x17xf32>
    %561 = arith.addf %528, %560 : vector<17x17xf32>
    %c287 = arith.constant 287 : index
    %562 = memref.load %arg2[%c287] : memref<288xf32, #tpu.memory_space<smem>>
    %563 = vector.broadcast %562 : f32 to vector<17x17xf32>
    %564 = arith.mulf %533, %563 : vector<17x17xf32>
    %565 = arith.addf %532, %564 : vector<17x17xf32>
    %c0_49 = arith.constant 0 : index
    %566 = memref.load %arg3[%c0_49] : memref<8xf32, #tpu.memory_space<smem>>
    %567 = vector.broadcast %566 : f32 to vector<17x17xf32>
    %568 = arith.addf %537, %567 : vector<17x17xf32>
    %cst_50 = arith.constant 0.000000e+00 : f32
    %569 = vector.broadcast %cst_50 : f32 to vector<17x17xf32>
    %570 = arith.cmpf ogt, %568, %569 : vector<17x17xf32>
    %c0_51 = arith.constant 0 : index
    %571 = memref.load %arg4[%c0_51] : memref<8xf32, #tpu.memory_space<smem>>
    %572 = vector.broadcast %571 : f32 to vector<17x17xf32>
    %573 = arith.mulf %572, %568 : vector<17x17xf32>
    %574 = arith.select %570, %568, %573 : vector<17x17xi1>, vector<17x17xf32>
    %c0_52 = arith.constant 0 : index
    %c0_53 = arith.constant 0 : index
    %c0_54 = arith.constant 0 : index
    %575 = vector.load %arg5[%c0_52, %c0_53, %c0_54] : memref<1x17x544xf32, #tpu.memory_space<vmem>>, vector<1x17x17xf32>
    %576 = vector.shape_cast %575 : vector<1x17x17xf32> to vector<17x17xf32>
    %577 = vector.shape_cast %574 : vector<17x17xf32> to vector<1x17x17xf32>
    tpu.vector_store %arg5[%c0_52, %c0_53, %c0_54], %577 {strides = array<i32>} : memref<1x17x544xf32, #tpu.memory_space<vmem>>, vector<1x17x17xf32>,
    %c1_55 = arith.constant 1 : index
    %578 = memref.load %arg3[%c1_55] : memref<8xf32, #tpu.memory_space<smem>>
    %579 = vector.broadcast %578 : f32 to vector<17x17xf32>
    %580 = arith.addf %541, %579 : vector<17x17xf32>
    %cst_56 = arith.constant 0.000000e+00 : f32
    %581 = vector.broadcast %cst_56 : f32 to vector<17x17xf32>
    %582 = arith.cmpf ogt, %580, %581 : vector<17x17xf32>
    %c1_57 = arith.constant 1 : index
    %583 = memref.load %arg4[%c1_57] : memref<8xf32, #tpu.memory_space<smem>>
    %584 = vector.broadcast %583 : f32 to vector<17x17xf32>
    %585 = arith.mulf %584, %580 : vector<17x17xf32>
    %586 = arith.select %582, %580, %585 : vector<17x17xi1>, vector<17x17xf32>
    %c0_58 = arith.constant 0 : index
    %c0_59 = arith.constant 0 : index
    %c17_60 = arith.constant 17 : index
    %587 = vector.load %arg5[%c0_58, %c0_59, %c17_60] : memref<1x17x544xf32, #tpu.memory_space<vmem>>, vector<1x17x17xf32>
    %588 = vector.shape_cast %587 : vector<1x17x17xf32> to vector<17x17xf32>
    %589 = vector.shape_cast %586 : vector<17x17xf32> to vector<1x17x17xf32>
    tpu.vector_store %arg5[%c0_58, %c0_59, %c17_60], %589 {strides = array<i32>} : memref<1x17x544xf32, #tpu.memory_space<vmem>>, vector<1x17x17xf32>,
    %c2_61 = arith.constant 2 : index
    %590 = memref.load %arg3[%c2_61] : memref<8xf32, #tpu.memory_space<smem>>
    %591 = vector.broadcast %590 : f32 to vector<17x17xf32>
    %592 = arith.addf %545, %591 : vector<17x17xf32>
    %cst_62 = arith.constant 0.000000e+00 : f32
    %593 = vector.broadcast %cst_62 : f32 to vector<17x17xf32>
    %594 = arith.cmpf ogt, %592, %593 : vector<17x17xf32>
    %c2_63 = arith.constant 2 : index
    %595 = memref.load %arg4[%c2_63] : memref<8xf32, #tpu.memory_space<smem>>
    %596 = vector.broadcast %595 : f32 to vector<17x17xf32>
    %597 = arith.mulf %596, %592 : vector<17x17xf32>
    %598 = arith.select %594, %592, %597 : vector<17x17xi1>, vector<17x17xf32>
    %c0_64 = arith.constant 0 : index
    %c0_65 = arith.constant 0 : index
    %c34 = arith.constant 34 : index
    %599 = vector.load %arg5[%c0_64, %c0_65, %c34] : memref<1x17x544xf32, #tpu.memory_space<vmem>>, vector<1x17x17xf32>
    %600 = vector.shape_cast %599 : vector<1x17x17xf32> to vector<17x17xf32>
    %601 = vector.shape_cast %598 : vector<17x17xf32> to vector<1x17x17xf32>
    tpu.vector_store %arg5[%c0_64, %c0_65, %c34], %601 {strides = array<i32>} : memref<1x17x544xf32, #tpu.memory_space<vmem>>, vector<1x17x17xf32>,
    %c3_66 = arith.constant 3 : index
    %602 = memref.load %arg3[%c3_66] : memref<8xf32, #tpu.memory_space<smem>>
    %603 = vector.broadcast %602 : f32 to vector<17x17xf32>
    %604 = arith.addf %549, %603 : vector<17x17xf32>
    %cst_67 = arith.constant 0.000000e+00 : f32
    %605 = vector.broadcast %cst_67 : f32 to vector<17x17xf32>
    %606 = arith.cmpf ogt, %604, %605 : vector<17x17xf32>
    %c3_68 = arith.constant 3 : index
    %607 = memref.load %arg4[%c3_68] : memref<8xf32, #tpu.memory_space<smem>>
    %608 = vector.broadcast %607 : f32 to vector<17x17xf32>
    %609 = arith.mulf %608, %604 : vector<17x17xf32>
    %610 = arith.select %606, %604, %609 : vector<17x17xi1>, vector<17x17xf32>
    %c0_69 = arith.constant 0 : index
    %c0_70 = arith.constant 0 : index
    %c51_71 = arith.constant 51 : index
    %611 = vector.load %arg5[%c0_69, %c0_70, %c51_71] : memref<1x17x544xf32, #tpu.memory_space<vmem>>, vector<1x17x17xf32>
    %612 = vector.shape_cast %611 : vector<1x17x17xf32> to vector<17x17xf32>
    %613 = vector.shape_cast %610 : vector<17x17xf32> to vector<1x17x17xf32>
    tpu.vector_store %arg5[%c0_69, %c0_70, %c51_71], %613 {strides = array<i32>} : memref<1x17x544xf32, #tpu.memory_space<vmem>>, vector<1x17x17xf32>,
    %c4 = arith.constant 4 : index
    %614 = memref.load %arg3[%c4] : memref<8xf32, #tpu.memory_space<smem>>
    %615 = vector.broadcast %614 : f32 to vector<17x17xf32>
    %616 = arith.addf %553, %615 : vector<17x17xf32>
    %cst_72 = arith.constant 0.000000e+00 : f32
    %617 = vector.broadcast %cst_72 : f32 to vector<17x17xf32>
    %618 = arith.cmpf ogt, %616, %617 : vector<17x17xf32>
    %c4_73 = arith.constant 4 : index
    %619 = memref.load %arg4[%c4_73] : memref<8xf32, #tpu.memory_space<smem>>
    %620 = vector.broadcast %619 : f32 to vector<17x17xf32>
    %621 = arith.mulf %620, %616 : vector<17x17xf32>
    %622 = arith.select %618, %616, %621 : vector<17x17xi1>, vector<17x17xf32>
    %c0_74 = arith.constant 0 : index
    %c0_75 = arith.constant 0 : index
    %c68 = arith.constant 68 : index
    %623 = vector.load %arg5[%c0_74, %c0_75, %c68] : memref<1x17x544xf32, #tpu.memory_space<vmem>>, vector<1x17x17xf32>
    %624 = vector.shape_cast %623 : vector<1x17x17xf32> to vector<17x17xf32>
    %625 = vector.shape_cast %622 : vector<17x17xf32> to vector<1x17x17xf32>
    tpu.vector_store %arg5[%c0_74, %c0_75, %c68], %625 {strides = array<i32>} : memref<1x17x544xf32, #tpu.memory_space<vmem>>, vector<1x17x17xf32>,
    %c5 = arith.constant 5 : index
    %626 = memref.load %arg3[%c5] : memref<8xf32, #tpu.memory_space<smem>>
    %627 = vector.broadcast %626 : f32 to vector<17x17xf32>
    %628 = arith.addf %557, %627 : vector<17x17xf32>
    %cst_76 = arith.constant 0.000000e+00 : f32
    %629 = vector.broadcast %cst_76 : f32 to vector<17x17xf32>
    %630 = arith.cmpf ogt, %628, %629 : vector<17x17xf32>
    %c5_77 = arith.constant 5 : index
    %631 = memref.load %arg4[%c5_77] : memref<8xf32, #tpu.memory_space<smem>>
    %632 = vector.broadcast %631 : f32 to vector<17x17xf32>
    %633 = arith.mulf %632, %628 : vector<17x17xf32>
    %634 = arith.select %630, %628, %633 : vector<17x17xi1>, vector<17x17xf32>
    %c0_78 = arith.constant 0 : index
    %c0_79 = arith.constant 0 : index
    %c85 = arith.constant 85 : index
    %635 = vector.load %arg5[%c0_78, %c0_79, %c85] : memref<1x17x544xf32, #tpu.memory_space<vmem>>, vector<1x17x17xf32>
    %636 = vector.shape_cast %635 : vector<1x17x17xf32> to vector<17x17xf32>
    %637 = vector.shape_cast %634 : vector<17x17xf32> to vector<1x17x17xf32>
    tpu.vector_store %arg5[%c0_78, %c0_79, %c85], %637 {strides = array<i32>} : memref<1x17x544xf32, #tpu.memory_space<vmem>>, vector<1x17x17xf32>,
    %c6_80 = arith.constant 6 : index
    %638 = memref.load %arg3[%c6_80] : memref<8xf32, #tpu.memory_space<smem>>
    %639 = vector.broadcast %638 : f32 to vector<17x17xf32>
    %640 = arith.addf %561, %639 : vector<17x17xf32>
    %cst_81 = arith.constant 0.000000e+00 : f32
    %641 = vector.broadcast %cst_81 : f32 to vector<17x17xf32>
    %642 = arith.cmpf ogt, %640, %641 : vector<17x17xf32>
    %c6_82 = arith.constant 6 : index
    %643 = memref.load %arg4[%c6_82] : memref<8xf32, #tpu.memory_space<smem>>
    %644 = vector.broadcast %643 : f32 to vector<17x17xf32>
    %645 = arith.mulf %644, %640 : vector<17x17xf32>
    %646 = arith.select %642, %640, %645 : vector<17x17xi1>, vector<17x17xf32>
    %c0_83 = arith.constant 0 : index
    %c0_84 = arith.constant 0 : index
    %c102 = arith.constant 102 : index
    %647 = vector.load %arg5[%c0_83, %c0_84, %c102] : memref<1x17x544xf32, #tpu.memory_space<vmem>>, vector<1x17x17xf32>
    %648 = vector.shape_cast %647 : vector<1x17x17xf32> to vector<17x17xf32>
    %649 = vector.shape_cast %646 : vector<17x17xf32> to vector<1x17x17xf32>
    tpu.vector_store %arg5[%c0_83, %c0_84, %c102], %649 {strides = array<i32>} : memref<1x17x544xf32, #tpu.memory_space<vmem>>, vector<1x17x17xf32>,
    %c7 = arith.constant 7 : index
    %650 = memref.load %arg3[%c7] : memref<8xf32, #tpu.memory_space<smem>>
    %651 = vector.broadcast %650 : f32 to vector<17x17xf32>
    %652 = arith.addf %565, %651 : vector<17x17xf32>
    %cst_85 = arith.constant 0.000000e+00 : f32
    %653 = vector.broadcast %cst_85 : f32 to vector<17x17xf32>
    %654 = arith.cmpf ogt, %652, %653 : vector<17x17xf32>
    %c7_86 = arith.constant 7 : index
    %655 = memref.load %arg4[%c7_86] : memref<8xf32, #tpu.memory_space<smem>>
    %656 = vector.broadcast %655 : f32 to vector<17x17xf32>
    %657 = arith.mulf %656, %652 : vector<17x17xf32>
    %658 = arith.select %654, %652, %657 : vector<17x17xi1>, vector<17x17xf32>
    %c0_87 = arith.constant 0 : index
    %c0_88 = arith.constant 0 : index
    %c119_89 = arith.constant 119 : index
    %659 = vector.load %arg5[%c0_87, %c0_88, %c119_89] : memref<1x17x544xf32, #tpu.memory_space<vmem>>, vector<1x17x17xf32>
    %660 = vector.shape_cast %659 : vector<1x17x17xf32> to vector<17x17xf32>
    %661 = vector.shape_cast %658 : vector<17x17xf32> to vector<1x17x17xf32>
    tpu.vector_store %arg5[%c0_87, %c0_88, %c119_89], %661 {strides = array<i32>} : memref<1x17x544xf32, #tpu.memory_space<vmem>>, vector<1x17x17xf32>,
    %cst_90 = arith.constant 0.000000e+00 : f32
    %662 = vector.broadcast %cst_90 : f32 to vector<17x17xf32>
    %cst_91 = arith.constant 0.000000e+00 : f32
    %663 = vector.broadcast %cst_91 : f32 to vector<17x17xf32>
    %cst_92 = arith.constant 0.000000e+00 : f32
    %664 = vector.broadcast %cst_92 : f32 to vector<17x17xf32>
    %cst_93 = arith.constant 0.000000e+00 : f32
    %665 = vector.broadcast %cst_93 : f32 to vector<17x17xf32>
    %cst_94 = arith.constant 0.000000e+00 : f32
    %666 = vector.broadcast %cst_94 : f32 to vector<17x17xf32>
    %cst_95 = arith.constant 0.000000e+00 : f32
    %667 = vector.broadcast %cst_95 : f32 to vector<17x17xf32>
    %cst_96 = arith.constant 0.000000e+00 : f32
    %668 = vector.broadcast %cst_96 : f32 to vector<17x17xf32>
    %cst_97 = arith.constant 0.000000e+00 : f32
    %669 = vector.broadcast %cst_97 : f32 to vector<17x17xf32>
    %c0_98 = arith.constant 0 : index
    %c0_99 = arith.constant 0 : index
    %c0_100 = arith.constant 0 : index
    %670 = vector.load %arg6[%c0_98, %c0_99, %c0_100] : memref<4x18x18xf32, #tpu.memory_space<vmem>>, vector<1x18x18xf32>
    %671 = vector.shape_cast %670 : vector<1x18x18xf32> to vector<18x18xf32>
    %672 = vector.extract_strided_slice %671 {offsets = [1, 1], sizes = [17, 17], strides = [1, 1]} : vector<18x18xf32> to vector<17x17xf32>
    %c1_101 = arith.constant 1 : index
    %673 = memref.load %arg2[%c1_101] : memref<288xf32, #tpu.memory_space<smem>>
    %674 = vector.broadcast %673 : f32 to vector<17x17xf32>
    %675 = arith.mulf %672, %674 : vector<17x17xf32>
    %676 = arith.addf %662, %675 : vector<17x17xf32>
    %c10 = arith.constant 10 : index
    %677 = memref.load %arg2[%c10] : memref<288xf32, #tpu.memory_space<smem>>
    %678 = vector.broadcast %677 : f32 to vector<17x17xf32>
    %679 = arith.mulf %672, %678 : vector<17x17xf32>
    %680 = arith.addf %663, %679 : vector<17x17xf32>
    %c19 = arith.constant 19 : index
    %681 = memref.load %arg2[%c19] : memref<288xf32, #tpu.memory_space<smem>>
    %682 = vector.broadcast %681 : f32 to vector<17x17xf32>
    %683 = arith.mulf %672, %682 : vector<17x17xf32>
    %684 = arith.addf %664, %683 : vector<17x17xf32>
    %c28 = arith.constant 28 : index
    %685 = memref.load %arg2[%c28] : memref<288xf32, #tpu.memory_space<smem>>
    %686 = vector.broadcast %685 : f32 to vector<17x17xf32>
    %687 = arith.mulf %672, %686 : vector<17x17xf32>
    %688 = arith.addf %665, %687 : vector<17x17xf32>
    %c37 = arith.constant 37 : index
    %689 = memref.load %arg2[%c37] : memref<288xf32, #tpu.memory_space<smem>>
    %690 = vector.broadcast %689 : f32 to vector<17x17xf32>
    %691 = arith.mulf %672, %690 : vector<17x17xf32>
    %692 = arith.addf %666, %691 : vector<17x17xf32>
    %c46 = arith.constant 46 : index
    %693 = memref.load %arg2[%c46] : memref<288xf32, #tpu.memory_space<smem>>
    %694 = vector.broadcast %693 : f32 to vector<17x17xf32>
    %695 = arith.mulf %672, %694 : vector<17x17xf32>
    %696 = arith.addf %667, %695 : vector<17x17xf32>
    %c55 = arith.constant 55 : index
    %697 = memref.load %arg2[%c55] : memref<288xf32, #tpu.memory_space<smem>>
    %698 = vector.broadcast %697 : f32 to vector<17x17xf32>
    %699 = arith.mulf %672, %698 : vector<17x17xf32>
    %700 = arith.addf %668, %699 : vector<17x17xf32>
    %c64 = arith.constant 64 : index
    %701 = memref.load %arg2[%c64] : memref<288xf32, #tpu.memory_space<smem>>
    %702 = vector.broadcast %701 : f32 to vector<17x17xf32>
    %703 = arith.mulf %672, %702 : vector<17x17xf32>
    %704 = arith.addf %669, %703 : vector<17x17xf32>
    %705 = vector.extract_strided_slice %671 {offsets = [0, 1], sizes = [17, 17], strides = [1, 1]} : vector<18x18xf32> to vector<17x17xf32>
    %c7_102 = arith.constant 7 : index
    %706 = memref.load %arg2[%c7_102] : memref<288xf32, #tpu.memory_space<smem>>
    %707 = vector.broadcast %706 : f32 to vector<17x17xf32>
    %708 = arith.mulf %705, %707 : vector<17x17xf32>
    %709 = arith.addf %676, %708 : vector<17x17xf32>
    %c16 = arith.constant 16 : index
    %710 = memref.load %arg2[%c16] : memref<288xf32, #tpu.memory_space<smem>>
    %711 = vector.broadcast %710 : f32 to vector<17x17xf32>
    %712 = arith.mulf %705, %711 : vector<17x17xf32>
    %713 = arith.addf %680, %712 : vector<17x17xf32>
    %c25 = arith.constant 25 : index
    %714 = memref.load %arg2[%c25] : memref<288xf32, #tpu.memory_space<smem>>
    %715 = vector.broadcast %714 : f32 to vector<17x17xf32>
    %716 = arith.mulf %705, %715 : vector<17x17xf32>
    %717 = arith.addf %684, %716 : vector<17x17xf32>
    %c34_103 = arith.constant 34 : index
    %718 = memref.load %arg2[%c34_103] : memref<288xf32, #tpu.memory_space<smem>>
    %719 = vector.broadcast %718 : f32 to vector<17x17xf32>
    %720 = arith.mulf %705, %719 : vector<17x17xf32>
    %721 = arith.addf %688, %720 : vector<17x17xf32>
    %c43 = arith.constant 43 : index
    %722 = memref.load %arg2[%c43] : memref<288xf32, #tpu.memory_space<smem>>
    %723 = vector.broadcast %722 : f32 to vector<17x17xf32>
    %724 = arith.mulf %705, %723 : vector<17x17xf32>
    %725 = arith.addf %692, %724 : vector<17x17xf32>
    %c52 = arith.constant 52 : index
    %726 = memref.load %arg2[%c52] : memref<288xf32, #tpu.memory_space<smem>>
    %727 = vector.broadcast %726 : f32 to vector<17x17xf32>
    %728 = arith.mulf %705, %727 : vector<17x17xf32>
    %729 = arith.addf %696, %728 : vector<17x17xf32>
    %c61 = arith.constant 61 : index
    %730 = memref.load %arg2[%c61] : memref<288xf32, #tpu.memory_space<smem>>
    %731 = vector.broadcast %730 : f32 to vector<17x17xf32>
    %732 = arith.mulf %705, %731 : vector<17x17xf32>
    %733 = arith.addf %700, %732 : vector<17x17xf32>
    %c70 = arith.constant 70 : index
    %734 = memref.load %arg2[%c70] : memref<288xf32, #tpu.memory_space<smem>>
    %735 = vector.broadcast %734 : f32 to vector<17x17xf32>
    %736 = arith.mulf %705, %735 : vector<17x17xf32>
    %737 = arith.addf %704, %736 : vector<17x17xf32>
    %c1_104 = arith.constant 1 : index
    %c0_105 = arith.constant 0 : index
    %c0_106 = arith.constant 0 : index
    %738 = vector.load %arg6[%c1_104, %c0_105, %c0_106] : memref<4x18x18xf32, #tpu.memory_space<vmem>>, vector<1x18x18xf32>
    %739 = vector.shape_cast %738 : vector<1x18x18xf32> to vector<18x18xf32>
    %740 = vector.extract_strided_slice %739 {offsets = [1, 1], sizes = [17, 17], strides = [1, 1]} : vector<18x18xf32> to vector<17x17xf32>
    %c73 = arith.constant 73 : index
    %741 = memref.load %arg2[%c73] : memref<288xf32, #tpu.memory_space<smem>>
    %742 = vector.broadcast %741 : f32 to vector<17x17xf32>
    %743 = arith.mulf %740, %742 : vector<17x17xf32>
    %744 = arith.addf %709, %743 : vector<17x17xf32>
    %c82 = arith.constant 82 : index
    %745 = memref.load %arg2[%c82] : memref<288xf32, #tpu.memory_space<smem>>
    %746 = vector.broadcast %745 : f32 to vector<17x17xf32>
    %747 = arith.mulf %740, %746 : vector<17x17xf32>
    %748 = arith.addf %713, %747 : vector<17x17xf32>
    %c91 = arith.constant 91 : index
    %749 = memref.load %arg2[%c91] : memref<288xf32, #tpu.memory_space<smem>>
    %750 = vector.broadcast %749 : f32 to vector<17x17xf32>
    %751 = arith.mulf %740, %750 : vector<17x17xf32>
    %752 = arith.addf %717, %751 : vector<17x17xf32>
    %c100 = arith.constant 100 : index
    %753 = memref.load %arg2[%c100] : memref<288xf32, #tpu.memory_space<smem>>
    %754 = vector.broadcast %753 : f32 to vector<17x17xf32>
    %755 = arith.mulf %740, %754 : vector<17x17xf32>
    %756 = arith.addf %721, %755 : vector<17x17xf32>
    %c109 = arith.constant 109 : index
    %757 = memref.load %arg2[%c109] : memref<288xf32, #tpu.memory_space<smem>>
    %758 = vector.broadcast %757 : f32 to vector<17x17xf32>
    %759 = arith.mulf %740, %758 : vector<17x17xf32>
    %760 = arith.addf %725, %759 : vector<17x17xf32>
    %c118 = arith.constant 118 : index
    %761 = memref.load %arg2[%c118] : memref<288xf32, #tpu.memory_space<smem>>
    %762 = vector.broadcast %761 : f32 to vector<17x17xf32>
    %763 = arith.mulf %740, %762 : vector<17x17xf32>
    %764 = arith.addf %729, %763 : vector<17x17xf32>
    %c127 = arith.constant 127 : index
    %765 = memref.load %arg2[%c127] : memref<288xf32, #tpu.memory_space<smem>>
    %766 = vector.broadcast %765 : f32 to vector<17x17xf32>
    %767 = arith.mulf %740, %766 : vector<17x17xf32>
    %768 = arith.addf %733, %767 : vector<17x17xf32>
    %c136 = arith.constant 136 : index
    %769 = memref.load %arg2[%c136] : memref<288xf32, #tpu.memory_space<smem>>
    %770 = vector.broadcast %769 : f32 to vector<17x17xf32>
    %771 = arith.mulf %740, %770 : vector<17x17xf32>
    %772 = arith.addf %737, %771 : vector<17x17xf32>
    %773 = vector.extract_strided_slice %739 {offsets = [0, 1], sizes = [17, 17], strides = [1, 1]} : vector<18x18xf32> to vector<17x17xf32>
    %c79 = arith.constant 79 : index
    %774 = memref.load %arg2[%c79] : memref<288xf32, #tpu.memory_space<smem>>
    %775 = vector.broadcast %774 : f32 to vector<17x17xf32>
    %776 = arith.mulf %773, %775 : vector<17x17xf32>
    %777 = arith.addf %744, %776 : vector<17x17xf32>
    %c88 = arith.constant 88 : index
    %778 = memref.load %arg2[%c88] : memref<288xf32, #tpu.memory_space<smem>>
    %779 = vector.broadcast %778 : f32 to vector<17x17xf32>
    %780 = arith.mulf %773, %779 : vector<17x17xf32>
    %781 = arith.addf %748, %780 : vector<17x17xf32>
    %c97 = arith.constant 97 : index
    %782 = memref.load %arg2[%c97] : memref<288xf32, #tpu.memory_space<smem>>
    %783 = vector.broadcast %782 : f32 to vector<17x17xf32>
    %784 = arith.mulf %773, %783 : vector<17x17xf32>
    %785 = arith.addf %752, %784 : vector<17x17xf32>
    %c106 = arith.constant 106 : index
    %786 = memref.load %arg2[%c106] : memref<288xf32, #tpu.memory_space<smem>>
    %787 = vector.broadcast %786 : f32 to vector<17x17xf32>
    %788 = arith.mulf %773, %787 : vector<17x17xf32>
    %789 = arith.addf %756, %788 : vector<17x17xf32>
    %c115 = arith.constant 115 : index
    %790 = memref.load %arg2[%c115] : memref<288xf32, #tpu.memory_space<smem>>
    %791 = vector.broadcast %790 : f32 to vector<17x17xf32>
    %792 = arith.mulf %773, %791 : vector<17x17xf32>
    %793 = arith.addf %760, %792 : vector<17x17xf32>
    %c124 = arith.constant 124 : index
    %794 = memref.load %arg2[%c124] : memref<288xf32, #tpu.memory_space<smem>>
    %795 = vector.broadcast %794 : f32 to vector<17x17xf32>
    %796 = arith.mulf %773, %795 : vector<17x17xf32>
    %797 = arith.addf %764, %796 : vector<17x17xf32>
    %c133 = arith.constant 133 : index
    %798 = memref.load %arg2[%c133] : memref<288xf32, #tpu.memory_space<smem>>
    %799 = vector.broadcast %798 : f32 to vector<17x17xf32>
    %800 = arith.mulf %773, %799 : vector<17x17xf32>
    %801 = arith.addf %768, %800 : vector<17x17xf32>
    %c142 = arith.constant 142 : index
    %802 = memref.load %arg2[%c142] : memref<288xf32, #tpu.memory_space<smem>>
    %803 = vector.broadcast %802 : f32 to vector<17x17xf32>
    %804 = arith.mulf %773, %803 : vector<17x17xf32>
    %805 = arith.addf %772, %804 : vector<17x17xf32>
    %c2_107 = arith.constant 2 : index
    %c0_108 = arith.constant 0 : index
    %c0_109 = arith.constant 0 : index
    %806 = vector.load %arg6[%c2_107, %c0_108, %c0_109] : memref<4x18x18xf32, #tpu.memory_space<vmem>>, vector<1x18x18xf32>
    %807 = vector.shape_cast %806 : vector<1x18x18xf32> to vector<18x18xf32>
    %808 = vector.extract_strided_slice %807 {offsets = [1, 1], sizes = [17, 17], strides = [1, 1]} : vector<18x18xf32> to vector<17x17xf32>
    %c145 = arith.constant 145 : index
    %809 = memref.load %arg2[%c145] : memref<288xf32, #tpu.memory_space<smem>>
    %810 = vector.broadcast %809 : f32 to vector<17x17xf32>
    %811 = arith.mulf %808, %810 : vector<17x17xf32>
    %812 = arith.addf %777, %811 : vector<17x17xf32>
    %c154 = arith.constant 154 : index
    %813 = memref.load %arg2[%c154] : memref<288xf32, #tpu.memory_space<smem>>
    %814 = vector.broadcast %813 : f32 to vector<17x17xf32>
    %815 = arith.mulf %808, %814 : vector<17x17xf32>
    %816 = arith.addf %781, %815 : vector<17x17xf32>
    %c163 = arith.constant 163 : index
    %817 = memref.load %arg2[%c163] : memref<288xf32, #tpu.memory_space<smem>>
    %818 = vector.broadcast %817 : f32 to vector<17x17xf32>
    %819 = arith.mulf %808, %818 : vector<17x17xf32>
    %820 = arith.addf %785, %819 : vector<17x17xf32>
    %c172 = arith.constant 172 : index
    %821 = memref.load %arg2[%c172] : memref<288xf32, #tpu.memory_space<smem>>
    %822 = vector.broadcast %821 : f32 to vector<17x17xf32>
    %823 = arith.mulf %808, %822 : vector<17x17xf32>
    %824 = arith.addf %789, %823 : vector<17x17xf32>
    %c181 = arith.constant 181 : index
    %825 = memref.load %arg2[%c181] : memref<288xf32, #tpu.memory_space<smem>>
    %826 = vector.broadcast %825 : f32 to vector<17x17xf32>
    %827 = arith.mulf %808, %826 : vector<17x17xf32>
    %828 = arith.addf %793, %827 : vector<17x17xf32>
    %c190 = arith.constant 190 : index
    %829 = memref.load %arg2[%c190] : memref<288xf32, #tpu.memory_space<smem>>
    %830 = vector.broadcast %829 : f32 to vector<17x17xf32>
    %831 = arith.mulf %808, %830 : vector<17x17xf32>
    %832 = arith.addf %797, %831 : vector<17x17xf32>
    %c199 = arith.constant 199 : index
    %833 = memref.load %arg2[%c199] : memref<288xf32, #tpu.memory_space<smem>>
    %834 = vector.broadcast %833 : f32 to vector<17x17xf32>
    %835 = arith.mulf %808, %834 : vector<17x17xf32>
    %836 = arith.addf %801, %835 : vector<17x17xf32>
    %c208 = arith.constant 208 : index
    %837 = memref.load %arg2[%c208] : memref<288xf32, #tpu.memory_space<smem>>
    %838 = vector.broadcast %837 : f32 to vector<17x17xf32>
    %839 = arith.mulf %808, %838 : vector<17x17xf32>
    %840 = arith.addf %805, %839 : vector<17x17xf32>
    %841 = vector.extract_strided_slice %807 {offsets = [0, 1], sizes = [17, 17], strides = [1, 1]} : vector<18x18xf32> to vector<17x17xf32>
    %c151 = arith.constant 151 : index
    %842 = memref.load %arg2[%c151] : memref<288xf32, #tpu.memory_space<smem>>
    %843 = vector.broadcast %842 : f32 to vector<17x17xf32>
    %844 = arith.mulf %841, %843 : vector<17x17xf32>
    %845 = arith.addf %812, %844 : vector<17x17xf32>
    %c160 = arith.constant 160 : index
    %846 = memref.load %arg2[%c160] : memref<288xf32, #tpu.memory_space<smem>>
    %847 = vector.broadcast %846 : f32 to vector<17x17xf32>
    %848 = arith.mulf %841, %847 : vector<17x17xf32>
    %849 = arith.addf %816, %848 : vector<17x17xf32>
    %c169 = arith.constant 169 : index
    %850 = memref.load %arg2[%c169] : memref<288xf32, #tpu.memory_space<smem>>
    %851 = vector.broadcast %850 : f32 to vector<17x17xf32>
    %852 = arith.mulf %841, %851 : vector<17x17xf32>
    %853 = arith.addf %820, %852 : vector<17x17xf32>
    %c178 = arith.constant 178 : index
    %854 = memref.load %arg2[%c178] : memref<288xf32, #tpu.memory_space<smem>>
    %855 = vector.broadcast %854 : f32 to vector<17x17xf32>
    %856 = arith.mulf %841, %855 : vector<17x17xf32>
    %857 = arith.addf %824, %856 : vector<17x17xf32>
    %c187 = arith.constant 187 : index
    %858 = memref.load %arg2[%c187] : memref<288xf32, #tpu.memory_space<smem>>
    %859 = vector.broadcast %858 : f32 to vector<17x17xf32>
    %860 = arith.mulf %841, %859 : vector<17x17xf32>
    %861 = arith.addf %828, %860 : vector<17x17xf32>
    %c196 = arith.constant 196 : index
    %862 = memref.load %arg2[%c196] : memref<288xf32, #tpu.memory_space<smem>>
    %863 = vector.broadcast %862 : f32 to vector<17x17xf32>
    %864 = arith.mulf %841, %863 : vector<17x17xf32>
    %865 = arith.addf %832, %864 : vector<17x17xf32>
    %c205 = arith.constant 205 : index
    %866 = memref.load %arg2[%c205] : memref<288xf32, #tpu.memory_space<smem>>
    %867 = vector.broadcast %866 : f32 to vector<17x17xf32>
    %868 = arith.mulf %841, %867 : vector<17x17xf32>
    %869 = arith.addf %836, %868 : vector<17x17xf32>
    %c214 = arith.constant 214 : index
    %870 = memref.load %arg2[%c214] : memref<288xf32, #tpu.memory_space<smem>>
    %871 = vector.broadcast %870 : f32 to vector<17x17xf32>
    %872 = arith.mulf %841, %871 : vector<17x17xf32>
    %873 = arith.addf %840, %872 : vector<17x17xf32>
    %c3_110 = arith.constant 3 : index
    %c0_111 = arith.constant 0 : index
    %c0_112 = arith.constant 0 : index
    %874 = vector.load %arg6[%c3_110, %c0_111, %c0_112] : memref<4x18x18xf32, #tpu.memory_space<vmem>>, vector<1x18x18xf32>
    %875 = vector.shape_cast %874 : vector<1x18x18xf32> to vector<18x18xf32>
    %876 = vector.extract_strided_slice %875 {offsets = [1, 1], sizes = [17, 17], strides = [1, 1]} : vector<18x18xf32> to vector<17x17xf32>
    %c217 = arith.constant 217 : index
    %877 = memref.load %arg2[%c217] : memref<288xf32, #tpu.memory_space<smem>>
    %878 = vector.broadcast %877 : f32 to vector<17x17xf32>
    %879 = arith.mulf %876, %878 : vector<17x17xf32>
    %880 = arith.addf %845, %879 : vector<17x17xf32>
    %c226 = arith.constant 226 : index
    %881 = memref.load %arg2[%c226] : memref<288xf32, #tpu.memory_space<smem>>
    %882 = vector.broadcast %881 : f32 to vector<17x17xf32>
    %883 = arith.mulf %876, %882 : vector<17x17xf32>
    %884 = arith.addf %849, %883 : vector<17x17xf32>
    %c235 = arith.constant 235 : index
    %885 = memref.load %arg2[%c235] : memref<288xf32, #tpu.memory_space<smem>>
    %886 = vector.broadcast %885 : f32 to vector<17x17xf32>
    %887 = arith.mulf %876, %886 : vector<17x17xf32>
    %888 = arith.addf %853, %887 : vector<17x17xf32>
    %c244 = arith.constant 244 : index
    %889 = memref.load %arg2[%c244] : memref<288xf32, #tpu.memory_space<smem>>
    %890 = vector.broadcast %889 : f32 to vector<17x17xf32>
    %891 = arith.mulf %876, %890 : vector<17x17xf32>
    %892 = arith.addf %857, %891 : vector<17x17xf32>
    %c253 = arith.constant 253 : index
    %893 = memref.load %arg2[%c253] : memref<288xf32, #tpu.memory_space<smem>>
    %894 = vector.broadcast %893 : f32 to vector<17x17xf32>
    %895 = arith.mulf %876, %894 : vector<17x17xf32>
    %896 = arith.addf %861, %895 : vector<17x17xf32>
    %c262 = arith.constant 262 : index
    %897 = memref.load %arg2[%c262] : memref<288xf32, #tpu.memory_space<smem>>
    %898 = vector.broadcast %897 : f32 to vector<17x17xf32>
    %899 = arith.mulf %876, %898 : vector<17x17xf32>
    %900 = arith.addf %865, %899 : vector<17x17xf32>
    %c271 = arith.constant 271 : index
    %901 = memref.load %arg2[%c271] : memref<288xf32, #tpu.memory_space<smem>>
    %902 = vector.broadcast %901 : f32 to vector<17x17xf32>
    %903 = arith.mulf %876, %902 : vector<17x17xf32>
    %904 = arith.addf %869, %903 : vector<17x17xf32>
    %c280 = arith.constant 280 : index
    %905 = memref.load %arg2[%c280] : memref<288xf32, #tpu.memory_space<smem>>
    %906 = vector.broadcast %905 : f32 to vector<17x17xf32>
    %907 = arith.mulf %876, %906 : vector<17x17xf32>
    %908 = arith.addf %873, %907 : vector<17x17xf32>
    %909 = vector.extract_strided_slice %875 {offsets = [0, 1], sizes = [17, 17], strides = [1, 1]} : vector<18x18xf32> to vector<17x17xf32>
    %c223 = arith.constant 223 : index
    %910 = memref.load %arg2[%c223] : memref<288xf32, #tpu.memory_space<smem>>
    %911 = vector.broadcast %910 : f32 to vector<17x17xf32>
    %912 = arith.mulf %909, %911 : vector<17x17xf32>
    %913 = arith.addf %880, %912 : vector<17x17xf32>
    %c232 = arith.constant 232 : index
    %914 = memref.load %arg2[%c232] : memref<288xf32, #tpu.memory_space<smem>>
    %915 = vector.broadcast %914 : f32 to vector<17x17xf32>
    %916 = arith.mulf %909, %915 : vector<17x17xf32>
    %917 = arith.addf %884, %916 : vector<17x17xf32>
    %c241 = arith.constant 241 : index
    %918 = memref.load %arg2[%c241] : memref<288xf32, #tpu.memory_space<smem>>
    %919 = vector.broadcast %918 : f32 to vector<17x17xf32>
    %920 = arith.mulf %909, %919 : vector<17x17xf32>
    %921 = arith.addf %888, %920 : vector<17x17xf32>
    %c250 = arith.constant 250 : index
    %922 = memref.load %arg2[%c250] : memref<288xf32, #tpu.memory_space<smem>>
    %923 = vector.broadcast %922 : f32 to vector<17x17xf32>
    %924 = arith.mulf %909, %923 : vector<17x17xf32>
    %925 = arith.addf %892, %924 : vector<17x17xf32>
    %c259 = arith.constant 259 : index
    %926 = memref.load %arg2[%c259] : memref<288xf32, #tpu.memory_space<smem>>
    %927 = vector.broadcast %926 : f32 to vector<17x17xf32>
    %928 = arith.mulf %909, %927 : vector<17x17xf32>
    %929 = arith.addf %896, %928 : vector<17x17xf32>
    %c268 = arith.constant 268 : index
    %930 = memref.load %arg2[%c268] : memref<288xf32, #tpu.memory_space<smem>>
    %931 = vector.broadcast %930 : f32 to vector<17x17xf32>
    %932 = arith.mulf %909, %931 : vector<17x17xf32>
    %933 = arith.addf %900, %932 : vector<17x17xf32>
    %c277 = arith.constant 277 : index
    %934 = memref.load %arg2[%c277] : memref<288xf32, #tpu.memory_space<smem>>
    %935 = vector.broadcast %934 : f32 to vector<17x17xf32>
    %936 = arith.mulf %909, %935 : vector<17x17xf32>
    %937 = arith.addf %904, %936 : vector<17x17xf32>
    %c286 = arith.constant 286 : index
    %938 = memref.load %arg2[%c286] : memref<288xf32, #tpu.memory_space<smem>>
    %939 = vector.broadcast %938 : f32 to vector<17x17xf32>
    %940 = arith.mulf %909, %939 : vector<17x17xf32>
    %941 = arith.addf %908, %940 : vector<17x17xf32>
    %c0_113 = arith.constant 0 : index
    %942 = memref.load %arg3[%c0_113] : memref<8xf32, #tpu.memory_space<smem>>
    %943 = vector.broadcast %942 : f32 to vector<17x17xf32>
    %944 = arith.addf %913, %943 : vector<17x17xf32>
    %cst_114 = arith.constant 0.000000e+00 : f32
    %945 = vector.broadcast %cst_114 : f32 to vector<17x17xf32>
    %946 = arith.cmpf ogt, %944, %945 : vector<17x17xf32>
    %c0_115 = arith.constant 0 : index
    %947 = memref.load %arg4[%c0_115] : memref<8xf32, #tpu.memory_space<smem>>
    %948 = vector.broadcast %947 : f32 to vector<17x17xf32>
    %949 = arith.mulf %948, %944 : vector<17x17xf32>
    %950 = arith.select %946, %944, %949 : vector<17x17xi1>, vector<17x17xf32>
    %c0_116 = arith.constant 0 : index
    %c0_117 = arith.constant 0 : index
    %c136_118 = arith.constant 136 : index
    %951 = vector.load %arg5[%c0_116, %c0_117, %c136_118] : memref<1x17x544xf32, #tpu.memory_space<vmem>>, vector<1x17x17xf32>
    %952 = vector.shape_cast %951 : vector<1x17x17xf32> to vector<17x17xf32>
    %953 = vector.shape_cast %950 : vector<17x17xf32> to vector<1x17x17xf32>
    tpu.vector_store %arg5[%c0_116, %c0_117, %c136_118], %953 {strides = array<i32>} : memref<1x17x544xf32, #tpu.memory_space<vmem>>, vector<1x17x17xf32>,
    %c1_119 = arith.constant 1 : index
    %954 = memref.load %arg3[%c1_119] : memref<8xf32, #tpu.memory_space<smem>>
    %955 = vector.broadcast %954 : f32 to vector<17x17xf32>
    %956 = arith.addf %917, %955 : vector<17x17xf32>
    %cst_120 = arith.constant 0.000000e+00 : f32
    %957 = vector.broadcast %cst_120 : f32 to vector<17x17xf32>
    %958 = arith.cmpf ogt, %956, %957 : vector<17x17xf32>
    %c1_121 = arith.constant 1 : index
    %959 = memref.load %arg4[%c1_121] : memref<8xf32, #tpu.memory_space<smem>>
    %960 = vector.broadcast %959 : f32 to vector<17x17xf32>
    %961 = arith.mulf %960, %956 : vector<17x17xf32>
    %962 = arith.select %958, %956, %961 : vector<17x17xi1>, vector<17x17xf32>
    %c0_122 = arith.constant 0 : index
    %c0_123 = arith.constant 0 : index
    %c153_124 = arith.constant 153 : index
    %963 = vector.load %arg5[%c0_122, %c0_123, %c153_124] : memref<1x17x544xf32, #tpu.memory_space<vmem>>, vector<1x17x17xf32>
    %964 = vector.shape_cast %963 : vector<1x17x17xf32> to vector<17x17xf32>
    %965 = vector.shape_cast %962 : vector<17x17xf32> to vector<1x17x17xf32>
    tpu.vector_store %arg5[%c0_122, %c0_123, %c153_124], %965 {strides = array<i32>} : memref<1x17x544xf32, #tpu.memory_space<vmem>>, vector<1x17x17xf32>,
    %c2_125 = arith.constant 2 : index
    %966 = memref.load %arg3[%c2_125] : memref<8xf32, #tpu.memory_space<smem>>
    %967 = vector.broadcast %966 : f32 to vector<17x17xf32>
    %968 = arith.addf %921, %967 : vector<17x17xf32>
    %cst_126 = arith.constant 0.000000e+00 : f32
    %969 = vector.broadcast %cst_126 : f32 to vector<17x17xf32>
    %970 = arith.cmpf ogt, %968, %969 : vector<17x17xf32>
    %c2_127 = arith.constant 2 : index
    %971 = memref.load %arg4[%c2_127] : memref<8xf32, #tpu.memory_space<smem>>
    %972 = vector.broadcast %971 : f32 to vector<17x17xf32>
    %973 = arith.mulf %972, %968 : vector<17x17xf32>
    %974 = arith.select %970, %968, %973 : vector<17x17xi1>, vector<17x17xf32>
    %c0_128 = arith.constant 0 : index
    %c0_129 = arith.constant 0 : index
    %c170_130 = arith.constant 170 : index
    %975 = vector.load %arg5[%c0_128, %c0_129, %c170_130] : memref<1x17x544xf32, #tpu.memory_space<vmem>>, vector<1x17x17xf32>
    %976 = vector.shape_cast %975 : vector<1x17x17xf32> to vector<17x17xf32>
    %977 = vector.shape_cast %974 : vector<17x17xf32> to vector<1x17x17xf32>
    tpu.vector_store %arg5[%c0_128, %c0_129, %c170_130], %977 {strides = array<i32>} : memref<1x17x544xf32, #tpu.memory_space<vmem>>, vector<1x17x17xf32>,
    %c3_131 = arith.constant 3 : index
    %978 = memref.load %arg3[%c3_131] : memref<8xf32, #tpu.memory_space<smem>>
    %979 = vector.broadcast %978 : f32 to vector<17x17xf32>
    %980 = arith.addf %925, %979 : vector<17x17xf32>
    %cst_132 = arith.constant 0.000000e+00 : f32
    %981 = vector.broadcast %cst_132 : f32 to vector<17x17xf32>
    %982 = arith.cmpf ogt, %980, %981 : vector<17x17xf32>
    %c3_133 = arith.constant 3 : index
    %983 = memref.load %arg4[%c3_133] : memref<8xf32, #tpu.memory_space<smem>>
    %984 = vector.broadcast %983 : f32 to vector<17x17xf32>
    %985 = arith.mulf %984, %980 : vector<17x17xf32>
    %986 = arith.select %982, %980, %985 : vector<17x17xi1>, vector<17x17xf32>
    %c0_134 = arith.constant 0 : index
    %c0_135 = arith.constant 0 : index
    %c187_136 = arith.constant 187 : index
    %987 = vector.load %arg5[%c0_134, %c0_135, %c187_136] : memref<1x17x544xf32, #tpu.memory_space<vmem>>, vector<1x17x17xf32>
    %988 = vector.shape_cast %987 : vector<1x17x17xf32> to vector<17x17xf32>
    %989 = vector.shape_cast %986 : vector<17x17xf32> to vector<1x17x17xf32>
    tpu.vector_store %arg5[%c0_134, %c0_135, %c187_136], %989 {strides = array<i32>} : memref<1x17x544xf32, #tpu.memory_space<vmem>>, vector<1x17x17xf32>,
    %c4_137 = arith.constant 4 : index
    %990 = memref.load %arg3[%c4_137] : memref<8xf32, #tpu.memory_space<smem>>
    %991 = vector.broadcast %990 : f32 to vector<17x17xf32>
    %992 = arith.addf %929, %991 : vector<17x17xf32>
    %cst_138 = arith.constant 0.000000e+00 : f32
    %993 = vector.broadcast %cst_138 : f32 to vector<17x17xf32>
    %994 = arith.cmpf ogt, %992, %993 : vector<17x17xf32>
    %c4_139 = arith.constant 4 : index
    %995 = memref.load %arg4[%c4_139] : memref<8xf32, #tpu.memory_space<smem>>
    %996 = vector.broadcast %995 : f32 to vector<17x17xf32>
    %997 = arith.mulf %996, %992 : vector<17x17xf32>
    %998 = arith.select %994, %992, %997 : vector<17x17xi1>, vector<17x17xf32>
    %c0_140 = arith.constant 0 : index
    %c0_141 = arith.constant 0 : index
    %c204_142 = arith.constant 204 : index
    %999 = vector.load %arg5[%c0_140, %c0_141, %c204_142] : memref<1x17x544xf32, #tpu.memory_space<vmem>>, vector<1x17x17xf32>
    %1000 = vector.shape_cast %999 : vector<1x17x17xf32> to vector<17x17xf32>
    %1001 = vector.shape_cast %998 : vector<17x17xf32> to vector<1x17x17xf32>
    tpu.vector_store %arg5[%c0_140, %c0_141, %c204_142], %1001 {strides = array<i32>} : memref<1x17x544xf32, #tpu.memory_space<vmem>>, vector<1x17x17xf32>,
    %c5_143 = arith.constant 5 : index
    %1002 = memref.load %arg3[%c5_143] : memref<8xf32, #tpu.memory_space<smem>>
    %1003 = vector.broadcast %1002 : f32 to vector<17x17xf32>
    %1004 = arith.addf %933, %1003 : vector<17x17xf32>
    %cst_144 = arith.constant 0.000000e+00 : f32
    %1005 = vector.broadcast %cst_144 : f32 to vector<17x17xf32>
    %1006 = arith.cmpf ogt, %1004, %1005 : vector<17x17xf32>
    %c5_145 = arith.constant 5 : index
    %1007 = memref.load %arg4[%c5_145] : memref<8xf32, #tpu.memory_space<smem>>
    %1008 = vector.broadcast %1007 : f32 to vector<17x17xf32>
    %1009 = arith.mulf %1008, %1004 : vector<17x17xf32>
    %1010 = arith.select %1006, %1004, %1009 : vector<17x17xi1>, vector<17x17xf32>
    %c0_146 = arith.constant 0 : index
    %c0_147 = arith.constant 0 : index
    %c221 = arith.constant 221 : index
    %1011 = vector.load %arg5[%c0_146, %c0_147, %c221] : memref<1x17x544xf32, #tpu.memory_space<vmem>>, vector<1x17x17xf32>
    %1012 = vector.shape_cast %1011 : vector<1x17x17xf32> to vector<17x17xf32>
    %1013 = vector.shape_cast %1010 : vector<17x17xf32> to vector<1x17x17xf32>
    tpu.vector_store %arg5[%c0_146, %c0_147, %c221], %1013 {strides = array<i32>} : memref<1x17x544xf32, #tpu.memory_space<vmem>>, vector<1x17x17xf32>,
    %c6_148 = arith.constant 6 : index
    %1014 = memref.load %arg3[%c6_148] : memref<8xf32, #tpu.memory_space<smem>>
    %1015 = vector.broadcast %1014 : f32 to vector<17x17xf32>
    %1016 = arith.addf %937, %1015 : vector<17x17xf32>
    %cst_149 = arith.constant 0.000000e+00 : f32
    %1017 = vector.broadcast %cst_149 : f32 to vector<17x17xf32>
    %1018 = arith.cmpf ogt, %1016, %1017 : vector<17x17xf32>
    %c6_150 = arith.constant 6 : index
    %1019 = memref.load %arg4[%c6_150] : memref<8xf32, #tpu.memory_space<smem>>
    %1020 = vector.broadcast %1019 : f32 to vector<17x17xf32>
    %1021 = arith.mulf %1020, %1016 : vector<17x17xf32>
    %1022 = arith.select %1018, %1016, %1021 : vector<17x17xi1>, vector<17x17xf32>
    %c0_151 = arith.constant 0 : index
    %c0_152 = arith.constant 0 : index
    %c238 = arith.constant 238 : index
    %1023 = vector.load %arg5[%c0_151, %c0_152, %c238] : memref<1x17x544xf32, #tpu.memory_space<vmem>>, vector<1x17x17xf32>
    %1024 = vector.shape_cast %1023 : vector<1x17x17xf32> to vector<17x17xf32>
    %1025 = vector.shape_cast %1022 : vector<17x17xf32> to vector<1x17x17xf32>
    tpu.vector_store %arg5[%c0_151, %c0_152, %c238], %1025 {strides = array<i32>} : memref<1x17x544xf32, #tpu.memory_space<vmem>>, vector<1x17x17xf32>,
    %c7_153 = arith.constant 7 : index
    %1026 = memref.load %arg3[%c7_153] : memref<8xf32, #tpu.memory_space<smem>>
    %1027 = vector.broadcast %1026 : f32 to vector<17x17xf32>
    %1028 = arith.addf %941, %1027 : vector<17x17xf32>
    %cst_154 = arith.constant 0.000000e+00 : f32
    %1029 = vector.broadcast %cst_154 : f32 to vector<17x17xf32>
    %1030 = arith.cmpf ogt, %1028, %1029 : vector<17x17xf32>
    %c7_155 = arith.constant 7 : index
    %1031 = memref.load %arg4[%c7_155] : memref<8xf32, #tpu.memory_space<smem>>
    %1032 = vector.broadcast %1031 : f32 to vector<17x17xf32>
    %1033 = arith.mulf %1032, %1028 : vector<17x17xf32>
    %1034 = arith.select %1030, %1028, %1033 : vector<17x17xi1>, vector<17x17xf32>
    %c0_156 = arith.constant 0 : index
    %c0_157 = arith.constant 0 : index
    %c255 = arith.constant 255 : index
    %1035 = vector.load %arg5[%c0_156, %c0_157, %c255] : memref<1x17x544xf32, #tpu.memory_space<vmem>>, vector<1x17x17xf32>
    %1036 = vector.shape_cast %1035 : vector<1x17x17xf32> to vector<17x17xf32>
    %1037 = vector.shape_cast %1034 : vector<17x17xf32> to vector<1x17x17xf32>
    tpu.vector_store %arg5[%c0_156, %c0_157, %c255], %1037 {strides = array<i32>} : memref<1x17x544xf32, #tpu.memory_space<vmem>>, vector<1x17x17xf32>,
    %cst_158 = arith.constant 0.000000e+00 : f32
    %1038 = vector.broadcast %cst_158 : f32 to vector<17x17xf32>
    %cst_159 = arith.constant 0.000000e+00 : f32
    %1039 = vector.broadcast %cst_159 : f32 to vector<17x17xf32>
    %cst_160 = arith.constant 0.000000e+00 : f32
    %1040 = vector.broadcast %cst_160 : f32 to vector<17x17xf32>
    %cst_161 = arith.constant 0.000000e+00 : f32
    %1041 = vector.broadcast %cst_161 : f32 to vector<17x17xf32>
    %cst_162 = arith.constant 0.000000e+00 : f32
    %1042 = vector.broadcast %cst_162 : f32 to vector<17x17xf32>
    %cst_163 = arith.constant 0.000000e+00 : f32
    %1043 = vector.broadcast %cst_163 : f32 to vector<17x17xf32>
    %cst_164 = arith.constant 0.000000e+00 : f32
    %1044 = vector.broadcast %cst_164 : f32 to vector<17x17xf32>
    %cst_165 = arith.constant 0.000000e+00 : f32
    %1045 = vector.broadcast %cst_165 : f32 to vector<17x17xf32>
    %c0_166 = arith.constant 0 : index
    %c0_167 = arith.constant 0 : index
    %c0_168 = arith.constant 0 : index
    %1046 = vector.load %arg6[%c0_166, %c0_167, %c0_168] : memref<4x18x18xf32, #tpu.memory_space<vmem>>, vector<1x18x18xf32>
    %1047 = vector.shape_cast %1046 : vector<1x18x18xf32> to vector<18x18xf32>
    %1048 = vector.extract_strided_slice %1047 {offsets = [1, 1], sizes = [17, 17], strides = [1, 1]} : vector<18x18xf32> to vector<17x17xf32>
    %c3_169 = arith.constant 3 : index
    %1049 = memref.load %arg2[%c3_169] : memref<288xf32, #tpu.memory_space<smem>>
    %1050 = vector.broadcast %1049 : f32 to vector<17x17xf32>
    %1051 = arith.mulf %1048, %1050 : vector<17x17xf32>
    %1052 = arith.addf %1038, %1051 : vector<17x17xf32>
    %c12 = arith.constant 12 : index
    %1053 = memref.load %arg2[%c12] : memref<288xf32, #tpu.memory_space<smem>>
    %1054 = vector.broadcast %1053 : f32 to vector<17x17xf32>
    %1055 = arith.mulf %1048, %1054 : vector<17x17xf32>
    %1056 = arith.addf %1039, %1055 : vector<17x17xf32>
    %c21 = arith.constant 21 : index
    %1057 = memref.load %arg2[%c21] : memref<288xf32, #tpu.memory_space<smem>>
    %1058 = vector.broadcast %1057 : f32 to vector<17x17xf32>
    %1059 = arith.mulf %1048, %1058 : vector<17x17xf32>
    %1060 = arith.addf %1040, %1059 : vector<17x17xf32>
    %c30 = arith.constant 30 : index
    %1061 = memref.load %arg2[%c30] : memref<288xf32, #tpu.memory_space<smem>>
    %1062 = vector.broadcast %1061 : f32 to vector<17x17xf32>
    %1063 = arith.mulf %1048, %1062 : vector<17x17xf32>
    %1064 = arith.addf %1041, %1063 : vector<17x17xf32>
    %c39 = arith.constant 39 : index
    %1065 = memref.load %arg2[%c39] : memref<288xf32, #tpu.memory_space<smem>>
    %1066 = vector.broadcast %1065 : f32 to vector<17x17xf32>
    %1067 = arith.mulf %1048, %1066 : vector<17x17xf32>
    %1068 = arith.addf %1042, %1067 : vector<17x17xf32>
    %c48 = arith.constant 48 : index
    %1069 = memref.load %arg2[%c48] : memref<288xf32, #tpu.memory_space<smem>>
    %1070 = vector.broadcast %1069 : f32 to vector<17x17xf32>
    %1071 = arith.mulf %1048, %1070 : vector<17x17xf32>
    %1072 = arith.addf %1043, %1071 : vector<17x17xf32>
    %c57 = arith.constant 57 : index
    %1073 = memref.load %arg2[%c57] : memref<288xf32, #tpu.memory_space<smem>>
    %1074 = vector.broadcast %1073 : f32 to vector<17x17xf32>
    %1075 = arith.mulf %1048, %1074 : vector<17x17xf32>
    %1076 = arith.addf %1044, %1075 : vector<17x17xf32>
    %c66 = arith.constant 66 : index
    %1077 = memref.load %arg2[%c66] : memref<288xf32, #tpu.memory_space<smem>>
    %1078 = vector.broadcast %1077 : f32 to vector<17x17xf32>
    %1079 = arith.mulf %1048, %1078 : vector<17x17xf32>
    %1080 = arith.addf %1045, %1079 : vector<17x17xf32>
    %1081 = vector.extract_strided_slice %1047 {offsets = [1, 0], sizes = [17, 17], strides = [1, 1]} : vector<18x18xf32> to vector<17x17xf32>
    %c5_170 = arith.constant 5 : index
    %1082 = memref.load %arg2[%c5_170] : memref<288xf32, #tpu.memory_space<smem>>
    %1083 = vector.broadcast %1082 : f32 to vector<17x17xf32>
    %1084 = arith.mulf %1081, %1083 : vector<17x17xf32>
    %1085 = arith.addf %1052, %1084 : vector<17x17xf32>
    %c14 = arith.constant 14 : index
    %1086 = memref.load %arg2[%c14] : memref<288xf32, #tpu.memory_space<smem>>
    %1087 = vector.broadcast %1086 : f32 to vector<17x17xf32>
    %1088 = arith.mulf %1081, %1087 : vector<17x17xf32>
    %1089 = arith.addf %1056, %1088 : vector<17x17xf32>
    %c23 = arith.constant 23 : index
    %1090 = memref.load %arg2[%c23] : memref<288xf32, #tpu.memory_space<smem>>
    %1091 = vector.broadcast %1090 : f32 to vector<17x17xf32>
    %1092 = arith.mulf %1081, %1091 : vector<17x17xf32>
    %1093 = arith.addf %1060, %1092 : vector<17x17xf32>
    %c32 = arith.constant 32 : index
    %1094 = memref.load %arg2[%c32] : memref<288xf32, #tpu.memory_space<smem>>
    %1095 = vector.broadcast %1094 : f32 to vector<17x17xf32>
    %1096 = arith.mulf %1081, %1095 : vector<17x17xf32>
    %1097 = arith.addf %1064, %1096 : vector<17x17xf32>
    %c41 = arith.constant 41 : index
    %1098 = memref.load %arg2[%c41] : memref<288xf32, #tpu.memory_space<smem>>
    %1099 = vector.broadcast %1098 : f32 to vector<17x17xf32>
    %1100 = arith.mulf %1081, %1099 : vector<17x17xf32>
    %1101 = arith.addf %1068, %1100 : vector<17x17xf32>
    %c50 = arith.constant 50 : index
    %1102 = memref.load %arg2[%c50] : memref<288xf32, #tpu.memory_space<smem>>
    %1103 = vector.broadcast %1102 : f32 to vector<17x17xf32>
    %1104 = arith.mulf %1081, %1103 : vector<17x17xf32>
    %1105 = arith.addf %1072, %1104 : vector<17x17xf32>
    %c59 = arith.constant 59 : index
    %1106 = memref.load %arg2[%c59] : memref<288xf32, #tpu.memory_space<smem>>
    %1107 = vector.broadcast %1106 : f32 to vector<17x17xf32>
    %1108 = arith.mulf %1081, %1107 : vector<17x17xf32>
    %1109 = arith.addf %1076, %1108 : vector<17x17xf32>
    %c68_171 = arith.constant 68 : index
    %1110 = memref.load %arg2[%c68_171] : memref<288xf32, #tpu.memory_space<smem>>
    %1111 = vector.broadcast %1110 : f32 to vector<17x17xf32>
    %1112 = arith.mulf %1081, %1111 : vector<17x17xf32>
    %1113 = arith.addf %1080, %1112 : vector<17x17xf32>
    %c1_172 = arith.constant 1 : index
    %c0_173 = arith.constant 0 : index
    %c0_174 = arith.constant 0 : index
    %1114 = vector.load %arg6[%c1_172, %c0_173, %c0_174] : memref<4x18x18xf32, #tpu.memory_space<vmem>>, vector<1x18x18xf32>
    %1115 = vector.shape_cast %1114 : vector<1x18x18xf32> to vector<18x18xf32>
    %1116 = vector.extract_strided_slice %1115 {offsets = [1, 1], sizes = [17, 17], strides = [1, 1]} : vector<18x18xf32> to vector<17x17xf32>
    %c75 = arith.constant 75 : index
    %1117 = memref.load %arg2[%c75] : memref<288xf32, #tpu.memory_space<smem>>
    %1118 = vector.broadcast %1117 : f32 to vector<17x17xf32>
    %1119 = arith.mulf %1116, %1118 : vector<17x17xf32>
    %1120 = arith.addf %1085, %1119 : vector<17x17xf32>
    %c84 = arith.constant 84 : index
    %1121 = memref.load %arg2[%c84] : memref<288xf32, #tpu.memory_space<smem>>
    %1122 = vector.broadcast %1121 : f32 to vector<17x17xf32>
    %1123 = arith.mulf %1116, %1122 : vector<17x17xf32>
    %1124 = arith.addf %1089, %1123 : vector<17x17xf32>
    %c93 = arith.constant 93 : index
    %1125 = memref.load %arg2[%c93] : memref<288xf32, #tpu.memory_space<smem>>
    %1126 = vector.broadcast %1125 : f32 to vector<17x17xf32>
    %1127 = arith.mulf %1116, %1126 : vector<17x17xf32>
    %1128 = arith.addf %1093, %1127 : vector<17x17xf32>
    %c102_175 = arith.constant 102 : index
    %1129 = memref.load %arg2[%c102_175] : memref<288xf32, #tpu.memory_space<smem>>
    %1130 = vector.broadcast %1129 : f32 to vector<17x17xf32>
    %1131 = arith.mulf %1116, %1130 : vector<17x17xf32>
    %1132 = arith.addf %1097, %1131 : vector<17x17xf32>
    %c111 = arith.constant 111 : index
    %1133 = memref.load %arg2[%c111] : memref<288xf32, #tpu.memory_space<smem>>
    %1134 = vector.broadcast %1133 : f32 to vector<17x17xf32>
    %1135 = arith.mulf %1116, %1134 : vector<17x17xf32>
    %1136 = arith.addf %1101, %1135 : vector<17x17xf32>
    %c120 = arith.constant 120 : index
    %1137 = memref.load %arg2[%c120] : memref<288xf32, #tpu.memory_space<smem>>
    %1138 = vector.broadcast %1137 : f32 to vector<17x17xf32>
    %1139 = arith.mulf %1116, %1138 : vector<17x17xf32>
    %1140 = arith.addf %1105, %1139 : vector<17x17xf32>
    %c129 = arith.constant 129 : index
    %1141 = memref.load %arg2[%c129] : memref<288xf32, #tpu.memory_space<smem>>
    %1142 = vector.broadcast %1141 : f32 to vector<17x17xf32>
    %1143 = arith.mulf %1116, %1142 : vector<17x17xf32>
    %1144 = arith.addf %1109, %1143 : vector<17x17xf32>
    %c138 = arith.constant 138 : index
    %1145 = memref.load %arg2[%c138] : memref<288xf32, #tpu.memory_space<smem>>
    %1146 = vector.broadcast %1145 : f32 to vector<17x17xf32>
    %1147 = arith.mulf %1116, %1146 : vector<17x17xf32>
    %1148 = arith.addf %1113, %1147 : vector<17x17xf32>
    %1149 = vector.extract_strided_slice %1115 {offsets = [1, 0], sizes = [17, 17], strides = [1, 1]} : vector<18x18xf32> to vector<17x17xf32>
    %c77 = arith.constant 77 : index
    %1150 = memref.load %arg2[%c77] : memref<288xf32, #tpu.memory_space<smem>>
    %1151 = vector.broadcast %1150 : f32 to vector<17x17xf32>
    %1152 = arith.mulf %1149, %1151 : vector<17x17xf32>
    %1153 = arith.addf %1120, %1152 : vector<17x17xf32>
    %c86 = arith.constant 86 : index
    %1154 = memref.load %arg2[%c86] : memref<288xf32, #tpu.memory_space<smem>>
    %1155 = vector.broadcast %1154 : f32 to vector<17x17xf32>
    %1156 = arith.mulf %1149, %1155 : vector<17x17xf32>
    %1157 = arith.addf %1124, %1156 : vector<17x17xf32>
    %c95 = arith.constant 95 : index
    %1158 = memref.load %arg2[%c95] : memref<288xf32, #tpu.memory_space<smem>>
    %1159 = vector.broadcast %1158 : f32 to vector<17x17xf32>
    %1160 = arith.mulf %1149, %1159 : vector<17x17xf32>
    %1161 = arith.addf %1128, %1160 : vector<17x17xf32>
    %c104 = arith.constant 104 : index
    %1162 = memref.load %arg2[%c104] : memref<288xf32, #tpu.memory_space<smem>>
    %1163 = vector.broadcast %1162 : f32 to vector<17x17xf32>
    %1164 = arith.mulf %1149, %1163 : vector<17x17xf32>
    %1165 = arith.addf %1132, %1164 : vector<17x17xf32>
    %c113 = arith.constant 113 : index
    %1166 = memref.load %arg2[%c113] : memref<288xf32, #tpu.memory_space<smem>>
    %1167 = vector.broadcast %1166 : f32 to vector<17x17xf32>
    %1168 = arith.mulf %1149, %1167 : vector<17x17xf32>
    %1169 = arith.addf %1136, %1168 : vector<17x17xf32>
    %c122 = arith.constant 122 : index
    %1170 = memref.load %arg2[%c122] : memref<288xf32, #tpu.memory_space<smem>>
    %1171 = vector.broadcast %1170 : f32 to vector<17x17xf32>
    %1172 = arith.mulf %1149, %1171 : vector<17x17xf32>
    %1173 = arith.addf %1140, %1172 : vector<17x17xf32>
    %c131 = arith.constant 131 : index
    %1174 = memref.load %arg2[%c131] : memref<288xf32, #tpu.memory_space<smem>>
    %1175 = vector.broadcast %1174 : f32 to vector<17x17xf32>
    %1176 = arith.mulf %1149, %1175 : vector<17x17xf32>
    %1177 = arith.addf %1144, %1176 : vector<17x17xf32>
    %c140 = arith.constant 140 : index
    %1178 = memref.load %arg2[%c140] : memref<288xf32, #tpu.memory_space<smem>>
    %1179 = vector.broadcast %1178 : f32 to vector<17x17xf32>
    %1180 = arith.mulf %1149, %1179 : vector<17x17xf32>
    %1181 = arith.addf %1148, %1180 : vector<17x17xf32>
    %c2_176 = arith.constant 2 : index
    %c0_177 = arith.constant 0 : index
    %c0_178 = arith.constant 0 : index
    %1182 = vector.load %arg6[%c2_176, %c0_177, %c0_178] : memref<4x18x18xf32, #tpu.memory_space<vmem>>, vector<1x18x18xf32>
    %1183 = vector.shape_cast %1182 : vector<1x18x18xf32> to vector<18x18xf32>
    %1184 = vector.extract_strided_slice %1183 {offsets = [1, 1], sizes = [17, 17], strides = [1, 1]} : vector<18x18xf32> to vector<17x17xf32>
    %c147 = arith.constant 147 : index
    %1185 = memref.load %arg2[%c147] : memref<288xf32, #tpu.memory_space<smem>>
    %1186 = vector.broadcast %1185 : f32 to vector<17x17xf32>
    %1187 = arith.mulf %1184, %1186 : vector<17x17xf32>
    %1188 = arith.addf %1153, %1187 : vector<17x17xf32>
    %c156 = arith.constant 156 : index
    %1189 = memref.load %arg2[%c156] : memref<288xf32, #tpu.memory_space<smem>>
    %1190 = vector.broadcast %1189 : f32 to vector<17x17xf32>
    %1191 = arith.mulf %1184, %1190 : vector<17x17xf32>
    %1192 = arith.addf %1157, %1191 : vector<17x17xf32>
    %c165 = arith.constant 165 : index
    %1193 = memref.load %arg2[%c165] : memref<288xf32, #tpu.memory_space<smem>>
    %1194 = vector.broadcast %1193 : f32 to vector<17x17xf32>
    %1195 = arith.mulf %1184, %1194 : vector<17x17xf32>
    %1196 = arith.addf %1161, %1195 : vector<17x17xf32>
    %c174 = arith.constant 174 : index
    %1197 = memref.load %arg2[%c174] : memref<288xf32, #tpu.memory_space<smem>>
    %1198 = vector.broadcast %1197 : f32 to vector<17x17xf32>
    %1199 = arith.mulf %1184, %1198 : vector<17x17xf32>
    %1200 = arith.addf %1165, %1199 : vector<17x17xf32>
    %c183 = arith.constant 183 : index
    %1201 = memref.load %arg2[%c183] : memref<288xf32, #tpu.memory_space<smem>>
    %1202 = vector.broadcast %1201 : f32 to vector<17x17xf32>
    %1203 = arith.mulf %1184, %1202 : vector<17x17xf32>
    %1204 = arith.addf %1169, %1203 : vector<17x17xf32>
    %c192 = arith.constant 192 : index
    %1205 = memref.load %arg2[%c192] : memref<288xf32, #tpu.memory_space<smem>>
    %1206 = vector.broadcast %1205 : f32 to vector<17x17xf32>
    %1207 = arith.mulf %1184, %1206 : vector<17x17xf32>
    %1208 = arith.addf %1173, %1207 : vector<17x17xf32>
    %c201 = arith.constant 201 : index
    %1209 = memref.load %arg2[%c201] : memref<288xf32, #tpu.memory_space<smem>>
    %1210 = vector.broadcast %1209 : f32 to vector<17x17xf32>
    %1211 = arith.mulf %1184, %1210 : vector<17x17xf32>
    %1212 = arith.addf %1177, %1211 : vector<17x17xf32>
    %c210 = arith.constant 210 : index
    %1213 = memref.load %arg2[%c210] : memref<288xf32, #tpu.memory_space<smem>>
    %1214 = vector.broadcast %1213 : f32 to vector<17x17xf32>
    %1215 = arith.mulf %1184, %1214 : vector<17x17xf32>
    %1216 = arith.addf %1181, %1215 : vector<17x17xf32>
    %1217 = vector.extract_strided_slice %1183 {offsets = [1, 0], sizes = [17, 17], strides = [1, 1]} : vector<18x18xf32> to vector<17x17xf32>
    %c149 = arith.constant 149 : index
    %1218 = memref.load %arg2[%c149] : memref<288xf32, #tpu.memory_space<smem>>
    %1219 = vector.broadcast %1218 : f32 to vector<17x17xf32>
    %1220 = arith.mulf %1217, %1219 : vector<17x17xf32>
    %1221 = arith.addf %1188, %1220 : vector<17x17xf32>
    %c158 = arith.constant 158 : index
    %1222 = memref.load %arg2[%c158] : memref<288xf32, #tpu.memory_space<smem>>
    %1223 = vector.broadcast %1222 : f32 to vector<17x17xf32>
    %1224 = arith.mulf %1217, %1223 : vector<17x17xf32>
    %1225 = arith.addf %1192, %1224 : vector<17x17xf32>
    %c167 = arith.constant 167 : index
    %1226 = memref.load %arg2[%c167] : memref<288xf32, #tpu.memory_space<smem>>
    %1227 = vector.broadcast %1226 : f32 to vector<17x17xf32>
    %1228 = arith.mulf %1217, %1227 : vector<17x17xf32>
    %1229 = arith.addf %1196, %1228 : vector<17x17xf32>
    %c176 = arith.constant 176 : index
    %1230 = memref.load %arg2[%c176] : memref<288xf32, #tpu.memory_space<smem>>
    %1231 = vector.broadcast %1230 : f32 to vector<17x17xf32>
    %1232 = arith.mulf %1217, %1231 : vector<17x17xf32>
    %1233 = arith.addf %1200, %1232 : vector<17x17xf32>
    %c185 = arith.constant 185 : index
    %1234 = memref.load %arg2[%c185] : memref<288xf32, #tpu.memory_space<smem>>
    %1235 = vector.broadcast %1234 : f32 to vector<17x17xf32>
    %1236 = arith.mulf %1217, %1235 : vector<17x17xf32>
    %1237 = arith.addf %1204, %1236 : vector<17x17xf32>
    %c194 = arith.constant 194 : index
    %1238 = memref.load %arg2[%c194] : memref<288xf32, #tpu.memory_space<smem>>
    %1239 = vector.broadcast %1238 : f32 to vector<17x17xf32>
    %1240 = arith.mulf %1217, %1239 : vector<17x17xf32>
    %1241 = arith.addf %1208, %1240 : vector<17x17xf32>
    %c203 = arith.constant 203 : index
    %1242 = memref.load %arg2[%c203] : memref<288xf32, #tpu.memory_space<smem>>
    %1243 = vector.broadcast %1242 : f32 to vector<17x17xf32>
    %1244 = arith.mulf %1217, %1243 : vector<17x17xf32>
    %1245 = arith.addf %1212, %1244 : vector<17x17xf32>
    %c212 = arith.constant 212 : index
    %1246 = memref.load %arg2[%c212] : memref<288xf32, #tpu.memory_space<smem>>
    %1247 = vector.broadcast %1246 : f32 to vector<17x17xf32>
    %1248 = arith.mulf %1217, %1247 : vector<17x17xf32>
    %1249 = arith.addf %1216, %1248 : vector<17x17xf32>
    %c3_179 = arith.constant 3 : index
    %c0_180 = arith.constant 0 : index
    %c0_181 = arith.constant 0 : index
    %1250 = vector.load %arg6[%c3_179, %c0_180, %c0_181] : memref<4x18x18xf32, #tpu.memory_space<vmem>>, vector<1x18x18xf32>
    %1251 = vector.shape_cast %1250 : vector<1x18x18xf32> to vector<18x18xf32>
    %1252 = vector.extract_strided_slice %1251 {offsets = [1, 1], sizes = [17, 17], strides = [1, 1]} : vector<18x18xf32> to vector<17x17xf32>
    %c219 = arith.constant 219 : index
    %1253 = memref.load %arg2[%c219] : memref<288xf32, #tpu.memory_space<smem>>
    %1254 = vector.broadcast %1253 : f32 to vector<17x17xf32>
    %1255 = arith.mulf %1252, %1254 : vector<17x17xf32>
    %1256 = arith.addf %1221, %1255 : vector<17x17xf32>
    %c228 = arith.constant 228 : index
    %1257 = memref.load %arg2[%c228] : memref<288xf32, #tpu.memory_space<smem>>
    %1258 = vector.broadcast %1257 : f32 to vector<17x17xf32>
    %1259 = arith.mulf %1252, %1258 : vector<17x17xf32>
    %1260 = arith.addf %1225, %1259 : vector<17x17xf32>
    %c237 = arith.constant 237 : index
    %1261 = memref.load %arg2[%c237] : memref<288xf32, #tpu.memory_space<smem>>
    %1262 = vector.broadcast %1261 : f32 to vector<17x17xf32>
    %1263 = arith.mulf %1252, %1262 : vector<17x17xf32>
    %1264 = arith.addf %1229, %1263 : vector<17x17xf32>
    %c246 = arith.constant 246 : index
    %1265 = memref.load %arg2[%c246] : memref<288xf32, #tpu.memory_space<smem>>
    %1266 = vector.broadcast %1265 : f32 to vector<17x17xf32>
    %1267 = arith.mulf %1252, %1266 : vector<17x17xf32>
    %1268 = arith.addf %1233, %1267 : vector<17x17xf32>
    %c255_182 = arith.constant 255 : index
    %1269 = memref.load %arg2[%c255_182] : memref<288xf32, #tpu.memory_space<smem>>
    %1270 = vector.broadcast %1269 : f32 to vector<17x17xf32>
    %1271 = arith.mulf %1252, %1270 : vector<17x17xf32>
    %1272 = arith.addf %1237, %1271 : vector<17x17xf32>
    %c264 = arith.constant 264 : index
    %1273 = memref.load %arg2[%c264] : memref<288xf32, #tpu.memory_space<smem>>
    %1274 = vector.broadcast %1273 : f32 to vector<17x17xf32>
    %1275 = arith.mulf %1252, %1274 : vector<17x17xf32>
    %1276 = arith.addf %1241, %1275 : vector<17x17xf32>
    %c273 = arith.constant 273 : index
    %1277 = memref.load %arg2[%c273] : memref<288xf32, #tpu.memory_space<smem>>
    %1278 = vector.broadcast %1277 : f32 to vector<17x17xf32>
    %1279 = arith.mulf %1252, %1278 : vector<17x17xf32>
    %1280 = arith.addf %1245, %1279 : vector<17x17xf32>
    %c282 = arith.constant 282 : index
    %1281 = memref.load %arg2[%c282] : memref<288xf32, #tpu.memory_space<smem>>
    %1282 = vector.broadcast %1281 : f32 to vector<17x17xf32>
    %1283 = arith.mulf %1252, %1282 : vector<17x17xf32>
    %1284 = arith.addf %1249, %1283 : vector<17x17xf32>
    %1285 = vector.extract_strided_slice %1251 {offsets = [1, 0], sizes = [17, 17], strides = [1, 1]} : vector<18x18xf32> to vector<17x17xf32>
    %c221_183 = arith.constant 221 : index
    %1286 = memref.load %arg2[%c221_183] : memref<288xf32, #tpu.memory_space<smem>>
    %1287 = vector.broadcast %1286 : f32 to vector<17x17xf32>
    %1288 = arith.mulf %1285, %1287 : vector<17x17xf32>
    %1289 = arith.addf %1256, %1288 : vector<17x17xf32>
    %c230 = arith.constant 230 : index
    %1290 = memref.load %arg2[%c230] : memref<288xf32, #tpu.memory_space<smem>>
    %1291 = vector.broadcast %1290 : f32 to vector<17x17xf32>
    %1292 = arith.mulf %1285, %1291 : vector<17x17xf32>
    %1293 = arith.addf %1260, %1292 : vector<17x17xf32>
    %c239 = arith.constant 239 : index
    %1294 = memref.load %arg2[%c239] : memref<288xf32, #tpu.memory_space<smem>>
    %1295 = vector.broadcast %1294 : f32 to vector<17x17xf32>
    %1296 = arith.mulf %1285, %1295 : vector<17x17xf32>
    %1297 = arith.addf %1264, %1296 : vector<17x17xf32>
    %c248 = arith.constant 248 : index
    %1298 = memref.load %arg2[%c248] : memref<288xf32, #tpu.memory_space<smem>>
    %1299 = vector.broadcast %1298 : f32 to vector<17x17xf32>
    %1300 = arith.mulf %1285, %1299 : vector<17x17xf32>
    %1301 = arith.addf %1268, %1300 : vector<17x17xf32>
    %c257 = arith.constant 257 : index
    %1302 = memref.load %arg2[%c257] : memref<288xf32, #tpu.memory_space<smem>>
    %1303 = vector.broadcast %1302 : f32 to vector<17x17xf32>
    %1304 = arith.mulf %1285, %1303 : vector<17x17xf32>
    %1305 = arith.addf %1272, %1304 : vector<17x17xf32>
    %c266 = arith.constant 266 : index
    %1306 = memref.load %arg2[%c266] : memref<288xf32, #tpu.memory_space<smem>>
    %1307 = vector.broadcast %1306 : f32 to vector<17x17xf32>
    %1308 = arith.mulf %1285, %1307 : vector<17x17xf32>
    %1309 = arith.addf %1276, %1308 : vector<17x17xf32>
    %c275 = arith.constant 275 : index
    %1310 = memref.load %arg2[%c275] : memref<288xf32, #tpu.memory_space<smem>>
    %1311 = vector.broadcast %1310 : f32 to vector<17x17xf32>
    %1312 = arith.mulf %1285, %1311 : vector<17x17xf32>
    %1313 = arith.addf %1280, %1312 : vector<17x17xf32>
    %c284 = arith.constant 284 : index
    %1314 = memref.load %arg2[%c284] : memref<288xf32, #tpu.memory_space<smem>>
    %1315 = vector.broadcast %1314 : f32 to vector<17x17xf32>
    %1316 = arith.mulf %1285, %1315 : vector<17x17xf32>
    %1317 = arith.addf %1284, %1316 : vector<17x17xf32>
    %c0_184 = arith.constant 0 : index
    %1318 = memref.load %arg3[%c0_184] : memref<8xf32, #tpu.memory_space<smem>>
    %1319 = vector.broadcast %1318 : f32 to vector<17x17xf32>
    %1320 = arith.addf %1289, %1319 : vector<17x17xf32>
    %cst_185 = arith.constant 0.000000e+00 : f32
    %1321 = vector.broadcast %cst_185 : f32 to vector<17x17xf32>
    %1322 = arith.cmpf ogt, %1320, %1321 : vector<17x17xf32>
    %c0_186 = arith.constant 0 : index
    %1323 = memref.load %arg4[%c0_186] : memref<8xf32, #tpu.memory_space<smem>>
    %1324 = vector.broadcast %1323 : f32 to vector<17x17xf32>
    %1325 = arith.mulf %1324, %1320 : vector<17x17xf32>
    %1326 = arith.select %1322, %1320, %1325 : vector<17x17xi1>, vector<17x17xf32>
    %c0_187 = arith.constant 0 : index
    %c0_188 = arith.constant 0 : index
    %c272_189 = arith.constant 272 : index
    %1327 = vector.load %arg5[%c0_187, %c0_188, %c272_189] : memref<1x17x544xf32, #tpu.memory_space<vmem>>, vector<1x17x17xf32>
    %1328 = vector.shape_cast %1327 : vector<1x17x17xf32> to vector<17x17xf32>
    %1329 = vector.shape_cast %1326 : vector<17x17xf32> to vector<1x17x17xf32>
    tpu.vector_store %arg5[%c0_187, %c0_188, %c272_189], %1329 {strides = array<i32>} : memref<1x17x544xf32, #tpu.memory_space<vmem>>, vector<1x17x17xf32>,
    %c1_190 = arith.constant 1 : index
    %1330 = memref.load %arg3[%c1_190] : memref<8xf32, #tpu.memory_space<smem>>
    %1331 = vector.broadcast %1330 : f32 to vector<17x17xf32>
    %1332 = arith.addf %1293, %1331 : vector<17x17xf32>
    %cst_191 = arith.constant 0.000000e+00 : f32
    %1333 = vector.broadcast %cst_191 : f32 to vector<17x17xf32>
    %1334 = arith.cmpf ogt, %1332, %1333 : vector<17x17xf32>
    %c1_192 = arith.constant 1 : index
    %1335 = memref.load %arg4[%c1_192] : memref<8xf32, #tpu.memory_space<smem>>
    %1336 = vector.broadcast %1335 : f32 to vector<17x17xf32>
    %1337 = arith.mulf %1336, %1332 : vector<17x17xf32>
    %1338 = arith.select %1334, %1332, %1337 : vector<17x17xi1>, vector<17x17xf32>
    %c0_193 = arith.constant 0 : index
    %c0_194 = arith.constant 0 : index
    %c289 = arith.constant 289 : index
    %1339 = vector.load %arg5[%c0_193, %c0_194, %c289] : memref<1x17x544xf32, #tpu.memory_space<vmem>>, vector<1x17x17xf32>
    %1340 = vector.shape_cast %1339 : vector<1x17x17xf32> to vector<17x17xf32>
    %1341 = vector.shape_cast %1338 : vector<17x17xf32> to vector<1x17x17xf32>
    tpu.vector_store %arg5[%c0_193, %c0_194, %c289], %1341 {strides = array<i32>} : memref<1x17x544xf32, #tpu.memory_space<vmem>>, vector<1x17x17xf32>,
    %c2_195 = arith.constant 2 : index
    %1342 = memref.load %arg3[%c2_195] : memref<8xf32, #tpu.memory_space<smem>>
    %1343 = vector.broadcast %1342 : f32 to vector<17x17xf32>
    %1344 = arith.addf %1297, %1343 : vector<17x17xf32>
    %cst_196 = arith.constant 0.000000e+00 : f32
    %1345 = vector.broadcast %cst_196 : f32 to vector<17x17xf32>
    %1346 = arith.cmpf ogt, %1344, %1345 : vector<17x17xf32>
    %c2_197 = arith.constant 2 : index
    %1347 = memref.load %arg4[%c2_197] : memref<8xf32, #tpu.memory_space<smem>>
    %1348 = vector.broadcast %1347 : f32 to vector<17x17xf32>
    %1349 = arith.mulf %1348, %1344 : vector<17x17xf32>
    %1350 = arith.select %1346, %1344, %1349 : vector<17x17xi1>, vector<17x17xf32>
    %c0_198 = arith.constant 0 : index
    %c0_199 = arith.constant 0 : index
    %c306 = arith.constant 306 : index
    %1351 = vector.load %arg5[%c0_198, %c0_199, %c306] : memref<1x17x544xf32, #tpu.memory_space<vmem>>, vector<1x17x17xf32>
    %1352 = vector.shape_cast %1351 : vector<1x17x17xf32> to vector<17x17xf32>
    %1353 = vector.shape_cast %1350 : vector<17x17xf32> to vector<1x17x17xf32>
    tpu.vector_store %arg5[%c0_198, %c0_199, %c306], %1353 {strides = array<i32>} : memref<1x17x544xf32, #tpu.memory_space<vmem>>, vector<1x17x17xf32>,
    %c3_200 = arith.constant 3 : index
    %1354 = memref.load %arg3[%c3_200] : memref<8xf32, #tpu.memory_space<smem>>
    %1355 = vector.broadcast %1354 : f32 to vector<17x17xf32>
    %1356 = arith.addf %1301, %1355 : vector<17x17xf32>
    %cst_201 = arith.constant 0.000000e+00 : f32
    %1357 = vector.broadcast %cst_201 : f32 to vector<17x17xf32>
    %1358 = arith.cmpf ogt, %1356, %1357 : vector<17x17xf32>
    %c3_202 = arith.constant 3 : index
    %1359 = memref.load %arg4[%c3_202] : memref<8xf32, #tpu.memory_space<smem>>
    %1360 = vector.broadcast %1359 : f32 to vector<17x17xf32>
    %1361 = arith.mulf %1360, %1356 : vector<17x17xf32>
    %1362 = arith.select %1358, %1356, %1361 : vector<17x17xi1>, vector<17x17xf32>
    %c0_203 = arith.constant 0 : index
    %c0_204 = arith.constant 0 : index
    %c323 = arith.constant 323 : index
    %1363 = vector.load %arg5[%c0_203, %c0_204, %c323] : memref<1x17x544xf32, #tpu.memory_space<vmem>>, vector<1x17x17xf32>
    %1364 = vector.shape_cast %1363 : vector<1x17x17xf32> to vector<17x17xf32>
    %1365 = vector.shape_cast %1362 : vector<17x17xf32> to vector<1x17x17xf32>
    tpu.vector_store %arg5[%c0_203, %c0_204, %c323], %1365 {strides = array<i32>} : memref<1x17x544xf32, #tpu.memory_space<vmem>>, vector<1x17x17xf32>,
    %c4_205 = arith.constant 4 : index
    %1366 = memref.load %arg3[%c4_205] : memref<8xf32, #tpu.memory_space<smem>>
    %1367 = vector.broadcast %1366 : f32 to vector<17x17xf32>
    %1368 = arith.addf %1305, %1367 : vector<17x17xf32>
    %cst_206 = arith.constant 0.000000e+00 : f32
    %1369 = vector.broadcast %cst_206 : f32 to vector<17x17xf32>
    %1370 = arith.cmpf ogt, %1368, %1369 : vector<17x17xf32>
    %c4_207 = arith.constant 4 : index
    %1371 = memref.load %arg4[%c4_207] : memref<8xf32, #tpu.memory_space<smem>>
    %1372 = vector.broadcast %1371 : f32 to vector<17x17xf32>
    %1373 = arith.mulf %1372, %1368 : vector<17x17xf32>
    %1374 = arith.select %1370, %1368, %1373 : vector<17x17xi1>, vector<17x17xf32>
    %c0_208 = arith.constant 0 : index
    %c0_209 = arith.constant 0 : index
    %c340 = arith.constant 340 : index
    %1375 = vector.load %arg5[%c0_208, %c0_209, %c340] : memref<1x17x544xf32, #tpu.memory_space<vmem>>, vector<1x17x17xf32>
    %1376 = vector.shape_cast %1375 : vector<1x17x17xf32> to vector<17x17xf32>
    %1377 = vector.shape_cast %1374 : vector<17x17xf32> to vector<1x17x17xf32>
    tpu.vector_store %arg5[%c0_208, %c0_209, %c340], %1377 {strides = array<i32>} : memref<1x17x544xf32, #tpu.memory_space<vmem>>, vector<1x17x17xf32>,
    %c5_210 = arith.constant 5 : index
    %1378 = memref.load %arg3[%c5_210] : memref<8xf32, #tpu.memory_space<smem>>
    %1379 = vector.broadcast %1378 : f32 to vector<17x17xf32>
    %1380 = arith.addf %1309, %1379 : vector<17x17xf32>
    %cst_211 = arith.constant 0.000000e+00 : f32
    %1381 = vector.broadcast %cst_211 : f32 to vector<17x17xf32>
    %1382 = arith.cmpf ogt, %1380, %1381 : vector<17x17xf32>
    %c5_212 = arith.constant 5 : index
    %1383 = memref.load %arg4[%c5_212] : memref<8xf32, #tpu.memory_space<smem>>
    %1384 = vector.broadcast %1383 : f32 to vector<17x17xf32>
    %1385 = arith.mulf %1384, %1380 : vector<17x17xf32>
    %1386 = arith.select %1382, %1380, %1385 : vector<17x17xi1>, vector<17x17xf32>
    %c0_213 = arith.constant 0 : index
    %c0_214 = arith.constant 0 : index
    %c357 = arith.constant 357 : index
    %1387 = vector.load %arg5[%c0_213, %c0_214, %c357] : memref<1x17x544xf32, #tpu.memory_space<vmem>>, vector<1x17x17xf32>
    %1388 = vector.shape_cast %1387 : vector<1x17x17xf32> to vector<17x17xf32>
    %1389 = vector.shape_cast %1386 : vector<17x17xf32> to vector<1x17x17xf32>
    tpu.vector_store %arg5[%c0_213, %c0_214, %c357], %1389 {strides = array<i32>} : memref<1x17x544xf32, #tpu.memory_space<vmem>>, vector<1x17x17xf32>,
    %c6_215 = arith.constant 6 : index
    %1390 = memref.load %arg3[%c6_215] : memref<8xf32, #tpu.memory_space<smem>>
    %1391 = vector.broadcast %1390 : f32 to vector<17x17xf32>
    %1392 = arith.addf %1313, %1391 : vector<17x17xf32>
    %cst_216 = arith.constant 0.000000e+00 : f32
    %1393 = vector.broadcast %cst_216 : f32 to vector<17x17xf32>
    %1394 = arith.cmpf ogt, %1392, %1393 : vector<17x17xf32>
    %c6_217 = arith.constant 6 : index
    %1395 = memref.load %arg4[%c6_217] : memref<8xf32, #tpu.memory_space<smem>>
    %1396 = vector.broadcast %1395 : f32 to vector<17x17xf32>
    %1397 = arith.mulf %1396, %1392 : vector<17x17xf32>
    %1398 = arith.select %1394, %1392, %1397 : vector<17x17xi1>, vector<17x17xf32>
    %c0_218 = arith.constant 0 : index
    %c0_219 = arith.constant 0 : index
    %c374 = arith.constant 374 : index
    %1399 = vector.load %arg5[%c0_218, %c0_219, %c374] : memref<1x17x544xf32, #tpu.memory_space<vmem>>, vector<1x17x17xf32>
    %1400 = vector.shape_cast %1399 : vector<1x17x17xf32> to vector<17x17xf32>
    %1401 = vector.shape_cast %1398 : vector<17x17xf32> to vector<1x17x17xf32>
    tpu.vector_store %arg5[%c0_218, %c0_219, %c374], %1401 {strides = array<i32>} : memref<1x17x544xf32, #tpu.memory_space<vmem>>, vector<1x17x17xf32>,
    %c7_220 = arith.constant 7 : index
    %1402 = memref.load %arg3[%c7_220] : memref<8xf32, #tpu.memory_space<smem>>
    %1403 = vector.broadcast %1402 : f32 to vector<17x17xf32>
    %1404 = arith.addf %1317, %1403 : vector<17x17xf32>
    %cst_221 = arith.constant 0.000000e+00 : f32
    %1405 = vector.broadcast %cst_221 : f32 to vector<17x17xf32>
    %1406 = arith.cmpf ogt, %1404, %1405 : vector<17x17xf32>
    %c7_222 = arith.constant 7 : index
    %1407 = memref.load %arg4[%c7_222] : memref<8xf32, #tpu.memory_space<smem>>
    %1408 = vector.broadcast %1407 : f32 to vector<17x17xf32>
    %1409 = arith.mulf %1408, %1404 : vector<17x17xf32>
    %1410 = arith.select %1406, %1404, %1409 : vector<17x17xi1>, vector<17x17xf32>
    %c0_223 = arith.constant 0 : index
    %c0_224 = arith.constant 0 : index
    %c391 = arith.constant 391 : index
    %1411 = vector.load %arg5[%c0_223, %c0_224, %c391] : memref<1x17x544xf32, #tpu.memory_space<vmem>>, vector<1x17x17xf32>
    %1412 = vector.shape_cast %1411 : vector<1x17x17xf32> to vector<17x17xf32>
    %1413 = vector.shape_cast %1410 : vector<17x17xf32> to vector<1x17x17xf32>
    tpu.vector_store %arg5[%c0_223, %c0_224, %c391], %1413 {strides = array<i32>} : memref<1x17x544xf32, #tpu.memory_space<vmem>>, vector<1x17x17xf32>,
    %cst_225 = arith.constant 0.000000e+00 : f32
    %1414 = vector.broadcast %cst_225 : f32 to vector<17x17xf32>
    %cst_226 = arith.constant 0.000000e+00 : f32
    %1415 = vector.broadcast %cst_226 : f32 to vector<17x17xf32>
    %cst_227 = arith.constant 0.000000e+00 : f32
    %1416 = vector.broadcast %cst_227 : f32 to vector<17x17xf32>
    %cst_228 = arith.constant 0.000000e+00 : f32
    %1417 = vector.broadcast %cst_228 : f32 to vector<17x17xf32>
    %cst_229 = arith.constant 0.000000e+00 : f32
    %1418 = vector.broadcast %cst_229 : f32 to vector<17x17xf32>
    %cst_230 = arith.constant 0.000000e+00 : f32
    %1419 = vector.broadcast %cst_230 : f32 to vector<17x17xf32>
    %cst_231 = arith.constant 0.000000e+00 : f32
    %1420 = vector.broadcast %cst_231 : f32 to vector<17x17xf32>
    %cst_232 = arith.constant 0.000000e+00 : f32
    %1421 = vector.broadcast %cst_232 : f32 to vector<17x17xf32>
    %c0_233 = arith.constant 0 : index
    %c0_234 = arith.constant 0 : index
    %c0_235 = arith.constant 0 : index
    %1422 = vector.load %arg6[%c0_233, %c0_234, %c0_235] : memref<4x18x18xf32, #tpu.memory_space<vmem>>, vector<1x18x18xf32>
    %1423 = vector.shape_cast %1422 : vector<1x18x18xf32> to vector<18x18xf32>
    %1424 = vector.extract_strided_slice %1423 {offsets = [1, 1], sizes = [17, 17], strides = [1, 1]} : vector<18x18xf32> to vector<17x17xf32>
    %c4_236 = arith.constant 4 : index
    %1425 = memref.load %arg2[%c4_236] : memref<288xf32, #tpu.memory_space<smem>>
    %1426 = vector.broadcast %1425 : f32 to vector<17x17xf32>
    %1427 = arith.mulf %1424, %1426 : vector<17x17xf32>
    %1428 = arith.addf %1414, %1427 : vector<17x17xf32>
    %c13 = arith.constant 13 : index
    %1429 = memref.load %arg2[%c13] : memref<288xf32, #tpu.memory_space<smem>>
    %1430 = vector.broadcast %1429 : f32 to vector<17x17xf32>
    %1431 = arith.mulf %1424, %1430 : vector<17x17xf32>
    %1432 = arith.addf %1415, %1431 : vector<17x17xf32>
    %c22 = arith.constant 22 : index
    %1433 = memref.load %arg2[%c22] : memref<288xf32, #tpu.memory_space<smem>>
    %1434 = vector.broadcast %1433 : f32 to vector<17x17xf32>
    %1435 = arith.mulf %1424, %1434 : vector<17x17xf32>
    %1436 = arith.addf %1416, %1435 : vector<17x17xf32>
    %c31 = arith.constant 31 : index
    %1437 = memref.load %arg2[%c31] : memref<288xf32, #tpu.memory_space<smem>>
    %1438 = vector.broadcast %1437 : f32 to vector<17x17xf32>
    %1439 = arith.mulf %1424, %1438 : vector<17x17xf32>
    %1440 = arith.addf %1417, %1439 : vector<17x17xf32>
    %c40 = arith.constant 40 : index
    %1441 = memref.load %arg2[%c40] : memref<288xf32, #tpu.memory_space<smem>>
    %1442 = vector.broadcast %1441 : f32 to vector<17x17xf32>
    %1443 = arith.mulf %1424, %1442 : vector<17x17xf32>
    %1444 = arith.addf %1418, %1443 : vector<17x17xf32>
    %c49 = arith.constant 49 : index
    %1445 = memref.load %arg2[%c49] : memref<288xf32, #tpu.memory_space<smem>>
    %1446 = vector.broadcast %1445 : f32 to vector<17x17xf32>
    %1447 = arith.mulf %1424, %1446 : vector<17x17xf32>
    %1448 = arith.addf %1419, %1447 : vector<17x17xf32>
    %c58 = arith.constant 58 : index
    %1449 = memref.load %arg2[%c58] : memref<288xf32, #tpu.memory_space<smem>>
    %1450 = vector.broadcast %1449 : f32 to vector<17x17xf32>
    %1451 = arith.mulf %1424, %1450 : vector<17x17xf32>
    %1452 = arith.addf %1420, %1451 : vector<17x17xf32>
    %c67 = arith.constant 67 : index
    %1453 = memref.load %arg2[%c67] : memref<288xf32, #tpu.memory_space<smem>>
    %1454 = vector.broadcast %1453 : f32 to vector<17x17xf32>
    %1455 = arith.mulf %1424, %1454 : vector<17x17xf32>
    %1456 = arith.addf %1421, %1455 : vector<17x17xf32>
    %c1_237 = arith.constant 1 : index
    %c0_238 = arith.constant 0 : index
    %c0_239 = arith.constant 0 : index
    %1457 = vector.load %arg6[%c1_237, %c0_238, %c0_239] : memref<4x18x18xf32, #tpu.memory_space<vmem>>, vector<1x18x18xf32>
    %1458 = vector.shape_cast %1457 : vector<1x18x18xf32> to vector<18x18xf32>
    %1459 = vector.extract_strided_slice %1458 {offsets = [1, 1], sizes = [17, 17], strides = [1, 1]} : vector<18x18xf32> to vector<17x17xf32>
    %c76 = arith.constant 76 : index
    %1460 = memref.load %arg2[%c76] : memref<288xf32, #tpu.memory_space<smem>>
    %1461 = vector.broadcast %1460 : f32 to vector<17x17xf32>
    %1462 = arith.mulf %1459, %1461 : vector<17x17xf32>
    %1463 = arith.addf %1428, %1462 : vector<17x17xf32>
    %c85_240 = arith.constant 85 : index
    %1464 = memref.load %arg2[%c85_240] : memref<288xf32, #tpu.memory_space<smem>>
    %1465 = vector.broadcast %1464 : f32 to vector<17x17xf32>
    %1466 = arith.mulf %1459, %1465 : vector<17x17xf32>
    %1467 = arith.addf %1432, %1466 : vector<17x17xf32>
    %c94 = arith.constant 94 : index
    %1468 = memref.load %arg2[%c94] : memref<288xf32, #tpu.memory_space<smem>>
    %1469 = vector.broadcast %1468 : f32 to vector<17x17xf32>
    %1470 = arith.mulf %1459, %1469 : vector<17x17xf32>
    %1471 = arith.addf %1436, %1470 : vector<17x17xf32>
    %c103 = arith.constant 103 : index
    %1472 = memref.load %arg2[%c103] : memref<288xf32, #tpu.memory_space<smem>>
    %1473 = vector.broadcast %1472 : f32 to vector<17x17xf32>
    %1474 = arith.mulf %1459, %1473 : vector<17x17xf32>
    %1475 = arith.addf %1440, %1474 : vector<17x17xf32>
    %c112 = arith.constant 112 : index
    %1476 = memref.load %arg2[%c112] : memref<288xf32, #tpu.memory_space<smem>>
    %1477 = vector.broadcast %1476 : f32 to vector<17x17xf32>
    %1478 = arith.mulf %1459, %1477 : vector<17x17xf32>
    %1479 = arith.addf %1444, %1478 : vector<17x17xf32>
    %c121 = arith.constant 121 : index
    %1480 = memref.load %arg2[%c121] : memref<288xf32, #tpu.memory_space<smem>>
    %1481 = vector.broadcast %1480 : f32 to vector<17x17xf32>
    %1482 = arith.mulf %1459, %1481 : vector<17x17xf32>
    %1483 = arith.addf %1448, %1482 : vector<17x17xf32>
    %c130 = arith.constant 130 : index
    %1484 = memref.load %arg2[%c130] : memref<288xf32, #tpu.memory_space<smem>>
    %1485 = vector.broadcast %1484 : f32 to vector<17x17xf32>
    %1486 = arith.mulf %1459, %1485 : vector<17x17xf32>
    %1487 = arith.addf %1452, %1486 : vector<17x17xf32>
    %c139 = arith.constant 139 : index
    %1488 = memref.load %arg2[%c139] : memref<288xf32, #tpu.memory_space<smem>>
    %1489 = vector.broadcast %1488 : f32 to vector<17x17xf32>
    %1490 = arith.mulf %1459, %1489 : vector<17x17xf32>
    %1491 = arith.addf %1456, %1490 : vector<17x17xf32>
    %c2_241 = arith.constant 2 : index
    %c0_242 = arith.constant 0 : index
    %c0_243 = arith.constant 0 : index
    %1492 = vector.load %arg6[%c2_241, %c0_242, %c0_243] : memref<4x18x18xf32, #tpu.memory_space<vmem>>, vector<1x18x18xf32>
    %1493 = vector.shape_cast %1492 : vector<1x18x18xf32> to vector<18x18xf32>
    %1494 = vector.extract_strided_slice %1493 {offsets = [1, 1], sizes = [17, 17], strides = [1, 1]} : vector<18x18xf32> to vector<17x17xf32>
    %c148 = arith.constant 148 : index
    %1495 = memref.load %arg2[%c148] : memref<288xf32, #tpu.memory_space<smem>>
    %1496 = vector.broadcast %1495 : f32 to vector<17x17xf32>
    %1497 = arith.mulf %1494, %1496 : vector<17x17xf32>
    %1498 = arith.addf %1463, %1497 : vector<17x17xf32>
    %c157 = arith.constant 157 : index
    %1499 = memref.load %arg2[%c157] : memref<288xf32, #tpu.memory_space<smem>>
    %1500 = vector.broadcast %1499 : f32 to vector<17x17xf32>
    %1501 = arith.mulf %1494, %1500 : vector<17x17xf32>
    %1502 = arith.addf %1467, %1501 : vector<17x17xf32>
    %c166 = arith.constant 166 : index
    %1503 = memref.load %arg2[%c166] : memref<288xf32, #tpu.memory_space<smem>>
    %1504 = vector.broadcast %1503 : f32 to vector<17x17xf32>
    %1505 = arith.mulf %1494, %1504 : vector<17x17xf32>
    %1506 = arith.addf %1471, %1505 : vector<17x17xf32>
    %c175 = arith.constant 175 : index
    %1507 = memref.load %arg2[%c175] : memref<288xf32, #tpu.memory_space<smem>>
    %1508 = vector.broadcast %1507 : f32 to vector<17x17xf32>
    %1509 = arith.mulf %1494, %1508 : vector<17x17xf32>
    %1510 = arith.addf %1475, %1509 : vector<17x17xf32>
    %c184 = arith.constant 184 : index
    %1511 = memref.load %arg2[%c184] : memref<288xf32, #tpu.memory_space<smem>>
    %1512 = vector.broadcast %1511 : f32 to vector<17x17xf32>
    %1513 = arith.mulf %1494, %1512 : vector<17x17xf32>
    %1514 = arith.addf %1479, %1513 : vector<17x17xf32>
    %c193 = arith.constant 193 : index
    %1515 = memref.load %arg2[%c193] : memref<288xf32, #tpu.memory_space<smem>>
    %1516 = vector.broadcast %1515 : f32 to vector<17x17xf32>
    %1517 = arith.mulf %1494, %1516 : vector<17x17xf32>
    %1518 = arith.addf %1483, %1517 : vector<17x17xf32>
    %c202 = arith.constant 202 : index
    %1519 = memref.load %arg2[%c202] : memref<288xf32, #tpu.memory_space<smem>>
    %1520 = vector.broadcast %1519 : f32 to vector<17x17xf32>
    %1521 = arith.mulf %1494, %1520 : vector<17x17xf32>
    %1522 = arith.addf %1487, %1521 : vector<17x17xf32>
    %c211 = arith.constant 211 : index
    %1523 = memref.load %arg2[%c211] : memref<288xf32, #tpu.memory_space<smem>>
    %1524 = vector.broadcast %1523 : f32 to vector<17x17xf32>
    %1525 = arith.mulf %1494, %1524 : vector<17x17xf32>
    %1526 = arith.addf %1491, %1525 : vector<17x17xf32>
    %c3_244 = arith.constant 3 : index
    %c0_245 = arith.constant 0 : index
    %c0_246 = arith.constant 0 : index
    %1527 = vector.load %arg6[%c3_244, %c0_245, %c0_246] : memref<4x18x18xf32, #tpu.memory_space<vmem>>, vector<1x18x18xf32>
    %1528 = vector.shape_cast %1527 : vector<1x18x18xf32> to vector<18x18xf32>
    %1529 = vector.extract_strided_slice %1528 {offsets = [1, 1], sizes = [17, 17], strides = [1, 1]} : vector<18x18xf32> to vector<17x17xf32>
    %c220 = arith.constant 220 : index
    %1530 = memref.load %arg2[%c220] : memref<288xf32, #tpu.memory_space<smem>>
    %1531 = vector.broadcast %1530 : f32 to vector<17x17xf32>
    %1532 = arith.mulf %1529, %1531 : vector<17x17xf32>
    %1533 = arith.addf %1498, %1532 : vector<17x17xf32>
    %c229 = arith.constant 229 : index
    %1534 = memref.load %arg2[%c229] : memref<288xf32, #tpu.memory_space<smem>>
    %1535 = vector.broadcast %1534 : f32 to vector<17x17xf32>
    %1536 = arith.mulf %1529, %1535 : vector<17x17xf32>
    %1537 = arith.addf %1502, %1536 : vector<17x17xf32>
    %c238_247 = arith.constant 238 : index
    %1538 = memref.load %arg2[%c238_247] : memref<288xf32, #tpu.memory_space<smem>>
    %1539 = vector.broadcast %1538 : f32 to vector<17x17xf32>
    %1540 = arith.mulf %1529, %1539 : vector<17x17xf32>
    %1541 = arith.addf %1506, %1540 : vector<17x17xf32>
    %c247 = arith.constant 247 : index
    %1542 = memref.load %arg2[%c247] : memref<288xf32, #tpu.memory_space<smem>>
    %1543 = vector.broadcast %1542 : f32 to vector<17x17xf32>
    %1544 = arith.mulf %1529, %1543 : vector<17x17xf32>
    %1545 = arith.addf %1510, %1544 : vector<17x17xf32>
    %c256 = arith.constant 256 : index
    %1546 = memref.load %arg2[%c256] : memref<288xf32, #tpu.memory_space<smem>>
    %1547 = vector.broadcast %1546 : f32 to vector<17x17xf32>
    %1548 = arith.mulf %1529, %1547 : vector<17x17xf32>
    %1549 = arith.addf %1514, %1548 : vector<17x17xf32>
    %c265 = arith.constant 265 : index
    %1550 = memref.load %arg2[%c265] : memref<288xf32, #tpu.memory_space<smem>>
    %1551 = vector.broadcast %1550 : f32 to vector<17x17xf32>
    %1552 = arith.mulf %1529, %1551 : vector<17x17xf32>
    %1553 = arith.addf %1518, %1552 : vector<17x17xf32>
    %c274 = arith.constant 274 : index
    %1554 = memref.load %arg2[%c274] : memref<288xf32, #tpu.memory_space<smem>>
    %1555 = vector.broadcast %1554 : f32 to vector<17x17xf32>
    %1556 = arith.mulf %1529, %1555 : vector<17x17xf32>
    %1557 = arith.addf %1522, %1556 : vector<17x17xf32>
    %c283 = arith.constant 283 : index
    %1558 = memref.load %arg2[%c283] : memref<288xf32, #tpu.memory_space<smem>>
    %1559 = vector.broadcast %1558 : f32 to vector<17x17xf32>
    %1560 = arith.mulf %1529, %1559 : vector<17x17xf32>
    %1561 = arith.addf %1526, %1560 : vector<17x17xf32>
    %c0_248 = arith.constant 0 : index
    %1562 = memref.load %arg3[%c0_248] : memref<8xf32, #tpu.memory_space<smem>>
    %1563 = vector.broadcast %1562 : f32 to vector<17x17xf32>
    %1564 = arith.addf %1533, %1563 : vector<17x17xf32>
    %cst_249 = arith.constant 0.000000e+00 : f32
    %1565 = vector.broadcast %cst_249 : f32 to vector<17x17xf32>
    %1566 = arith.cmpf ogt, %1564, %1565 : vector<17x17xf32>
    %c0_250 = arith.constant 0 : index
    %1567 = memref.load %arg4[%c0_250] : memref<8xf32, #tpu.memory_space<smem>>
    %1568 = vector.broadcast %1567 : f32 to vector<17x17xf32>
    %1569 = arith.mulf %1568, %1564 : vector<17x17xf32>
    %1570 = arith.select %1566, %1564, %1569 : vector<17x17xi1>, vector<17x17xf32>
    %c0_251 = arith.constant 0 : index
    %c0_252 = arith.constant 0 : index
    %c408 = arith.constant 408 : index
    %1571 = vector.load %arg5[%c0_251, %c0_252, %c408] : memref<1x17x544xf32, #tpu.memory_space<vmem>>, vector<1x17x17xf32>
    %1572 = vector.shape_cast %1571 : vector<1x17x17xf32> to vector<17x17xf32>
    %1573 = vector.shape_cast %1570 : vector<17x17xf32> to vector<1x17x17xf32>
    tpu.vector_store %arg5[%c0_251, %c0_252, %c408], %1573 {strides = array<i32>} : memref<1x17x544xf32, #tpu.memory_space<vmem>>, vector<1x17x17xf32>,
    %c1_253 = arith.constant 1 : index
    %1574 = memref.load %arg3[%c1_253] : memref<8xf32, #tpu.memory_space<smem>>
    %1575 = vector.broadcast %1574 : f32 to vector<17x17xf32>
    %1576 = arith.addf %1537, %1575 : vector<17x17xf32>
    %cst_254 = arith.constant 0.000000e+00 : f32
    %1577 = vector.broadcast %cst_254 : f32 to vector<17x17xf32>
    %1578 = arith.cmpf ogt, %1576, %1577 : vector<17x17xf32>
    %c1_255 = arith.constant 1 : index
    %1579 = memref.load %arg4[%c1_255] : memref<8xf32, #tpu.memory_space<smem>>
    %1580 = vector.broadcast %1579 : f32 to vector<17x17xf32>
    %1581 = arith.mulf %1580, %1576 : vector<17x17xf32>
    %1582 = arith.select %1578, %1576, %1581 : vector<17x17xi1>, vector<17x17xf32>
    %c0_256 = arith.constant 0 : index
    %c0_257 = arith.constant 0 : index
    %c425 = arith.constant 425 : index
    %1583 = vector.load %arg5[%c0_256, %c0_257, %c425] : memref<1x17x544xf32, #tpu.memory_space<vmem>>, vector<1x17x17xf32>
    %1584 = vector.shape_cast %1583 : vector<1x17x17xf32> to vector<17x17xf32>
    %1585 = vector.shape_cast %1582 : vector<17x17xf32> to vector<1x17x17xf32>
    tpu.vector_store %arg5[%c0_256, %c0_257, %c425], %1585 {strides = array<i32>} : memref<1x17x544xf32, #tpu.memory_space<vmem>>, vector<1x17x17xf32>,
    %c2_258 = arith.constant 2 : index
    %1586 = memref.load %arg3[%c2_258] : memref<8xf32, #tpu.memory_space<smem>>
    %1587 = vector.broadcast %1586 : f32 to vector<17x17xf32>
    %1588 = arith.addf %1541, %1587 : vector<17x17xf32>
    %cst_259 = arith.constant 0.000000e+00 : f32
    %1589 = vector.broadcast %cst_259 : f32 to vector<17x17xf32>
    %1590 = arith.cmpf ogt, %1588, %1589 : vector<17x17xf32>
    %c2_260 = arith.constant 2 : index
    %1591 = memref.load %arg4[%c2_260] : memref<8xf32, #tpu.memory_space<smem>>
    %1592 = vector.broadcast %1591 : f32 to vector<17x17xf32>
    %1593 = arith.mulf %1592, %1588 : vector<17x17xf32>
    %1594 = arith.select %1590, %1588, %1593 : vector<17x17xi1>, vector<17x17xf32>
    %c0_261 = arith.constant 0 : index
    %c0_262 = arith.constant 0 : index
    %c442 = arith.constant 442 : index
    %1595 = vector.load %arg5[%c0_261, %c0_262, %c442] : memref<1x17x544xf32, #tpu.memory_space<vmem>>, vector<1x17x17xf32>
    %1596 = vector.shape_cast %1595 : vector<1x17x17xf32> to vector<17x17xf32>
    %1597 = vector.shape_cast %1594 : vector<17x17xf32> to vector<1x17x17xf32>
    tpu.vector_store %arg5[%c0_261, %c0_262, %c442], %1597 {strides = array<i32>} : memref<1x17x544xf32, #tpu.memory_space<vmem>>, vector<1x17x17xf32>,
    %c3_263 = arith.constant 3 : index
    %1598 = memref.load %arg3[%c3_263] : memref<8xf32, #tpu.memory_space<smem>>
    %1599 = vector.broadcast %1598 : f32 to vector<17x17xf32>
    %1600 = arith.addf %1545, %1599 : vector<17x17xf32>
    %cst_264 = arith.constant 0.000000e+00 : f32
    %1601 = vector.broadcast %cst_264 : f32 to vector<17x17xf32>
    %1602 = arith.cmpf ogt, %1600, %1601 : vector<17x17xf32>
    %c3_265 = arith.constant 3 : index
    %1603 = memref.load %arg4[%c3_265] : memref<8xf32, #tpu.memory_space<smem>>
    %1604 = vector.broadcast %1603 : f32 to vector<17x17xf32>
    %1605 = arith.mulf %1604, %1600 : vector<17x17xf32>
    %1606 = arith.select %1602, %1600, %1605 : vector<17x17xi1>, vector<17x17xf32>
    %c0_266 = arith.constant 0 : index
    %c0_267 = arith.constant 0 : index
    %c459 = arith.constant 459 : index
    %1607 = vector.load %arg5[%c0_266, %c0_267, %c459] : memref<1x17x544xf32, #tpu.memory_space<vmem>>, vector<1x17x17xf32>
    %1608 = vector.shape_cast %1607 : vector<1x17x17xf32> to vector<17x17xf32>
    %1609 = vector.shape_cast %1606 : vector<17x17xf32> to vector<1x17x17xf32>
    tpu.vector_store %arg5[%c0_266, %c0_267, %c459], %1609 {strides = array<i32>} : memref<1x17x544xf32, #tpu.memory_space<vmem>>, vector<1x17x17xf32>,
    %c4_268 = arith.constant 4 : index
    %1610 = memref.load %arg3[%c4_268] : memref<8xf32, #tpu.memory_space<smem>>
    %1611 = vector.broadcast %1610 : f32 to vector<17x17xf32>
    %1612 = arith.addf %1549, %1611 : vector<17x17xf32>
    %cst_269 = arith.constant 0.000000e+00 : f32
    %1613 = vector.broadcast %cst_269 : f32 to vector<17x17xf32>
    %1614 = arith.cmpf ogt, %1612, %1613 : vector<17x17xf32>
    %c4_270 = arith.constant 4 : index
    %1615 = memref.load %arg4[%c4_270] : memref<8xf32, #tpu.memory_space<smem>>
    %1616 = vector.broadcast %1615 : f32 to vector<17x17xf32>
    %1617 = arith.mulf %1616, %1612 : vector<17x17xf32>
    %1618 = arith.select %1614, %1612, %1617 : vector<17x17xi1>, vector<17x17xf32>
    %c0_271 = arith.constant 0 : index
    %c0_272 = arith.constant 0 : index
    %c476 = arith.constant 476 : index
    %1619 = vector.load %arg5[%c0_271, %c0_272, %c476] : memref<1x17x544xf32, #tpu.memory_space<vmem>>, vector<1x17x17xf32>
    %1620 = vector.shape_cast %1619 : vector<1x17x17xf32> to vector<17x17xf32>
    %1621 = vector.shape_cast %1618 : vector<17x17xf32> to vector<1x17x17xf32>
    tpu.vector_store %arg5[%c0_271, %c0_272, %c476], %1621 {strides = array<i32>} : memref<1x17x544xf32, #tpu.memory_space<vmem>>, vector<1x17x17xf32>,
    %c5_273 = arith.constant 5 : index
    %1622 = memref.load %arg3[%c5_273] : memref<8xf32, #tpu.memory_space<smem>>
    %1623 = vector.broadcast %1622 : f32 to vector<17x17xf32>
    %1624 = arith.addf %1553, %1623 : vector<17x17xf32>
    %cst_274 = arith.constant 0.000000e+00 : f32
    %1625 = vector.broadcast %cst_274 : f32 to vector<17x17xf32>
    %1626 = arith.cmpf ogt, %1624, %1625 : vector<17x17xf32>
    %c5_275 = arith.constant 5 : index
    %1627 = memref.load %arg4[%c5_275] : memref<8xf32, #tpu.memory_space<smem>>
    %1628 = vector.broadcast %1627 : f32 to vector<17x17xf32>
    %1629 = arith.mulf %1628, %1624 : vector<17x17xf32>
    %1630 = arith.select %1626, %1624, %1629 : vector<17x17xi1>, vector<17x17xf32>
    %c0_276 = arith.constant 0 : index
    %c0_277 = arith.constant 0 : index
    %c493 = arith.constant 493 : index
    %1631 = vector.load %arg5[%c0_276, %c0_277, %c493] : memref<1x17x544xf32, #tpu.memory_space<vmem>>, vector<1x17x17xf32>
    %1632 = vector.shape_cast %1631 : vector<1x17x17xf32> to vector<17x17xf32>
    %1633 = vector.shape_cast %1630 : vector<17x17xf32> to vector<1x17x17xf32>
    tpu.vector_store %arg5[%c0_276, %c0_277, %c493], %1633 {strides = array<i32>} : memref<1x17x544xf32, #tpu.memory_space<vmem>>, vector<1x17x17xf32>,
    %c6_278 = arith.constant 6 : index
    %1634 = memref.load %arg3[%c6_278] : memref<8xf32, #tpu.memory_space<smem>>
    %1635 = vector.broadcast %1634 : f32 to vector<17x17xf32>
    %1636 = arith.addf %1557, %1635 : vector<17x17xf32>
    %cst_279 = arith.constant 0.000000e+00 : f32
    %1637 = vector.broadcast %cst_279 : f32 to vector<17x17xf32>
    %1638 = arith.cmpf ogt, %1636, %1637 : vector<17x17xf32>
    %c6_280 = arith.constant 6 : index
    %1639 = memref.load %arg4[%c6_280] : memref<8xf32, #tpu.memory_space<smem>>
    %1640 = vector.broadcast %1639 : f32 to vector<17x17xf32>
    %1641 = arith.mulf %1640, %1636 : vector<17x17xf32>
    %1642 = arith.select %1638, %1636, %1641 : vector<17x17xi1>, vector<17x17xf32>
    %c0_281 = arith.constant 0 : index
    %c0_282 = arith.constant 0 : index
    %c510 = arith.constant 510 : index
    %1643 = vector.load %arg5[%c0_281, %c0_282, %c510] : memref<1x17x544xf32, #tpu.memory_space<vmem>>, vector<1x17x17xf32>
    %1644 = vector.shape_cast %1643 : vector<1x17x17xf32> to vector<17x17xf32>
    %1645 = vector.shape_cast %1642 : vector<17x17xf32> to vector<1x17x17xf32>
    tpu.vector_store %arg5[%c0_281, %c0_282, %c510], %1645 {strides = array<i32>} : memref<1x17x544xf32, #tpu.memory_space<vmem>>, vector<1x17x17xf32>,
    %c7_283 = arith.constant 7 : index
    %1646 = memref.load %arg3[%c7_283] : memref<8xf32, #tpu.memory_space<smem>>
    %1647 = vector.broadcast %1646 : f32 to vector<17x17xf32>
    %1648 = arith.addf %1561, %1647 : vector<17x17xf32>
    %cst_284 = arith.constant 0.000000e+00 : f32
    %1649 = vector.broadcast %cst_284 : f32 to vector<17x17xf32>
    %1650 = arith.cmpf ogt, %1648, %1649 : vector<17x17xf32>
    %c7_285 = arith.constant 7 : index
    %1651 = memref.load %arg4[%c7_285] : memref<8xf32, #tpu.memory_space<smem>>
    %1652 = vector.broadcast %1651 : f32 to vector<17x17xf32>
    %1653 = arith.mulf %1652, %1648 : vector<17x17xf32>
    %1654 = arith.select %1650, %1648, %1653 : vector<17x17xi1>, vector<17x17xf32>
    %c0_286 = arith.constant 0 : index
    %c0_287 = arith.constant 0 : index
    %c527 = arith.constant 527 : index
    %1655 = vector.load %arg5[%c0_286, %c0_287, %c527] : memref<1x17x544xf32, #tpu.memory_space<vmem>>, vector<1x17x17xf32>
    %1656 = vector.shape_cast %1655 : vector<1x17x17xf32> to vector<17x17xf32>
    %1657 = vector.shape_cast %1654 : vector<17x17xf32> to vector<1x17x17xf32>
    tpu.vector_store %arg5[%c0_286, %c0_287, %c527], %1657 {strides = array<i32>} : memref<1x17x544xf32, #tpu.memory_space<vmem>>, vector<1x17x17xf32>,
    return
  }
  func.func @transform_0(%arg0: i32) -> (i32, i32, i32, i32) {
    %c0_i32 = arith.constant 0 : i32
    %c0_i32_0 = arith.constant 0 : i32
    %c0_i32_1 = arith.constant 0 : i32
    %c0_i32_2 = arith.constant 0 : i32
    return %arg0, %c0_i32, %c0_i32_0, %c0_i32_1 : i32, i32, i32, i32
  }
  func.func @transform_1(%arg0: i32) -> i32 {
    %c0_i32 = arith.constant 0 : i32
    %c0_i32_0 = arith.constant 0 : i32
    return %c0_i32 : i32
  }
  func.func @transform_2(%arg0: i32) -> i32 {
    %c0_i32 = arith.constant 0 : i32
    %c0_i32_0 = arith.constant 0 : i32
    return %c0_i32 : i32
  }
  func.func @transform_3(%arg0: i32) -> i32 {
    %c0_i32 = arith.constant 0 : i32
    %c0_i32_0 = arith.constant 0 : i32
    return %c0_i32 : i32
  }
  func.func @transform_4(%arg0: i32) -> (i32, i32, i32) {
    %c0_i32 = arith.constant 0 : i32
    %c0_i32_0 = arith.constant 0 : i32
    %c0_i32_1 = arith.constant 0 : i32
    return %arg0, %c0_i32, %c0_i32_0 : i32, i32, i32
  }
}

</mosaic_0001>

<bundles_post_ra>
// kernel: upsample_forward.1
= control target key start
LH: loop header
LB: loop body
LE: loop exit
PB: predicated region body
PF: predicated region fallthrough
CT: control target
= control target key end

     0   :  { %9 = vsyncpa [#allocation4], 0  ;;  %s12825_s0 = inlined_call_operand.hbm [shape: f32[2,4,16,16], index: 0, kind: input, shape index: {}]   ;;  %s12826_s1 = inlined_call_operand.vmem [shape: f32[288], index: 1, kind: input, shape index: {}]   ;;  %s12827_s2 = inlined_call_operand.hbm [shape: f32[8], index: 2, kind: input, shape index: {}]   ;;  %s12828_s3 = inlined_call_operand.hbm [shape: f32[8], index: 3, kind: input, shape index: {}]   ;;  %s12829_s4 = inlined_call_operand.vmem [shape: f32[2,17,544], index: 4, kind: output, shape index: {}]  }
   0x1   :  { %11 = vsyncpa [#allocation4 + $0x1], 0 }
   0x2   :  { %12 = vsyncpa [#allocation6], 0 }
   0x3   :  { %13 = vsyncpa [#allocation5], 0 }
   0x4   :  { %14 = vsyncpa [#allocation10], 0  ;;  %s6762_s15 = smov 0   ;;  %s6764_s16 = smov 0  }
   0x5   :  { %s6766_s17 = smov 0   ;;  %s6768_s18 = smov 0  }
   0x6 LB: > { %s6781_s19 = sadd.s32 4294967295, %s6696_s18   ;;  %p40_p0 = scmp.ne.s32.totalorder %s6688_s16, %s6684_s15  ;;  %s6696_s18 = sphi %s6768_s18, %s13958_s18   ;;  %s6692_s17 = sphi %s6766_s17, %s13957_s17   ;;  %s6688_s16 = sphi %s6764_s16, %s13956_s16   ;;  %s6684_s15 = sphi %s6762_s15, %s13955_s15  }
   0x7   : > { %p41_p1 = scmp.eq.s32.totalorder %s6781_s19, 0  ;;  %p6037_p2 = scmp.ge.s32.totalorder %s6696_s18, 1 }
   0x8   : > { %p140_p3 = scmp.lt.s32.totalorder %s6696_s18, 3  ;;  %s152_s23 = sshll.u32 %s12826_s1, 4  ;;  %s153_s23 = int_to_ptr.vmem [resolvable:$true] %s152_s23 }
   0x9   : > { %p6789_p4 = por %p41_p1, %p40_p0  ;;  %s162_s27 = sshll.u32 %s12827_s2, 4  ;;  %s163_s27 = int_to_ptr.hbm [resolvable:$true] %s162_s27 }
   0xa   : > { %p6796_p5 = pnand %p6037_p2, %p140_p3  ;;  %s172_s30 = sshll.u32 %s12828_s3, 4  ;;  %s173_s30 = int_to_ptr.hbm [resolvable:$true] %s172_s30 }
   0xb   : > { %s6698_s5 = smov [#allocation7]   ;;  %s6699_s6 = smov [#allocation8]  }
   0xc   : > { %p6418_p6 = pneg %p6796_p5  ;;  %s6700_s7 = smov [#allocation9]  }
   0xd   : > { %s6811_s8 = sadd.s32 1, %s6696_s18   ;;  %s27_s10 = sadd.s32 1, %s6692_s17 }
   0xe   : > { %p6419_p7 = pnand %p6418_p6, %p41_p1  ;;  %s24_s9 = ssub.s32 %s6696_s18, %s6811_s8 }
   0xf   : > { %p25_p8 = scmp.eq.s32.totalorder %s24_s9, 0  ;;  %p34_p9 = scmp.ne.s32.totalorder %s6692_s17, %s6688_s16 }
  0x10   : > { %6421 = dma.vmem_to_smem (!%p6419_p7), %s153_s23, 48, %s6698_s5, [#allocation6]  }
  0x11   : > { %6424 = dma.hbm_to_smem (!%p6419_p7), %s163_s27, 16, %s6699_s6, [#allocation5]  }
  0x12   : > { %6427 = dma.hbm_to_smem (!%p6419_p7), %s173_s30, 16, %s6700_s7, [#allocation10]  }
  0x13   : > { %p35_p10 = scmp.eq.s32.totalorder %s6696_s18, 0  ;;  %p6435_p11 = scmp.lt.s32.totalorder %s6696_s18, 2 }
  0x14   : > { %s6821_s11 = scalar_select %p25_p8, %s6692_s17, %s27_s10  }
  0x15   : > { %p36_p12 = por %p35_p10, %p34_p9  ;;  %s183_s12 = sand.u32 1, %s6692_s17  }
  0x16   : > { %s6042_s13 = sshll.u32 %s183_s12, 6  ;;  %s6402_s14 = sshll.u32 %s6696_s18, 6 }
  0x17   : > { %s192_s22 = scalar_lea.hbm %s12825_s0, %s6402_s14  ;;  %s187_s23 = scalar_lea.vmem [#allocation3], %s6042_s13 }
  0x18   : > { %s195_s25 = sshll.u32 %s187_s23, 4  ;;  %s193_s26 = sshll.u32 %s192_s22, 4  ;;  %s196_s25 = int_to_ptr.vmem [resolvable:$true] %s195_s25  ;;  %s194_s26 = int_to_ptr.hbm [resolvable:$true] %s193_s26 }
  0x19   : > { %p6828_p13 = pnand %p6435_p11, %p36_p12  ;;  %s184_s28 = scalar_lea.sflag [#allocation4], %s183_s12 }
  0x1a   : > { %s6620_s29 = sshra.s32 %s194_s26, 4  ;;  %s6627_s6 = scalar_lea.hbm %s12825_s0, 128  ;;  %s6621_s29 = int_to_ptr.hbm [resolvable:$true] %s6620_s29 }
  0x1b   : > { %s6622_s30 = scalar_lea.hbm %s6621_s29, 64  ;;  %p6624_p2 = pneg %p6828_p13 }
  0x1c   : > { %p6623_p0 = scmp.ne.s32.totalorder %s6621_s29, %s6622_s30  ;;  %p6628_p7 = scmp.lt.s32.totalorder %s6621_s29, %s12825_s0 }
  0x1d   : > { %p6629_p8 = scmp.lt.s32.totalorder %s6627_s6, %s6622_s30 }
  0x1e   : > { %p6625_p3 = pnand %p6624_p2, %p6623_p0 }
  0x1f   : > { %p6630_p9 = por %p6629_p8, %p6628_p7 }
  0x20   : > { %p6626_p6 = pneg %p6625_p3 }
  0x22   : > { %p6631_p10 = pnand %p6630_p9, %p6626_p6 }
  0x24   : > { %6634 = shalt.err (!%p6631_p10)
}
  0x25   : > { %s6701_s10 = smov 128   ;;  %s6702_s12 = smov 8  }
  0x26   : > { %6431 = dma.hbm_to_vmem [thread:$0]  (!%p6828_p13), %s194_s26, 1024, %s196_s25, %s184_s28, %s6701_s10, %s6701_s10, %s6702_s12  }
  0x27   : > { %207 = sbr.rel (%p6796_p5) target bundleno = 1545 (0x609), region = 36 }
  0x2c   : > { %s209_s13 = sand.u32 1, %s6688_s16  }
  0x2d   : > { %s6046_s14 = sshll.u32 %s209_s13, 6  ;;  %s210_s15 = scalar_lea.sflag [#allocation4], %s209_s13 }
  0x2e   : > { %s213_s21 = scalar_lea.vmem [#allocation3], %s6046_s14 }
  0x2f   : > { %6667 = dma.done.wait (%p6789_p4), %s210_s15, 1024  }
  0x30   : > { %6669 = vsyncadd (%p6789_p4), %s210_s15, 4294966272 }
  0x31   : > { %6671 = dma.done.wait (%p41_p1), [#allocation6], 48  }
  0x32   : > { %6673 = vsyncadd (%p41_p1), [#allocation6], 4294967248 }
  0x33   : > { %6675 = dma.done.wait (%p41_p1), [#allocation5], 16  }
  0x34   : > { %6677 = vsyncadd (%p41_p1), [#allocation5], 4294967280 }
  0x35   : > { %6679 = dma.done.wait (%p41_p1), [#allocation10], 16  }
  0x36   : > { %6681 = vsyncadd (%p41_p1), [#allocation10], 4294967280 }
  0x37   : > { %234 = sfence }
  0x38   : > { %v6051_v0 = vld [vmem:[%s213_s21 + $0x10] sm:$0xff]  ;;  %v274_v1 = vld [vmem:[%s213_s21] sm:$0xff]  ;;  %s6703_s20 = smov 1   ;;  %v6052_v3 = vld [vmem:[%s213_s21 + $0x18] sm:$0xff]  ;;  %vm260_vm0 = vcmask 146432   ;;  %v6704_v8 = vmov 0.0  }
  0x39   : > { %292 = vrot.lane.b32.xlu1 %v6051_v0, %s6703_s20  ;;  %278 = vrot.lane.b32.xlu0 %v274_v1, %s6703_s20  ;;  %v6053_v2 = vld [vmem:[%s213_s21 + $0x20] sm:$0xff]  ;;  %v275_v4 = vld [vmem:[%s213_s21 + $0x8] sm:$0xff]  ;;  %265 = vst.msk [vmem:[#allocation2 + $0x18] sm:$0xff] %vm260_vm0, %v6704_v8  ;;  %vm263_vm1 = vcmask 140288   ;;  %vm284_vm2 = vcmask 138248   ;;  %s6064_s24 = sld [smem:[#allocation7 + $0x2]] }
  0x3a   : > { %306 = vrot.lane.b32.xlu2 %v6053_v2, %s6703_s20  ;;  %v6054_v5 = vld [vmem:[%s213_s21 + $0x28] sm:$0xff]  ;;  %v6056_v6 = vld [vmem:[%s213_s21 + $0x38] sm:$0xff]  ;;  %v6055_v7 = vld [vmem:[%s213_s21 + $0x30] sm:$0xff]  ;;  %266 = vst.msk [vmem:[#allocation2 + $0x20] sm:$0xff] %vm260_vm0, %v6704_v8  ;;  %s6065_s22 = sld [smem:[#allocation7 + $0xb]]  ;;  %vm564_vm3 = vcmask 1040384  }
  0x3b   : > { %261 = vst.msk [vmem:[#allocation2] sm:$0xff] %vm260_vm0, %v6704_v8  ;;  %s6066_s23 = sld [smem:[#allocation7 + $0x14]]  ;;  %vm2665_vm7 = vcmask 1046528   ;;  %p255_p1 = scmp.lt.s32.totalorder %s6781_s19, 1 }
  0x3c   : > { %262 = vst.msk [vmem:[#allocation2 + $0x8] sm:$0xff] %vm260_vm0, %v6704_v8  ;;  %s6067_s25 = sld [smem:[#allocation7 + $0x1d]] }
  0x3d   : > { %268 = vst.msk [vmem:[#allocation2 + $0x30] sm:$0xff] %vm260_vm0, %v6704_v8  ;;  %s6068_s26 = sld [smem:[#allocation7 + $0x26]]  ;;  %s13960_s19 = smov (!%p255_p1, %s6781_s19), 1 }
  0x3e   : > { %269 = vst.msk [vmem:[#allocation2 + $0x38] sm:$0xff] %vm260_vm0, %v6704_v8  ;;  %s6069_s27 = sld [smem:[#allocation7 + $0x2f]] }
  0x3f   : > { %271 = vst.msk [vmem:[#allocation2 + $0x48] sm:$0xff] %vm260_vm0, %v6704_v8  ;;  %v397_v13 = vstv %s6064_s24  ;;  %s6070_s28 = sld [smem:[#allocation7 + $0x38]] }
  0x40   : > { %272 = vst.msk [vmem:[#allocation2 + $0x50] sm:$0xff] %vm260_vm0, %v6704_v8  ;;  %v417_v18 = vstv %s6065_s22  ;;  %s6071_s29 = sld [smem:[#allocation7 + $0x41]] }
  0x41   : > { %294 = vrot.lane.b32.xlu1 %v6052_v3, %s6703_s20  ;;  %280 = vrot.lane.b32.xlu0 %v275_v4, %s6703_s20  ;;  %267 = vst.msk [vmem:[#allocation2 + $0x28] sm:$0x3] %vm263_vm1, %v6704_v8  ;;  %v437_v26 = vstv %s6066_s23  ;;  %s6080_s30 = sld [smem:[#allocation7 + $0x8]] }
  0x42   : > { %308 = vrot.lane.b32.xlu2 %v6054_v5, %s6703_s20  ;;  %264 = vst.msk [vmem:[#allocation2 + $0x10] sm:$0x3] %vm263_vm1, %v6704_v8  ;;  %v457_v30 = vstv %s6067_s25  ;;  %s6081_s18 = sld [smem:[#allocation7 + $0x11]] }
  0x43   : > { %270 = vst.msk [vmem:[#allocation2 + $0x40] sm:$0x3] %vm263_vm1, %v6704_v8  ;;  %v477_v34 = vstv %s6068_s26  ;;  %s6082_s5 = sld [smem:[#allocation7 + $0x1a]] }
  0x44   : > { %273 = vst.msk [vmem:[#allocation2 + $0x58] sm:$0x3] %vm263_vm1, %v6704_v8  ;;  %v497_v38 = vstv %s6069_s27  ;;  %s6083_s6 = sld [smem:[#allocation7 + $0x23]] }
  0x45   : > { %v517_v42 = vstv %s6070_s28  ;;  %s6084_s7 = sld [smem:[#allocation7 + $0x2c]] }
  0x46   : > { %v537_v46 = vstv %s6071_s29  ;;  %s6085_s9 = sld [smem:[#allocation7 + $0x35]] }
  0x47   : > { %v710_v50 = vstv %s6080_s30  ;;  %s6086_s10 = sld [smem:[#allocation7 + $0x3e]] }
  0x48   : > { %v735_v56 = vstv %s6081_s18  ;;  %s6087_s12 = sld [smem:[#allocation7 + $0x47]] }
  0x49   : > { %322 = vrot.lane.b32.xlu1 %v6056_v6, %s6703_s20  ;;  %320 = vrot.lane.b32.xlu0 %v6055_v7, %s6703_s20  ;;  %v760_v0 = vstv %s6082_s5  ;;  %s6096_s13 = sld [smem:[#allocation7 + $0x4a]] }
  0x4a   : > { %s6097_s14 = sld [smem:[#allocation7 + $0x53]] }
  0x4b   : > { %s6098_s15 = sld [smem:[#allocation7 + $0x5c]] }
  0x4c   : > { %s6099_s21 = sld [smem:[#allocation7 + $0x65]] }
  0x4d   : > { %s6100_s24 = sld [smem:[#allocation7 + $0x6e]] }
  0x4e   : > { %s6101_s22 = sld [smem:[#allocation7 + $0x77]] }
  0x4f   : > { %s6102_s23 = sld [smem:[#allocation7 + $0x80]] }
  0x50   : > { %s6072_s25 = sld [smem:[#allocation7 + $0x6]] }
  0x51   : > { %s6103_s26 = sld [smem:[#allocation7 + $0x89]] }
  0x52   : > { %s332_s27 = sld [smem:[#allocation7]] }
  0x53   : > { %s6112_s28 = sld [smem:[#allocation7 + $0x50]] }
  0x54   : > { %s6073_s29 = sld [smem:[#allocation7 + $0xf]] }
  0x55   : > { %s6057_s30 = sld [smem:[#allocation7 + $0x9]] }
  0x56   : > { %s6113_s18 = sld [smem:[#allocation7 + $0x59]] }
  0x57   : > { %s6088_s5 = sld [smem:[#allocation7 + $0x48]] }
  0x94   : > { %v307_v9 = vpop.permute.xlu2 %306 }
  0x95   : > { %313 = vst.msk [vmem:[#allocation2 + $0x31] sm:$0xff] %vm284_vm2, %v307_v9  ;;  %v785_v9 = vstv %s6083_s6  ;;  %s6074_s6 = sld [smem:[#allocation7 + $0x18]] }
  0x9c   : > { %v309_v10 = vpop.permute.xlu2 %308 }
  0x9d   : > { %314 = vst.msk [vmem:[#allocation2 + $0x39] sm:$0xff] %vm284_vm2, %v309_v10 }
  0xab   : > { %v293_v11 = vpop.permute.xlu1 %292  ;;  %v279_v12 = vpop.permute.xlu0 %278 }
  0xac   : > { %299 = vst.msk [vmem:[#allocation2 + $0x19] sm:$0xff] %vm284_vm2, %v293_v11 }
  0xad   : > { %285 = vst.msk [vmem:[#allocation2 + $0x1] sm:$0xff] %vm284_vm2, %v279_v12 }
  0xb3   : > { %v295_v14 = vpop.permute.xlu1 %294  ;;  %v281_v15 = vpop.permute.xlu0 %280 }
  0xb4   : > { %v6873_v16 = vld [vmem:[#allocation2] sm:$0xff]  ;;  %300 = vst.msk [vmem:[#allocation2 + $0x21] sm:$0xff] %vm284_vm2, %v295_v14 }
  0xb5   : > { %286 = vst.msk [vmem:[#allocation2 + $0x9] sm:$0xff] %vm284_vm2, %v281_v15  ;;  %v398_v17 = vmul.f32 %v397_v13, %v6873_v16  ;;  %v418_v24 = vmul.f32 %v417_v18, %v6873_v16  ;;  %v438_v28 = vmul.f32 %v437_v26, %v6873_v16  ;;  %v458_v32 = vmul.f32 %v457_v30, %v6873_v16 }
  0xb6   : > { %v478_v36 = vmul.f32 %v477_v34, %v6873_v16  ;;  %v498_v40 = vmul.f32 %v497_v38, %v6873_v16  ;;  %v518_v44 = vmul.f32 %v517_v42, %v6873_v16  ;;  %v538_v48 = vmul.f32 %v537_v46, %v6873_v16 }
  0xb7   : > { %404 = vrot.lane.b32.xlu2 %v398_v17, %s6703_s20  ;;  %v711_v51 = vmul.f32 %v710_v50, %v6873_v16  ;;  %v736_v58 = vmul.f32 %v735_v56, %v6873_v16  ;;  %v761_v3 = vmul.f32 %v760_v0, %v6873_v16  ;;  %v786_v12 = vmul.f32 %v785_v9, %v6873_v16 }
  0xb9   : > { %v717_v53 = vrot.slane %v711_v51, 7  ;;  %v742_v61 = vrot.slane %v736_v58, 7  ;;  %v767_v6 = vrot.slane %v761_v3, 7  ;;  %v792_v15 = vrot.slane %v786_v12, 7 }
  0xba   : > { %v885_v51 = vstv %s6087_s12  ;;  %s7152_s12 = sld [smem:[#allocation7 + $0x21]] }
  0xbb   : > { %v323_v19 = vpop.permute.xlu1 %322  ;;  %v321_v20 = vpop.permute.xlu0 %320  ;;  %v7019_v12 = vld [vmem:[#allocation2 + $0x20] sm:$0xff] }
  0xbc   : > { %v6879_v21 = vld [vmem:[#allocation2 + $0x8] sm:$0xff]  ;;  %328 = vst.msk [vmem:[#allocation2 + $0x51] sm:$0xff] %vm284_vm2, %v323_v19  ;;  %v6882_v22 = vld [vmem:[#allocation2 + $0x10] sm:$0x3]  ;;  %v810_v19 = vstv %s6084_s7  ;;  %s7133_s7 = sld [smem:[#allocation7 + $0x12]] }
  0xbd   : > { %v399_v23 = vmul.f32 %v397_v13, %v6879_v21  ;;  %327 = vst.msk [vmem:[#allocation2 + $0x49] sm:$0xff] %vm284_vm2, %v321_v20  ;;  %v400_v25 = vmul.f32 %v397_v13, %v6882_v22  ;;  %v419_v27 = vmul.f32 %v417_v18, %v6879_v21  ;;  %v420_v29 = vmul.f32 %v417_v18, %v6882_v22 }
  0xbe   : > { %v439_v31 = vmul.f32 %v437_v26, %v6879_v21  ;;  %v440_v33 = vmul.f32 %v437_v26, %v6882_v22  ;;  %v459_v35 = vmul.f32 %v457_v30, %v6879_v21  ;;  %v460_v37 = vmul.f32 %v457_v30, %v6882_v22 }
  0xbf   : > { %406 = vrot.lane.b32.xlu0 %v399_v23, %s6703_s20  ;;  %424 = vrot.lane.b32.xlu2 %v418_v24, %s6703_s20  ;;  %v479_v39 = vmul.f32 %v477_v34, %v6879_v21  ;;  %v480_v41 = vmul.f32 %v477_v34, %v6882_v22  ;;  %v499_v43 = vmul.f32 %v497_v38, %v6879_v21 }
  0xc0   : > { %408 = vrot.lane.b32.xlu1 %v400_v25, %s6703_s20  ;;  %v500_v45 = vmul.f32 %v497_v38, %v6882_v22  ;;  %v519_v47 = vmul.f32 %v517_v42, %v6879_v21  ;;  %v520_v49 = vmul.f32 %v517_v42, %v6882_v22  ;;  %v539_v52 = vmul.f32 %v537_v46, %v6879_v21 }
  0xc1   : > { %v540_v54 = vmul.f32 %v537_v46, %v6882_v22  ;;  %v712_v55 = vmul.f32 %v710_v50, %v6879_v21  ;;  %v713_v57 = vmul.f32 %v710_v50, %v6882_v22  ;;  %v737_v63 = vmul.f32 %v735_v56, %v6879_v21 }
  0xc2   : > { %v738_v2 = vmul.f32 %v735_v56, %v6882_v22  ;;  %v762_v8 = vmul.f32 %v760_v0, %v6879_v21  ;;  %v763_v11 = vmul.f32 %v760_v0, %v6882_v22  ;;  %v787_v18 = vmul.f32 %v785_v9, %v6879_v21 }
  0xc3   : > { %v718_v59 = vrot.slane %v712_v55, 7  ;;  %v720_v60 = vrot.slane %v713_v57, 7  ;;  %v743_v4 = vrot.slane %v737_v63, 7  ;;  %v788_v23 = vmul.f32 %v785_v9, %v6882_v22 }
  0xc4   : > { %v745_v5 = vrot.slane %v738_v2, 7  ;;  %v768_v13 = vrot.slane %v762_v8, 7  ;;  %v770_v14 = vrot.slane %v763_v11, 7  ;;  %v811_v25 = vmul.f32 %v810_v19, %v6873_v16 }
  0xc5   : > { %v719_v62 = vsel %vm564_vm3, %v717_v53, %v718_v59  ;;  %v721_v1 = vsel %vm564_vm3, %v718_v59, %v720_v60  ;;  %v744_v7 = vsel %vm564_vm3, %v742_v61, %v743_v4  ;;  %v793_v26 = vrot.slane %v787_v18, 7 }
  0xc6   : > { %v746_v10 = vsel %vm564_vm3, %v743_v4, %v745_v5  ;;  %v769_v17 = vsel %vm564_vm3, %v767_v6, %v768_v13  ;;  %v771_v20 = vsel %vm564_vm3, %v768_v13, %v770_v14  ;;  %v812_v30 = vmul.f32 %v810_v19, %v6879_v21  ;;  %v7005_v4 = vld [vmem:[#allocation2 + $0x18] sm:$0xff]  ;;  %v7021_v13 = vld [vmem:[#allocation2 + $0x28] sm:$0x3] }
  0xc7   : > { %426 = vrot.lane.b32.xlu0 %v419_v27, %s6703_s20  ;;  %444 = vrot.lane.b32.xlu2 %v438_v28, %s6703_s20  ;;  %v795_v27 = vrot.slane %v788_v23, 7  ;;  %v817_v28 = vrot.slane %v811_v25, 7  ;;  %v886_v55 = vmul.f32 %v885_v51, %v6873_v16  ;;  %v887_v60 = vmul.f32 %v885_v51, %v6879_v21 }
  0xc8   : > { %428 = vrot.lane.b32.xlu1 %v420_v29, %s6703_s20  ;;  %v794_v29 = vsel %vm564_vm3, %v792_v15, %v793_v26  ;;  %v977_v2 = vstv %s6096_s13  ;;  %v997_v11 = vstv %s6097_s14  ;;  %v1017_v23 = vstv %s6098_s15  ;;  %s7177_s13 = sld [smem:[#allocation7 + $0x1b]] }
  0xc9   : > { %v892_v58 = vrot.slane %v886_v55, 7  ;;  %v978_v5 = vmul.f32 %v977_v2, %v7005_v4  ;;  %v979_v14 = vmul.f32 %v977_v2, %v7019_v12  ;;  %v999_v25 = vmul.f32 %v997_v11, %v7019_v12  ;;  %s7181_s14 = sld [smem:[#allocation7 + $0x6b]] }
  0xca   : > { %v1097_v55 = vstv %s6102_s23  ;;  %s7188_s15 = sld [smem:[#allocation7 + $0x5a]] }
  0xcb   : > { %s7238_s23 = sld [smem:[#allocation7 + $0x74]] }
  0xcf   : > { %446 = vrot.lane.b32.xlu0 %v439_v31, %s6703_s20  ;;  %464 = vrot.lane.b32.xlu2 %v458_v32, %s6703_s20  ;;  %v835_v31 = vstv %s6085_s9  ;;  %v796_v32 = vsel %vm564_vm3, %v793_v26, %v795_v27  ;;  %v1018_v26 = vmul.f32 %v1017_v23, %v7005_v4  ;;  %v1000_v27 = vmul.f32 %v997_v11, %v7021_v13  ;;  %s7141_s9 = sld [smem:[#allocation7 + $0x51]] }
  0xd0   : > { %448 = vrot.lane.b32.xlu1 %v440_v33, %s6703_s20  ;;  %v813_v33 = vmul.f32 %v810_v19, %v6882_v22 }
  0xd7   : > { %466 = vrot.lane.b32.xlu0 %v459_v35, %s6703_s20  ;;  %484 = vrot.lane.b32.xlu2 %v478_v36, %s6703_s20  ;;  %v836_v35 = vmul.f32 %v835_v31, %v6873_v16  ;;  %v818_v36 = vrot.slane %v812_v30, 7 }
  0xd8   : > { %468 = vrot.lane.b32.xlu1 %v460_v37, %s6703_s20  ;;  %v820_v37 = vrot.slane %v813_v33, 7 }
  0xd9   : > { %v842_v38 = vrot.slane %v836_v35, 7  ;;  %v1020_v35 = vmul.f32 %v1017_v23, %v7021_v13 }
  0xda   : > { %v821_v42 = vsel %vm564_vm3, %v818_v36, %v820_v37 }
  0xdf   : > { %486 = vrot.lane.b32.xlu0 %v479_v39, %s6703_s20  ;;  %504 = vrot.lane.b32.xlu2 %v498_v40, %s6703_s20  ;;  %v819_v39 = vsel %vm564_vm3, %v817_v28, %v818_v36  ;;  %v837_v40 = vmul.f32 %v835_v31, %v6879_v21 }
  0xe0   : > { %488 = vrot.lane.b32.xlu1 %v480_v41, %s6703_s20  ;;  %v860_v41 = vstv %s6086_s10  ;;  %s7146_s10 = sld [smem:[#allocation7 + $0x62]] }
  0xe1   : > { %v843_v46 = vrot.slane %v837_v40, 7  ;;  %v862_v50 = vmul.f32 %v860_v41, %v6879_v21 }
  0xe3   : > { %v868_v56 = vrot.slane %v862_v50, 7 }
  0xe7   : > { %506 = vrot.lane.b32.xlu0 %v499_v43, %s6703_s20  ;;  %524 = vrot.lane.b32.xlu2 %v518_v44, %s6703_s20  ;;  %v838_v43 = vmul.f32 %v835_v31, %v6882_v22  ;;  %v1037_v31 = vstv %s6099_s21  ;;  %s7198_s21 = sld [smem:[#allocation7 + $0x2a]] }
  0xe8   : > { %508 = vrot.lane.b32.xlu1 %v500_v45, %s6703_s20  ;;  %v861_v45 = vmul.f32 %v860_v41, %v6873_v16  ;;  %v1038_v33 = vmul.f32 %v1037_v31, %v7005_v4  ;;  %v1039_v40 = vmul.f32 %v1037_v31, %v7019_v12 }
  0xef   : > { %526 = vrot.lane.b32.xlu0 %v519_v47, %s6703_s20  ;;  %544 = vrot.lane.b32.xlu2 %v538_v48, %s6703_s20  ;;  %v845_v47 = vrot.slane %v838_v43, 7  ;;  %v867_v48 = vrot.slane %v861_v45, 7 }
  0xf0   : > { %528 = vrot.lane.b32.xlu1 %v520_v49, %s6703_s20  ;;  %v844_v49 = vsel %vm564_vm3, %v842_v38, %v843_v46 }
  0xf1   : > { %v869_v59 = vsel %vm564_vm3, %v867_v48, %v868_v56 }
  0xf7   : > { %546 = vrot.lane.b32.xlu0 %v539_v52, %s6703_s20  ;;  %722 = vrot.lane.b32.xlu2 %v717_v53, %s6703_s20  ;;  %v846_v52 = vsel %vm564_vm3, %v843_v46, %v845_v47  ;;  %v863_v53 = vmul.f32 %v860_v41, %v6882_v22  ;;  %v1077_v47 = vstv %s6101_s22  ;;  %s7233_s22 = sld [smem:[#allocation7 + $0x63]] }
  0xf8   : > { %548 = vrot.lane.b32.xlu1 %v540_v54, %s6703_s20 }
  0xf9   : > { %v870_v57 = vrot.slane %v863_v53, 7 }
  0xff   : > { %724 = vrot.lane.b32.xlu0 %v719_v62, %s6703_s20  ;;  %747 = vrot.lane.b32.xlu2 %v742_v61, %s6703_s20  ;;  %v871_v61 = vsel %vm564_vm3, %v868_v56, %v870_v57  ;;  %v888_v62 = vmul.f32 %v885_v51, %v6882_v22  ;;  %v1079_v56 = vmul.f32 %v1077_v47, %v7019_v12 }
 0x100   : > { %726 = vrot.lane.b32.xlu1 %v721_v1, %s6703_s20  ;;  %v893_v1 = vrot.slane %v887_v60, 7  ;;  %v1098_v57 = vmul.f32 %v1097_v55, %v7005_v4 }
 0x101   : > { %v895_v3 = vrot.slane %v888_v62, 7 }
 0x107   : > { %749 = vrot.lane.b32.xlu0 %v744_v7, %s6703_s20  ;;  %772 = vrot.lane.b32.xlu2 %v767_v6, %s6703_s20  ;;  %v894_v6 = vsel %vm564_vm3, %v892_v58, %v893_v1  ;;  %v896_v7 = vsel %vm564_vm3, %v893_v1, %v895_v3  ;;  %v1117_v3 = vstv %s6103_s26  ;;  %s7271_s26 = sld [smem:[#allocation7 + $0x2d]] }
 0x108   : > { %751 = vrot.lane.b32.xlu1 %v746_v10, %s6703_s20 }
 0x10f   : > { %774 = vrot.lane.b32.xlu0 %v769_v17, %s6703_s20  ;;  %797 = vrot.lane.b32.xlu2 %v792_v15, %s6703_s20  ;;  %v998_v15 = vmul.f32 %v997_v11, %v7005_v4  ;;  %v980_v17 = vmul.f32 %v977_v2, %v7021_v13  ;;  %v1118_v11 = vmul.f32 %v1117_v3, %v7005_v4 }
 0x110   : > { %776 = vrot.lane.b32.xlu1 %v771_v20, %s6703_s20 }
 0x111   : > { %v6959_v24 = vpop.permute.xlu2 %404 }
 0x117   : > { %799 = vrot.lane.b32.xlu0 %v794_v29, %s6703_s20  ;;  %822 = vrot.lane.b32.xlu2 %v817_v28, %s6703_s20 }
 0x118   : > { %801 = vrot.lane.b32.xlu1 %v796_v32, %s6703_s20  ;;  %v1019_v32 = vmul.f32 %v1017_v23, %v7019_v12  ;;  %v1100_v23 = vmul.f32 %v1097_v55, %v7021_v13 }
 0x119   : > { %v6969_v34 = vpop.permute.xlu2 %424 }
 0x11f   : > { %824 = vrot.lane.b32.xlu0 %v819_v39, %s6703_s20  ;;  %847 = vrot.lane.b32.xlu2 %v842_v38, %s6703_s20  ;;  %v1057_v39 = vstv %s6100_s24  ;;  %s7224_s24 = sld [smem:[#allocation7 + $0x24]] }
 0x120   : > { %826 = vrot.lane.b32.xlu1 %v821_v42, %s6703_s20  ;;  %v1058_v41 = vmul.f32 %v1057_v39, %v7005_v4  ;;  %v1040_v42 = vmul.f32 %v1037_v31, %v7021_v13  ;;  %v1060_v50 = vmul.f32 %v1057_v39, %v7021_v13 }
 0x121   : > { %v6979_v44 = vpop.permute.xlu2 %444 }
 0x127   : > { %849 = vrot.lane.b32.xlu0 %v844_v49, %s6703_s20  ;;  %872 = vrot.lane.b32.xlu2 %v867_v48, %s6703_s20  ;;  %v1059_v48 = vmul.f32 %v1057_v39, %v7019_v12  ;;  %v1078_v49 = vmul.f32 %v1077_v47, %v7005_v4 }
 0x128   : > { %851 = vrot.lane.b32.xlu1 %v846_v52, %s6703_s20 }
 0x129   : > { %v6989_v54 = vpop.permute.xlu2 %464 }
 0x12f   : > { %874 = vrot.lane.b32.xlu0 %v869_v59, %s6703_s20  ;;  %897 = vrot.lane.b32.xlu2 %v892_v58, %s6703_s20  ;;  %v1080_v58 = vmul.f32 %v1077_v47, %v7021_v13  ;;  %v7088_v59 = vstv %s6072_s25  ;;  %s7245_s25 = sld [smem:[#allocation7 + $0x33]] }
 0x130   : > { %876 = vrot.lane.b32.xlu1 %v871_v61, %s6703_s20  ;;  %v560_v62 = vmul.f32 %v7088_v59, %v6882_v22  ;;  %v7099_v1 = vmul.f32 %v7088_v59, %v6879_v21 }
 0x131   : > { %v6999_v63 = vpop.permute.xlu0 %406  ;;  %v7001_v16 = vpop.permute.xlu2 %484 }
 0x132   : > { %v7003_v0 = vpop.permute.xlu1 %408 }
 0x137   : > { %899 = vrot.lane.b32.xlu0 %v894_v6, %s6703_s20  ;;  %984 = vrot.lane.b32.xlu2 %v978_v5, %s6703_s20  ;;  %v7103_v5 = vstv %s332_s27  ;;  %s7280_s27 = sld [smem:[#allocation7 + $0x6c]] }
 0x138   : > { %901 = vrot.lane.b32.xlu1 %v896_v7, %s6703_s20  ;;  %v336_v6 = vmul.f32 %v7103_v5, %v6882_v22  ;;  %v1099_v7 = vmul.f32 %v1097_v55, %v7019_v12 }
 0x139   : > { %v7013_v8 = vpop.permute.xlu0 %426  ;;  %v7015_v9 = vpop.permute.xlu2 %504 }
 0x13a   : > { %v7017_v10 = vpop.permute.xlu1 %428 }
 0x13f   : > { %986 = vrot.lane.b32.xlu0 %v979_v14, %s6703_s20  ;;  %1004 = vrot.lane.b32.xlu2 %v998_v15, %s6703_s20  ;;  %v568_v14 = vrot.slane %v560_v62, 7  ;;  %v12831_v15 = vrot.slane %v7099_v1, 7  ;;  %v1120_v62 = vmul.f32 %v1117_v3, %v7021_v13 }
 0x140   : > { %988 = vrot.lane.b32.xlu1 %v980_v17, %s6703_s20  ;;  %v415_v17 = vadd.f32 %v7003_v0, %v336_v6 }
 0x141   : > { %v7029_v18 = vpop.permute.xlu0 %446  ;;  %v7031_v19 = vpop.permute.xlu2 %524  ;;  %v569_v0 = vsel %vm564_vm3, %v12831_v15, %v568_v14  ;;  %v1339_v15 = vstv %s7146_s10  ;;  %s7379_s10 = sld [smem:[#allocation7 + $0x8f]] }
 0x142   : > { %12964 = vst [vmem:[#allocation15_spill] sm:$0xff] %v7029_v18  ;;  %v7033_v20 = vpop.permute.xlu1 %448 }
 0x143   : > { %12965 = vst [vmem:[#allocation16_spill] sm:$0xff] %v7031_v19 }
 0x147   : > { %1006 = vrot.lane.b32.xlu0 %v999_v25, %s6703_s20  ;;  %1024 = vrot.lane.b32.xlu2 %v1018_v26, %s6703_s20  ;;  %v1289_v25 = vstv %s6112_s28  ;;  %v7112_v26 = vstv %s6073_s29  ;;  %s7285_s28 = sld [smem:[#allocation7 + $0x7d]] }
 0x148   : > { %1008 = vrot.lane.b32.xlu1 %v1000_v27, %s6703_s20  ;;  %v580_v27 = vmul.f32 %v7112_v26, %v6882_v22  ;;  %v7121_v31 = vmul.f32 %v7112_v26, %v6879_v21  ;;  %v1291_v6 = vmul.f32 %v1289_v25, %v7019_v12  ;;  %s7292_s29 = sld [smem:[#allocation7 + $0x3c]] }
 0x149   : > { %v7041_v28 = vpop.permute.xlu0 %466  ;;  %v7043_v29 = vpop.permute.xlu2 %544 }
 0x14a   : > { %12966 = vst [vmem:[#allocation17_spill] sm:$0xff] %v7041_v28  ;;  %v7045_v30 = vpop.permute.xlu1 %468 }
 0x14b   : > { %12967 = vst [vmem:[#allocation18_spill] sm:$0xff] %v7043_v29 }
 0x14d   : > { %v1414_v29 = vstv %s7285_s28  ;;  %s7724_s28 = sld [smem:[#allocation7 + $0x84]] }
 0x14f   : > { %1026 = vrot.lane.b32.xlu0 %v1019_v32, %s6703_s20  ;;  %1044 = vrot.lane.b32.xlu2 %v1038_v33, %s6703_s20 }
 0x150   : > { %1028 = vrot.lane.b32.xlu1 %v1020_v35, %s6703_s20  ;;  %v1290_v35 = vmul.f32 %v1289_v25, %v7005_v4 }
 0x151   : > { %v7053_v36 = vpop.permute.xlu0 %486  ;;  %v7055_v37 = vpop.permute.xlu2 %722 }
 0x152   : > { %12968 = vst [vmem:[#allocation19_spill] sm:$0xff] %v7053_v36  ;;  %v7057_v38 = vpop.permute.xlu1 %488  ;;  %v1296_v55 = vrot.slane %v1290_v35, 7  ;;  %v7325_v36 = vstv %s7280_s27  ;;  %s7707_s27 = sld [smem:[#allocation7 + $0x7b]] }
 0x153   : > { %12969 = vst [vmem:[#allocation20_spill] sm:$0xff] %v7055_v37 }
 0x154   : > { %12989 = vst [vmem:[#allocation40_spill] sm:$0xff] %v7325_v36 }
 0x157   : > { %1046 = vrot.lane.b32.xlu0 %v1039_v40, %s6703_s20  ;;  %1064 = vrot.lane.b32.xlu2 %v1058_v41, %s6703_s20  ;;  %v575_v40 = vadd.f32 %v569_v0, %v415_v17  ;;  %v7131_v41 = vstv %s6057_s30  ;;  %s7318_s30 = sld [smem:[#allocation7 + $0x36]] }
 0x158   : > { %1048 = vrot.lane.b32.xlu1 %v1040_v42, %s6703_s20  ;;  %v344_v42 = vmul.f32 %v7131_v41, %v6882_v22 }
 0x159   : > { %v7065_v43 = vpop.permute.xlu0 %506  ;;  %v7067_v45 = vpop.permute.xlu2 %747 }
 0x15a   : > { %12970 = vst [vmem:[#allocation21_spill] sm:$0xff] %v7065_v43  ;;  %v7069_v46 = vpop.permute.xlu1 %508 }
 0x15b   : > { %12971 = vst [vmem:[#allocation22_spill] sm:$0xff] %v7067_v45  ;;  %v7278_v45 = vstv %s7233_s22  ;;  %s7565_s22 = sld [smem:[#allocation7 + $0xa4]] }
 0x15c   : > { %12985 = vst [vmem:[#allocation36_spill] sm:$0xff] %v7278_v45 }
 0x15f   : > { %1066 = vrot.lane.b32.xlu0 %v1059_v48, %s6703_s20  ;;  %1084 = vrot.lane.b32.xlu2 %v1078_v49, %s6703_s20  ;;  %v587_v48 = vrot.slane %v580_v27, 7  ;;  %v12830_v49 = vrot.slane %v7121_v31, 7 }
 0x160   : > { %1068 = vrot.lane.b32.xlu1 %v1060_v50, %s6703_s20  ;;  %v1119_v50 = vmul.f32 %v1117_v3, %v7019_v12 }
 0x161   : > { %v7077_v51 = vpop.permute.xlu0 %526  ;;  %v7079_v52 = vpop.permute.xlu2 %772  ;;  %v588_v17 = vsel %vm564_vm3, %v12830_v49, %v587_v48 }
 0x162   : > { %12972 = vst [vmem:[#allocation23_spill] sm:$0xff] %v7077_v51  ;;  %v7081_v53 = vpop.permute.xlu1 %528 }
 0x163   : > { %12973 = vst [vmem:[#allocation24_spill] sm:$0xff] %v7079_v52 }
 0x167   : > { %1086 = vrot.lane.b32.xlu0 %v1079_v56, %s6703_s20  ;;  %1104 = vrot.lane.b32.xlu2 %v1098_v57, %s6703_s20  ;;  %v1314_v56 = vstv %s6113_s18  ;;  %v7139_v57 = vstv %s6088_s5  ;;  %s7327_s18 = sld [smem:[#allocation7 + $0x75]] }
 0x168   : > { %1088 = vrot.lane.b32.xlu1 %v1080_v58, %s6703_s20  ;;  %v435_v58 = vadd.f32 %v7017_v10, %v344_v42  ;;  %v1292_v10 = vmul.f32 %v1289_v25, %v7021_v13  ;;  %v1315_v0 = vmul.f32 %v1314_v56, %v7005_v4  ;;  %v7175_v42 = vstv %s7133_s7  ;;  %s7332_s5 = sld [smem:[#allocation7 + $0x86]] }
 0x169   : > { %v7091_v60 = vpop.permute.xlu0 %546  ;;  %v7093_v61 = vpop.permute.xlu2 %797  ;;  %v352_v48 = vmul.f32 %v7175_v42, %v6882_v22  ;;  %s7365_s7 = sld [smem:[#allocation7 + $0x3f]] }
 0x16a   : > { %12974 = vst [vmem:[#allocation25_spill] sm:$0xff] %v7091_v60  ;;  %v7101_v2 = vpop.permute.xlu1 %548 }
 0x16b   : > { %12975 = vst [vmem:[#allocation26_spill] sm:$0xff] %v7093_v61  ;;  %v7231_v61 = vstv %s7188_s15  ;;  %s7439_s15 = sld [smem:[#allocation7 + $0x57]] }
 0x16d   : > { %v7372_v19 = vstv %s7327_s18  ;;  %s7830_s18 = sld [smem:[#allocation7 + $0xbf]] }
 0x16e   : > { %12993 = vst [vmem:[#allocation44_spill] sm:$0xff] %v7372_v19 }
 0x16f   : > { %1106 = vrot.lane.b32.xlu0 %v1099_v7, %s6703_s20  ;;  %1124 = vrot.lane.b32.xlu2 %v1118_v11, %s6703_s20  ;;  %v916_v7 = vmul.f32 %v7139_v57, %v7021_v13  ;;  %v7150_v11 = vstv %s6074_s6  ;;  %s7339_s6 = sld [smem:[#allocation7 + $0x45]] }
 0x170   : > { %1108 = vrot.lane.b32.xlu1 %v1100_v23, %s6703_s20  ;;  %v599_v3 = vmul.f32 %v7150_v11, %v6882_v22  ;;  %v7172_v25 = vmul.f32 %v7150_v11, %v6879_v21 }
 0x171   : > { %v7126_v32 = vpop.permute.xlu0 %724  ;;  %v7128_v33 = vpop.permute.xlu2 %822 }
 0x172   : > { %12976 = vst [vmem:[#allocation27_spill] sm:$0xff] %v7126_v32  ;;  %v727_v39 = vpop.permute.xlu1 %726  ;;  %v12832_v49 = vrot.slane %v7172_v25, 7  ;;  %v1364_v32 = vstv %s7181_s14  ;;  %s6128_s14 = sld [smem:[#allocation7 + $0x92]] }
 0x173   : > { %12977 = vst [vmem:[#allocation28_spill] sm:$0xff] %v7128_v33  ;;  %v733_v47 = vadd.f32 %v727_v39, %v575_v40  ;;  %v594_v39 = vadd.f32 %v588_v17, %v435_v58  ;;  %v1297_v40 = vrot.slane %v1291_v6, 7  ;;  %v1316_v58 = vmul.f32 %v1314_v56, %v7019_v12 }
 0x174   : > { %v7186_v17 = vstv %s7141_s9  ;;  %v455_v6 = vadd.f32 %v7033_v20, %v352_v48  ;;  %v1366_v51 = vmul.f32 %v1364_v32, %v7019_v12  ;;  %s7374_s9 = sld [smem:[#allocation7 + $0x7e]] }
 0x175   : > { %v7160_v14 = vadd.f32 %v916_v7, %v733_v47  ;;  %v1299_v47 = vrot.slane %v1292_v10, 7  ;;  %v1321_v7 = vrot.slane %v1315_v0, 7  ;;  %v1298_v10 = vsel %vm564_vm3, %v1296_v55, %v1297_v40 }
 0x177   : > { %1126 = vrot.lane.b32.xlu0 %v1119_v50, %s6703_s20  ;;  %1301 = vrot.lane.b32.xlu2 %v1296_v55, %s6703_s20  ;;  %v1300_v0 = vsel %vm564_vm3, %v1297_v40, %v1299_v47  ;;  %v1340_v47 = vmul.f32 %v1339_v15, %v7005_v4 }
 0x178   : > { %1128 = vrot.lane.b32.xlu1 %v1120_v62, %s6703_s20  ;;  %v606_v62 = vrot.slane %v599_v3, 7  ;;  %v7196_v3 = vstv %s7152_s12  ;;  %s6104_s12 = sld [smem:[#allocation7 + $0x4e]] }
 0x179   : > { %v7165_v23 = vpop.permute.xlu0 %749  ;;  %v7167_v27 = vpop.permute.xlu2 %847  ;;  %v618_v20 = vmul.f32 %v7196_v3, %v6882_v22 }
 0x17a   : > { %12978 = vst [vmem:[#allocation29_spill] sm:$0xff] %v7165_v23  ;;  %v752_v35 = vpop.permute.xlu1 %751  ;;  %v607_v48 = vsel %vm564_vm3, %v12832_v49, %v606_v62  ;;  %v1346_v23 = vrot.slane %v1340_v47, 7 }
 0x17b   : > { %12979 = vst [vmem:[#allocation30_spill] sm:$0xff] %v7167_v27  ;;  %v758_v50 = vadd.f32 %v752_v35, %v594_v39  ;;  %v924_v35 = vmul.f32 %v7186_v17, %v7021_v13  ;;  %v1317_v39 = vmul.f32 %v1314_v56, %v7021_v13  ;;  %v7219_v56 = vmul.f32 %v7196_v3, %v6879_v21 }
 0x17d   : > { %v7207_v55 = vadd.f32 %v924_v35, %v758_v50  ;;  %v1322_v50 = vrot.slane %v1316_v58, 7  ;;  %v7222_v35 = vstv %s7177_s13  ;;  %v1324_v62 = vrot.slane %v1317_v39, 7  ;;  %s6095_s13 = sld [smem:[#allocation7 + $0x87]] }
 0x17e   : > { %v360_v49 = vmul.f32 %v7222_v35, %v6882_v22  ;;  %v12833_v33 = vrot.slane %v7219_v56, 7  ;;  %v932_v39 = vmul.f32 %v7231_v61, %v7021_v13 }
 0x17f   : > { %1303 = vrot.lane.b32.xlu0 %v1298_v10, %s6703_s20  ;;  %1326 = vrot.lane.b32.xlu2 %v1321_v7, %s6703_s20  ;;  %v1325_v47 = vsel %vm564_vm3, %v1322_v50, %v1324_v62  ;;  %v1365_v62 = vmul.f32 %v1364_v32, %v7005_v4 }
 0x180   : > { %1305 = vrot.lane.b32.xlu1 %v1300_v0, %s6703_s20  ;;  %v613_v0 = vadd.f32 %v607_v48, %v455_v6  ;;  %v475_v58 = vadd.f32 %v7045_v30, %v360_v49  ;;  %v1323_v6 = vsel %vm564_vm3, %v1321_v7, %v1322_v50  ;;  %v1341_v48 = vmul.f32 %v1339_v15, %v7019_v12 }
 0x181   : > { %v7212_v27 = vpop.permute.xlu0 %774  ;;  %v7214_v40 = vpop.permute.xlu2 %872  ;;  %v1342_v30 = vmul.f32 %v1339_v15, %v7021_v13  ;;  %v1371_v60 = vrot.slane %v1365_v62, 7 }
 0x182   : > { %12980 = vst [vmem:[#allocation31_spill] sm:$0xff] %v7212_v27  ;;  %v777_v10 = vpop.permute.xlu1 %776 }
 0x183   : > { %12981 = vst [vmem:[#allocation32_spill] sm:$0xff] %v7214_v40  ;;  %v783_v27 = vadd.f32 %v777_v10, %v613_v0  ;;  %v625_v40 = vrot.slane %v618_v20, 7  ;;  %v7243_v20 = vstv %s7198_s21  ;;  %s7479_s21 = sld [smem:[#allocation7 + $0x9b]] }
 0x184   : > { %v637_v49 = vmul.f32 %v7243_v20, %v6882_v22  ;;  %v7266_v15 = vmul.f32 %v7243_v20, %v6879_v21 }
 0x185   : > { %v7254_v7 = vadd.f32 %v932_v39, %v783_v27  ;;  %v626_v10 = vsel %vm564_vm3, %v12833_v33, %v625_v40  ;;  %v1347_v27 = vrot.slane %v1341_v48, 7  ;;  %v7269_v39 = vstv %s7224_s24  ;;  %s7520_s24 = sld [smem:[#allocation7 + $0x60]] }
 0x186   : > { %v1349_v40 = vrot.slane %v1342_v30, 7  ;;  %v368_v33 = vmul.f32 %v7269_v39, %v6882_v22  ;;  %v12834_v52 = vrot.slane %v7266_v15, 7  ;;  %v940_v30 = vmul.f32 %v7278_v45, %v7021_v13 }
 0x187   : > { %1328 = vrot.lane.b32.xlu0 %v1323_v6, %s6703_s20  ;;  %1351 = vrot.lane.b32.xlu2 %v1346_v23, %s6703_s20  ;;  %12982 = vst [vmem:[#allocation33_spill] sm:$0xff] %v7254_v7  ;;  %v1348_v48 = vsel %vm564_vm3, %v1346_v23, %v1347_v27  ;;  %v6511_v7 = vld [vmem:[#allocation2 + $0x8] sm:$0xff] }
 0x188   : > { %1330 = vrot.lane.b32.xlu1 %v1325_v47, %s6703_s20  ;;  %v632_v47 = vadd.f32 %v626_v10, %v475_v58  ;;  %v495_v58 = vadd.f32 %v7057_v38, %v368_v33  ;;  %v1389_v10 = vstv %s7238_s23  ;;  %v1350_v62 = vsel %vm564_vm3, %v1347_v27, %v1349_v40  ;;  %s7646_s23 = sld [smem:[#allocation7 + $0x69]] }
 0x189   : > { %v7259_v0 = vpop.permute.xlu0 %799  ;;  %v7261_v50 = vpop.permute.xlu2 %897  ;;  %v1367_v38 = vmul.f32 %v1364_v32, %v7021_v13  ;;  %v1372_v40 = vrot.slane %v1366_v51, 7  ;;  %v7501_v45 = vmul.f32 %v6511_v7, %v7103_v5 }
 0x18a   : > { %12983 = vst [vmem:[#allocation34_spill] sm:$0xff] %v7259_v0  ;;  %v802_v6 = vpop.permute.xlu1 %801  ;;  %v644_v0 = vrot.slane %v637_v49, 7  ;;  %v7290_v49 = vstv %s7245_s25  ;;  %s7656_s25 = sld [smem:[#allocation7 + $0xad]] }
 0x18b   : > { %12984 = vst [vmem:[#allocation35_spill] sm:$0xff] %v7261_v50  ;;  %v808_v50 = vadd.f32 %v802_v6, %v632_v47  ;;  %v656_v33 = vmul.f32 %v7290_v49, %v6882_v22  ;;  %v7313_v32 = vmul.f32 %v7290_v49, %v6879_v21 }
 0x18c   : > { %v645_v6 = vsel %vm564_vm3, %v12834_v52, %v644_v0  ;;  %v1374_v0 = vrot.slane %v1367_v38, 7  ;;  %v948_v38 = vmul.f32 %v7325_v36, %v7021_v13  ;;  %v7498_v36 = vstv %s7439_s15  ;;  %s7948_s15 = sld [smem:[#allocation7 + $0xd1]] }
 0x18d   : > { %v7301_v23 = vadd.f32 %v940_v30, %v808_v50  ;;  %v651_v50 = vadd.f32 %v645_v6, %v495_v58  ;;  %v7316_v30 = vstv %s7271_s26  ;;  %v663_v51 = vrot.slane %v656_v33, 7  ;;  %s7695_s26 = sld [smem:[#allocation7 + $0x72]] }
 0x18e   : > { %v376_v52 = vmul.f32 %v7316_v30, %v6882_v22  ;;  %v12835_v37 = vrot.slane %v7313_v32, 7  ;;  %v1391_v6 = vmul.f32 %v1389_v10, %v7019_v12  ;;  %v7337_v33 = vstv %s7292_s29  ;;  %s7741_s29 = sld [smem:[#allocation7 + $0x8d]] }
 0x18f   : > { %1353 = vrot.lane.b32.xlu0 %v1348_v48, %s6703_s20  ;;  %1376 = vrot.lane.b32.xlu2 %v1371_v60, %s6703_s20  ;;  %12986 = vst [vmem:[#allocation37_spill] sm:$0xff] %v7301_v23  ;;  %v1390_v48 = vmul.f32 %v1389_v10, %v7005_v4  ;;  %v1416_v23 = vmul.f32 %v1414_v29, %v7019_v12 }
 0x190   : > { %1355 = vrot.lane.b32.xlu1 %v1350_v62, %s6703_s20  ;;  %v515_v58 = vadd.f32 %v7069_v46, %v376_v52  ;;  %v1392_v46 = vmul.f32 %v1389_v10, %v7021_v13  ;;  %v675_v52 = vmul.f32 %v7337_v33, %v6882_v22  ;;  %v7360_v10 = vmul.f32 %v7337_v33, %v6879_v21 }
 0x191   : > { %v7306_v47 = vpop.permute.xlu0 %824  ;;  %v7308_v27 = vpop.permute.xlu2 %984  ;;  %v1396_v43 = vrot.slane %v1390_v48, 7 }
 0x192   : > { %12987 = vst [vmem:[#allocation38_spill] sm:$0xff] %v7306_v47  ;;  %v827_v62 = vpop.permute.xlu1 %826  ;;  %v1373_v47 = vsel %vm564_vm3, %v1371_v60, %v1372_v40  ;;  %v1375_v60 = vsel %vm564_vm3, %v1372_v40, %v1374_v0  ;;  %v12836_v28 = vrot.slane %v7360_v10, 7 }
 0x193   : > { %12988 = vst [vmem:[#allocation39_spill] sm:$0xff] %v7308_v27  ;;  %v833_v27 = vadd.f32 %v827_v62, %v651_v50  ;;  %v664_v62 = vsel %vm564_vm3, %v12835_v37, %v663_v51  ;;  %v1399_v51 = vrot.slane %v1392_v46, 7  ;;  %v956_v46 = vmul.f32 %v7372_v19, %v7021_v13 }
 0x194   : > { %v7415_v19 = vstv %s7374_s9  ;;  %s7903_s9 = sld [smem:[#allocation7 + $0xf5]] }
 0x195   : > { %v7348_v48 = vadd.f32 %v948_v38, %v833_v27  ;;  %v1397_v27 = vrot.slane %v1391_v6, 7  ;;  %v7363_v38 = vstv %s7318_s30  ;;  %12997 = vst [vmem:[#allocation48_spill] sm:$0xff] %v7415_v19  ;;  %s7752_s30 = sld [smem:[#allocation7 + $0xb6]] }
 0x196   : > { %v384_v37 = vmul.f32 %v7363_v38, %v6882_v22 }
 0x197   : > { %1378 = vrot.lane.b32.xlu0 %v1373_v47, %s6703_s20  ;;  %1401 = vrot.lane.b32.xlu2 %v1396_v43, %s6703_s20  ;;  %12990 = vst [vmem:[#allocation41_spill] sm:$0xff] %v7348_v48  ;;  %v1415_v47 = vmul.f32 %v1414_v29, %v7005_v4  ;;  %v1398_v6 = vsel %vm564_vm3, %v1396_v43, %v1397_v27 }
 0x198   : > { %1380 = vrot.lane.b32.xlu1 %v1375_v60, %s6703_s20  ;;  %v670_v60 = vadd.f32 %v664_v62, %v515_v58  ;;  %v535_v58 = vadd.f32 %v7081_v53, %v384_v37  ;;  %v1439_v62 = vstv %s7332_s5  ;;  %s7868_s5 = sld [smem:[#allocation7 + $0xda]] }
 0x199   : > { %v7353_v50 = vpop.permute.xlu0 %849  ;;  %v7355_v40 = vpop.permute.xlu2 %1004  ;;  %v1421_v48 = vrot.slane %v1415_v47, 7  ;;  %v1400_v47 = vsel %vm564_vm3, %v1397_v27, %v1399_v51  ;;  %v1422_v51 = vrot.slane %v1416_v23, 7 }
 0x19a   : > { %12991 = vst [vmem:[#allocation42_spill] sm:$0xff] %v7353_v50  ;;  %v852_v0 = vpop.permute.xlu1 %851  ;;  %v682_v50 = vrot.slane %v675_v52, 7  ;;  %v7384_v52 = vstv %s7339_s6  ;;  %s7871_s6 = sld [smem:[#allocation7 + $0xe3]] }
 0x19b   : > { %12992 = vst [vmem:[#allocation43_spill] sm:$0xff] %v7355_v40  ;;  %v858_v40 = vadd.f32 %v852_v0, %v670_v60  ;;  %v1417_v0 = vmul.f32 %v1414_v29, %v7021_v13  ;;  %v694_v37 = vmul.f32 %v7384_v52, %v6882_v22  ;;  %v7405_v29 = vmul.f32 %v7384_v52, %v6879_v21 }
 0x19c   : > { %v683_v53 = vsel %vm564_vm3, %v12836_v28, %v682_v50  ;;  %v1423_v23 = vsel %vm564_vm3, %v1421_v48, %v1422_v51 }
 0x19d   : > { %v7393_v43 = vadd.f32 %v956_v46, %v858_v40  ;;  %v689_v40 = vadd.f32 %v683_v53, %v535_v58  ;;  %v7408_v46 = vstv %s7365_s7  ;;  %v12841_v18 = vrot.slane %v7405_v29, 7  ;;  %s7888_s7 = sld [smem:[#allocation7 + $0xec]] }
 0x19e   : > { %v392_v50 = vmul.f32 %v7408_v46, %v6882_v22  ;;  %v1441_v58 = vmul.f32 %v1439_v62, %v7019_v12  ;;  %v1464_v53 = vstv %s7379_s10  ;;  %s7908_s10 = sld [smem:[#allocation7 + $0xc8]] }
 0x19f   : > { %1403 = vrot.lane.b32.xlu0 %v1398_v6, %s6703_s20  ;;  %1426 = vrot.lane.b32.xlu2 %v1421_v48, %s6703_s20  ;;  %12994 = vst [vmem:[#allocation45_spill] sm:$0xff] %v7393_v43  ;;  %v1440_v6 = vmul.f32 %v1439_v62, %v7005_v4  ;;  %v1424_v43 = vrot.slane %v1417_v0, 7  ;;  %v964_v0 = vmul.f32 %v7415_v19, %v7021_v13  ;;  %v7437_v19 = vstv %s6104_s12  ;;  %s7924_s12 = sld [smem:[#allocation7 + $0xfe]] }
 0x1a0   : > { %1405 = vrot.lane.b32.xlu1 %v1400_v47, %s6703_s20  ;;  %v555_v21 = vadd.f32 %v7101_v2, %v392_v50  ;;  %v1442_v48 = vmul.f32 %v1439_v62, %v7021_v13  ;;  %v1447_v50 = vrot.slane %v1441_v58, 7  ;;  %13001 = vst [vmem:[#allocation52_spill] sm:$0xff] %v7437_v19 }
 0x1a1   : > { %v7398_v60 = vpop.permute.xlu0 %874  ;;  %v7400_v27 = vpop.permute.xlu2 %1024  ;;  %v1425_v22 = vsel %vm564_vm3, %v1422_v51, %v1424_v43  ;;  %v1465_v43 = vmul.f32 %v1464_v53, %v7005_v4 }
 0x1a2   : > { %12995 = vst [vmem:[#allocation46_spill] sm:$0xff] %v7398_v60  ;;  %v877_v47 = vpop.permute.xlu1 %876  ;;  %v701_v60 = vrot.slane %v694_v37, 7 }
 0x1a3   : > { %12996 = vst [vmem:[#allocation47_spill] sm:$0xff] %v7400_v27  ;;  %v883_v28 = vadd.f32 %v877_v47, %v689_v40  ;;  %v1446_v27 = vrot.slane %v1440_v6, 7 }
 0x1a4   : > { %v702_v2 = vsel %vm564_vm3, %v12841_v18, %v701_v60  ;;  %v1467_v18 = vmul.f32 %v1464_v53, %v7021_v13 }
 0x1a5   : > { %v7427_v37 = vadd.f32 %v964_v0, %v883_v28  ;;  %v708_v40 = vadd.f32 %v702_v2, %v555_v21  ;;  %v1471_v28 = vrot.slane %v1465_v43, 7  ;;  %v7441_v0 = vstv %s6095_s13  ;;  %s7932_s13 = sld [smem:[#allocation7 + $0x98]] }
 0x1a6   : > { %13002 = vst [vmem:[#allocation53_spill] sm:$0xff] %v7441_v0  ;;  %v1448_v60 = vsel %vm564_vm3, %v1446_v27, %v1447_v50  ;;  %v972_v21 = vmul.f32 %v7441_v0, %v7021_v13 }
 0x1a7   : > { %1428 = vrot.lane.b32.xlu0 %v1423_v23, %s6703_s20  ;;  %1451 = vrot.lane.b32.xlu2 %v1446_v27, %s6703_s20  ;;  %12998 = vst [vmem:[#allocation49_spill] sm:$0xff] %v7427_v37  ;;  %v1449_v23 = vrot.slane %v1442_v48, 7  ;;  %v7453_v48 = vmul.f32 %v7437_v19, %v7019_v12  ;;  %v1140_v27 = vmul.f32 %v7437_v19, %v7021_v13  ;;  %v7488_v19 = vld [vmem:[#allocation2 + $0x30] sm:$0xff] }
 0x1a8   : > { %1430 = vrot.lane.b32.xlu1 %v1425_v22, %s6703_s20  ;;  %v1466_v22 = vmul.f32 %v1464_v53, %v7019_v12  ;;  %v6510_v53 = vld [vmem:[#allocation2] sm:$0xff] }
 0x1a9   : > { %v7432_v6 = vpop.permute.xlu0 %899  ;;  %v7434_v47 = vpop.permute.xlu2 %1044  ;;  %v1450_v58 = vsel %vm564_vm3, %v1447_v50, %v1449_v23  ;;  %v7461_v43 = vmul.f32 %v6510_v53, %v7103_v5  ;;  %v7470_v50 = vmul.f32 %v6510_v53, %v7222_v35  ;;  %v7485_v37 = vmul.f32 %v6510_v53, %v7363_v38 }
 0x1aa   : > { %12999 = vst [vmem:[#allocation50_spill] sm:$0xff] %v7432_v6  ;;  %v902_v51 = vpop.permute.xlu1 %901  ;;  %v1556_v6 = vstv %s6128_s14  ;;  %v1147_v0 = vrot.slane %v1140_v27, 7  ;;  %v7507_v27 = vmul.f32 %v6510_v53, %v7112_v26  ;;  %v13008_v5 = vrot.slane %v7453_v48, 7  ;;  %s7942_s14 = sld [smem:[#allocation7 + $0x107]] }
 0x1ab   : > { %13000 = vst [vmem:[#allocation51_spill] sm:$0xff] %v7434_v47  ;;  %v908_v62 = vadd.f32 %v902_v51, %v708_v40  ;;  %v7464_v51 = vmul.f32 %v6510_v53, %v7131_v41  ;;  %v7467_v40 = vmul.f32 %v6510_v53, %v7175_v42  ;;  %v1474_v47 = vrot.slane %v1467_v18, 7 }
 0x1ac   : > { %13006 = vst [vmem:[#allocation57_spill] sm:$0xff] %v7485_v37  ;;  %v7504_v37 = vmul.f32 %v6511_v7, %v7131_v41  ;;  %v1148_v26 = vsel %vm564_vm3, %v13008_v5, %v1147_v0  ;;  %v7527_v41 = vmul.f32 %v7498_v36, %v7019_v12 }
 0x1ad   : > { %v7458_v2 = vadd.f32 %v972_v21, %v908_v62  ;;  %v7477_v62 = vmul.f32 %v6510_v53, %v7269_v39 }
 0x1af   : > { %1453 = vrot.lane.b32.xlu0 %v1448_v60, %s6703_s20  ;;  %1476 = vrot.lane.b32.xlu2 %v1471_v28, %s6703_s20  ;;  %13003 = vst [vmem:[#allocation54_spill] sm:$0xff] %v7458_v2  ;;  %v7482_v2 = vmul.f32 %v6510_v53, %v7316_v30 }
 0x1b0   : > { %1455 = vrot.lane.b32.xlu1 %v1450_v58, %s6703_s20  ;;  %v1472_v58 = vrot.slane %v1466_v22, 7  ;;  %v7494_v22 = vmul.f32 %v6510_v53, %v7088_v59  ;;  %v7514_v59 = vmul.f32 %v6510_v53, %v7150_v11  ;;  %v1159_v11 = vmul.f32 %v7498_v36, %v7021_v13 }
 0x1b1   : > { %v7472_v23 = vpop.permute.xlu0 %986  ;;  %v7474_v60 = vpop.permute.xlu2 %1064 }
 0x1b2   : > { %13004 = vst [vmem:[#allocation55_spill] sm:$0xff] %v7472_v23  ;;  %v989_v21 = vpop.permute.xlu1 %988  ;;  %v1557_v23 = vmul.f32 %v1556_v6, %v7488_v19 }
 0x1b3   : > { %13005 = vst [vmem:[#allocation56_spill] sm:$0xff] %v7474_v60  ;;  %v7491_v60 = vmul.f32 %v6510_v53, %v7408_v46  ;;  %v995_v18 = vadd.f32 %v989_v21, %v7160_v14  ;;  %v1475_v14 = vsel %vm564_vm3, %v1472_v58, %v1474_v47  ;;  %v1473_v21 = vsel %vm564_vm3, %v1471_v28, %v1472_v58 }
 0x1b4   : > { %v7535_v47 = vmul.f32 %v6510_v53, %v7196_v3  ;;  %v7538_v28 = vmul.f32 %v6510_v53, %v7243_v20  ;;  %v565_v58 = vrot.slane %v7494_v22, 7  ;;  %v584_v20 = vrot.slane %v7507_v27, 7 }
 0x1b5   : > { %13007 = vst [vmem:[#allocation58_spill] sm:$0xff] %v7491_v60  ;;  %v7511_v60 = vmul.f32 %v6511_v7, %v7175_v42  ;;  %v7532_v42 = vmul.f32 %v6511_v7, %v7222_v35  ;;  %v7541_v0 = vadd.f32 %v1148_v26, %v995_v18  ;;  %v7551_v35 = vmul.f32 %v6510_v53, %v7290_v49 }
 0x1b6   : > { %v7559_v18 = vmul.f32 %v6511_v7, %v7363_v38  ;;  %v1576_v22 = vstv %s7479_s21  ;;  %v7569_v49 = vmul.f32 %v6511_v7, %v7408_v46  ;;  %v12850_v26 = vrot.slane %v7527_v41, 7  ;;  %s7966_s21 = sld [smem:[#allocation7 + $0xa1]] }
 0x1b7   : > { %1478 = vrot.lane.b32.xlu0 %v1473_v21, %s6703_s20  ;;  %1563 = vrot.lane.b32.xlu2 %v1557_v23, %s6703_s20  ;;  %13009 = vst [vmem:[#allocation59_spill] sm:$0xff] %v7541_v0  ;;  %v7544_v23 = vmul.f32 %v6511_v7, %v7269_v39  ;;  %v7548_v21 = vmul.f32 %v6511_v7, %v7316_v30  ;;  %v603_v30 = vrot.slane %v7514_v59, 7  ;;  %v1166_v0 = vrot.slane %v1159_v11, 7 }
 0x1b8   : > { %1480 = vrot.lane.b32.xlu1 %v1475_v14, %s6703_s20  ;;  %13012 = vst [vmem:[#allocation62_spill] sm:$0xff] %v7559_v18  ;;  %v7562_v39 = vmul.f32 %v6510_v53, %v7337_v33  ;;  %v622_v38 = vrot.slane %v7535_v47, 7  ;;  %v641_v27 = vrot.slane %v7538_v28, 7  ;;  %v7577_v33 = vmul.f32 %v6510_v53, %v7384_v52  ;;  %v7580_v18 = vld [vmem:[#allocation2 + $0x40] sm:$0x3] }
 0x1b9   : > { %v7553_v3 = vpop.permute.xlu0 %1006  ;;  %v7555_v5 = vpop.permute.xlu2 %1084  ;;  %v13013_v7 = vrot.slane %v7099_v1, 7  ;;  %v1577_v47 = vmul.f32 %v1576_v22, %v7488_v19  ;;  %v413_v28 = vadd.f32 %v6959_v24, %v7461_v43  ;;  %v13014_v52 = vrot.slane %v7121_v31, 7 }
 0x1ba   : > { %13010 = vst [vmem:[#allocation60_spill] sm:$0xff] %v7553_v3  ;;  %v1009_v14 = vpop.permute.xlu1 %1008  ;;  %v433_v1 = vadd.f32 %v6969_v34, %v7464_v51  ;;  %v7602_v59 = vstv %s7520_s24  ;;  %v1167_v24 = vsel %vm564_vm3, %v12850_v26, %v1166_v0  ;;  %v473_v31 = vadd.f32 %v6989_v54, %v7470_v50  ;;  %s8008_s24 = sld [smem:[#allocation7 + $0xaa]] }
 0x1bb   : > { %13011 = vst [vmem:[#allocation61_spill] sm:$0xff] %v7555_v5  ;;  %v7572_v5 = vld [vmem:[#allocation2 + $0x38] sm:$0xff]  ;;  %v1015_v3 = vadd.f32 %v1009_v14, %v7207_v55  ;;  %v567_v46 = vsel %vm564_vm3, %v565_v58, %v13013_v7  ;;  %v586_v53 = vsel %vm564_vm3, %v584_v20, %v13014_v52  ;;  %v12851_v55 = vrot.slane %v7562_v39, 7 }
 0x1bc   : > { %v1558_v11 = vmul.f32 %v1556_v6, %v7572_v5  ;;  %v1559_v14 = vmul.f32 %v1556_v6, %v7580_v18  ;;  %v453_v7 = vadd.f32 %v6979_v44, %v7467_v40  ;;  %v13015_v6 = vrot.slane %v7172_v25, 7 }
 0x1bd   : > { %v12849_v44 = vrot.slane %v7577_v33, 7  ;;  %v7616_v43 = vadd.f32 %v1167_v24, %v1015_v3  ;;  %v13017_v51 = vrot.slane %v7219_v56, 7  ;;  %v13018_v0 = vrot.slane %v7266_v15, 7 }
 0x1be   : > { %v7612_v34 = vsel %vm564_vm3, %v603_v30, %v13015_v6  ;;  %v13019_v25 = vrot.slane %v7313_v32, 7  ;;  %v13020_v50 = vrot.slane %v7551_v35, 7  ;;  %v13021_v3 = vrot.slane %v7360_v10, 7 }
 0x1bf   : > { %1565 = vrot.lane.b32.xlu0 %v1558_v11, %s6703_s20  ;;  %1583 = vrot.lane.b32.xlu2 %v1577_v47, %s6703_s20  ;;  %13016 = vst [vmem:[#allocation63_spill] sm:$0xff] %v7616_v43  ;;  %v7621_v40 = vsel %vm564_vm3, %v622_v38, %v13017_v51  ;;  %v7626_v54 = vsel %vm564_vm3, %v641_v27, %v13018_v0  ;;  %v13024_v32 = vrot.slane %v7405_v29, 7  ;;  %v1596_v10 = vstv %s7565_s22  ;;  %v13038_v43 = vld [vmem:[#allocation53_spill] sm:$0xff]  ;;  %s8037_s22 = sld [smem:[#allocation7 + $0xb3]] }
 0x1c0   : > { %1567 = vrot.lane.b32.xlu1 %v1559_v14, %s6703_s20  ;;  %v7633_v11 = vsel %vm564_vm3, %v13020_v50, %v13019_v25  ;;  %v7640_v56 = vsel %vm564_vm3, %v12851_v55, %v13021_v3  ;;  %v7660_v24 = vmul.f32 %v7602_v59, %v7019_v12  ;;  %v1178_v6 = vmul.f32 %v7602_v59, %v7021_v13 }
 0x1c1   : > { %v7642_v47 = vpop.permute.xlu0 %1026  ;;  %v7644_v15 = vpop.permute.xlu2 %1104  ;;  %v7653_v52 = vsel %vm564_vm3, %v12849_v44, %v13024_v32  ;;  %v414_v51 = vadd.f32 %v6999_v63, %v7501_v45  ;;  %v7666_v29 = vadd.f32 %v565_v58, %v413_v28  ;;  %v7668_v0 = vadd.f32 %v584_v20, %v433_v1  ;;  %v13026_v1 = vld [vmem:[#allocation33_spill] sm:$0xff] }
 0x1c2   : > { %13022 = vst [vmem:[#allocation64_spill] sm:$0xff] %v7642_v47  ;;  %v1029_v14 = vpop.permute.xlu1 %1028  ;;  %v7670_v25 = vadd.f32 %v603_v30, %v453_v7  ;;  %v493_v50 = vadd.f32 %v7001_v16, %v7477_v62  ;;  %v7674_v3 = vadd.f32 %v622_v38, %v473_v31  ;;  %v7678_v32 = vmul.f32 %v7139_v57, %v7005_v4 }
 0x1c3   : > { %13023 = vst [vmem:[#allocation65_spill] sm:$0xff] %v7644_v15  ;;  %v7682_v44 = vmul.f32 %v7186_v17, %v7005_v4  ;;  %v434_v63 = vadd.f32 %v7013_v8, %v7504_v37  ;;  %v7688_v45 = vmul.f32 %v7231_v61, %v7005_v4  ;;  %v1578_v58 = vmul.f32 %v1576_v22, %v7572_v5  ;;  %v13025_v8 = vld [vmem:[#allocation36_spill] sm:$0xff] }
 0x1c4   : > { %v1597_v16 = vmul.f32 %v1596_v10, %v7488_v19  ;;  %v513_v62 = vadd.f32 %v7015_v9, %v7482_v2  ;;  %v1579_v20 = vmul.f32 %v1576_v22, %v7580_v18  ;;  %v12852_v30 = vrot.slane %v7660_v24, 7  ;;  %v13027_v22 = vld [vmem:[#allocation40_spill] sm:$0xff] }
 0x1c5   : > { %v1185_v38 = vrot.slane %v1178_v6, 7  ;;  %v7698_v28 = vadd.f32 %v567_v46, %v414_v51  ;;  %v7702_v37 = vmul.f32 %v13025_v8, %v7005_v4  ;;  %v1035_v7 = vadd.f32 %v1029_v14, %v13026_v1  ;;  %v13047_v15 = vld [vmem:[#allocation16_spill] sm:$0xff] }
 0x1c6   : > { %v7709_v9 = vadd.f32 %v641_v27, %v493_v50  ;;  %v7713_v2 = vmul.f32 %v7139_v57, %v7019_v12  ;;  %v7717_v46 = vmul.f32 %v13027_v22, %v7005_v4  ;;  %v7721_v31 = vmul.f32 %v7186_v17, %v7019_v12  ;;  %v13028_v27 = vld [vmem:[#allocation44_spill] sm:$0xff] }
 0x1c7   : > { %1585 = vrot.lane.b32.xlu0 %v1578_v58, %s6703_s20  ;;  %1603 = vrot.lane.b32.xlu2 %v1597_v16, %s6703_s20  ;;  %v7726_v14 = vadd.f32 %v586_v53, %v434_v63  ;;  %v7730_v6 = vmul.f32 %v13028_v27, %v7005_v4  ;;  %v7734_v57 = vmul.f32 %v7231_v61, %v7019_v12  ;;  %v1194_v17 = vstv %s7646_s23  ;;  %v13032_v53 = vld [vmem:[#allocation48_spill] sm:$0xff]  ;;  %s8067_s23 = sld [smem:[#allocation7 + $0xbc]] }
 0x1c8   : > { %1587 = vrot.lane.b32.xlu1 %v1579_v20, %s6703_s20  ;;  %v13031_v58 = vrot.slane %v7551_v35, 7  ;;  %v7749_v63 = vmul.f32 %v13032_v53, %v7005_v4  ;;  %v1616_v1 = vstv %s7656_s25  ;;  %v1186_v61 = vsel %vm564_vm3, %v12852_v30, %v1185_v38  ;;  %v13034_v35 = vld [vmem:[#allocation52_spill] sm:$0xff]  ;;  %v13041_v30 = vld [vmem:[#allocation15_spill] sm:$0xff]  ;;  %s8077_s25 = sld [smem:[#allocation7 + $0x90]] }
 0x1c9   : > { %v7736_v51 = vpop.permute.xlu0 %1046  ;;  %v7738_v50 = vpop.permute.xlu2 %1124  ;;  %v7759_v26 = vmul.f32 %v13025_v8, %v7019_v12  ;;  %v7769_v55 = vadd.f32 %v1186_v61, %v1035_v7  ;;  %v7777_v38 = vmul.f32 %v13027_v22, %v7019_v12  ;;  %v7780_v8 = vmul.f32 %v1194_v17, %v7019_v12 }
 0x1ca   : > { %13029 = vst [vmem:[#allocation36_spill] sm:$0xff] %v7736_v51  ;;  %v7745_v16 = vadd.f32 %v13031_v58, %v513_v62  ;;  %v1049_v20 = vpop.permute.xlu1 %1048  ;;  %v7763_v62 = vmul.f32 %v13034_v35, %v7005_v4  ;;  %v7767_v58 = vmul.f32 %v7498_v36, %v7005_v4  ;;  %v1197_v35 = vmul.f32 %v1194_v17, %v7021_v13 }
 0x1cb   : > { %13030 = vst [vmem:[#allocation33_spill] sm:$0xff] %v7738_v50  ;;  %v7773_v50 = vmul.f32 %v13038_v43, %v7005_v4  ;;  %v454_v36 = vadd.f32 %v13041_v30, %v7511_v60  ;;  %v1598_v7 = vmul.f32 %v1596_v10, %v7572_v5  ;;  %v1617_v61 = vmul.f32 %v1616_v1, %v7488_v19  ;;  %v13046_v30 = vld [vmem:[#allocation57_spill] sm:$0xff] }
 0x1cc   : > { %13033 = vst [vmem:[#allocation40_spill] sm:$0xff] %v7759_v26  ;;  %v1599_v22 = vmul.f32 %v1596_v10, %v7580_v18  ;;  %v7794_v51 = vmul.f32 %v13028_v27, %v7019_v12  ;;  %v7798_v13 = vmul.f32 %v13032_v53, %v7019_v12  ;;  %v7801_v60 = vmul.f32 %v1194_v17, %v7005_v4 }
 0x1cd   : > { %13035 = vst [vmem:[#allocation44_spill] sm:$0xff] %v7763_v62  ;;  %v533_v47 = vadd.f32 %v13047_v15, %v13046_v30  ;;  %v1213_v27 = vstv %s7695_s26  ;;  %v1232_v17 = vstv %s7707_s27  ;;  %v1202_v15 = vrot.slane %v7780_v8, 7  ;;  %v6512_v8 = vld [vmem:[#allocation2 + $0x18] sm:$0xff]  ;;  %s8105_s26 = sld [smem:[#allocation7 + $0x99]] }
 0x1ce   : > { %13036 = vst [vmem:[#allocation48_spill] sm:$0xff] %v7767_v58  ;;  %v1204_v53 = vrot.slane %v1197_v35, 7  ;;  %v7833_v35 = vmul.f32 %v6512_v8, %v1213_v27  ;;  %s8113_s27 = sld [smem:[#allocation7 + $0xc5]] }
 0x1cf   : > { %13037 = vst [vmem:[#allocation52_spill] sm:$0xff] %v7769_v55  ;;  %v7789_v55 = vmul.f32 %v7602_v59, %v7005_v4  ;;  %1605 = vrot.lane.b32.xlu0 %v1598_v7, %s6703_s20  ;;  %1623 = vrot.lane.b32.xlu2 %v1617_v61, %s6703_s20  ;;  %v7813_v4 = vmul.f32 %v13038_v43, %v7019_v12  ;;  %v13049_v61 = vld [vmem:[#allocation37_spill] sm:$0xff]  ;;  %v7828_v12 = vstv %s7752_s30  ;;  %s8157_s30 = sld [smem:[#allocation7 + $0xd7]] }
 0x1d0   : > { %13039 = vst [vmem:[#allocation53_spill] sm:$0xff] %v7773_v50  ;;  %1607 = vrot.lane.b32.xlu1 %v1599_v22, %s6703_s20  ;;  %v7818_v7 = vadd.f32 %v7612_v34, %v454_v36  ;;  %v1055_v30 = vadd.f32 %v1049_v20, %v13049_v61  ;;  %v1270_v34 = vstv %s7741_s29  ;;  %v13053_v20 = vrot.slane %v7562_v39, 7  ;;  %v13061_v39 = vld [vmem:[#allocation17_spill] sm:$0xff]  ;;  %s8135_s29 = sld [smem:[#allocation7 + $0xa2]] }
 0x1d1   : > { %13040 = vst [vmem:[#allocation66_spill] sm:$0xff] %v7777_v38  ;;  %v7821_v59 = vpop.permute.xlu0 %1066  ;;  %v7823_v10 = vpop.permute.xlu2 %1301  ;;  %v13054_v61 = vrot.slane %v7453_v48, 7  ;;  %v13055_v22 = vrot.slane %v7763_v62, 7  ;;  %v7854_v38 = vmul.f32 %v6512_v8, %v1232_v17  ;;  %v1205_v48 = vsel %vm564_vm3, %v1202_v15, %v1204_v53  ;;  %v6513_v62 = vld [vmem:[#allocation2 + $0x20] sm:$0xff]  ;;  %v13065_v53 = vld [vmem:[#allocation58_spill] sm:$0xff] }
 0x1d2   : > { %13042 = vst [vmem:[#allocation15_spill] sm:$0xff] %v7789_v55  ;;  %v7838_v36 = vadd.f32 %v13053_v20, %v533_v47  ;;  %v474_v47 = vadd.f32 %v13061_v39, %v7532_v42  ;;  %v1215_v50 = vmul.f32 %v6513_v62, %v1213_v27  ;;  %v6514_v42 = vld [vmem:[#allocation2 + $0x28] sm:$0x3] }
 0x1d3   : > { %13043 = vst [vmem:[#allocation67_spill] sm:$0xff] %v7794_v51  ;;  %v1069_v51 = vpop.permute.xlu1 %1068  ;;  %v1216_v39 = vmul.f32 %v6514_v42, %v1213_v27  ;;  %v13067_v27 = vrot.slane %v7660_v24, 7 }
 0x1d4   : > { %13044 = vst [vmem:[#allocation68_spill] sm:$0xff] %v7798_v13  ;;  %v1251_v13 = vstv %s7724_s28  ;;  %s8127_s28 = sld [smem:[#allocation7 + $0xce]] }
 0x1d5   : > { %13045 = vst [vmem:[#allocation69_spill] sm:$0xff] %v7801_v60  ;;  %v7858_v20 = vmul.f32 %v6512_v8, %v1251_v13 }
 0x1d6   : > { %13048 = vst [vmem:[#allocation57_spill] sm:$0xff] %v7813_v4  ;;  %v13058_v4 = vrot.slane %v7767_v58, 7  ;;  %v13066_v58 = vld [vmem:[#allocation18_spill] sm:$0xff] }
 0x1d7   : > { %13050 = vst [vmem:[#allocation16_spill] sm:$0xff] %v7821_v59  ;;  %v13057_v59 = vrot.slane %v7527_v41, 7  ;;  %v1637_v41 = vmul.f32 %v7828_v12, %v7488_v19  ;;  %v553_v26 = vadd.f32 %v13066_v58, %v13065_v53  ;;  %v13072_v53 = vrot.slane %v7801_v60, 7  ;;  %v13077_v60 = vld [vmem:[#allocation41_spill] sm:$0xff] }
 0x1d8   : > { %13051 = vst [vmem:[#allocation37_spill] sm:$0xff] %v7823_v10  ;;  %v7845_v10 = vsel %vm564_vm3, %v13055_v22, %v13054_v61  ;;  %v1618_v22 = vmul.f32 %v1616_v1, %v7572_v5  ;;  %v7864_v61 = vadd.f32 %v1205_v48, %v1055_v30  ;;  %v1254_v48 = vmul.f32 %v6514_v42, %v1251_v13 }
 0x1d9   : > { %13052 = vst [vmem:[#allocation70_spill] sm:$0xff] %v7833_v35  ;;  %v7852_v43 = vsel %vm564_vm3, %v13058_v4, %v13057_v59  ;;  %v7866_v59 = vmul.f32 %v6512_v8, %v1270_v34  ;;  %v1619_v4 = vmul.f32 %v1616_v1, %v7580_v18  ;;  %1643 = vrot.lane.b32.xlu2 %v1637_v41, %s6703_s20  ;;  %v7906_v58 = vstv %s7830_s18  ;;  %s8182_s18 = sld [smem:[#allocation7 + $0xab]] }
 0x1da   : > { %13056 = vst [vmem:[#allocation71_spill] sm:$0xff] %v7845_v10  ;;  %v1235_v10 = vmul.f32 %v6514_v42, %v1232_v17  ;;  %1625 = vrot.lane.b32.xlu0 %v1618_v22, %s6703_s20  ;;  %v1253_v8 = vmul.f32 %v6513_v62, %v1251_v13  ;;  %v1221_v22 = vrot.slane %v1215_v50, 7  ;;  %v7891_v41 = vadd.f32 %v7621_v40, %v474_v47  ;;  %v7893_v13 = vpop.permute.xlu0 %1086 }
 0x1db   : > { %13059 = vst [vmem:[#allocation72_spill] sm:$0xff] %v7852_v43  ;;  %v1234_v43 = vmul.f32 %v6513_v62, %v1232_v17  ;;  %1627 = vrot.lane.b32.xlu1 %v1619_v4, %s6703_s20  ;;  %v13068_v17 = vrot.slane %v7789_v55, 7  ;;  %v7895_v4 = vpop.permute.xlu2 %1326  ;;  %v7900_v24 = vsel %vm564_vm3, %v13072_v53, %v1202_v15  ;;  %v1089_v50 = vpop.permute.xlu1 %1088  ;;  %v1223_v40 = vrot.slane %v1216_v39, 7 }
 0x1dc   : > { %13060 = vst [vmem:[#allocation73_spill] sm:$0xff] %v7854_v38  ;;  %v1242_v1 = vrot.slane %v1235_v10, 7  ;;  %v13074_v30 = vrot.slane %v7577_v33, 7  ;;  %v1259_v15 = vrot.slane %v1253_v8, 7  ;;  %v1261_v53 = vrot.slane %v1254_v48, 7 }
 0x1dd   : > { %13062 = vst [vmem:[#allocation17_spill] sm:$0xff] %v7858_v20  ;;  %v1240_v47 = vrot.slane %v1234_v43, 7  ;;  %v1075_v55 = vadd.f32 %v1069_v51, %v13077_v60  ;;  %v13078_v43 = vrot.slane %v7833_v35, 7  ;;  %v1638_v33 = vmul.f32 %v7828_v12, %v7572_v5 }
 0x1de   : > { %13063 = vst [vmem:[#allocation74_spill] sm:$0xff] %v7864_v61  ;;  %v7885_v61 = vsel %vm564_vm3, %v13068_v17, %v13067_v27  ;;  %v1272_v17 = vmul.f32 %v6513_v62, %v1270_v34  ;;  %v1273_v27 = vmul.f32 %v6514_v42, %v1270_v34  ;;  %v13075_v62 = vld [vmem:[#allocation19_spill] sm:$0xff]  ;;  %v2135_v34 = vstv %s7868_s5  ;;  %s8213_s5 = sld [smem:[#allocation7 + $0xb4]] }
 0x1df   : > { %13064 = vst [vmem:[#allocation75_spill] sm:$0xff] %v7866_v59  ;;  %v7922_v10 = vsel %vm564_vm3, %v13078_v43, %v1221_v22  ;;  %v1639_v51 = vmul.f32 %v7828_v12, %v7580_v18  ;;  %v1224_v60 = vsel %vm564_vm3, %v1221_v22, %v1223_v40  ;;  %v7939_v42 = vsel %vm564_vm3, %v1240_v47, %v1242_v1 }
 0x1e0   : > { %13069 = vst [vmem:[#allocation58_spill] sm:$0xff] %v7885_v61  ;;  %v2155_v39 = vstv %s7871_s6  ;;  %v13080_v8 = vrot.slane %v7854_v38, 7  ;;  %v7956_v48 = vsel %vm564_vm3, %v1259_v15, %v1261_v53  ;;  %v13082_v1 = vrot.slane %v7858_v20, 7  ;;  %v13107_v20 = vld [vmem:[#allocation62_spill] sm:$0xff]  ;;  %s8240_s6 = sld [smem:[#allocation7 + $0xbd]] }
 0x1e1   : > { %13070 = vst [vmem:[#allocation18_spill] sm:$0xff] %v7893_v13  ;;  %v494_v13 = vadd.f32 %v13075_v62, %v7544_v23  ;;  %v1657_v23 = vmul.f32 %v7906_v58, %v7488_v19  ;;  %v7968_v40 = vadd.f32 %v1224_v60, %v1075_v55  ;;  %v2175_v62 = vstv %s7888_s7  ;;  %s8252_s7 = sld [smem:[#allocation7 + $0xc6]] }
 0x1e2   : > { %13071 = vst [vmem:[#allocation76_spill] sm:$0xff] %v7895_v4  ;;  %v7912_v4 = vadd.f32 %v13074_v30, %v553_v26  ;;  %v7926_v26 = vld [vmem:[#allocation2 + $0x58] sm:$0x3]  ;;  %v7944_v30 = vld [vmem:[#allocation2 + $0x48] sm:$0xff]  ;;  %1645 = vrot.lane.b32.xlu0 %v1638_v33, %s6703_s20  ;;  %v7953_v12 = vsel %vm564_vm3, %v13080_v8, %v1240_v47  ;;  %v7961_v22 = vsel %vm564_vm3, %v13082_v1, %v1259_v15  ;;  %v7977_v43 = vpop.permute.xlu0 %1106  ;;  %v1676_v1 = vstv %s7908_s10  ;;  %s8270_s10 = sld [smem:[#allocation7 + $0xcf]] }
 0x1e3   : > { %13073 = vst [vmem:[#allocation77_spill] sm:$0xff] %v7900_v24  ;;  %v13076_v24 = vld [vmem:[#allocation20_spill] sm:$0xff]  ;;  %1663 = vrot.lane.b32.xlu2 %v1657_v23, %s6703_s20  ;;  %1647 = vrot.lane.b32.xlu1 %v1639_v51, %s6703_s20  ;;  %v7971_v47 = vmul.f32 %v2135_v34, %v7944_v30  ;;  %v7974_v53 = vmul.f32 %v2135_v34, %v7926_v26  ;;  %v7979_v15 = vpop.permute.xlu2 %1351  ;;  %v2195_v51 = vstv %s7903_s9  ;;  %v7996_v8 = vpop.permute.xlu1 %1108  ;;  %s8262_s9 = sld [smem:[#allocation7 + $0x96]] }
 0x1e4   : > { %v731_v61 = vadd.f32 %v13076_v24, %v7666_v29  ;;  %13079 = vst [vmem:[#allocation19_spill] sm:$0xff] %v7922_v10  ;;  %v1278_v29 = vrot.slane %v1272_v17, 7  ;;  %v1280_v24 = vrot.slane %v1273_v27, 7  ;;  %v7963_v17 = vld [vmem:[#allocation2 + $0x50] sm:$0xff]  ;;  %v13089_v27 = vrot.slane %v7866_v59, 7  ;;  %v13101_v59 = vld [vmem:[#allocation22_spill] sm:$0xff] }
 0x1e5   : > { %13081 = vst [vmem:[#allocation20_spill] sm:$0xff] %v7953_v12  ;;  %v7987_v23 = vmul.f32 %v2135_v34, %v7963_v17  ;;  %v7990_v55 = vmul.f32 %v2155_v39, %v7944_v30  ;;  %v7994_v60 = vadd.f32 %v7626_v54, %v494_v13  ;;  %v8014_v54 = vmul.f32 %v2175_v62, %v7944_v30 }
 0x1e6   : > { %13083 = vst [vmem:[#allocation41_spill] sm:$0xff] %v7961_v22  ;;  %v7984_v33 = vsel %vm564_vm3, %v13089_v27, %v1278_v29  ;;  %v8003_v27 = vmul.f32 %v2155_v39, %v7963_v17  ;;  %v8006_v34 = vadd.f32 %v7678_v32, %v731_v61  ;;  %v8017_v13 = vmul.f32 %v2175_v62, %v7926_v26  ;;  %v13097_v22 = vld [vmem:[#allocation21_spill] sm:$0xff] }
 0x1e7   : > { %13084 = vst [vmem:[#allocation78_spill] sm:$0xff] %v7968_v40  ;;  %v8000_v40 = vmul.f32 %v2155_v39, %v7926_v26  ;;  %v514_v12 = vadd.f32 %v13097_v22, %v7548_v21  ;;  %v8022_v39 = vmul.f32 %v2175_v62, %v7963_v17  ;;  %v8025_v32 = vmul.f32 %v2195_v51, %v7944_v30 }
 0x1e8   : > { %13085 = vst [vmem:[#allocation79_spill] sm:$0xff] %v7971_v47  ;;  %v2215_v61 = vstv %s7924_s12  ;;  %v1868_v10 = vstv %s7932_s13  ;;  %v756_v21 = vadd.f32 %v13101_v59, %v7668_v0  ;;  %v1659_v22 = vmul.f32 %v7906_v58, %v7580_v18  ;;  %s8278_s12 = sld [smem:[#allocation7 + $0x9f]] }
 0x1e9   : > { %13086 = vst [vmem:[#allocation80_spill] sm:$0xff] %v7974_v53  ;;  %v8040_v62 = vmul.f32 %v2195_v51, %v7926_v26  ;;  %v8051_v0 = vmul.f32 %v2215_v61, %v7926_v26  ;;  %v8054_v59 = vmul.f32 %v2215_v61, %v7963_v17  ;;  %s8296_s13 = sld [smem:[#allocation8]] }
 0x1ea   : > { %13087 = vst [vmem:[#allocation81_spill] sm:$0xff] %v7977_v43  ;;  %v1677_v43 = vmul.f32 %v1676_v1, %v7488_v19 }
 0x1eb   : > { %13088 = vst [vmem:[#allocation82_spill] sm:$0xff] %v7979_v15  ;;  %v13100_v15 = vld [vmem:[#allocation45_spill] sm:$0xff]  ;;  %1667 = vrot.lane.b32.xlu1 %v1659_v22, %s6703_s20 }
 0x1ec   : > { %13090 = vst [vmem:[#allocation83_spill] sm:$0xff] %v7984_v33  ;;  %v8011_v33 = vsel %vm564_vm3, %v1278_v29, %v1280_v24  ;;  %v1095_v29 = vadd.f32 %v1089_v50, %v13100_v15  ;;  %v1658_v24 = vmul.f32 %v7906_v58, %v7572_v5  ;;  %v8043_v50 = vmul.f32 %v2195_v51, %v7963_v17 }
 0x1ed   : > { %13091 = vst [vmem:[#allocation84_spill] sm:$0xff] %v7987_v23  ;;  %1683 = vrot.lane.b32.xlu2 %v1677_v43, %s6703_s20  ;;  %v8048_v15 = vmul.f32 %v2215_v61, %v7944_v30  ;;  %v8057_v58 = vstv %s7942_s14  ;;  %v1696_v51 = vstv %s7948_s15  ;;  %v1893_v43 = vstv %s7966_s21  ;;  %v8071_v61 = vpop.permute.xlu0 %1126  ;;  %s8308_s14 = sld [smem:[#allocation7 + $0xa8]] }
 0x1ee   : > { %13092 = vst [vmem:[#allocation85_spill] sm:$0xff] %v7990_v55  ;;  %1665 = vrot.lane.b32.xlu0 %v1658_v24, %s6703_s20  ;;  %v8064_v24 = vmul.f32 %v1868_v10, %v7488_v19  ;;  %v8080_v22 = vadd.f32 %v7939_v42, %v1095_v29  ;;  %v1918_v42 = vstv %s8008_s24  ;;  %s8334_s15 = sld [smem:[#allocation7 + $0xe0]] }
 0x1ef   : > { %13093 = vst [vmem:[#allocation86_spill] sm:$0xff] %v8000_v40  ;;  %s8352_s21 = sld [smem:[#allocation7 + $0x110]] }
 0x1f0   : > { %13094 = vst [vmem:[#allocation87_spill] sm:$0xff] %v8003_v27  ;;  %v1875_v29 = vrot.slane %v8064_v24, 7  ;;  %v1920_v24 = vmul.f32 %v1918_v42, %v7572_v5  ;;  %v13114_v27 = vld [vmem:[#allocation49_spill] sm:$0xff]  ;;  %s8364_s24 = sld [smem:[#allocation7 + $0xe9]] }
 0x1f1   : > { %13095 = vst [vmem:[#allocation88_spill] sm:$0xff] %v8014_v54  ;;  %v1943_v54 = vstv %s8037_s22  ;;  %s8381_s22 = sld [smem:[#allocation7 + $0x119]] }
 0x1f2   : > { %13096 = vst [vmem:[#allocation89_spill] sm:$0xff] %v8017_v13 }
 0x1f3   : > { %13098 = vst [vmem:[#allocation21_spill] sm:$0xff] %v8022_v39 }
 0x1f4   : > { %13099 = vst [vmem:[#allocation90_spill] sm:$0xff] %v8025_v32  ;;  %v8086_v32 = vadd.f32 %v7682_v44, %v756_v21  ;;  %v1679_v44 = vmul.f32 %v1676_v1, %v7580_v18  ;;  %v1896_v21 = vmul.f32 %v1893_v43, %v7580_v18 }
 0x1f5   : > { %13102 = vst [vmem:[#allocation45_spill] sm:$0xff] %v8040_v62  ;;  %v13108_v62 = vld [vmem:[#allocation23_spill] sm:$0xff] }
 0x1f6   : > { %13103 = vst [vmem:[#allocation22_spill] sm:$0xff] %v8043_v50  ;;  %v534_v13 = vadd.f32 %v13108_v62, %v13107_v20  ;;  %v1870_v50 = vmul.f32 %v1868_v10, %v7572_v5  ;;  %v1871_v20 = vmul.f32 %v1868_v10, %v7580_v18  ;;  %v8083_v62 = vadd.f32 %v7633_v11, %v514_v12 }
 0x1f7   : > { %13104 = vst [vmem:[#allocation91_spill] sm:$0xff] %v8048_v15  ;;  %v13109_v15 = vld [vmem:[#allocation24_spill] sm:$0xff]  ;;  %v1697_v10 = vmul.f32 %v1696_v51, %v7488_v19  ;;  %v1895_v11 = vmul.f32 %v1893_v43, %v7572_v5  ;;  %v1698_v12 = vmul.f32 %v1696_v51, %v7572_v5  ;;  %1687 = vrot.lane.b32.xlu1 %v1679_v44, %s6703_s20 }
 0x1f8   : > { %13105 = vst [vmem:[#allocation92_spill] sm:$0xff] %v8051_v0  ;;  %v781_v0 = vadd.f32 %v13109_v15, %v7670_v25  ;;  %v8088_v25 = vpop.permute.xlu1 %1128  ;;  %v1678_v15 = vmul.f32 %v1676_v1, %v7572_v5  ;;  %v1876_v39 = vrot.slane %v1870_v50, 7  ;;  %v1878_v40 = vrot.slane %v1871_v20, 7 }
 0x1f9   : > { %13106 = vst [vmem:[#allocation93_spill] sm:$0xff] %v8054_v59  ;;  %v8073_v59 = vpop.permute.xlu2 %1376  ;;  %v8116_v1 = vmul.f32 %v1918_v42, %v7488_v19  ;;  %1703 = vrot.lane.b32.xlu2 %v1697_v10, %s6703_s20  ;;  %v1901_v50 = vrot.slane %v1895_v11, 7  ;;  %v8145_v11 = vmul.f32 %v1943_v54, %v7488_v19 }
 0x1fa   : > { %13110 = vst [vmem:[#allocation62_spill] sm:$0xff] %v8071_v61  ;;  %v8097_v61 = vmul.f32 %v1893_v43, %v7488_v19  ;;  %v1921_v43 = vmul.f32 %v1918_v42, %v7580_v18  ;;  %1685 = vrot.lane.b32.xlu0 %v1678_v15, %s6703_s20  ;;  %v13116_v42 = vld [vmem:[#allocation26_spill] sm:$0xff]  ;;  %v8137_v15 = vpop.permute.xlu0 %1303  ;;  %v8142_v10 = vsel %vm564_vm3, %v1876_v39, %v1878_v40 }
 0x1fb   : > { %13111 = vst [vmem:[#allocation23_spill] sm:$0xff] %v8073_v59  ;;  %v8093_v59 = vmul.f32 %v8057_v58, %v7944_v30  ;;  %v806_v38 = vadd.f32 %v13116_v42, %v7674_v3  ;;  %v1945_v3 = vmul.f32 %v1943_v54, %v7572_v5  ;;  %v1926_v42 = vrot.slane %v1920_v24, 7 }
 0x1fc   : > { %13112 = vst [vmem:[#allocation24_spill] sm:$0xff] %v8080_v22  ;;  %v8108_v22 = vadd.f32 %v7640_v56, %v534_v13  ;;  %v1115_v56 = vadd.f32 %v7996_v8, %v13114_v27  ;;  %v1903_v8 = vrot.slane %v1896_v21, 7  ;;  %v1968_v27 = vstv %s8067_s23  ;;  %s8428_s23 = sld [smem:[#allocation7 + $0xf2]] }
 0x1fd   : > { %13113 = vst [vmem:[#allocation94_spill] sm:$0xff] %v8093_v59  ;;  %v8111_v59 = vadd.f32 %v7688_v45, %v781_v0  ;;  %v1699_v45 = vmul.f32 %v1696_v51, %v7580_v18  ;;  %v13115_v0 = vld [vmem:[#allocation25_spill] sm:$0xff]  ;;  %v8154_v21 = vsel %vm564_vm3, %v1875_v29, %v1876_v39  ;;  %v1928_v13 = vrot.slane %v1921_v43, 7 }
 0x1fe   : > { %v554_v20 = vadd.f32 %v13115_v0, %v7569_v49  ;;  %13117 = vst [vmem:[#allocation49_spill] sm:$0xff] %v8137_v15  ;;  %v8148_v49 = vstv %s8077_s25  ;;  %v13120_v40 = vrot.slane %v8097_v61, 7  ;;  %v1946_v15 = vmul.f32 %v1943_v54, %v7580_v18  ;;  %s8448_s25 = sld [smem:[#allocation7 + $0xb1]] }
 0x1ff   : > { %v8166_v53 = vmul.f32 %v1968_v27, %v7488_v19  ;;  %v8169_v39 = vadd.f32 %v7956_v48, %v1115_v56  ;;  %v8172_v0 = vsel %vm564_vm3, %v1901_v50, %v1903_v8  ;;  %v8176_v24 = vmul.f32 %v8148_v49, %v7488_v19  ;;  %v13123_v8 = vld [vmem:[#allocation27_spill] sm:$0xff]  ;;  %1707 = vrot.lane.b32.xlu1 %v1699_v45, %s6703_s20 }
 0x200   : > { %v8151_v44 = vpop.permute.xlu1 %1305  ;;  %v8179_v43 = vstv %s8105_s26  ;;  %v8185_v54 = vadd.f32 %v7653_v52, %v554_v20  ;;  %v12860_v48 = vrot.slane %v8145_v11, 7  ;;  %v1951_v56 = vrot.slane %v1945_v3, 7  ;;  %s8461_s26 = sld [smem:[#allocation7 + $0xba]] }
 0x201   : > { %v8139_v51 = vpop.permute.xlu2 %1401  ;;  %13119 = vst [vmem:[#allocation26_spill] sm:$0xff] %v8151_v44  ;;  %v8192_v44 = vadd.f32 %v7702_v37, %v806_v38  ;;  %v13125_v55 = vrot.slane %v8116_v1, 7  ;;  %1880 = vrot.lane.b32.xlu2 %v1875_v29, %s6703_s20  ;;  %v1953_v52 = vrot.slane %v1946_v15, 7  ;;  %v2018_v3 = vstv %s8127_s28  ;;  %s8534_s28 = sld [smem:[#allocation7 + $0xcc]] }
 0x202   : > { %13118 = vst [vmem:[#allocation25_spill] sm:$0xff] %v8139_v51  ;;  %v8162_v51 = vsel %vm564_vm3, %v13120_v40, %v1901_v50  ;;  %v1970_v40 = vmul.f32 %v1968_v27, %v7572_v5  ;;  %v1993_v50 = vstv %s8113_s27  ;;  %1705 = vrot.lane.b32.xlu0 %v1698_v12, %s6703_s20  ;;  %v8209_v38 = vstv %s8135_s29  ;;  %v13126_v12 = vld [vmem:[#allocation28_spill] sm:$0xff]  ;;  %v8217_v15 = vpop.permute.xlu0 %1328  ;;  %s8484_s27 = sld [smem:[#allocation7 + $0xc3]] }
 0x203   : > { %13121 = vst [vmem:[#allocation95_spill] sm:$0xff] %v8169_v39  ;;  %v732_v39 = vadd.f32 %v13123_v8, %v7698_v28  ;;  %v8200_v23 = vsel %vm564_vm3, %v13125_v55, %v1926_v42  ;;  %v1971_v28 = vmul.f32 %v1968_v27, %v7580_v18  ;;  %v1996_v55 = vmul.f32 %v1993_v50, %v7580_v18  ;;  %v13130_v8 = vld [vmem:[#allocation54_spill] sm:$0xff]  ;;  %s8564_s29 = sld [smem:[#allocation7 + $0xfb]] }
 0x204   : > { %13122 = vst [vmem:[#allocation96_spill] sm:$0xff] %v8176_v24  ;;  %v8195_v24 = vsel %vm564_vm3, %v1926_v42, %v1928_v13  ;;  %v1976_v37 = vrot.slane %v1970_v40, 7  ;;  %v1995_v13 = vmul.f32 %v1993_v50, %v7572_v5  ;;  %v831_v29 = vadd.f32 %v13126_v12, %v7709_v9 }
 0x205   : > { %13124 = vst [vmem:[#allocation27_spill] sm:$0xff] %v8192_v44  ;;  %v8224_v45 = vsel %vm564_vm3, %v12860_v48, %v1951_v56  ;;  %v8228_v27 = vmul.f32 %v8179_v43, %v7488_v19  ;;  %v8231_v40 = vmul.f32 %v1993_v50, %v7488_v19  ;;  %v1135_v9 = vadd.f32 %v8088_v25, %v13130_v8 }
 0x206   : > { %13127 = vst [vmem:[#allocation28_spill] sm:$0xff] %v8217_v15  ;;  %v2020_v20 = vmul.f32 %v2018_v3, %v7572_v5  ;;  %v2043_v15 = vstv %s8157_s30  ;;  %v8243_v48 = vsel %vm564_vm3, %v1951_v56, %v1953_v52  ;;  %v8247_v50 = vmul.f32 %v8209_v38, %v7488_v19  ;;  %s8596_s30 = sld [smem:[#allocation7 + $0xd8]] }
 0x207   : > { %13129 = vst [vmem:[#allocation98_spill] sm:$0xff] %v8228_v27  ;;  %v1978_v27 = vrot.slane %v1971_v28, 7  ;;  %v8250_v35 = vmul.f32 %v2018_v3, %v7488_v19  ;;  %v13133_v25 = vrot.slane %v8166_v53, 7  ;;  %v2003_v47 = vrot.slane %v1996_v55, 7  ;;  %1884 = vrot.lane.b32.xlu1 %v8142_v10, %s6703_s20 }
 0x208   : > { %v8235_v12 = vpop.permute.xlu1 %1330  ;;  %13132 = vst [vmem:[#allocation99_spill] sm:$0xff] %v8247_v50  ;;  %v8260_v44 = vstv %s8182_s18  ;;  %v8266_v52 = vmul.f32 %v2043_v15, %v7488_v19  ;;  %v2045_v28 = vmul.f32 %v2043_v15, %v7572_v5  ;;  %v2026_v55 = vrot.slane %v2020_v20, 7  ;;  %s8612_s18 = sld [smem:[#allocation7 + $0x104]] }
 0x209   : > { %v8219_v42 = vpop.permute.xlu2 %1426  ;;  %13131 = vst [vmem:[#allocation54_spill] sm:$0xff] %v8235_v12  ;;  %v8257_v8 = vsel %vm564_vm3, %v13133_v25, %v1976_v37  ;;  %v2001_v12 = vrot.slane %v1995_v13, 7  ;;  %v8273_v25 = vadd.f32 %v7713_v2, %v732_v39  ;;  %v8276_v13 = vadd.f32 %v8011_v33, %v1135_v9 }
 0x20a   : > { %13128 = vst [vmem:[#allocation97_spill] sm:$0xff] %v8219_v42  ;;  %v2021_v42 = vmul.f32 %v2018_v3, %v7580_v18  ;;  %v2046_v3 = vmul.f32 %v2043_v15, %v7580_v18  ;;  %v8281_v56 = vadd.f32 %v7717_v46, %v831_v29  ;;  %1882 = vrot.lane.b32.xlu0 %v8154_v21, %s6703_s20  ;;  %v13135_v15 = vrot.slane %v8097_v61, 7  ;;  %v13137_v46 = vld [vmem:[#allocation29_spill] sm:$0xff]  ;;  %v13138_v21 = vld [vmem:[#allocation30_spill] sm:$0xff] }
 0x20b   : > { %13134 = vst [vmem:[#allocation100_spill] sm:$0xff] %v8276_v13  ;;  %v8289_v2 = vsel %vm564_vm3, %v1976_v37, %v1978_v27  ;;  %v8294_v39 = vmul.f32 %v8260_v44, %v7488_v19  ;;  %v757_v20 = vadd.f32 %v13137_v46, %v7726_v14  ;;  %v856_v29 = vadd.f32 %v13138_v21, %v7745_v16 }
 0x20c   : > { %v2028_v50 = vrot.slane %v2021_v42, 7  ;;  %1905 = vrot.lane.b32.xlu2 %v13135_v15, %s6703_s20  ;;  %v8305_v61 = vsel %vm564_vm3, %v2001_v12, %v2003_v47  ;;  %v1524_v37 = vstv %s8213_s5  ;;  %v8310_v42 = vpop.permute.xlu0 %1353  ;;  %v13141_v9 = vrot.slane %v8231_v40, 7  ;;  %s8635_s5 = sld [smem:[#allocation7 + $0xe1]] }
 0x20d   : > { %13136 = vst [vmem:[#allocation101_spill] sm:$0xff] %v8294_v39  ;;  %v2051_v15 = vrot.slane %v2045_v28, 7  ;;  %v2053_v10 = vrot.slane %v2046_v3, 7  ;;  %v8327_v21 = vmul.f32 %v8148_v49, %v7580_v18  ;;  %v8331_v33 = vmul.f32 %v8148_v49, %v7572_v5 }
 0x20e   : > { %13139 = vst [vmem:[#allocation29_spill] sm:$0xff] %v8310_v42  ;;  %v8317_v14 = vsel %vm564_vm3, %v13141_v9, %v2001_v12  ;;  %v8323_v46 = vsel %vm564_vm3, %v2026_v55, %v2028_v50  ;;  %v1532_v12 = vstv %s8240_s6  ;;  %v13145_v28 = vrot.slane %v8250_v35, 7  ;;  %s8647_s6 = sld [smem:[#allocation7 + $0xd5]] }
 0x20f   : > { %13143 = vst [vmem:[#allocation103_spill] sm:$0xff] %v8327_v21  ;;  %v8342_v9 = vmul.f32 %v1524_v37, %v7488_v19  ;;  %v8346_v50 = vmul.f32 %v8179_v43, %v7580_v18  ;;  %v8350_v49 = vmul.f32 %v8179_v43, %v7572_v5  ;;  %v8355_v16 = vadd.f32 %v7721_v31, %v757_v20  ;;  %v13152_v20 = vld [vmem:[#allocation31_spill] sm:$0xff] }
 0x210   : > { %v8320_v47 = vpop.permute.xlu1 %1355  ;;  %13144 = vst [vmem:[#allocation104_spill] sm:$0xff] %v8331_v33  ;;  %v8339_v3 = vsel %vm564_vm3, %v13145_v28, %v2026_v55  ;;  %v8358_v55 = vadd.f32 %v7730_v6, %v856_v29  ;;  %v1540_v28 = vstv %s8252_s7  ;;  %v8362_v13 = vstv %s8262_s9  ;;  %1909 = vrot.lane.b32.xlu1 %v8172_v0, %s6703_s20  ;;  %s8658_s7 = sld [smem:[#allocation7 + $0x10d]] }
 0x211   : > { %v8312_v27 = vpop.permute.xlu2 %1451  ;;  %13142 = vst [vmem:[#allocation102_spill] sm:$0xff] %v8320_v47  ;;  %v13149_v43 = vrot.slane %v8266_v52, 7  ;;  %v8375_v31 = vmul.f32 %v1532_v12, %v7488_v19  ;;  %v8379_v6 = vmul.f32 %v8209_v38, %v7580_v18  ;;  %v782_v29 = vadd.f32 %v13152_v20, %v7818_v7  ;;  %s8738_s9 = sld [smem:[#allocation7 + $0xea]] }
 0x212   : > { %13140 = vst [vmem:[#allocation30_spill] sm:$0xff] %v8312_v27  ;;  %v8388_v33 = vstv %s8270_s10  ;;  %1907 = vrot.lane.b32.xlu0 %v8162_v51, %s6703_s20  ;;  %v8403_v7 = vmul.f32 %v1540_v28, %v7488_v19  ;;  %v8410_v20 = vstv %s8296_s13  ;;  %v8420_v51 = vmul.f32 %v8260_v44, %v7572_v5  ;;  %s8765_s10 = sld [smem:[#allocation7 + $0x116]] }
 0x213   : > { %13146 = vst [vmem:[#allocation105_spill] sm:$0xff] %v8342_v9  ;;  %s8784_s13 = sld [smem:[#allocation7 + $0x11f]] }
 0x214   : > { %13147 = vst [vmem:[#allocation106_spill] sm:$0xff] %v8346_v50  ;;  %v8367_v50 = vsel %vm564_vm3, %v2051_v15, %v2053_v10  ;;  %v13153_v10 = vld [vmem:[#allocation32_spill] sm:$0xff] }
 0x215   : > { %13148 = vst [vmem:[#allocation107_spill] sm:$0xff] %v8350_v49  ;;  %v8372_v49 = vsel %vm564_vm3, %v13149_v43, %v2051_v15  ;;  %v881_v9 = vadd.f32 %v13153_v10, %v7838_v36  ;;  %v8391_v15 = vstv %s8278_s12  ;;  %v13154_v43 = vrot.slane %v8116_v1, 7  ;;  %s8771_s12 = sld [smem:[#allocation7 + $0xf3]] }
 0x216   : > { %13150 = vst [vmem:[#allocation108_spill] sm:$0xff] %v8375_v31  ;;  %v8407_v36 = vmul.f32 %v8362_v13, %v7488_v19  ;;  %v8416_v1 = vmul.f32 %v8260_v44, %v7580_v18  ;;  %v8426_v10 = vstv %s8308_s14  ;;  %v8439_v44 = vmul.f32 %v1524_v37, %v7572_v5  ;;  %s8857_s14 = sld [smem:[#allocation7 + $0xfc]] }
 0x217   : > { %13151 = vst [vmem:[#allocation109_spill] sm:$0xff] %v8379_v6  ;;  %1930 = vrot.lane.b32.xlu2 %v13154_v43, %s6703_s20  ;;  %v8400_v6 = vmul.f32 %v8209_v38, %v7572_v5  ;;  %v8423_v38 = vmul.f32 %v1524_v37, %v7580_v18  ;;  %v8430_v43 = vpop.permute.xlu0 %1378  ;;  %v8459_v37 = vmul.f32 %v1540_v28, %v7572_v5 }
 0x218   : > { %13156 = vst [vmem:[#allocation32_spill] sm:$0xff] %v8403_v7  ;;  %v8450_v7 = vpop.permute.xlu1 %1380  ;;  %v8467_v31 = vmul.f32 %v8426_v10, %v7488_v19  ;;  %1934 = vrot.lane.b32.xlu1 %v8195_v24, %s6703_s20 }
 0x219   : > { %13155 = vst [vmem:[#allocation31_spill] sm:$0xff] %v8400_v6  ;;  %v8432_v0 = vpop.permute.xlu2 %1476  ;;  %v8453_v6 = vmul.f32 %v1532_v12, %v7572_v5 }
 0x21a   : > { %13157 = vst [vmem:[#allocation110_spill] sm:$0xff] %v8407_v36  ;;  %1932 = vrot.lane.b32.xlu0 %v8200_v23, %s6703_s20 }
 0x21b   : > { %13158 = vst [vmem:[#allocation111_spill] sm:$0xff] %v8410_v20  ;;  %v1756_v20 = vmul.f32 %v8426_v10, %v7572_v5 }
 0x21c   : > { %13159 = vst [vmem:[#allocation112_spill] sm:$0xff] %v8416_v1  ;;  %v8436_v1 = vmul.f32 %v8388_v33, %v7488_v19 }
 0x21d   : > { %13160 = vst [vmem:[#allocation113_spill] sm:$0xff] %v8420_v51  ;;  %v8442_v51 = vmul.f32 %v1532_v12, %v7580_v18  ;;  %v2255_v12 = vstv %s8352_s21  ;;  %s8909_s21 = sld [smem:[#allocation7 + $0x105]] }
 0x21e   : > { %13161 = vst [vmem:[#allocation114_spill] sm:$0xff] %v8423_v38  ;;  %v8446_v38 = vmul.f32 %v8391_v15, %v7488_v19  ;;  %v8499_v21 = vmul.f32 %v2255_v12, %v7926_v26  ;;  %v13180_v19 = vrot.slane %v8145_v11, 7 }
 0x21f   : > { %13162 = vst [vmem:[#allocation115_spill] sm:$0xff] %v8430_v43 }
 0x220   : > { %13163 = vst [vmem:[#allocation116_spill] sm:$0xff] %v8432_v0  ;;  %1955 = vrot.lane.b32.xlu2 %v13180_v19, %s6703_s20  ;;  %v8528_v19 = vstv %s8428_s23  ;;  %v8542_v39 = vpop.permute.xlu1 %1405  ;;  %1959 = vrot.lane.b32.xlu1 %v8243_v48, %s6703_s20  ;;  %v13210_v48 = vld [vmem:[#allocation66_spill] sm:$0xff]  ;;  %s8945_s23 = sld [smem:[#allocation7 + $0x117]] }
 0x221   : > { %13164 = vst [vmem:[#allocation117_spill] sm:$0xff] %v8436_v1  ;;  %v8456_v1 = vmul.f32 %v1540_v28, %v7580_v18  ;;  %v8478_v28 = vadd.f32 %v7749_v63, %v881_v9  ;;  %v13177_v63 = vld [vmem:[#allocation35_spill] sm:$0xff] }
 0x222   : > { %13165 = vst [vmem:[#allocation118_spill] sm:$0xff] %v8439_v44  ;;  %v2472_v44 = vstv %s8364_s24  ;;  %v906_v9 = vadd.f32 %v13177_v63, %v7912_v4  ;;  %v8532_v63 = vpop.permute.xlu2 %1563  ;;  %1957 = vrot.lane.b32.xlu0 %v8224_v45, %s6703_s20  ;;  %s8922_s24 = sld [smem:[#allocation9]] }
 0x223   : > { %13166 = vst [vmem:[#allocation119_spill] sm:$0xff] %v8442_v51  ;;  %v2447_v51 = vstv %s8334_s15  ;;  %v8537_v24 = vmul.f32 %v2472_v44, %v7963_v17  ;;  %v8540_v47 = vmul.f32 %v2472_v44, %v7926_v26  ;;  %s8872_s15 = sld [smem:[#allocation7 + $0x7]] }
 0x224   : > { %13167 = vst [vmem:[#allocation120_spill] sm:$0xff] %v8446_v38  ;;  %v2449_v0 = vmul.f32 %v2447_v51, %v7963_v17  ;;  %v2450_v43 = vmul.f32 %v2447_v51, %v7926_v26  ;;  %v8511_v4 = vmul.f32 %v2447_v51, %v7944_v30  ;;  %v8530_v51 = vpop.permute.xlu0 %1403 }
 0x225   : > { %13168 = vst [vmem:[#allocation121_spill] sm:$0xff] %v8450_v7  ;;  %v8471_v7 = vmul.f32 %v8057_v58, %v7926_v26 }
 0x226   : > { %13169 = vst [vmem:[#allocation122_spill] sm:$0xff] %v8453_v6  ;;  %v8475_v6 = vadd.f32 %v7734_v57, %v782_v29  ;;  %v13176_v57 = vld [vmem:[#allocation34_spill] sm:$0xff]  ;;  %v2455_v27 = vrot.slane %v2449_v0, 7  ;;  %v2457_v42 = vrot.slane %v2450_v43, 7  ;;  %v1719_v0 = vmul.f32 %v8362_v13, %v7580_v18 }
 0x227   : > { %13170 = vst [vmem:[#allocation123_spill] sm:$0xff] %v8456_v1  ;;  %v2275_v1 = vstv %s8381_s22  ;;  %v807_v29 = vadd.f32 %v13176_v57, %v7891_v41  ;;  %v8508_v41 = vmul.f32 %v2255_v12, %v7963_v17  ;;  %v8514_v57 = vmul.f32 %v2472_v44, %v7944_v30  ;;  %s8935_s22 = sld [smem:[#allocation7 + $0x10e]] }
 0x228   : > { %13171 = vst [vmem:[#allocation124_spill] sm:$0xff] %v8459_v37  ;;  %v8482_v37 = vmul.f32 %v8057_v58, %v7963_v17  ;;  %v8496_v58 = vmul.f32 %v2255_v12, %v7944_v30  ;;  %v8519_v23 = vmul.f32 %v2275_v1, %v7944_v30  ;;  %v8522_v11 = vmul.f32 %v2275_v1, %v7926_v26 }
 0x229   : > { %13172 = vst [vmem:[#allocation125_spill] sm:$0xff] %v8467_v31  ;;  %v8525_v12 = vmul.f32 %v2275_v1, %v7963_v17  ;;  %v8545_v1 = vstv %s8448_s25  ;;  %v8552_v43 = vstv %s8461_s26  ;;  %v8558_v44 = vmul.f32 %v8528_v19, %v7944_v30  ;;  %1984 = vrot.lane.b32.xlu1 %v8289_v2, %s6703_s20  ;;  %s8958_s25 = sld [smem:[#allocation7 + $0xde]] }
 0x22a   : > { %13173 = vst [vmem:[#allocation126_spill] sm:$0xff] %v8471_v7  ;;  %v8579_v7 = vld [vmem:[#allocation2 + $0x30] sm:$0xff]  ;;  %1982 = vrot.lane.b32.xlu0 %v8257_v8, %s6703_s20  ;;  %s8964_s26 = sld [smem:[#allocation7 + $0x4f]] }
 0x22b   : > { %13174 = vst [vmem:[#allocation127_spill] sm:$0xff] %v8478_v28 }
 0x22c   : > { %13175 = vst [vmem:[#allocation128_spill] sm:$0xff] %v8482_v37 }
 0x22d   : > { %13178 = vst [vmem:[#allocation34_spill] sm:$0xff] %v8496_v58  ;;  %v8583_v58 = vmul.f32 %v8579_v7, %v8545_v1 }
 0x22e   : > { %13179 = vst [vmem:[#allocation35_spill] sm:$0xff] %v8499_v21 }
 0x22f   : > { %13181 = vst [vmem:[#allocation129_spill] sm:$0xff] %v8508_v41 }
 0x230   : > { %13182 = vst [vmem:[#allocation130_spill] sm:$0xff] %v8514_v57 }
 0x231   : > { %13183 = vst [vmem:[#allocation131_spill] sm:$0xff] %v8519_v23  ;;  %v13192_v23 = vld [vmem:[#allocation53_spill] sm:$0xff]  ;;  %2009 = vrot.lane.b32.xlu1 %v8305_v61, %s6703_s20 }
 0x232   : > { %13184 = vst [vmem:[#allocation132_spill] sm:$0xff] %v8522_v11  ;;  %v8574_v11 = vstv %s8484_s27  ;;  %v8577_v41 = vadd.f32 %v13192_v23, %v906_v9  ;;  %v1757_v9 = vmul.f32 %v8426_v10, %v7580_v18  ;;  %v13197_v23 = vld [vmem:[#allocation38_spill] sm:$0xff]  ;;  %v8622_v10 = vpop.permute.xlu0 %1428  ;;  %2007 = vrot.lane.b32.xlu0 %v8317_v14, %s6703_s20  ;;  %s8975_s27 = sld [smem:[#allocation7 + $0x1]] }
 0x233   : > { %13185 = vst [vmem:[#allocation133_spill] sm:$0xff] %v8525_v12  ;;  %v13190_v12 = vld [vmem:[#allocation40_spill] sm:$0xff] }
 0x234   : > { %13186 = vst [vmem:[#allocation134_spill] sm:$0xff] %v8530_v51  ;;  %v1718_v51 = vmul.f32 %v8362_v13, %v7572_v5  ;;  %v8567_v21 = vadd.f32 %v13190_v12, %v807_v29  ;;  %v1737_v13 = vmul.f32 %v8391_v15, %v7572_v5  ;;  %v8587_v29 = vmul.f32 %v8579_v7, %v8552_v43 }
 0x235   : > { %13187 = vst [vmem:[#allocation135_spill] sm:$0xff] %v8532_v63  ;;  %v1738_v63 = vmul.f32 %v8391_v15, %v7580_v18  ;;  %v8590_v12 = vsel %vm564_vm3, %v2455_v27, %v2457_v42  ;;  %v1726_v15 = vrot.slane %v1719_v0, 7  ;;  %v13199_v42 = vrot.slane %v8166_v53, 7  ;;  %v8624_v0 = vpop.permute.xlu2 %1583 }
 0x236   : > { %13188 = vst [vmem:[#allocation136_spill] sm:$0xff] %v8542_v39  ;;  %v8562_v39 = vmul.f32 %v8528_v19, %v7963_v17  ;;  %v1724_v37 = vrot.slane %v1718_v51, 7  ;;  %v8609_v51 = vmul.f32 %v8579_v7, %v8574_v11  ;;  %v2480_v18 = vrot.slane %v8537_v24, 7 }
 0x237   : > { %13189 = vst [vmem:[#allocation137_spill] sm:$0xff] %v8558_v44  ;;  %1980 = vrot.lane.b32.xlu2 %v13199_v42, %s6703_s20  ;;  %v2482_v53 = vrot.slane %v8540_v47, 7  ;;  %v8628_v24 = vmul.f32 %v8388_v33, %v7572_v5  ;;  %v1762_v5 = vrot.slane %v1756_v20, 7  ;;  %v13214_v20 = vrot.slane %v8446_v38, 7 }
 0x238   : > { %13191 = vst [vmem:[#allocation40_spill] sm:$0xff] %v8567_v21  ;;  %v13198_v21 = vld [vmem:[#allocation39_spill] sm:$0xff]  ;;  %v8640_v47 = vsel %vm564_vm3, %v1724_v37, %v1726_v15  ;;  %v2505_v15 = vrot.slane %v8562_v39, 7  ;;  %v13222_v39 = vrot.slane %v8467_v31, 7  ;;  %v2572_v38 = vstv %s8658_s7  ;;  %s9096_s7 = sld [smem:[#allocation7 + $0xd9]] }
 0x239   : > { %13193 = vst [vmem:[#allocation53_spill] sm:$0xff] %v8577_v41  ;;  %v832_v41 = vadd.f32 %v13197_v23, %v7994_v60  ;;  %v993_v28 = vadd.f32 %v13198_v21, %v8006_v34  ;;  %v1743_v60 = vrot.slane %v1737_v13, 7  ;;  %v1745_v34 = vrot.slane %v1738_v63, 7  ;;  %2034 = vrot.lane.b32.xlu1 %v8323_v46, %s6703_s20 }
 0x23a   : > { %13194 = vst [vmem:[#allocation138_spill] sm:$0xff] %v8583_v58  ;;  %v13201_v21 = vrot.slane %v8511_v4, 7  ;;  %v8633_v13 = vstv %s8534_s28  ;;  %v13208_v23 = vrot.slane %v8407_v36, 7  ;;  %v13235_v36 = vld [vmem:[#allocation67_spill] sm:$0xff]  ;;  %2032 = vrot.lane.b32.xlu0 %v8339_v3, %s6703_s20  ;;  %v13270_v3 = vrot.slane %v8609_v51, 7  ;;  %s8996_s28 = sld [smem:[#allocation8 + $0x1]] }
 0x23b   : > { %13195 = vst [vmem:[#allocation139_spill] sm:$0xff] %v8587_v29  ;;  %v8650_v63 = vadd.f32 %v13210_v48, %v832_v41  ;;  %v8670_v41 = vmul.f32 %v8579_v7, %v8633_v13  ;;  %v13218_v48 = vld [vmem:[#allocation43_spill] sm:$0xff] }
 0x23c   : > { %13196 = vst [vmem:[#allocation140_spill] sm:$0xff] %v8590_v12  ;;  %v8619_v45 = vsel %vm564_vm3, %v13201_v21, %v2455_v27  ;;  %v8637_v27 = vpop.permute.xlu1 %1430  ;;  %v8645_v42 = vsel %vm564_vm3, %v13208_v23, %v1724_v37  ;;  %v1764_v21 = vrot.slane %v1757_v9, 7  ;;  %v8661_v37 = vsel %vm564_vm3, %v1743_v60, %v1745_v34 }
 0x23d   : > { %13200 = vst [vmem:[#allocation38_spill] sm:$0xff] %v8609_v51  ;;  %v8666_v9 = vsel %vm564_vm3, %v13214_v20, %v1743_v60  ;;  %v1013_v34 = vadd.f32 %v13218_v48, %v8086_v32  ;;  %v8680_v60 = vld [vmem:[#allocation2 + $0x40] sm:$0x3]  ;;  %v13221_v32 = vrot.slane %v8231_v40, 7  ;;  %v2547_v48 = vstv %s8612_s18  ;;  %v8721_v23 = vpop.permute.xlu2 %1603  ;;  %v13284_v51 = vld [vmem:[#allocation56_spill] sm:$0xff]  ;;  %s9043_s18 = sld [smem:[#allocation7 + $0x97]] }
 0x23e   : > { %13202 = vst [vmem:[#allocation39_spill] sm:$0xff] %v8619_v45  ;;  %v8684_v20 = vmul.f32 %v8680_v60, %v8388_v33  ;;  %v8704_v33 = vsel %vm564_vm3, %v2480_v18, %v2482_v53  ;;  %v13225_v40 = vrot.slane %v8514_v57, 7  ;;  %v8719_v53 = vpop.permute.xlu0 %1453  ;;  %v1776_v8 = vmul.f32 %v8680_v60, %v8545_v1 }
 0x23f   : > { %13203 = vst [vmem:[#allocation141_spill] sm:$0xff] %v8622_v10  ;;  %2005 = vrot.lane.b32.xlu2 %v13221_v32, %s6703_s20  ;;  %v2550_v31 = vmul.f32 %v2547_v48, %v7926_v26  ;;  %v1814_v14 = vmul.f32 %v8680_v60, %v8574_v11 }
 0x240   : > { %13204 = vst [vmem:[#allocation142_spill] sm:$0xff] %v8624_v0  ;;  %v8714_v32 = vsel %vm564_vm3, %v13225_v40, %v2480_v18  ;;  %v13230_v18 = vrot.slane %v8558_v44, 7 }
 0x241   : > { %13205 = vst [vmem:[#allocation143_spill] sm:$0xff] %v8628_v24  ;;  %v13211_v24 = vld [vmem:[#allocation44_spill] sm:$0xff]  ;;  %2059 = vrot.lane.b32.xlu1 %v8367_v50, %s6703_s20 }
 0x242   : > { %13206 = vst [vmem:[#allocation144_spill] sm:$0xff] %v8637_v27  ;;  %v13212_v0 = vrot.slane %v13211_v24, 7  ;;  %2057 = vrot.lane.b32.xlu0 %v8372_v49, %s6703_s20 }
 0x243   : > { %13207 = vst [vmem:[#allocation145_spill] sm:$0xff] %v8640_v47  ;;  %v2522_v47 = vstv %s8564_s29  ;;  %s9016_s29 = sld [smem:[#allocation7 + $0x49]] }
 0x244   : > { %13209 = vst [vmem:[#allocation146_spill] sm:$0xff] %v8645_v42  ;;  %v8654_v10 = vadd.f32 %v13212_v0, %v993_v28  ;;  %v2500_v28 = vmul.f32 %v8528_v19, %v7926_v26  ;;  %v13217_v0 = vld [vmem:[#allocation42_spill] sm:$0xff]  ;;  %v8690_v19 = vstv %s8596_s30  ;;  %v8740_v40 = vpop.permute.xlu1 %1455  ;;  %v8746_v42 = vmul.f32 %v2547_v48, %v7944_v30  ;;  %s9035_s30 = sld [smem:[#allocation9 + $0x1]] }
 0x245   : > { %13213 = vst [vmem:[#allocation66_spill] sm:$0xff] %v8661_v37  ;;  %v857_v24 = vadd.f32 %v13217_v0, %v8083_v62  ;;  %v2524_v62 = vmul.f32 %v2522_v47, %v7963_v17  ;;  %v8701_v0 = vsel %vm564_vm3, %v13222_v39, %v1762_v5  ;;  %v8717_v39 = vmul.f32 %v2522_v47, %v7944_v30  ;;  %v8815_v61 = vpop.permute.xlu2 %1623 }
 0x246   : > { %13215 = vst [vmem:[#allocation44_spill] sm:$0xff] %v8666_v9  ;;  %v8687_v9 = vsel %vm564_vm3, %v1762_v5, %v1764_v21  ;;  %v2525_v21 = vmul.f32 %v2522_v47, %v7926_v26  ;;  %v2507_v5 = vrot.slane %v2500_v28, 7  ;;  %v8732_v28 = vsel %vm564_vm3, %v13230_v18, %v2505_v15 }
 0x247   : > { %13216 = vst [vmem:[#allocation147_spill] sm:$0xff] %v8670_v41  ;;  %v8736_v47 = vmul.f32 %v8690_v19, %v7944_v30  ;;  %v2530_v37 = vrot.slane %v2524_v62, 7  ;;  %v2549_v18 = vmul.f32 %v2547_v48, %v7963_v17  ;;  %v12867_v27 = vrot.slane %v8717_v39, 7  ;;  %v13240_v48 = vld [vmem:[#allocation47_spill] sm:$0xff] }
 0x248   : > { %13219 = vst [vmem:[#allocation42_spill] sm:$0xff] %v8684_v20  ;;  %v2532_v20 = vrot.slane %v2525_v21, 7  ;;  %v8762_v62 = vsel %vm564_vm3, %v2505_v15, %v2507_v5  ;;  %v13239_v21 = vld [vmem:[#allocation46_spill] sm:$0xff] }
 0x249   : > { %13220 = vst [vmem:[#allocation43_spill] sm:$0xff] %v8687_v9  ;;  %v8743_v9 = vstv %s8647_s6  ;;  %v2555_v5 = vrot.slane %v2549_v18, 7  ;;  %v8813_v18 = vpop.permute.xlu0 %1478  ;;  %s9080_s6 = sld [smem:[#allocation7 + $0x91]] }
 0x24a   : > { %13223 = vst [vmem:[#allocation148_spill] sm:$0xff] %v8701_v0  ;;  %v8723_v0 = vld [vmem:[#allocation2 + $0x38] sm:$0xff] }
 0x24b   : > { %13224 = vst [vmem:[#allocation149_spill] sm:$0xff] %v8704_v33  ;;  %v1775_v2 = vmul.f32 %v8723_v0, %v8545_v1  ;;  %v8749_v1 = vstv %s8635_s5  ;;  %v1033_v33 = vadd.f32 %v13240_v48, %v8111_v59  ;;  %v1794_v15 = vmul.f32 %v8723_v0, %v8552_v43  ;;  %s9062_s5 = sld [smem:[#allocation7 + $0x10]] }
 0x24c   : > { %13226 = vst [vmem:[#allocation150_spill] sm:$0xff] %v8714_v32  ;;  %v13243_v59 = vrot.slane %v8250_v35, 7  ;;  %v1813_v35 = vmul.f32 %v8723_v0, %v8574_v11  ;;  %v8826_v11 = vstv %s8738_s9  ;;  %s9114_s9 = sld [smem:[#allocation7 + $0xdf]] }
 0x24d   : > { %13227 = vst [vmem:[#allocation151_spill] sm:$0xff] %v8717_v39  ;;  %v1781_v44 = vrot.slane %v1775_v2, 7  ;;  %v13247_v2 = vld [vmem:[#allocation68_spill] sm:$0xff]  ;;  %v8906_v46 = vpop.permute.xlu2 %1643 }
 0x24e   : > { %13228 = vst [vmem:[#allocation152_spill] sm:$0xff] %v8719_v53  ;;  %2030 = vrot.lane.b32.xlu2 %v13243_v59, %s6703_s20  ;;  %v13253_v59 = vld [vmem:[#allocation15_spill] sm:$0xff] }
 0x24f   : > { %13229 = vst [vmem:[#allocation153_spill] sm:$0xff] %v8721_v23  ;;  %v13236_v23 = vld [vmem:[#allocation48_spill] sm:$0xff] }
 0x250   : > { %13231 = vst [vmem:[#allocation154_spill] sm:$0xff] %v8732_v28  ;;  %v13237_v53 = vrot.slane %v13236_v23, 7  ;;  %v882_v28 = vadd.f32 %v13239_v21, %v8108_v22  ;;  %v8782_v23 = vmul.f32 %v2572_v38, %v7944_v30  ;;  %v8792_v22 = vsel %vm564_vm3, %v2530_v37, %v2532_v20 }
 0x251   : > { %13232 = vst [vmem:[#allocation155_spill] sm:$0xff] %v8736_v47  ;;  %v8755_v47 = vadd.f32 %v13235_v36, %v857_v24  ;;  %v1783_v36 = vrot.slane %v1776_v8, 7  ;;  %v8775_v24 = vmul.f32 %v8579_v7, %v8743_v9  ;;  %v8808_v20 = vmul.f32 %v8749_v1, %v7944_v30 }
 0x252   : > { %13233 = vst [vmem:[#allocation156_spill] sm:$0xff] %v8740_v40  ;;  %v8759_v40 = vadd.f32 %v13237_v53, %v1013_v34  ;;  %v1795_v34 = vmul.f32 %v8680_v60, %v8552_v43  ;;  %v2557_v43 = vrot.slane %v2550_v31, 7  ;;  %v8800_v53 = vsel %vm564_vm3, %v12867_v27, %v2530_v37 }
 0x253   : > { %13234 = vst [vmem:[#allocation157_spill] sm:$0xff] %v8746_v42  ;;  %v8811_v31 = vadd.f32 %v13247_v2, %v882_v28  ;;  %v8818_v37 = vsel %vm564_vm3, %v1781_v44, %v1783_v36  ;;  %v13251_v21 = vrot.slane %v8583_v58, 7  ;;  %v13254_v27 = vrot.slane %v13253_v59, 7  ;;  %v8832_v28 = vpop.permute.xlu1 %1480  ;;  %v13261_v58 = vld [vmem:[#allocation51_spill] sm:$0xff] }
 0x254   : > { %13238 = vst [vmem:[#allocation67_spill] sm:$0xff] %v8762_v62  ;;  %v1800_v2 = vrot.slane %v1794_v15, 7  ;;  %v8836_v36 = vsel %vm564_vm3, %v2555_v5, %v2557_v43  ;;  %v1819_v15 = vrot.slane %v1813_v35, 7 }
 0x255   : > { %13241 = vst [vmem:[#allocation48_spill] sm:$0xff] %v8775_v24  ;;  %v8823_v48 = vsel %vm564_vm3, %v13251_v21, %v1781_v44  ;;  %v8830_v8 = vadd.f32 %v13254_v27, %v1033_v33  ;;  %v2574_v21 = vmul.f32 %v2572_v38, %v7963_v17  ;;  %v2575_v27 = vmul.f32 %v2572_v38, %v7926_v26  ;;  %v13259_v33 = vld [vmem:[#allocation50_spill] sm:$0xff] }
 0x256   : > { %13242 = vst [vmem:[#allocation46_spill] sm:$0xff] %v8782_v23  ;;  %v907_v59 = vadd.f32 %v13259_v33, %v8185_v54  ;;  %v13263_v54 = vrot.slane %v8587_v29, 7  ;;  %v1073_v29 = vadd.f32 %v13284_v51, %v8281_v56 }
 0x257   : > { %13244 = vst [vmem:[#allocation47_spill] sm:$0xff] %v8792_v22  ;;  %v9192_v22 = vstv %s9080_s6  ;;  %s9538_s6 = sld [smem:[#allocation7 + $0xe7]] }
 0x258   : > { %13245 = vst [vmem:[#allocation158_spill] sm:$0xff] %v8800_v53  ;;  %v8865_v35 = vsel %vm564_vm3, %v13263_v54, %v1800_v2  ;;  %v9194_v53 = vld [vmem:[#allocation2 + $0x58] sm:$0x3] }
 0x259   : > { %13246 = vst [vmem:[#allocation159_spill] sm:$0xff] %v8808_v20  ;;  %v1802_v20 = vrot.slane %v1795_v34, 7  ;;  %v1821_v34 = vrot.slane %v1814_v14, 7  ;;  %v2622_v14 = vstv %s8784_s13  ;;  %s9211_s13 = sld [smem:[#allocation7 + $0x52]] }
 0x25a   : > { %13248 = vst [vmem:[#allocation68_spill] sm:$0xff] %v8813_v18 }
 0x25b   : > { %13249 = vst [vmem:[#allocation160_spill] sm:$0xff] %v8815_v61  ;;  %v13260_v61 = vld [vmem:[#allocation27_spill] sm:$0xff]  ;;  %v8860_v38 = vsel %vm564_vm3, %v1800_v2, %v1802_v20  ;;  %v2580_v20 = vrot.slane %v2574_v21, 7  ;;  %v8884_v2 = vmul.f32 %v8690_v19, %v7926_v26  ;;  %v8889_v54 = vsel %vm564_vm3, %v1819_v15, %v1821_v34 }
 0x25c   : > { %13250 = vst [vmem:[#allocation161_spill] sm:$0xff] %v8818_v37  ;;  %v13257_v37 = vrot.slane %v8746_v42, 7  ;;  %v1053_v43 = vadd.f32 %v13261_v58, %v13260_v61  ;;  %v8869_v58 = vmul.f32 %v8826_v11, %v7944_v30  ;;  %v2582_v61 = vrot.slane %v2575_v27, 7 }
 0x25d   : > { %13252 = vst [vmem:[#allocation162_spill] sm:$0xff] %v8823_v48  ;;  %v2597_v48 = vstv %s8765_s10  ;;  %s9176_s10 = sld [smem:[#allocation7 + $0x58]] }
 0x25e   : > { %13255 = vst [vmem:[#allocation15_spill] sm:$0xff] %v8832_v28  ;;  %v8841_v44 = vsel %vm564_vm3, %v13257_v37, %v2555_v5  ;;  %v1832_v28 = vmul.f32 %v8723_v0, %v8633_v13  ;;  %v1833_v5 = vmul.f32 %v8680_v60, %v8633_v13  ;;  %v8855_v37 = vstv %s8771_s12  ;;  %s9183_s12 = sld [smem:[#allocation7 + $0xa]] }
 0x25f   : > { %13256 = vst [vmem:[#allocation163_spill] sm:$0xff] %v8836_v36  ;;  %v13266_v13 = vrot.slane %v8266_v52, 7  ;;  %v8880_v33 = vmul.f32 %v2597_v48, %v7944_v30  ;;  %v8894_v52 = vsel %vm564_vm3, %v13270_v3, %v1819_v15  ;;  %v8898_v21 = vmul.f32 %v8855_v37, %v7944_v30  ;;  %v13276_v15 = vld [vmem:[#allocation69_spill] sm:$0xff] }
 0x260   : > { %13258 = vst [vmem:[#allocation164_spill] sm:$0xff] %v8841_v44  ;;  %v2599_v27 = vmul.f32 %v2597_v48, %v7963_v17  ;;  %v1838_v34 = vrot.slane %v1832_v28, 7  ;;  %v13277_v3 = vrot.slane %v13276_v15, 7  ;;  %v3187_v45 = vstv %s9211_s13  ;;  %s9634_s13 = sld [smem:[#allocation7 + $0x114]] }
 0x261   : > { %13262 = vst [vmem:[#allocation50_spill] sm:$0xff] %v8860_v38  ;;  %2055 = vrot.lane.b32.xlu2 %v13266_v13, %s6703_s20  ;;  %v13273_v13 = vld [vmem:[#allocation57_spill] sm:$0xff]  ;;  %v8918_v38 = vmul.f32 %v2622_v14, %v7944_v30 }
 0x262   : > { %13264 = vst [vmem:[#allocation27_spill] sm:$0xff] %v8865_v35  ;;  %v2600_v35 = vmul.f32 %v2597_v48, %v7926_v26  ;;  %v13280_v48 = vld [vmem:[#allocation55_spill] sm:$0xff] }
 0x263   : > { %13265 = vst [vmem:[#allocation51_spill] sm:$0xff] %v8869_v58  ;;  %v8902_v58 = vadd.f32 %v13273_v13, %v907_v59  ;;  %v2624_v59 = vmul.f32 %v2622_v14, %v7963_v17  ;;  %v2625_v13 = vmul.f32 %v2622_v14, %v7926_v26  ;;  %v994_v28 = vadd.f32 %v13280_v48, %v8273_v25  ;;  %v8937_v14 = vld [vmem:[#allocation2 + $0x10] sm:$0x3] }
 0x264   : > { %13267 = vst [vmem:[#allocation165_spill] sm:$0xff] %v8880_v33  ;;  %v1851_v25 = vmul.f32 %v8723_v0, %v8743_v9  ;;  %v2605_v48 = vrot.slane %v2599_v27, 7  ;;  %v8973_v27 = vmul.f32 %v8690_v19, %v7963_v17  ;;  %v13290_v19 = vrot.slane %v8880_v33, 7 }
 0x265   : > { %13268 = vst [vmem:[#allocation166_spill] sm:$0xff] %v8884_v2  ;;  %v8904_v2 = vpop.permute.xlu0 %1565  ;;  %v2630_v51 = vrot.slane %v2624_v59, 7  ;;  %v3462_v33 = vstv %s9043_s18  ;;  %s9530_s18 = sld [smem:[#allocation8 + $0x2]] }
 0x266   : > { %13269 = vst [vmem:[#allocation167_spill] sm:$0xff] %v8889_v54  ;;  %v1840_v54 = vrot.slane %v1833_v5, 7  ;;  %v8927_v5 = vsel %vm564_vm3, %v2580_v20, %v2582_v61  ;;  %v1852_v61 = vmul.f32 %v8680_v60, %v8743_v9  ;;  %v2632_v9 = vrot.slane %v2625_v13, 7 }
 0x267   : > { %13271 = vst [vmem:[#allocation168_spill] sm:$0xff] %v8894_v52  ;;  %v8913_v52 = vadd.f32 %v13277_v3, %v1053_v43  ;;  %v13282_v43 = vrot.slane %v8782_v23, 7  ;;  %v8962_v60 = vstv %s8872_s15  ;;  %v1857_v13 = vrot.slane %v1851_v25, 7  ;;  %s9265_s15 = sld [smem:[#allocation7 + $0x9a]] }
 0x268   : > { %13272 = vst [vmem:[#allocation169_spill] sm:$0xff] %v8898_v21  ;;  %v8915_v21 = vpop.permute.xlu1 %1567  ;;  %v3027_v49 = vmul.f32 %v8962_v60, %v8937_v14  ;;  %v9007_v25 = vmul.f32 %v8749_v1, %v7926_v26  ;;  %v9028_v26 = vsel %vm564_vm3, %v2630_v51, %v2632_v9  ;;  %v9045_v9 = vld [vmem:[#allocation2 + $0x28] sm:$0x3]  ;;  %v3043_v23 = vstv %s9062_s5  ;;  %s9536_s5 = sld [smem:[#allocation9 + $0x2]] }
 0x269   : > { %13274 = vst [vmem:[#allocation57_spill] sm:$0xff] %v8904_v2  ;;  %v8932_v15 = vsel %vm564_vm3, %v13282_v43, %v2580_v20  ;;  %v8948_v20 = vsel %vm564_vm3, %v1838_v34, %v1840_v54  ;;  %v13286_v43 = vrot.slane %v8670_v41, 7  ;;  %v8956_v2 = vstv %s8857_s14  ;;  %v13288_v54 = vld [vmem:[#allocation79_spill] sm:$0xff]  ;;  %s9249_s14 = sld [smem:[#allocation7 + $0xa0]] }
 0x26a   : > { %13275 = vst [vmem:[#allocation170_spill] sm:$0xff] %v8906_v46  ;;  %v2607_v46 = vrot.slane %v2600_v35, 7  ;;  %2142 = vrot.lane.b32.xlu2 %v13288_v54, %s6703_s20  ;;  %v8990_v54 = vsel %vm564_vm3, %v13290_v19, %v2605_v48  ;;  %v8994_v35 = vmul.f32 %v8956_v2, %v7944_v30  ;;  %v9014_v19 = vstv %s8909_s21  ;;  %s9290_s21 = sld [smem:[#allocation7 + $0xe8]] }
 0x26b   : > { %13278 = vst [vmem:[#allocation69_spill] sm:$0xff] %v8915_v21  ;;  %v8953_v3 = vsel %vm564_vm3, %v13286_v43, %v1838_v34  ;;  %v8977_v34 = vld [vmem:[#allocation2 + $0x8] sm:$0xff]  ;;  %v1859_v43 = vrot.slane %v1852_v61, 7  ;;  %v9011_v61 = vmul.f32 %v8749_v1, %v7963_v17  ;;  %v9262_v57 = vmul.f32 %v8579_v7, %v3462_v33 }
 0x26c   : > { %13279 = vst [vmem:[#allocation171_spill] sm:$0xff] %v8918_v38  ;;  %v8981_v59 = vmul.f32 %v8977_v34, %v8962_v60  ;;  %v9003_v50 = vsel %vm564_vm3, %v2605_v48, %v2607_v46  ;;  %v13304_v48 = vrot.slane %v8918_v38, 7  ;;  %v13335_v38 = vld [vmem:[#allocation72_spill] sm:$0xff] }
 0x26d   : > { %13281 = vst [vmem:[#allocation55_spill] sm:$0xff] %v8927_v5  ;;  %v8998_v56 = vpop.permute.xlu0 %1585 }
 0x26e   : > { %13283 = vst [vmem:[#allocation172_spill] sm:$0xff] %v8932_v15  ;;  %v9033_v1 = vsel %vm564_vm3, %v13304_v48, %v2630_v51  ;;  %v13308_v51 = vld [vmem:[#allocation61_spill] sm:$0xff]  ;;  %v9050_v48 = vsel %vm564_vm3, %v1857_v13, %v1859_v43  ;;  %v9071_v43 = vmul.f32 %v8826_v11, %v7963_v17 }
 0x26f   : > { %13285 = vst [vmem:[#allocation56_spill] sm:$0xff] %v8948_v20  ;;  %v13337_v15 = vld [vmem:[#allocation73_spill] sm:$0xff] }
 0x270   : > { %13287 = vst [vmem:[#allocation173_spill] sm:$0xff] %v8953_v3  ;;  %v9000_v3 = vpop.permute.xlu2 %1663  ;;  %v9025_v46 = vpop.permute.xlu1 %1587 }
 0x271   : > { %13289 = vst [vmem:[#allocation79_spill] sm:$0xff] %v8973_v27  ;;  %v13300_v27 = vld [vmem:[#allocation70_spill] sm:$0xff] }
 0x272   : > { %13291 = vst [vmem:[#allocation174_spill] sm:$0xff] %v8990_v54  ;;  %v13301_v41 = vrot.slane %v13300_v27, 7  ;;  %v1093_v27 = vadd.f32 %v13308_v51, %v8358_v55 }
 0x273   : > { %13292 = vst [vmem:[#allocation175_spill] sm:$0xff] %v8994_v35  ;;  %v13299_v35 = vld [vmem:[#allocation71_spill] sm:$0xff] }
 0x274   : > { %13293 = vst [vmem:[#allocation176_spill] sm:$0xff] %v8998_v56  ;;  %v9019_v20 = vadd.f32 %v13299_v35, %v994_v28  ;;  %v9040_v35 = vstv %s8935_s22  ;;  %s9320_s22 = sld [smem:[#allocation7 + $0xe2]] }
 0x275   : > { %13294 = vst [vmem:[#allocation177_spill] sm:$0xff] %v9000_v3  ;;  %v9023_v3 = vadd.f32 %v13301_v41, %v1073_v29  ;;  %v3034_v41 = vrot.slane %v3027_v49, 7  ;;  %v13313_v29 = vrot.slane %v8775_v24, 7 }
 0x276   : > { %13295 = vst [vmem:[#allocation178_spill] sm:$0xff] %v9003_v50 }
 0x277   : > { %13296 = vst [vmem:[#allocation179_spill] sm:$0xff] %v9007_v25  ;;  %v13306_v25 = vld [vmem:[#allocation60_spill] sm:$0xff]  ;;  %v9067_v55 = vsel %vm564_vm3, %v13313_v29, %v1857_v13  ;;  %v9088_v13 = vmul.f32 %v8855_v37, %v7963_v17  ;;  %v9091_v29 = vstv %s8958_s25  ;;  %v9106_v17 = vld [vmem:[#allocation2 + $0x20] sm:$0xff]  ;;  %s9355_s25 = sld [smem:[#allocation7 + $0x13]] }
 0x278   : > { %13297 = vst [vmem:[#allocation180_spill] sm:$0xff] %v9011_v61  ;;  %v1014_v28 = vadd.f32 %v13306_v25, %v8355_v16  ;;  %v9054_v16 = vmul.f32 %v9014_v19, %v7944_v30  ;;  %v9056_v25 = vld [vmem:[#allocation2 + $0x58] sm:$0x3]  ;;  %v2960_v61 = vstv %s8975_s27  ;;  %v9139_v56 = vpop.permute.xlu2 %1683  ;;  %s9404_s27 = sld [smem:[#allocation7 + $0xa9]] }
 0x279   : > { %13298 = vst [vmem:[#allocation181_spill] sm:$0xff] %v9014_v19  ;;  %v9060_v49 = vmul.f32 %v9056_v25, %v8826_v11  ;;  %v9075_v51 = vmul.f32 %v9056_v25, %v8855_v37  ;;  %v9094_v11 = vstv %s8964_s26  ;;  %v2963_v24 = vmul.f32 %v2960_v61, %v8937_v14  ;;  %v13353_v19 = vld [vmem:[#allocation21_spill] sm:$0xff]  ;;  %s9373_s26 = sld [smem:[#allocation7 + $0x5b]] }
 0x27a   : > { %13302 = vst [vmem:[#allocation71_spill] sm:$0xff] %v9025_v46  ;;  %v9110_v37 = vmul.f32 %v9106_v17, %v9094_v11  ;;  %v9135_v46 = vld [vmem:[#allocation2 + $0x40] sm:$0x3]  ;;  %v9163_v54 = vadd.f32 %v13335_v38, %v1014_v28  ;;  %v13340_v38 = vld [vmem:[#allocation64_spill] sm:$0xff]  ;;  %v2962_v32 = vmul.f32 %v8977_v34, %v2960_v61 }
 0x27b   : > { %13303 = vst [vmem:[#allocation70_spill] sm:$0xff] %v9028_v26  ;;  %v9149_v26 = vstv %s8996_s28  ;;  %s9431_s28 = sld [smem:[#allocation7 + $0xa3]] }
 0x27c   : > { %13305 = vst [vmem:[#allocation182_spill] sm:$0xff] %v9033_v1  ;;  %v9155_v1 = vstv %s9035_s30  ;;  %v13346_v28 = vrot.slane %v9110_v37, 7  ;;  %s9502_s30 = sld [smem:[#allocation7 + $0xeb]] }
 0x27d   : > { %13307 = vst [vmem:[#allocation60_spill] sm:$0xff] %v9040_v35 }
 0x27e   : > { %13309 = vst [vmem:[#allocation61_spill] sm:$0xff] %v9050_v48 }
 0x27f   : > { %13310 = vst [vmem:[#allocation183_spill] sm:$0xff] %v9054_v16  ;;  %v9078_v16 = vstv %s8945_s23  ;;  %s9351_s23 = sld [smem:[#allocation7 + $0x61]] }
 0x280   : > { %13311 = vst [vmem:[#allocation184_spill] sm:$0xff] %v9056_v25 }
 0x281   : > { %13312 = vst [vmem:[#allocation185_spill] sm:$0xff] %v9060_v49  ;;  %v9084_v49 = vmul.f32 %v9040_v35, %v7944_v30  ;;  %v13323_v30 = vrot.slane %v8981_v59, 7 }
 0x282   : > { %13314 = vst [vmem:[#allocation186_spill] sm:$0xff] %v9067_v55  ;;  %v9128_v55 = vld [vmem:[#allocation2 + $0x50] sm:$0xff] }
 0x283   : > { %13315 = vst [vmem:[#allocation187_spill] sm:$0xff] %v9071_v43  ;;  %v13322_v43 = vld [vmem:[#allocation85_spill] sm:$0xff]  ;;  %v9132_v48 = vmul.f32 %v9128_v55, %v8956_v2 }
 0x284   : > { %13316 = vst [vmem:[#allocation188_spill] sm:$0xff] %v9075_v51  ;;  %v13321_v51 = vld [vmem:[#allocation84_spill] sm:$0xff]  ;;  %2162 = vrot.lane.b32.xlu2 %v13322_v43, %s6703_s20 }
 0x285   : > { %13317 = vst [vmem:[#allocation189_spill] sm:$0xff] %v9078_v16  ;;  %2144 = vrot.lane.b32.xlu0 %v13321_v51, %s6703_s20  ;;  %v3246_v51 = vmul.f32 %v9094_v11, %v9045_v9  ;;  %v13324_v43 = vld [vmem:[#allocation80_spill] sm:$0xff] }
 0x286   : > { %13318 = vst [vmem:[#allocation190_spill] sm:$0xff] %v9084_v49  ;;  %v3035_v49 = vsel %vm564_vm3, %v13323_v30, %v3034_v41  ;;  %2146 = vrot.lane.b32.xlu1 %v13324_v43, %s6703_s20  ;;  %v9126_v30 = vmul.f32 %v9056_v25, %v8956_v2  ;;  %v9137_v43 = vpop.permute.xlu0 %1605  ;;  %v3179_v2 = vstv %s9016_s29  ;;  %v13354_v25 = vld [vmem:[#allocation90_spill] sm:$0xff]  ;;  %s9467_s29 = sld [smem:[#allocation7 + $0xf1]] }
 0x287   : > { %13319 = vst [vmem:[#allocation191_spill] sm:$0xff] %v9088_v13  ;;  %v9118_v13 = vld [vmem:[#allocation2 + $0x48] sm:$0xff]  ;;  %v3041_v21 = vadd.f32 %v3035_v49, %v2963_v24  ;;  %v3182_v50 = vmul.f32 %v3179_v2, %v9045_v9  ;;  %v3253_v5 = vrot.slane %v3246_v51, 7  ;;  %v9172_v24 = vmul.f32 %v8723_v0, %v3462_v33  ;;  %v13342_v51 = vld [vmem:[#allocation65_spill] sm:$0xff] }
 0x288   : > { %13320 = vst [vmem:[#allocation192_spill] sm:$0xff] %v9091_v29  ;;  %v9122_v41 = vmul.f32 %v9118_v13, %v9078_v16  ;;  %v3465_v49 = vmul.f32 %v3462_v33, %v9135_v46 }
 0x289   : > { %13326 = vst [vmem:[#allocation85_spill] sm:$0xff] %v9126_v30  ;;  %v9146_v30 = vstv %s8922_s24  ;;  %v3185_v44 = vadd.f32 %v3182_v50, %v3041_v21  ;;  %v3254_v62 = vsel %vm564_vm3, %v13346_v28, %v3253_v5  ;;  %v9209_v21 = vstv %s9114_s9  ;;  %s9299_s24 = sld [smem:[#allocation7 + $0x19]] }
 0x28a   : > { %13325 = vst [vmem:[#allocation84_spill] sm:$0xff] %v9122_v41  ;;  %v9143_v41 = vmul.f32 %v9118_v13, %v9091_v29  ;;  %v13348_v5 = vrot.slane %v8981_v59, 7  ;;  %v9233_v29 = vld [vmem:[#allocation2 + $0x18] sm:$0xff]  ;;  %s9582_s9 = sld [smem:[#allocation7 + $0xf9]] }
 0x28b   : > { %13327 = vst [vmem:[#allocation80_spill] sm:$0xff] %v9132_v48  ;;  %v9152_v48 = vpop.permute.xlu1 %1607  ;;  %v3260_v35 = vadd.f32 %v3254_v62, %v3185_v44  ;;  %v3684_v44 = vmul.f32 %v9209_v21, %v9194_v53 }
 0x28c   : > { %13328 = vst [vmem:[#allocation193_spill] sm:$0xff] %v9137_v43  ;;  %v9158_v43 = vld [vmem:[#allocation2] sm:$0xff] }
 0x28d   : > { %13329 = vst [vmem:[#allocation194_spill] sm:$0xff] %v9139_v56  ;;  %v3025_v56 = vmul.f32 %v9158_v43, %v8962_v60  ;;  %v9180_v60 = vadd.f32 %v13340_v38, %v8475_v6  ;;  %v13344_v6 = vld [vmem:[#allocation87_spill] sm:$0xff]  ;;  %v13345_v38 = vld [vmem:[#allocation88_spill] sm:$0xff]  ;;  %v2961_v16 = vmul.f32 %v9158_v43, %v2960_v61  ;;  %v3181_v61 = vmul.f32 %v9106_v17, %v3179_v2 }
 0x28e   : > { %13330 = vst [vmem:[#allocation195_spill] sm:$0xff] %v9143_v41  ;;  %2164 = vrot.lane.b32.xlu0 %v13344_v6, %s6703_s20  ;;  %2182 = vrot.lane.b32.xlu2 %v13345_v38, %s6703_s20  ;;  %v3472_v6 = vrot.slane %v3465_v49, 7  ;;  %v9218_v38 = vmul.f32 %v9128_v55, %v9209_v21  ;;  %v9223_v39 = vpop.permute.xlu0 %1625  ;;  %v9225_v41 = vpop.permute.xlu2 %1703 }
 0x28f   : > { %13331 = vst [vmem:[#allocation196_spill] sm:$0xff] %v9146_v30  ;;  %v3031_v42 = vrot.slane %v3025_v56, 7  ;;  %v13347_v56 = vld [vmem:[#allocation86_spill] sm:$0xff] }
 0x290   : > { %13332 = vst [vmem:[#allocation197_spill] sm:$0xff] %v9149_v26  ;;  %2166 = vrot.lane.b32.xlu1 %v13347_v56, %s6703_s20 }
 0x291   : > { %13333 = vst [vmem:[#allocation198_spill] sm:$0xff] %v9152_v48  ;;  %v13338_v48 = vrot.slane %v13337_v15, 7  ;;  %v3045_v15 = vmul.f32 %v8977_v34, %v3043_v23  ;;  %v3033_v28 = vsel %vm564_vm3, %v3031_v42, %v13348_v5  ;;  %v3244_v5 = vmul.f32 %v9233_v29, %v9094_v11 }
 0x292   : > { %13334 = vst [vmem:[#allocation199_spill] sm:$0xff] %v9155_v1  ;;  %v3262_v11 = vstv %s9176_s10  ;;  %s9594_s10 = sld [smem:[#allocation7 + $0x102]] }
 0x293   : > { %13336 = vst [vmem:[#allocation72_spill] sm:$0xff] %v9163_v54  ;;  %v9169_v36 = vadd.f32 %v13338_v48, %v1093_v27  ;;  %v3046_v27 = vmul.f32 %v3043_v23, %v8937_v14  ;;  %v13341_v48 = vld [vmem:[#allocation127_spill] sm:$0xff]  ;;  %v3051_v56 = vrot.slane %v3045_v15, 7  ;;  %v9229_v49 = vpop.permute.xlu1 %1627  ;;  %v3039_v15 = vadd.f32 %v3031_v42, %v2961_v16 }
 0x294   : > { %v9189_v18 = vadd.f32 %v13342_v51, %v13341_v48  ;;  %13343 = vst [vmem:[#allocation64_spill] sm:$0xff] %v9194_v53  ;;  %v3401_v48 = vmul.f32 %v9192_v22, %v9135_v46  ;;  %v9206_v51 = vstv %s9096_s7  ;;  %v3264_v42 = vmul.f32 %v9106_v17, %v3262_v11  ;;  %s9574_s7 = sld [smem:[#allocation7 + $0xf0]] }
 0x295   : > { %13339 = vst [vmem:[#allocation73_spill] sm:$0xff] %v9169_v36  ;;  %v3053_v50 = vrot.slane %v3046_v27, 7  ;;  %v3620_v59 = vmul.f32 %v9206_v51, %v9194_v53  ;;  %v3180_v27 = vmul.f32 %v9233_v29, %v3179_v2  ;;  %v3265_v16 = vmul.f32 %v3262_v11, %v9045_v9 }
 0x296   : > { %13349 = vst [vmem:[#allocation127_spill] sm:$0xff] %v9223_v39  ;;  %v3040_v39 = vadd.f32 %v3033_v28, %v2962_v32  ;;  %v3404_v2 = vadd.f32 %v3401_v48, %v3260_v35  ;;  %v3250_v28 = vrot.slane %v3244_v5, 7  ;;  %2184 = vrot.lane.b32.xlu0 %v13353_v19, %s6703_s20  ;;  %2202 = vrot.lane.b32.xlu2 %v13354_v25, %s6703_s20  ;;  %v13355_v35 = vld [vmem:[#allocation89_spill] sm:$0xff]  ;;  %v13356_v48 = vrot.slane %v9110_v37, 7  ;;  %v9276_v33 = vpop.permute.xlu0 %1645 }
 0x297   : > { %13350 = vst [vmem:[#allocation65_spill] sm:$0xff] %v9225_v41  ;;  %v9238_v41 = vmul.f32 %v9158_v43, %v3043_v23  ;;  %v2968_v23 = vstv %s9183_s12  ;;  %v3054_v32 = vsel %vm564_vm3, %v3051_v56, %v3053_v50  ;;  %v3183_v50 = vadd.f32 %v3180_v27, %v3039_v15  ;;  %s9606_s12 = sld [smem:[#allocation7 + $0x10b]] }
 0x298   : > { %13351 = vst [vmem:[#allocation87_spill] sm:$0xff] %v9229_v49  ;;  %v13352_v49 = vrot.slane %v9172_v24, 7  ;;  %v3184_v12 = vadd.f32 %v3181_v61, %v3040_v39  ;;  %2186 = vrot.lane.b32.xlu1 %v13355_v35, %s6703_s20  ;;  %v3252_v5 = vsel %vm564_vm3, %v3250_v28, %v13356_v48  ;;  %v3190_v19 = vmul.f32 %v3187_v45, %v9045_v9  ;;  %v9278_v61 = vpop.permute.xlu2 %1880 }
 0x299   : > { %v13357_v25 = vrot.slane %v9238_v41, 7  ;;  %13358 = vst [vmem:[#allocation88_spill] sm:$0xff] %v9276_v33  ;;  %v3691_v15 = vrot.slane %v3684_v44, 7  ;;  %v3270_v27 = vrot.slane %v3264_v42, 7  ;;  %v3272_v36 = vrot.slane %v3265_v16, 7  ;;  %v13361_v16 = vld [vmem:[#allocation40_spill] sm:$0xff] }
 0x29a   : > { %v3473_v62 = vsel %vm564_vm3, %v13352_v49, %v3472_v6  ;;  %v2971_v6 = vmul.f32 %v2968_v23, %v8937_v14  ;;  %13359 = vst [vmem:[#allocation86_spill] sm:$0xff] %v9278_v61  ;;  %v2970_v35 = vmul.f32 %v8977_v34, %v2968_v23  ;;  %v3258_v61 = vadd.f32 %v3250_v28, %v3183_v50  ;;  %v13362_v33 = vld [vmem:[#allocation36_spill] sm:$0xff] }
 0x29b   : > { %v3052_v39 = vsel %vm564_vm3, %v13357_v25, %v3051_v56  ;;  %v9281_v37 = vpop.permute.xlu1 %1647  ;;  %v3479_v48 = vadd.f32 %v3473_v62, %v3404_v2  ;;  %v9288_v56 = vmul.f32 %v9233_v29, %v3262_v11  ;;  %v3259_v25 = vadd.f32 %v3252_v5, %v3184_v12 }
 0x29c   : > { %v3060_v49 = vadd.f32 %v3054_v32, %v2971_v6  ;;  %13360 = vst [vmem:[#allocation21_spill] sm:$0xff] %v9281_v37  ;;  %v3400_v32 = vmul.f32 %v8723_v0, %v9192_v22  ;;  %v3399_v6 = vmul.f32 %v8579_v7, %v9192_v22  ;;  %v3059_v44 = vadd.f32 %v3052_v39, %v2970_v35 }
 0x29d   : > { %v3189_v42 = vmul.f32 %v9106_v17, %v3187_v45  ;;  %v9295_v37 = vadd.f32 %v13362_v33, %v13361_v16  ;;  %v3469_v62 = vrot.slane %v9262_v57, 7  ;;  %v3481_v54 = vstv %s9249_s14  ;;  %s9745_s14 = sld [smem:[#allocation7 + $0x11d]] }
 0x29e   : > { %v3193_v2 = vadd.f32 %v3190_v19, %v3060_v49  ;;  %v9303_v12 = vmul.f32 %v9118_v13, %v9209_v21  ;;  %v3273_v22 = vsel %vm564_vm3, %v3270_v27, %v3272_v36  ;;  %v3483_v11 = vmul.f32 %v8723_v0, %v3481_v54  ;;  %v13365_v21 = vld [vmem:[#allocation22_spill] sm:$0xff]  ;;  %v13366_v36 = vld [vmem:[#allocation91_spill] sm:$0xff] }
 0x29f   : > { %v3484_v28 = vmul.f32 %v3481_v54, %v9135_v46  ;;  %v3623_v50 = vadd.f32 %v3620_v59, %v3479_v48  ;;  %v13363_v5 = vrot.slane %v9218_v38, 7  ;;  %v13364_v49 = vrot.slane %v9172_v24, 7  ;;  %2204 = vrot.lane.b32.xlu0 %v13365_v21, %s6703_s20  ;;  %2222 = vrot.lane.b32.xlu2 %v13366_v36, %s6703_s20  ;;  %v9329_v21 = vpop.permute.xlu0 %1665 }
 0x2a0   : > { %v12891_v39 = vrot.slane %v9288_v56, 7  ;;  %v3403_v33 = vadd.f32 %v3400_v32, %v3259_v25  ;;  %v3402_v35 = vadd.f32 %v3399_v6, %v3258_v61  ;;  %v3406_v16 = vstv %s9265_s15  ;;  %13368 = vst [vmem:[#allocation90_spill] sm:$0xff] %v9329_v21  ;;  %v9331_v32 = vpop.permute.xlu2 %1905  ;;  %s9804_s15 = sld [smem:[#allocation7 + $0x22]] }
 0x2a1   : > { %v3692_v57 = vsel %vm564_vm3, %v13363_v5, %v3691_v15  ;;  %v3471_v19 = vsel %vm564_vm3, %v3469_v62, %v13364_v49  ;;  %v3192_v59 = vadd.f32 %v3189_v42, %v3059_v44  ;;  %v13367_v15 = vld [vmem:[#allocation45_spill] sm:$0xff]  ;;  %v3279_v24 = vadd.f32 %v3273_v22, %v3193_v2  ;;  %13369 = vst [vmem:[#allocation89_spill] sm:$0xff] %v9331_v32 }
 0x2a2   : > { %2206 = vrot.lane.b32.xlu1 %v13367_v15, %s6703_s20  ;;  %v3409_v48 = vmul.f32 %v3406_v16, %v9135_v46  ;;  %v3271_v5 = vsel %vm564_vm3, %v12891_v39, %v3270_v27  ;;  %v2969_v49 = vmul.f32 %v9158_v43, %v2968_v23  ;;  %v3619_v61 = vmul.f32 %v9128_v55, %v9206_v51 }
 0x2a3   : > { %v3688_v6 = vrot.slane %v9303_v12, 7  ;;  %v3489_v25 = vrot.slane %v3483_v11, 7  ;;  %v3491_v44 = vrot.slane %v3484_v28, 7  ;;  %v9336_v42 = vpop.permute.xlu1 %1667  ;;  %v3618_v27 = vmul.f32 %v9118_v13, %v9206_v51 }
 0x2a4   : > { %13370 = vst [vmem:[#allocation40_spill] sm:$0xff] %v9336_v42  ;;  %v9341_v23 = vmul.f32 %v8579_v7, %v3481_v54  ;;  %v13371_v2 = vrot.slane %v9238_v41, 7  ;;  %v3188_v36 = vmul.f32 %v9233_v29, %v3187_v45  ;;  %v3698_v15 = vadd.f32 %v3692_v57, %v3623_v50 }
 0x2a5   : > { %v3478_v39 = vadd.f32 %v3471_v19, %v3403_v33  ;;  %v3278_v32 = vadd.f32 %v3271_v5, %v3192_v59  ;;  %v3408_v12 = vmul.f32 %v8723_v0, %v3406_v16  ;;  %v3477_v11 = vadd.f32 %v3469_v62, %v3402_v35  ;;  %v13373_v35 = vld [vmem:[#allocation93_spill] sm:$0xff]  ;;  %v13374_v59 = vld [vmem:[#allocation94_spill] sm:$0xff] }
 0x2a6   : > { %v3058_v22 = vadd.f32 %v13371_v2, %v2969_v49  ;;  %v3412_v28 = vadd.f32 %v3409_v48, %v3279_v24  ;;  %v3700_v21 = vstv %s9290_s21  ;;  %v9349_v42 = vstv %s9299_s24  ;;  %s9885_s21 = sld [smem:[#allocation7 + $0x1c]] }
 0x2a7   : > { %v3492_v54 = vsel %vm564_vm3, %v3489_v25, %v3491_v44  ;;  %v3702_v41 = vmul.f32 %v9128_v55, %v3700_v21  ;;  %v9359_v45 = vmul.f32 %v8977_v34, %v9349_v42  ;;  %v3065_v51 = vmul.f32 %v9349_v42, %v8937_v14  ;;  %2224 = vrot.lane.b32.xlu0 %v13373_v35, %s6703_s20  ;;  %v13376_v44 = vld [vmem:[#allocation111_spill] sm:$0xff]  ;;  %v13377_v35 = vld [vmem:[#allocation53_spill] sm:$0xff]  ;;  %s9901_s24 = sld [smem:[#allocation7 + $0x6a]] }
 0x2a8   : > { %v13372_v62 = vrot.slane %v9218_v38, 7  ;;  %v3703_v57 = vmul.f32 %v3700_v21, %v9194_v53  ;;  %v12892_v19 = vrot.slane %v9341_v23, 7  ;;  %v3191_v33 = vadd.f32 %v3188_v36, %v3058_v22  ;;  %2242 = vrot.lane.b32.xlu2 %v13374_v59, %s6703_s20  ;;  %v13375_v38 = vld [vmem:[#allocation92_spill] sm:$0xff]  ;;  %v13378_v59 = vld [vmem:[#allocation33_spill] sm:$0xff] }
 0x2a9   : > { %v3622_v24 = vadd.f32 %v3619_v61, %v3478_v39  ;;  %v3621_v48 = vadd.f32 %v3618_v27, %v3477_v11  ;;  %v3625_v5 = vstv %s9320_s22  ;;  %v3411_v49 = vadd.f32 %v3408_v12, %v3278_v32  ;;  %v9386_v61 = vpop.permute.xlu0 %1685  ;;  %v9388_v32 = vpop.permute.xlu2 %1930  ;;  %s9935_s22 = sld [smem:[#allocation7 + $0x64]] }
 0x2aa   : > { %v3690_v50 = vsel %vm564_vm3, %v3688_v6, %v13372_v62  ;;  %2226 = vrot.lane.b32.xlu1 %v13375_v38, %s6703_s20  ;;  %v3836_v2 = vadd.f32 %v3698_v15, %v13376_v44  ;;  %v3498_v62 = vadd.f32 %v3492_v54, %v3412_v28  ;;  %v3628_v22 = vmul.f32 %v3625_v5, %v9194_v53 }
 0x2ab   : > { %v3490_v36 = vsel %vm564_vm3, %v12892_v19, %v3489_v25  ;;  %v9384_v39 = vadd.f32 %v13378_v59, %v13377_v35  ;;  %13379 = vst [vmem:[#allocation36_spill] sm:$0xff] %v9386_v61  ;;  %v3708_v27 = vrot.slane %v3702_v41, 7  ;;  %v3072_v15 = vrot.slane %v3065_v51, 7  ;;  %v9391_v11 = vpop.permute.xlu1 %1687 }
 0x2ac   : > { %13380 = vst [vmem:[#allocation22_spill] sm:$0xff] %v9388_v32  ;;  %v3710_v28 = vrot.slane %v3703_v57, 7  ;;  %v9394_v54 = vmul.f32 %v9118_v13, %v3700_v21  ;;  %v13382_v25 = vrot.slane %v9288_v56, 7  ;;  %v3407_v35 = vmul.f32 %v8579_v7, %v3406_v16 }
 0x2ad   : > { %13381 = vst [vmem:[#allocation91_spill] sm:$0xff] %v9391_v11  ;;  %v3697_v59 = vadd.f32 %v3690_v50, %v3622_v24  ;;  %v3696_v19 = vadd.f32 %v3688_v6, %v3621_v48  ;;  %v3497_v32 = vadd.f32 %v3490_v36, %v3411_v49  ;;  %v3627_v41 = vmul.f32 %v9128_v55, %v3625_v5  ;;  %v13384_v48 = vld [vmem:[#allocation128_spill] sm:$0xff]  ;;  %v13385_v49 = vld [vmem:[#allocation34_spill] sm:$0xff] }
 0x2ae   : > { %v3277_v38 = vadd.f32 %v13382_v25, %v3191_v33  ;;  %vm3839_vm4 = vcmp.gt.f32.partialorder %v3836_v2, 0.0  ;;  %v3844_v12 = vmul.f32 %v3836_v2, %v9146_v30  ;;  %v3631_v51 = vadd.f32 %v3628_v22, %v3498_v62 }
 0x2af   : > { %v9402_v11 = vstv %s9351_s23  ;;  %v9407_v21 = vstv %s9355_s25  ;;  %v13383_v56 = vrot.slane %v9359_v45, 7  ;;  %v3711_v50 = vsel %vm564_vm3, %v3708_v27, %v3710_v28  ;;  %2244 = vrot.lane.b32.xlu0 %v13384_v48, %s6703_s20  ;;  %v13386_v28 = vld [vmem:[#allocation126_spill] sm:$0xff]  ;;  %s9998_s23 = sld [smem:[#allocation7 + $0xb2]] }
 0x2b0   : > { %v9414_v16 = vmul.f32 %v9106_v17, %v9402_v11  ;;  %v3284_v6 = vmul.f32 %v9402_v11, %v9045_v9  ;;  %v3707_v57 = vrot.slane %v9394_v54, 7  ;;  %v3410_v33 = vadd.f32 %v3407_v35, %v3277_v38  ;;  %2262 = vrot.lane.b32.xlu2 %v13385_v49, %s6703_s20  ;;  %s10024_s25 = sld [smem:[#allocation7 + $0xac]] }
 0x2b1   : > { %v3073_v7 = vsel %vm564_vm3, %v13383_v56, %v3072_v15  ;;  %v2979_v24 = vmul.f32 %v9407_v21, %v8937_v14  ;;  %v3835_v62 = vadd.f32 %v3697_v59, %v13376_v44  ;;  %v3834_v22 = vadd.f32 %v3696_v19, %v13376_v44  ;;  %v13387_v59 = vld [vmem:[#allocation58_spill] sm:$0xff]  ;;  %v9443_v19 = vpop.permute.xlu0 %1705 }
 0x2b2   : > { %v3630_v36 = vadd.f32 %v3627_v41, %v3497_v32  ;;  %v9429_v15 = vstv %s9373_s26  ;;  %2246 = vrot.lane.b32.xlu1 %v13386_v28, %s6703_s20  ;;  %v3709_v54 = vsel %vm564_vm3, %v3707_v57, %v3708_v27  ;;  %v3626_v25 = vmul.f32 %v9118_v13, %v3625_v5  ;;  %13388 = vst [vmem:[#allocation45_spill] sm:$0xff] %v9443_v19  ;;  %v9445_v32 = vpop.permute.xlu2 %1955  ;;  %v13390_v27 = vld [vmem:[#allocation16_spill] sm:$0xff]  ;;  %s10050_s26 = sld [smem:[#allocation7 + $0xfa]] }
 0x2b3   : > { %v3079_v38 = vadd.f32 %v3073_v7, %v2979_v24  ;;  %v3198_v35 = vmul.f32 %v9429_v15, %v9045_v9  ;;  %v9441_v56 = vadd.f32 %v13387_v59, %v9180_v60  ;;  %13389 = vst [vmem:[#allocation93_spill] sm:$0xff] %v9445_v32  ;;  %v3717_v41 = vadd.f32 %v3711_v50, %v3631_v51  ;;  %v13391_v7 = vld [vmem:[#allocation17_spill] sm:$0xff]  ;;  %v9455_v44 = vpop.permute.xlu1 %1707 }
 0x2b4   : > { %v12894_v48 = vrot.slane %v9414_v16, 7  ;;  %v3291_v49 = vrot.slane %v3284_v6, 7  ;;  %v1074_v5 = vadd.f32 %v13390_v27, %v8650_v63  ;;  %v13392_v24 = vrot.slane %v13391_v7, 7  ;;  %13393 = vst [vmem:[#allocation94_spill] sm:$0xff] %v9455_v44  ;;  %v13460_v44 = vld [vmem:[#allocation184_spill] sm:$0xff] }
 0x2b5   : > { %v9458_v60 = vsel %vm3839_vm4, %v3836_v2, %v3844_v12  ;;  %v13395_v59 = vrot.slane %v9341_v23, 7  ;;  %vm3838_vm5 = vcmp.gt.f32.partialorder %v3835_v62, 0.0  ;;  %v3843_v51 = vmul.f32 %v3835_v62, %v9146_v30 }
 0x2b6   : > { %v9453_v28 = vadd.f32 %v13392_v24, %v9189_v18  ;;  %13394 = vst [vmem:[#allocation92_spill] sm:$0xff] %v9458_v60  ;;  %vm3837_vm6 = vcmp.gt.f32.partialorder %v3834_v22, 0.0  ;;  %v3716_v6 = vadd.f32 %v3709_v54, %v3630_v36  ;;  %v3842_v63 = vmul.f32 %v3834_v22, %v9146_v30  ;;  %v13397_v54 = vld [vmem:[#allocation77_spill] sm:$0xff] }
 0x2b7   : > { %v3496_v32 = vadd.f32 %v13395_v59, %v3410_v33  ;;  %v3201_v27 = vadd.f32 %v3198_v35, %v3079_v38  ;;  %v9465_v7 = vstv %s9404_s27  ;;  %v3874_v18 = vadd.f32 %v3717_v41, %v9149_v26  ;;  %v13396_v33 = vld [vmem:[#allocation37_spill] sm:$0xff]  ;;  %v13398_v38 = vld [vmem:[#allocation75_spill] sm:$0xff]  ;;  %s10085_s27 = sld [smem:[#allocation7 + $0xf4]] }
 0x2b8   : > { %v3292_v23 = vsel %vm564_vm3, %v12894_v48, %v3291_v49  ;;  %v9475_v2 = vmul.f32 %v8723_v0, %v9465_v7  ;;  %v3503_v12 = vmul.f32 %v9465_v7, %v9135_v46  ;;  %v1310_v36 = vadd.f32 %v13396_v33, %v8654_v10  ;;  %v13400_v0 = vld [vmem:[#allocation18_spill] sm:$0xff]  ;;  %v13401_v24 = vld [vmem:[#allocation129_spill] sm:$0xff]  ;;  %v13402_v59 = vld [vmem:[#allocation131_spill] sm:$0xff] }
 0x2b9   : > { %v3629_v50 = vadd.f32 %v3626_v25, %v3496_v32  ;;  %v9483_v25 = vadd.f32 %v13397_v54, %v9295_v37  ;;  %v13399_v35 = vrot.slane %v13398_v38, 7  ;;  %v1094_v49 = vadd.f32 %v13400_v0, %v8755_v47  ;;  %2264 = vrot.lane.b32.xlu0 %v13401_v24, %s6703_s20  ;;  %2282 = vrot.lane.b32.xlu2 %v13402_v59, %s6703_s20  ;;  %v13404_v0 = vld [vmem:[#allocation76_spill] sm:$0xff]  ;;  %v13407_v48 = vld [vmem:[#allocation19_spill] sm:$0xff] }
 0x2ba   : > { %v3846_v10 = vsel %vm3838_vm5, %v3835_v62, %v3843_v51  ;;  %v3873_v37 = vadd.f32 %v3716_v6, %v9149_v26  ;;  %v9500_v33 = vstv %s9431_s28  ;;  %v3845_v54 = vsel %vm3837_vm6, %v3834_v22, %v3842_v63  ;;  %v9511_v62 = vpop.permute.xlu0 %1882  ;;  %v9513_v51 = vpop.permute.xlu2 %1980  ;;  %s10136_s28 = sld [smem:[#allocation7 + $0x2b]] }
 0x2bb   : > { %v9488_v32 = vadd.f32 %v13399_v35, %v9384_v39  ;;  %v13403_v39 = vld [vmem:[#allocation35_spill] sm:$0xff]  ;;  %v3715_v47 = vadd.f32 %v3707_v57, %v3629_v50  ;;  %v3298_v38 = vadd.f32 %v3292_v23, %v3201_v27  ;;  %v3417_v35 = vmul.f32 %v9500_v33, %v9135_v46  ;;  %13405 = vst [vmem:[#allocation53_spill] sm:$0xff] %v9511_v62  ;;  %v13408_v57 = vld [vmem:[#allocation96_spill] sm:$0xff]  ;;  %v9523_v50 = vpop.permute.xlu1 %1884 }
 0x2bc   : > { %2266 = vrot.lane.b32.xlu1 %v13403_v39, %s6703_s20  ;;  %v1335_v24 = vadd.f32 %v13404_v0, %v8759_v40  ;;  %13406 = vst [vmem:[#allocation33_spill] sm:$0xff] %v9513_v51  ;;  %v3882_v6 = vmul.f32 %v3874_v18, %v9155_v1  ;;  %v3510_v39 = vrot.slane %v3503_v12, 7  ;;  %v9518_v22 = vadd.f32 %v13407_v48, %v1074_v5  ;;  %v13410_v40 = vld [vmem:[#allocation81_spill] sm:$0xff]  ;;  %v13411_v0 = vld [vmem:[#allocation82_spill] sm:$0xff]  ;;  %v13463_v62 = vld [vmem:[#allocation192_spill] sm:$0xff] }
 0x2bd   : > { %v9521_v63 = vadd.f32 %v13408_v57, %v1310_v36  ;;  %13409 = vst [vmem:[#allocation128_spill] sm:$0xff] %v9523_v50  ;;  %v3852_v27 = vrot.slane %v3846_v10, 1  ;;  %vm3877_vm8 = vcmp.gt.f32.partialorder %v3874_v18, 0.0  ;;  %v1114_v23 = vadd.f32 %v13410_v40, %v8811_v31  ;;  %v13419_v40 = vld [vmem:[#allocation62_spill] sm:$0xff] }
 0x2be   : > { %v1360_v41 = vadd.f32 %v13411_v0, %v8830_v8  ;;  %v3851_v30 = vrot.slane %v3845_v54, 1  ;;  %v3881_v59 = vmul.f32 %v3873_v37, %v9155_v1  ;;  %vm3876_vm9 = vcmp.gt.f32.partialorder %v3873_v37, 0.0 }
 0x2bf   : > { %v3872_v48 = vadd.f32 %v3715_v47, %v9149_v26  ;;  %v3420_v5 = vadd.f32 %v3417_v35, %v3298_v38  ;;  %v9534_v12 = vstv %s9467_s29  ;;  %v9540_v31 = vsel %vm3877_vm8, %v3874_v18, %v3882_v6  ;;  %v13414_v47 = vld [vmem:[#allocation20_spill] sm:$0xff]  ;;  %v13415_v35 = vld [vmem:[#allocation98_spill] sm:$0xff]  ;;  %s10199_s29 = sld [smem:[#allocation8 + $0x3]] }
 0x2c0   : > { %13412 = vst [vmem:[#allocation34_spill] sm:$0xff] %v9540_v31  ;;  %v13413_v8 = vrot.slane %v9475_v2, 7  ;;  %v9547_v10 = vmul.f32 %v9128_v55, %v9534_v12  ;;  %v3722_v54 = vmul.f32 %v9534_v12, %v9194_v53  ;;  %v9552_v38 = vadd.f32 %v13414_v47, %v1094_v49  ;;  %v13421_v49 = vld [vmem:[#allocation133_spill] sm:$0xff] }
 0x2c1   : > { %v9555_v57 = vadd.f32 %v13415_v35, %v1335_v24  ;;  %v13416_v18 = vrot.slane %v9458_v60, 1  ;;  %v1134_v0 = vadd.f32 %v13419_v40, %v8902_v58  ;;  %2284 = vrot.lane.b32.xlu0 %v13421_v49, %s6703_s20  ;;  %v13422_v24 = vrot.slane %v8511_v4, 7  ;;  %v13433_v60 = vld [vmem:[#allocation63_spill] sm:$0xff] }
 0x2c2   : > { %v3511_v36 = vsel %vm564_vm3, %v13413_v8, %v3510_v39  ;;  %v9563_v39 = vsel %vm2665_vm7, %v3851_v30, %v3852_v27  ;;  %v13420_v8 = vld [vmem:[#allocation23_spill] sm:$0xff]  ;;  %v3884_v47 = vsel %vm3876_vm9, %v3873_v37, %v3881_v59  ;;  %v9578_v35 = vstv %s9502_s30  ;;  %v13423_v30 = vld [vmem:[#allocation132_spill] sm:$0xff]  ;;  %v9592_v37 = vpop.permute.xlu2 %2005  ;;  %s10217_s30 = sld [smem:[#allocation7 + $0x25]] }
 0x2c3   : > { %v9560_v6 = vsel %vm2665_vm7, %v3852_v27, %v13416_v18  ;;  %13418 = vst [vmem:[#allocation58_spill] sm:$0xff] %v9563_v39  ;;  %v1385_v26 = vadd.f32 %v13420_v8, %v8913_v52  ;;  %2459 = vrot.lane.b32.xlu2 %v13422_v24, %s6703_s20  ;;  %v3880_v52 = vmul.f32 %v3872_v48, %v9155_v1  ;;  %v13424_v18 = vld [vmem:[#allocation49_spill] sm:$0xff]  ;;  %v9590_v8 = vpop.permute.xlu0 %1907  ;;  %vm3875_vm10 = vcmp.gt.f32.partialorder %v3872_v48, 0.0  ;;  %v13427_v24 = vld [vmem:[#allocation59_spill] sm:$0xff]  ;;  %v13434_v1 = vld [vmem:[#allocation54_spill] sm:$0xff] }
 0x2c4   : > { %13417 = vst [vmem:[#allocation126_spill] sm:$0xff] %v9560_v6  ;;  %2286 = vrot.lane.b32.xlu1 %v13423_v30, %s6703_s20  ;;  %v3517_v27 = vadd.f32 %v3511_v36, %v3420_v5  ;;  %v3636_v4 = vmul.f32 %v9578_v35, %v9194_v53  ;;  %v1311_v40 = vadd.f32 %v13424_v18, %v9019_v20  ;;  %v3729_v49 = vrot.slane %v3722_v54, 7  ;;  %v13428_v30 = vld [vmem:[#allocation26_spill] sm:$0xff]  ;;  %v13429_v36 = vld [vmem:[#allocation25_spill] sm:$0xff]  ;;  %v9604_v18 = vpop.permute.xlu1 %1909  ;;  %v13435_v54 = vld [vmem:[#allocation72_spill] sm:$0xff] }
 0x2c5   : > { %13425 = vst [vmem:[#allocation16_spill] sm:$0xff] %v9590_v8  ;;  %v1312_v5 = vadd.f32 %v13428_v30, %v13427_v24  ;;  %v1410_v58 = vadd.f32 %v13429_v36, %v9023_v3  ;;  %v13430_v6 = vld [vmem:[#allocation41_spill] sm:$0xff]  ;;  %v3890_v39 = vrot.slane %v3884_v47, 1  ;;  %v9610_v59 = vadd.f32 %v13434_v1, %v13433_v60  ;;  %v13441_v1 = vld [vmem:[#allocation83_spill] sm:$0xff]  ;;  %v13473_v53 = vld [vmem:[#allocation60_spill] sm:$0xff] }
 0x2c6   : > { %13426 = vst [vmem:[#allocation17_spill] sm:$0xff] %v9592_v37  ;;  %v9602_v20 = vadd.f32 %v13430_v6, %v1114_v23  ;;  %v13436_v37 = vld [vmem:[#allocation28_spill] sm:$0xff]  ;;  %v13437_v24 = vld [vmem:[#allocation73_spill] sm:$0xff]  ;;  %v13439_v23 = vld [vmem:[#allocation99_spill] sm:$0xff]  ;;  %v3883_v36 = vsel %vm3875_vm10, %v3872_v48, %v3880_v52  ;;  %v9624_v51 = vstv %s9530_s18  ;;  %v9628_v47 = vmul.f32 %v9158_v43, %v9349_v42  ;;  %s10233_s18 = sld [smem:[#allocation7 + $0x73]] }
 0x2c7   : > { %13432 = vst [vmem:[#allocation77_spill] sm:$0xff] %v9604_v18  ;;  %v9614_v8 = vadd.f32 %v13436_v37, %v13435_v54  ;;  %v13438_v30 = vld [vmem:[#allocation97_spill] sm:$0xff]  ;;  %v9621_v6 = vadd.f32 %v13439_v23, %v1360_v41  ;;  %v3639_v18 = vadd.f32 %v3636_v4, %v3517_v27  ;;  %v9631_v60 = vadd.f32 %v13441_v1, %v1134_v0  ;;  %v13449_v23 = vld [vmem:[#allocation102_spill] sm:$0xff] }
 0x2c8   : > { %13431 = vst [vmem:[#allocation37_spill] sm:$0xff] %v9602_v20  ;;  %v9618_v3 = vadd.f32 %v13438_v30, %v13437_v24  ;;  %v2314_v37 = vstv %s9538_s6  ;;  %v13443_v54 = vrot.slane %v9547_v10, 7  ;;  %v9640_v24 = vstv %s9536_s5  ;;  %v13444_v48 = vld [vmem:[#allocation101_spill] sm:$0xff]  ;;  %v13448_v30 = vld [vmem:[#allocation52_spill] sm:$0xff]  ;;  %s10258_s5 = sld [smem:[#allocation9 + $0x3]] }
 0x2c9   : > { %13440 = vst [vmem:[#allocation75_spill] sm:$0xff] %v9621_v6  ;;  %v9643_v52 = vadd.f32 %v13444_v48, %v1385_v26  ;;  %v13446_v27 = vrot.slane %v9540_v31, 1  ;;  %v2978_v0 = vmul.f32 %v8977_v34, %v9407_v21  ;;  %v9654_v4 = vmul.f32 %v9106_v17, %v9429_v15  ;;  %v13450_v26 = vld [vmem:[#allocation29_spill] sm:$0xff]  ;;  %s10271_s6 = sld [smem:[#allocation7 + $0x6d]] }
 0x2ca   : > { %13442 = vst [vmem:[#allocation18_spill] sm:$0xff] %v9631_v60  ;;  %v3730_v41 = vsel %vm564_vm3, %v13443_v54, %v3729_v49  ;;  %v9658_v49 = vadd.f32 %v13449_v23, %v13448_v30  ;;  %v9662_v1 = vadd.f32 %v13450_v26, %v9441_v56  ;;  %v13451_v54 = vld [vmem:[#allocation30_spill] sm:$0xff]  ;;  %v3889_v50 = vrot.slane %v3883_v36, 1  ;;  %v13455_v30 = vld [vmem:[#allocation140_spill] sm:$0xff] }
 0x2cb   : > { %13445 = vst [vmem:[#allocation129_spill] sm:$0xff] %v9643_v52  ;;  %v9648_v42 = vsel %vm2665_vm7, %v3890_v39, %v13446_v27  ;;  %v9666_v48 = vadd.f32 %v13451_v54, %v9453_v28  ;;  %v13452_v27 = vld [vmem:[#allocation39_spill] sm:$0xff]  ;;  %v9676_v56 = vmul.f32 %v9118_v13, %v2314_v37  ;;  %v2333_v23 = vstv %s9574_s7  ;;  %v9682_v54 = vpop.permute.xlu0 %1932  ;;  %v13470_v52 = vld [vmem:[#allocation105_spill] sm:$0xff]  ;;  %s10319_s7 = sld [smem:[#allocation7 + $0xbb]] }
 0x2cc   : > { %13447 = vst [vmem:[#allocation131_spill] sm:$0xff] %v9648_v42  ;;  %2461 = vrot.lane.b32.xlu0 %v13452_v27, %s6703_s20  ;;  %v13453_v42 = vld [vmem:[#allocation130_spill] sm:$0xff]  ;;  %2463 = vrot.lane.b32.xlu1 %v13455_v30, %s6703_s20  ;;  %v9679_v26 = vadd.f32 %v3730_v41, %v3639_v18  ;;  %v9684_v27 = vpop.permute.xlu2 %2030  ;;  %v2352_v30 = vstv %s9582_s9  ;;  %v2297_v19 = vmul.f32 %v9128_v55, %v13463_v62  ;;  %v9697_v18 = vpop.permute.xlu1 %1934  ;;  %v9702_v28 = vstv %s9594_s10  ;;  %s10357_s9 = sld [smem:[#allocation7 + $0xb5]] }
 0x2cd   : > { %v13454_v31 = vrot.slane %v13453_v42, 7  ;;  %13456 = vst [vmem:[#allocation35_spill] sm:$0xff] %v9676_v56  ;;  %v13459_v42 = vld [vmem:[#allocation181_spill] sm:$0xff]  ;;  %v2298_v41 = vmul.f32 %v13460_v44, %v13463_v62  ;;  %v9717_v60 = vadd.f32 %v13470_v52, %v1410_v58  ;;  %v9725_v6 = vmul.f32 %v13460_v44, %v13473_v53  ;;  %s10384_s10 = sld [smem:[#allocation7 + $0x103]] }
 0x2ce   : > { %13457 = vst [vmem:[#allocation76_spill] sm:$0xff] %v9682_v54  ;;  %v9692_v36 = vmul.f32 %v9128_v55, %v13459_v42  ;;  %v13466_v54 = vld [vmem:[#allocation103_spill] sm:$0xff]  ;;  %v9740_v52 = vmul.f32 %v9118_v13, %v9702_v28  ;;  %v2317_v62 = vmul.f32 %v13460_v44, %v2314_v37 }
 0x2cf   : > { %2484 = vrot.lane.b32.xlu2 %v13454_v31, %s6703_s20  ;;  %13458 = vst [vmem:[#allocation19_spill] sm:$0xff] %v9684_v27  ;;  %v9688_v31 = vmul.f32 %v13460_v44, %v13459_v42  ;;  %v9705_v27 = vstv %s9606_s12  ;;  %v9711_v42 = vadd.f32 %v13466_v54, %v1312_v5  ;;  %v2303_v5 = vrot.slane %v2297_v19, 7  ;;  %v13482_v19 = vld [vmem:[#allocation115_spill] sm:$0xff]  ;;  %s10389_s12 = sld [smem:[#allocation7 + $0xfd]] }
 0x2d0   : > { %13462 = vst [vmem:[#allocation81_spill] sm:$0xff] %v9692_v36  ;;  %v13468_v36 = vld [vmem:[#allocation104_spill] sm:$0xff]  ;;  %v9743_v54 = vstv %s9634_s13  ;;  %s10401_s13 = sld [smem:[#allocation7 + $0x34]] }
 0x2d1   : > { %13461 = vst [vmem:[#allocation96_spill] sm:$0xff] %v9688_v31  ;;  %v9708_v31 = vsel %vm2665_vm7, %v3889_v50, %v3890_v39  ;;  %v9714_v61 = vadd.f32 %v13468_v36, %v1311_v40  ;;  %v9729_v50 = vmul.f32 %v9128_v55, %v13473_v53  ;;  %v9732_v39 = vmul.f32 %v9118_v13, %v2352_v30  ;;  %v13477_v40 = vld [vmem:[#allocation189_spill] sm:$0xff] }
 0x2d2   : > { %13464 = vst [vmem:[#allocation82_spill] sm:$0xff] %v9697_v18  ;;  %v9720_v18 = vmul.f32 %v9118_v13, %v2333_v23  ;;  %v9736_v58 = vmul.f32 %v13460_v44, %v13477_v40  ;;  %v2305_v36 = vrot.slane %v2298_v41, 7  ;;  %v2316_v53 = vmul.f32 %v9128_v55, %v2314_v37  ;;  %v13485_v41 = vld [vmem:[#allocation150_spill] sm:$0xff] }
 0x2d3   : > { %13465 = vst [vmem:[#allocation20_spill] sm:$0xff] %v9708_v31  ;;  %v13480_v31 = vrot.slane %v9359_v45, 7 }
 0x2d4   : > { %13467 = vst [vmem:[#allocation98_spill] sm:$0xff] %v9711_v42  ;;  %2486 = vrot.lane.b32.xlu0 %v13485_v41, %s6703_s20  ;;  %v13486_v42 = vld [vmem:[#allocation137_spill] sm:$0xff]  ;;  %v2335_v41 = vmul.f32 %v9128_v55, %v2333_v23  ;;  %v9786_v45 = vpop.permute.xlu2 %2055  ;;  %v9795_v20 = vpop.permute.xlu1 %1959 }
 0x2d5   : > { %13469 = vst [vmem:[#allocation62_spill] sm:$0xff] %v9714_v61  ;;  %v13487_v37 = vrot.slane %v13486_v42, 7  ;;  %v9782_v42 = vmul.f32 %v9233_v29, %v9402_v11  ;;  %v9798_v11 = vsel %vm564_vm3, %v2303_v5, %v2305_v36 }
 0x2d6   : > { %13471 = vst [vmem:[#allocation23_spill] sm:$0xff] %v9717_v60  ;;  %v13483_v60 = vld [vmem:[#allocation116_spill] sm:$0xff]  ;;  %v2341_v36 = vrot.slane %v2335_v41, 7 }
 0x2d7   : > { %13472 = vst [vmem:[#allocation133_spill] sm:$0xff] %v9720_v18  ;;  %v9760_v61 = vadd.f32 %v13483_v60, %v9488_v32  ;;  %2509 = vrot.lane.b32.xlu2 %v13487_v37, %s6703_s20  ;;  %v13491_v32 = vld [vmem:[#allocation149_spill] sm:$0xff]  ;;  %v9784_v37 = vpop.permute.xlu0 %1957 }
 0x2d8   : > { %13474 = vst [vmem:[#allocation132_spill] sm:$0xff] %v9725_v6  ;;  %v9756_v6 = vadd.f32 %v13482_v19, %v9483_v25  ;;  %v13490_v25 = vld [vmem:[#allocation121_spill] sm:$0xff]  ;;  %2488 = vrot.lane.b32.xlu1 %v13491_v32, %s6703_s20  ;;  %v2336_v32 = vmul.f32 %v13460_v44, %v2333_v23 }
 0x2d9   : > { %13475 = vst [vmem:[#allocation49_spill] sm:$0xff] %v9729_v50  ;;  %v13481_v50 = vrot.slane %v9628_v47, 7 }
 0x2da   : > { %13476 = vst [vmem:[#allocation59_spill] sm:$0xff] %v9732_v39 }
 0x2db   : > { %13478 = vst [vmem:[#allocation26_spill] sm:$0xff] %v9736_v58  ;;  %v3071_v58 = vsel %vm564_vm3, %v13481_v50, %v13480_v31  ;;  %v9770_v31 = vmul.f32 %v9128_v55, %v13477_v40  ;;  %v13489_v50 = vld [vmem:[#allocation74_spill] sm:$0xff]  ;;  %v13494_v40 = vld [vmem:[#allocation195_spill] sm:$0xff] }
 0x2dc   : > { %13479 = vst [vmem:[#allocation25_spill] sm:$0xff] %v9740_v52  ;;  %v9774_v19 = vadd.f32 %v13490_v25, %v13489_v50  ;;  %v3078_v60 = vadd.f32 %v3071_v58, %v2978_v0  ;;  %v13501_v0 = vld [vmem:[#allocation107_spill] sm:$0xff]  ;;  %v13502_v58 = vld [vmem:[#allocation108_spill] sm:$0xff] }
 0x2dd   : > { %13484 = vst [vmem:[#allocation41_spill] sm:$0xff] %v9760_v61  ;;  %v2322_v61 = vrot.slane %v2316_v53, 7  ;;  %v9812_v23 = vadd.f32 %v13501_v0, %v9614_v8  ;;  %v2354_v53 = vmul.f32 %v9128_v55, %v2352_v30 }
 0x2de   : > { %13488 = vst [vmem:[#allocation63_spill] sm:$0xff] %v9770_v31  ;;  %v13495_v31 = vrot.slane %v13494_v40, 7  ;;  %v3200_v8 = vadd.f32 %v9654_v4, %v3078_v60  ;;  %v13508_v4 = vld [vmem:[#allocation154_spill] sm:$0xff] }
 0x2df   : > { %13492 = vst [vmem:[#allocation54_spill] sm:$0xff] %v9784_v37  ;;  %v2324_v37 = vrot.slane %v2317_v62, 7  ;;  %v9820_v62 = vmul.f32 %v9118_v13, %v9743_v54  ;;  %2511 = vrot.lane.b32.xlu0 %v13508_v4, %s6703_s20 }
 0x2e0   : > { %13493 = vst [vmem:[#allocation72_spill] sm:$0xff] %v9786_v45  ;;  %v9791_v50 = vsel %vm564_vm3, %v13495_v31, %v2303_v5  ;;  %v9802_v45 = vmul.f32 %v9118_v13, %v9705_v27  ;;  %v13500_v31 = vld [vmem:[#allocation106_spill] sm:$0xff]  ;;  %v9816_v5 = vadd.f32 %v13502_v58, %v9618_v3  ;;  %v2977_v3 = vmul.f32 %v9158_v43, %v9407_v21  ;;  %v13509_v21 = vld [vmem:[#allocation151_spill] sm:$0xff] }
 0x2e1   : > { %13496 = vst [vmem:[#allocation28_spill] sm:$0xff] %v9791_v50  ;;  %v9808_v25 = vadd.f32 %v13500_v31, %v9610_v59  ;;  %v3288_v59 = vrot.slane %v9782_v42, 7  ;;  %v2343_v31 = vrot.slane %v2336_v32, 7  ;;  %v9826_v50 = vstv %s9745_s14  ;;  %s10442_s14 = sld [smem:[#allocation7 + $0x2e]] }
 0x2e2   : > { %13497 = vst [vmem:[#allocation73_spill] sm:$0xff] %v9795_v20  ;;  %v9832_v0 = vsel %vm564_vm3, %v2322_v61, %v2324_v37  ;;  %v13505_v58 = vrot.slane %v9676_v56, 7  ;;  %v13507_v42 = vrot.slane %v9414_v16, 7  ;;  %v13510_v60 = vrot.slane %v13509_v21, 7  ;;  %v13512_v16 = vld [vmem:[#allocation67_spill] sm:$0xff]  ;;  %v9863_v21 = vld [vmem:[#allocation2 + $0x30] sm:$0xff] }
 0x2e3   : > { %13498 = vst [vmem:[#allocation97_spill] sm:$0xff] %v9798_v11  ;;  %v2355_v11 = vmul.f32 %v13460_v44, %v2352_v30  ;;  %v9841_v30 = vmul.f32 %v9128_v55, %v9702_v28  ;;  %2513 = vrot.lane.b32.xlu1 %v13512_v16, %s6703_s20  ;;  %v9861_v4 = vmul.f32 %v9118_v13, %v9826_v50  ;;  %v9881_v16 = vld [vmem:[#allocation2 + $0x38] sm:$0xff] }
 0x2e4   : > { %13499 = vst [vmem:[#allocation99_spill] sm:$0xff] %v9802_v45  ;;  %v9837_v41 = vsel %vm564_vm3, %v13505_v58, %v2322_v61  ;;  %v3290_v32 = vsel %vm564_vm3, %v3288_v59, %v13507_v42  ;;  %2534 = vrot.lane.b32.xlu2 %v13510_v60, %s6703_s20  ;;  %v13511_v58 = vrot.slane %v9628_v47, 7  ;;  %v2360_v42 = vrot.slane %v2354_v53, 7  ;;  %v9869_v47 = vpop.permute.xlu0 %1982 }
 0x2e5   : > { %13503 = vst [vmem:[#allocation83_spill] sm:$0xff] %v9820_v62  ;;  %v2362_v56 = vrot.slane %v2355_v11, 7  ;;  %v9867_v60 = vmul.f32 %v9863_v21, %v9465_v7  ;;  %v13517_v11 = vrot.slane %v9720_v18, 7  ;;  %v3416_v61 = vmul.f32 %v9881_v16, %v9500_v33  ;;  %v13519_v7 = vld [vmem:[#allocation134_spill] sm:$0xff] }
 0x2e6   : > { %13504 = vst [vmem:[#allocation101_spill] sm:$0xff] %v9832_v0  ;;  %v3077_v0 = vadd.f32 %v13511_v58, %v2977_v3  ;;  %v9871_v3 = vpop.permute.xlu2 %2142  ;;  %v3297_v58 = vadd.f32 %v3290_v32, %v3200_v8  ;;  %v9889_v37 = vadd.f32 %v13519_v7, %v9518_v22  ;;  %v9899_v8 = vstv %s9804_s15  ;;  %v13521_v32 = vld [vmem:[#allocation135_spill] sm:$0xff]  ;;  %s10454_s15 = sld [smem:[#allocation7 + $0x7c]] }
 0x2e7   : > { %13506 = vst [vmem:[#allocation52_spill] sm:$0xff] %v9837_v41  ;;  %v3196_v41 = vmul.f32 %v9233_v29, %v9429_v15  ;;  %v9874_v15 = vsel %vm564_vm3, %v2341_v36, %v2343_v31  ;;  %v9879_v53 = vsel %vm564_vm3, %v13517_v11, %v2341_v36  ;;  %v9895_v31 = vmul.f32 %v13460_v44, %v9702_v28  ;;  %v13522_v28 = vld [vmem:[#allocation78_spill] sm:$0xff] }
 0x2e8   : > { %13513 = vst [vmem:[#allocation102_spill] sm:$0xff] %v9861_v4  ;;  %v9905_v11 = vadd.f32 %v13521_v32, %v9521_v63  ;;  %v9909_v22 = vmul.f32 %v8977_v34, %v9899_v8  ;;  %v3084_v7 = vmul.f32 %v9899_v8, %v8937_v14  ;;  %v9918_v36 = vsel %vm564_vm3, %v2360_v42, %v2362_v56 }
 0x2e9   : > { %13514 = vst [vmem:[#allocation29_spill] sm:$0xff] %v9869_v47  ;;  %v9891_v47 = vpop.permute.xlu1 %1984  ;;  %v3507_v63 = vrot.slane %v9867_v60, 7  ;;  %v9929_v34 = vmul.f32 %v9128_v55, %v9705_v27  ;;  %v9933_v14 = vmul.f32 %v13460_v44, %v9705_v27  ;;  %v2381_v56 = vrot.slane %v9895_v31, 7 }
 0x2ea   : > { %13515 = vst [vmem:[#allocation30_spill] sm:$0xff] %v9871_v3  ;;  %v13527_v60 = vrot.slane %v9841_v30, 7  ;;  %v13528_v32 = vrot.slane %v9740_v52, 7  ;;  %v13617_v3 = vld [vmem:[#allocation170_spill] sm:$0xff] }
 0x2eb   : > { %13516 = vst [vmem:[#allocation39_spill] sm:$0xff] %v9874_v15  ;;  %v3199_v15 = vadd.f32 %v3196_v41, %v3077_v0  ;;  %v13525_v0 = vrot.slane %v9732_v39, 7  ;;  %v10022_v39 = vstv %s9935_s22  ;;  %s10504_s22 = sld [smem:[#allocation7 + $0xc4]] }
 0x2ec   : > { %13518 = vst [vmem:[#allocation130_spill] sm:$0xff] %v9879_v53  ;;  %v13523_v53 = vld [vmem:[#allocation136_spill] sm:$0xff] }
 0x2ed   : > { %13520 = vst [vmem:[#allocation140_spill] sm:$0xff] %v9891_v47  ;;  %v9915_v18 = vadd.f32 %v13523_v53, %v13522_v28  ;;  %v9925_v41 = vsel %vm564_vm3, %v13525_v0, %v2360_v42  ;;  %v3419_v53 = vadd.f32 %v3416_v61, %v3297_v58  ;;  %v9943_v42 = vsel %vm564_vm3, %v13528_v32, %v13527_v60  ;;  %v13531_v61 = vld [vmem:[#allocation158_spill] sm:$0xff]  ;;  %v13532_v58 = vld [vmem:[#allocation157_spill] sm:$0xff] }
 0x2ee   : > { %13524 = vst [vmem:[#allocation181_spill] sm:$0xff] %v9918_v36  ;;  %v9947_v28 = vmul.f32 %v9128_v55, %v9743_v54  ;;  %v13530_v0 = vrot.slane %v9475_v2, 7  ;;  %2536 = vrot.lane.b32.xlu0 %v13531_v61, %s6703_s20  ;;  %v13533_v31 = vrot.slane %v13532_v58, 7  ;;  %v3296_v47 = vadd.f32 %v3288_v59, %v3199_v15  ;;  %v13534_v36 = vld [vmem:[#allocation109_spill] sm:$0xff]  ;;  %v13536_v58 = vld [vmem:[#allocation47_spill] sm:$0xff]  ;;  %v13537_v15 = vld [vmem:[#allocation32_spill] sm:$0xff] }
 0x2ef   : > { %13526 = vst [vmem:[#allocation184_spill] sm:$0xff] %v9925_v41  ;;  %v3415_v60 = vmul.f32 %v9863_v21, %v9500_v33  ;;  %v9962_v2 = vadd.f32 %v13534_v36, %v9658_v49  ;;  %2538 = vrot.lane.b32.xlu1 %v13536_v58, %s6703_s20  ;;  %v2412_v59 = vmul.f32 %v13460_v44, %v9743_v54  ;;  %v9980_v49 = vpop.permute.xlu0 %2007  ;;  %v9982_v36 = vpop.permute.xlu2 %2162  ;;  %v2400_v54 = vrot.slane %v9933_v14, 7 }
 0x2f0   : > { %13529 = vst [vmem:[#allocation192_spill] sm:$0xff] %v9943_v42  ;;  %v3509_v27 = vsel %vm564_vm3, %v3507_v63, %v13530_v0  ;;  %2559 = vrot.lane.b32.xlu2 %v13533_v31, %s6703_s20  ;;  %v3091_v42 = vrot.slane %v3084_v7, 7  ;;  %v13535_v0 = vld [vmem:[#allocation31_spill] sm:$0xff]  ;;  %v9974_v33 = vmul.f32 %v9118_v13, %v9534_v12  ;;  %v9978_v7 = vadd.f32 %v13537_v15, %v9666_v48 }
 0x2f1   : > { %v9966_v61 = vadd.f32 %v13535_v0, %v9662_v1  ;;  %13538 = vst [vmem:[#allocation103_spill] sm:$0xff] %v9980_v49  ;;  %v2398_v1 = vrot.slane %v9929_v34, 7  ;;  %v3516_v31 = vadd.f32 %v3509_v27, %v3419_v53  ;;  %v3635_v0 = vmul.f32 %v9128_v55, %v9578_v35  ;;  %v9987_v58 = vpop.permute.xlu1 %2009  ;;  %v13543_v49 = vld [vmem:[#allocation164_spill] sm:$0xff] }
 0x2f2   : > { %13539 = vst [vmem:[#allocation104_spill] sm:$0xff] %v9982_v36  ;;  %v2430_v12 = vmul.f32 %v9128_v55, %v9826_v50  ;;  %v9993_v48 = vstv %s9885_s21  ;;  %v9996_v15 = vstv %s9901_s24  ;;  %v3418_v32 = vadd.f32 %v3415_v60, %v3296_v47  ;;  %v10014_v47 = vld [vmem:[#allocation2 + $0x10] sm:$0x3]  ;;  %s10475_s21 = sld [smem:[#allocation7 + $0x76]] }
 0x2f3   : > { %13540 = vst [vmem:[#allocation105_spill] sm:$0xff] %v9987_v58  ;;  %v13541_v34 = vrot.slane %v9909_v22, 7  ;;  %v10005_v27 = vmul.f32 %v9106_v17, %v9996_v15  ;;  %v3303_v14 = vmul.f32 %v9996_v15, %v9045_v9  ;;  %v2431_v55 = vmul.f32 %v13460_v44, %v9826_v50  ;;  %s10497_s24 = sld [smem:[#allocation8 + $0x4]] }
 0x2f4   : > { %v3912_v41 = vadd.f32 %v9624_v51, %v9679_v26  ;;  %v3726_v52 = vrot.slane %v9974_v33, 7  ;;  %v2417_v60 = vrot.slane %v9947_v28, 7  ;;  %v3638_v17 = vadd.f32 %v3635_v0, %v3516_v31  ;;  %v13544_v28 = vld [vmem:[#allocation46_spill] sm:$0xff] }
 0x2f5   : > { %v3092_v53 = vsel %vm564_vm3, %v13541_v34, %v3091_v42  ;;  %v2987_v42 = vmul.f32 %v10014_v47, %v9993_v48  ;;  %v3634_v34 = vmul.f32 %v9118_v13, %v9578_v35  ;;  %v2419_v44 = vrot.slane %v2412_v59, 7 }
 0x2f6   : > { %v13542_v26 = vrot.slane %v9547_v10, 7  ;;  %v3206_v58 = vmul.f32 %v10022_v39, %v9045_v9  ;;  %2561 = vrot.lane.b32.xlu0 %v13543_v49, %s6703_s20  ;;  %v13545_v31 = vrot.slane %v13544_v28, 7  ;;  %v13546_v13 = vrot.slane %v9841_v30, 7 }
 0x2f7   : > { %v3098_v33 = vadd.f32 %v3092_v53, %v2987_v42  ;;  %v3515_v59 = vadd.f32 %v3507_v63, %v3418_v32  ;;  %v12908_v10 = vrot.slane %v10005_v27, 7  ;;  %v3310_v0 = vrot.slane %v3303_v14, 7  ;;  %v13548_v53 = vld [vmem:[#allocation163_spill] sm:$0xff]  ;;  %v10054_v63 = vpop.permute.xlu2 %2182 }
 0x2f8   : > { %v3728_v50 = vsel %vm564_vm3, %v3726_v52, %v13542_v26  ;;  %2584 = vrot.lane.b32.xlu2 %v13545_v31, %s6703_s20  ;;  %v10039_v35 = vsel %vm564_vm3, %v13546_v13, %v2381_v56  ;;  %2563 = vrot.lane.b32.xlu1 %v13548_v53, %s6703_s20  ;;  %v13549_v9 = vrot.slane %v9802_v45, 7  ;;  %v2436_v42 = vrot.slane %v2430_v12, 7  ;;  %v10052_v56 = vpop.permute.xlu0 %2032  ;;  %13552 = vst [vmem:[#allocation116_spill] sm:$0xff] %v10054_v63  ;;  %v13587_v45 = vld [vmem:[#allocation118_spill] sm:$0xff] }
 0x2f9   : > { %13547 = vst [vmem:[#allocation60_spill] sm:$0xff] %v10039_v35  ;;  %v2438_v26 = vrot.slane %v2431_v55, 7  ;;  %v3920_v30 = vmul.f32 %v9640_v24, %v3912_v41  ;;  %v10057_v32 = vsel %vm564_vm3, %v2398_v1, %v2400_v54  ;;  %vm3915_vm11 = vcmp.gt.f32.partialorder %v3912_v41, 0.0  ;;  %v10059_v31 = vpop.permute.xlu1 %2034 }
 0x2fa   : > { %v10047_v49 = vsel %vm564_vm3, %v13549_v9, %v2398_v1  ;;  %13551 = vst [vmem:[#allocation115_spill] sm:$0xff] %v10052_v56  ;;  %v3735_v14 = vadd.f32 %v3728_v50, %v3638_v17  ;;  %v3637_v28 = vadd.f32 %v3634_v34, %v3515_v59  ;;  %v10062_v12 = vsel %vm564_vm3, %v2417_v60, %v2419_v44  ;;  %v13558_v1 = vld [vmem:[#allocation141_spill] sm:$0xff] }
 0x2fb   : > { %13550 = vst [vmem:[#allocation189_spill] sm:$0xff] %v10047_v49  ;;  %v13556_v55 = vrot.slane %v9820_v62, 7  ;;  %v3209_v53 = vadd.f32 %v3206_v58, %v3098_v33  ;;  %v10070_v9 = vstv %s9998_s23  ;;  %v10074_v54 = vadd.f32 %v13558_v1, %v9552_v38  ;;  %v13559_v58 = vld [vmem:[#allocation24_spill] sm:$0xff]  ;;  %v13561_v38 = vld [vmem:[#allocation142_spill] sm:$0xff]  ;;  %s10506_s23 = sld [smem:[#allocation9 + $0x4]] }
 0x2fc   : > { %13553 = vst [vmem:[#allocation150_spill] sm:$0xff] %v10057_v32  ;;  %v3311_v17 = vsel %vm564_vm3, %v12908_v10, %v3310_v0  ;;  %v10081_v34 = vmul.f32 %v9881_v16, %v10070_v9  ;;  %v3522_v44 = vmul.f32 %v10070_v9, %v9135_v46  ;;  %v10093_v33 = vadd.f32 %v13561_v38, %v9555_v57  ;;  %v13570_v38 = vld [vmem:[#allocation172_spill] sm:$0xff] }
 0x2fd   : > { %13554 = vst [vmem:[#allocation137_spill] sm:$0xff] %v10059_v31  ;;  %v10067_v13 = vsel %vm564_vm3, %v13556_v55, %v2417_v60  ;;  %v13560_v60 = vld [vmem:[#allocation144_spill] sm:$0xff]  ;;  %v10096_v59 = vsel %vm564_vm3, %v2436_v42, %v2438_v26  ;;  %v10099_v0 = vsel %vm3915_vm11, %v3912_v41, %v3920_v30  ;;  %v3911_v55 = vadd.f32 %v9624_v51, %v3735_v14  ;;  %v10118_v30 = vld [vmem:[#allocation2 + $0x40] sm:$0x3]  ;;  %v13567_v14 = vld [vmem:[#allocation113_spill] sm:$0xff] }
 0x2fe   : > { %13555 = vst [vmem:[#allocation74_spill] sm:$0xff] %v10062_v12  ;;  %v10089_v50 = vadd.f32 %v13560_v60, %v13559_v58  ;;  %v3734_v1 = vadd.f32 %v3726_v52, %v3637_v28  ;;  %v10103_v46 = vstv %s10024_s25  ;;  %v10107_v10 = vmul.f32 %v9158_v43, %v9899_v8  ;;  %v13564_v58 = vld [vmem:[#allocation112_spill] sm:$0xff]  ;;  %v13568_v8 = vld [vmem:[#allocation41_spill] sm:$0xff]  ;;  %2586 = vrot.lane.b32.xlu0 %v13570_v38, %s6703_s20  ;;  %s10545_s25 = sld [smem:[#allocation7 + $0xbe]] }
 0x2ff   : > { %13557 = vst [vmem:[#allocation121_spill] sm:$0xff] %v10067_v13  ;;  %v10111_v60 = vadd.f32 %v13564_v58, %v9774_v19  ;;  %v13565_v57 = vrot.slane %v9861_v4, 7  ;;  %v3317_v41 = vadd.f32 %v3311_v17, %v3209_v53  ;;  %v3425_v52 = vmul.f32 %v10118_v30, %v10103_v46  ;;  %v13569_v28 = vld [vmem:[#allocation117_spill] sm:$0xff]  ;;  %v13581_v38 = vld [vmem:[#allocation156_spill] sm:$0xff] }
 0x300   : > { %13562 = vst [vmem:[#allocation149_spill] sm:$0xff] %v10096_v59  ;;  %v10124_v43 = vadd.f32 %v13567_v14, %v9756_v6  ;;  %v10128_v19 = vadd.f32 %v13569_v28, %v13568_v8  ;;  %v3529_v17 = vrot.slane %v3522_v44, 7  ;;  %v13574_v59 = vld [vmem:[#allocation152_spill] sm:$0xff]  ;;  %v13575_v14 = vld [vmem:[#allocation75_spill] sm:$0xff]  ;;  %v10154_v44 = vpop.permute.xlu2 %2202  ;;  %v3919_v53 = vmul.f32 %v9640_v24, %v3911_v55 }
 0x301   : > { %13563 = vst [vmem:[#allocation106_spill] sm:$0xff] %v10099_v0  ;;  %v10116_v26 = vsel %vm564_vm3, %v13565_v57, %v2436_v42  ;;  %v13571_v42 = vld [vmem:[#allocation165_spill] sm:$0xff]  ;;  %v13577_v28 = vld [vmem:[#allocation55_spill] sm:$0xff]  ;;  %v10169_v13 = vpop.permute.xlu1 %2059  ;;  %vm3914_vm12 = vcmp.gt.f32.partialorder %v3911_v55, 0.0  ;;  %v3428_v4 = vadd.f32 %v3425_v52, %v3317_v41  ;;  %v13583_v32 = vld [vmem:[#allocation64_spill] sm:$0xff]  ;;  %v13585_v62 = vrot.slane %v10081_v34, 7 }
 0x302   : > { %13566 = vst [vmem:[#allocation107_spill] sm:$0xff] %v10116_v26  ;;  %v13572_v58 = vrot.slane %v13571_v42, 7  ;;  %v13573_v57 = vld [vmem:[#allocation37_spill] sm:$0xff]  ;;  %2588 = vrot.lane.b32.xlu1 %v13577_v28, %s6703_s20  ;;  %v10150_v42 = vstv %s10050_s26  ;;  %v13580_v28 = vld [vmem:[#allocation95_spill] sm:$0xff]  ;;  %v10188_v41 = vadd.f32 %v13587_v45, %v9889_v37  ;;  %v10205_v45 = vsel %vm3914_vm12, %v3911_v55, %v3919_v53  ;;  %v13590_v55 = vld [vmem:[#allocation18_spill] sm:$0xff]  ;;  %s10561_s26 = sld [smem:[#allocation7 + $0x10c]] }
 0x303   : > { %v10140_v6 = vadd.f32 %v13574_v59, %v13573_v57  ;;  %v13576_v26 = vld [vmem:[#allocation153_spill] sm:$0xff]  ;;  %13579 = vst [vmem:[#allocation154_spill] sm:$0xff] %v10154_v44  ;;  %v3910_v59 = vadd.f32 %v9624_v51, %v3734_v1  ;;  %v10167_v12 = vadd.f32 %v13581_v38, %v13580_v28  ;;  %v3741_v49 = vmul.f32 %v10150_v42, %v13583_v32  ;;  %v13584_v51 = vld [vmem:[#allocation114_spill] sm:$0xff]  ;;  %v13591_v53 = vld [vmem:[#allocation68_spill] sm:$0xff] }
 0x304   : > { %2609 = vrot.lane.b32.xlu2 %v13572_v58, %s6703_s20  ;;  %v10144_v8 = vadd.f32 %v13576_v26, %v13575_v14  ;;  %v10152_v58 = vpop.permute.xlu0 %2057  ;;  %v10158_v57 = vld [vmem:[#allocation2 + $0x50] sm:$0xff]  ;;  %v3088_v14 = vrot.slane %v10107_v10, 7  ;;  %13582 = vst [vmem:[#allocation151_spill] sm:$0xff] %v10169_v13  ;;  %v10175_v1 = vadd.f32 %v13584_v51, %v9915_v18  ;;  %v3530_v35 = vsel %vm564_vm3, %v13585_v62, %v3529_v17  ;;  %v13588_v32 = vld [vmem:[#allocation110_spill] sm:$0xff]  ;;  %v10201_v17 = vld [vmem:[#allocation2 + $0x8] sm:$0xff] }
 0x305   : > { %13578 = vst [vmem:[#allocation108_spill] sm:$0xff] %v10152_v58  ;;  %v10162_v26 = vmul.f32 %v10158_v57, %v10150_v42  ;;  %v10181_v10 = vstv %s10085_s27  ;;  %v13586_v38 = vrot.slane %v9909_v22, 7  ;;  %v13589_v52 = vrot.slane %v13588_v32, 7  ;;  %v10195_v18 = vld [vmem:[#allocation2 + $0x58] sm:$0x3]  ;;  %v10213_v58 = vld [vmem:[#allocation2 + $0x20] sm:$0xff] }
 0x306   : > { %v3644_v62 = vmul.f32 %v10195_v18, %v10181_v10  ;;  %v2986_v22 = vmul.f32 %v10201_v17, %v9993_v48  ;;  %v3918_v37 = vmul.f32 %v9640_v24, %v3910_v59  ;;  %v10211_v51 = vmul.f32 %v9233_v29, %v9996_v15  ;;  %v13592_v24 = vld [vmem:[#allocation129_spill] sm:$0xff]  ;;  %v13594_v29 = vld [vmem:[#allocation174_spill] sm:$0xff]  ;;  %s10595_s27 = sld [smem:[#allocation7 + $0x106]] }
 0x307   : > { %v3090_v28 = vsel %vm564_vm3, %v3088_v14, %v13586_v38  ;;  %v10193_v13 = vadd.f32 %v13589_v52, %v9905_v11  ;;  %v3536_v38 = vadd.f32 %v3530_v35, %v3428_v4  ;;  %v3748_v32 = vrot.slane %v3741_v49, 7  ;;  %v13593_v11 = vld [vmem:[#allocation160_spill] sm:$0xff]  ;;  %2611 = vrot.lane.b32.xlu0 %v13594_v29, %s6703_s20  ;;  %v13595_v4 = vld [vmem:[#allocation171_spill] sm:$0xff] }
 0x308   : > { %v3097_v52 = vadd.f32 %v3090_v28, %v2986_v22  ;;  %v3205_v44 = vmul.f32 %v10213_v58, %v10022_v39  ;;  %v10221_v31 = vadd.f32 %v13591_v53, %v13590_v55  ;;  %v10225_v56 = vadd.f32 %v13593_v11, %v13592_v24  ;;  %v13597_v49 = vld [vmem:[#allocation100_spill] sm:$0xff]  ;;  %v13598_v28 = vld [vmem:[#allocation15_spill] sm:$0xff]  ;;  %v13601_v11 = vld [vmem:[#allocation178_spill] sm:$0xff] }
 0x309   : > { %v13596_v15 = vrot.slane %v13595_v4, 7  ;;  %vm3913_vm13 = vcmp.gt.f32.partialorder %v3910_v59, 0.0  ;;  %v3100_v35 = vstv %s10136_s28  ;;  %v10237_v22 = vadd.f32 %v13598_v28, %v13597_v49  ;;  %v13599_v55 = vld [vmem:[#allocation119_spill] sm:$0xff]  ;;  %v13602_v4 = vld [vmem:[#allocation122_spill] sm:$0xff]  ;;  %v10255_v49 = vpop.permute.xlu2 %2222  ;;  %v10265_v20 = vpop.permute.xlu1 %2146  ;;  %s10776_s28 = sld [smem:[#allocation8 + $0x2]] }
 0x30a   : > { %v10241_v53 = vadd.f32 %v13599_v55, %v10089_v50  ;;  %2613 = vrot.lane.b32.xlu1 %v13601_v11, %s6703_s20  ;;  %v10246_v24 = vmul.f32 %v10201_v17, %v3100_v35  ;;  %v3103_v29 = vmul.f32 %v10014_v47, %v3100_v35  ;;  %13604 = vst [vmem:[#allocation135_spill] sm:$0xff] %v10255_v49  ;;  %v3928_v28 = vrot.slane %v10205_v45, 1  ;;  %v10261_v55 = vld [vmem:[#allocation2] sm:$0xff] }
 0x30b   : > { %v3307_v50 = vrot.slane %v10211_v51, 7  ;;  %v2985_v11 = vmul.f32 %v10261_v55, %v9993_v48  ;;  %13605 = vst [vmem:[#allocation78_spill] sm:$0xff] %v10265_v20  ;;  %v3208_v45 = vadd.f32 %v3205_v44, %v3097_v52  ;;  %v13607_v36 = vrot.slane %v10005_v27, 7  ;;  %v10280_v20 = vld [vmem:[#allocation2 + $0x18] sm:$0xff]  ;;  %v13615_v52 = vld [vmem:[#allocation57_spill] sm:$0xff] }
 0x30c   : > { %2634 = vrot.lane.b32.xlu2 %v13596_v15, %s6703_s20  ;;  %13600 = vst [vmem:[#allocation67_spill] sm:$0xff] %v10241_v53  ;;  %v10251_v15 = vadd.f32 %v13602_v4, %v10074_v54  ;;  %v10253_v63 = vpop.permute.xlu0 %2144  ;;  %v3921_v54 = vsel %vm3913_vm13, %v3910_v59, %v3918_v37  ;;  %v3647_v4 = vadd.f32 %v3644_v62, %v3536_v38  ;;  %v13609_v62 = vld [vmem:[#allocation120_spill] sm:$0xff]  ;;  %v10290_v27 = vstv %s10199_s29  ;;  %v13613_v38 = vld [vmem:[#allocation69_spill] sm:$0xff]  ;;  %s10796_s29 = sld [smem:[#allocation9 + $0x2]] }
 0x30d   : > { %13603 = vst [vmem:[#allocation134_spill] sm:$0xff] %v10253_v63  ;;  %v13606_v63 = vrot.slane %v10162_v26, 7  ;;  %v3309_v51 = vsel %vm564_vm3, %v3307_v50, %v13607_v36  ;;  %v10278_v40 = vmul.f32 %v9863_v21, %v10070_v9  ;;  %v3096_v48 = vadd.f32 %v3088_v14, %v2985_v11  ;;  %v13612_v9 = vld [vmem:[#allocation98_spill] sm:$0xff] }
 0x30e   : > { %13608 = vst [vmem:[#allocation136_spill] sm:$0xff] %v10280_v20  ;;  %v3204_v59 = vmul.f32 %v10280_v20, %v10022_v39  ;;  %v3108_v36 = vrot.slane %v10246_v24, 7  ;;  %v3110_v37 = vrot.slane %v3103_v29, 7  ;;  %v10295_v14 = vadd.f32 %v13613_v38, %v13612_v9  ;;  %v13616_v39 = vld [vmem:[#allocation23_spill] sm:$0xff]  ;;  %v13621_v38 = vld [vmem:[#allocation182_spill] sm:$0xff] }
 0x30f   : > { %v3749_v49 = vsel %vm564_vm3, %v13606_v63, %v3748_v32  ;;  %v13610_v63 = vrot.slane %v13609_v62, 7  ;;  %v13614_v32 = vld [vmem:[#allocation62_spill] sm:$0xff]  ;;  %v10303_v62 = vadd.f32 %v13617_v3, %v13616_v39  ;;  %v3927_v53 = vrot.slane %v3921_v54, 1  ;;  %2636 = vrot.lane.b32.xlu0 %v13621_v38, %s6703_s20  ;;  %v13625_v38 = vld [vmem:[#allocation124_spill] sm:$0xff] }
 0x310   : > { %v10299_v11 = vadd.f32 %v13615_v52, %v13614_v32  ;;  %v3755_v24 = vadd.f32 %v3749_v49, %v3647_v4  ;;  %v3316_v29 = vadd.f32 %v3309_v51, %v3208_v45  ;;  %v3424_v9 = vmul.f32 %v9881_v16, %v10103_v46  ;;  %v10327_v4 = vld [vmem:[#allocation2 + $0x28] sm:$0x3] }
 0x311   : > { %v10287_v44 = vadd.f32 %v13610_v63, %v10093_v33  ;;  %13618 = vst [vmem:[#allocation157_spill] sm:$0xff] %v10303_v62  ;;  %v13619_v33 = vrot.slane %v10099_v0, 1  ;;  %v3207_v52 = vadd.f32 %v3204_v59, %v3096_v48  ;;  %v10316_v3 = vstv %s10217_s30  ;;  %v13623_v48 = vld [vmem:[#allocation123_spill] sm:$0xff]  ;;  %v10348_v0 = vpop.permute.xlu1 %2166  ;;  %s10806_s30 = sld [smem:[#allocation8 + $0x3]] }
 0x312   : > { %v3319_v39 = vstv %s10233_s18  ;;  %v3111_v49 = vsel %vm564_vm3, %v3108_v36, %v3110_v37  ;;  %v10331_v51 = vmul.f32 %v10261_v55, %v3100_v35  ;;  %v10335_v59 = vadd.f32 %v13623_v48, %v10167_v12  ;;  %13628 = vst [vmem:[#allocation164_spill] sm:$0xff] %v10348_v0  ;;  %s6705_s18 = smov 127  }
 0x313   : > { %13611 = vst [vmem:[#allocation158_spill] sm:$0xff] %v10287_v44  ;;  %v10308_v63 = vsel %vm2665_vm7, %v3928_v28, %v13619_v33  ;;  %v13622_v33 = vld [vmem:[#allocation70_spill] sm:$0xff]  ;;  %v10325_v54 = vmul.f32 %v10213_v58, %v3319_v39  ;;  %v3322_v45 = vmul.f32 %v10327_v4, %v3319_v39  ;;  %v10339_v32 = vadd.f32 %v13625_v38, %v10140_v6  ;;  %v10359_v38 = vpop.permute.xlu2 %2242 }
 0x314   : > { %13620 = vst [vmem:[#allocation109_spill] sm:$0xff] %v10308_v63  ;;  %2638 = vrot.lane.b32.xlu1 %v13622_v33, %s6703_s20  ;;  %v10341_v33 = vpop.permute.xlu0 %2164  ;;  %v10344_v37 = vstv %s10258_s5  ;;  %v2995_v63 = vmul.f32 %v10014_v47, %v10316_v3  ;;  %v3950_v35 = vadd.f32 %v10290_v27, %v3755_v24  ;;  %v3427_v62 = vadd.f32 %v3424_v9, %v3316_v29  ;;  %v13632_v24 = vld [vmem:[#allocation125_spill] sm:$0xff]  ;;  %s10825_s5 = sld [smem:[#allocation9 + $0x3]] }
 0x315   : > { %13624 = vst [vmem:[#allocation31_spill] sm:$0xff] %v10335_v59  ;;  %v13629_v44 = vrot.slane %v10081_v34, 7  ;;  %v13630_v12 = vrot.slane %v10278_v40, 7  ;;  %v3211_v6 = vstv %s10271_s6  ;;  %v3423_v59 = vmul.f32 %v9863_v21, %v10103_v46  ;;  %s10835_s6 = sld [smem:[#allocation8 + $0x4]] }
 0x316   : > { %13626 = vst [vmem:[#allocation47_spill] sm:$0xff] %v10339_v32  ;;  %v3117_v32 = vadd.f32 %v3111_v49, %v2995_v63  ;;  %v3214_v0 = vmul.f32 %v10327_v4, %v3211_v6  ;;  %v13633_v29 = vrot.slane %v13632_v24, 7  ;;  %v3329_v9 = vrot.slane %v3322_v45, 7 }
 0x317   : > { %13627 = vst [vmem:[#allocation32_spill] sm:$0xff] %v10341_v33  ;;  %v3528_v48 = vsel %vm564_vm3, %v13630_v12, %v13629_v44  ;;  %v3315_v33 = vadd.f32 %v3307_v50, %v3207_v52  ;;  %v3327_v44 = vrot.slane %v10325_v54, 7  ;;  %v3107_v12 = vrot.slane %v10331_v51, 7  ;;  %v10380_v52 = vld [vmem:[#allocation2 + $0x48] sm:$0xff] }
 0x318   : > { %13631 = vst [vmem:[#allocation46_spill] sm:$0xff] %v10359_v38  ;;  %v10367_v34 = vadd.f32 %v13633_v29, %v10144_v8  ;;  %v13635_v38 = vld [vmem:[#allocation176_spill] sm:$0xff]  ;;  %v10376_v46 = vsel %vm2665_vm7, %v3927_v53, %v3928_v28  ;;  %v3643_v63 = vmul.f32 %v10158_v57, %v10181_v10  ;;  %v3739_v8 = vmul.f32 %v10380_v52, %v10150_v42 }
 0x319   : > { %v10373_v50 = vadd.f32 %v13635_v38, %v9812_v23  ;;  %13636 = vst [vmem:[#allocation141_spill] sm:$0xff] %v10376_v46  ;;  %vm3953_vm14 = vcmp.gt.f32.partialorder %v3950_v35, 0.0  ;;  %v3958_v49 = vmul.f32 %v10344_v37, %v3950_v35  ;;  %v3535_v54 = vadd.f32 %v3528_v48, %v3427_v62  ;;  %v10410_v29 = vpop.permute.xlu1 %2186 }
 0x31a   : > { %13634 = vst [vmem:[#allocation163_spill] sm:$0xff] %v10367_v34  ;;  %v3109_v23 = vsel %vm564_vm3, %v3107_v12, %v3108_v36  ;;  %v3426_v45 = vadd.f32 %v3423_v59, %v3315_v33  ;;  %v3217_v51 = vadd.f32 %v3214_v0, %v3117_v32  ;;  %v3538_v53 = vstv %s10319_s7  ;;  %v13637_v0 = vld [vmem:[#allocation177_spill] sm:$0xff]  ;;  %s6706_s7 = smov 16  }
 0x31b   : > { %v2994_v28 = vmul.f32 %v10201_v17, %v10316_v3  ;;  %v3330_v38 = vsel %vm564_vm3, %v3327_v44, %v3329_v9  ;;  %v10395_v42 = vmul.f32 %v9881_v16, %v3538_v53  ;;  %v3541_v24 = vmul.f32 %v10118_v30, %v3538_v53  ;;  %13639 = vst [vmem:[#allocation144_spill] sm:$0xff] %v10410_v29 }
 0x31c   : > { %v10399_v62 = vmul.f32 %v10280_v20, %v3319_v39  ;;  %v10405_v36 = vadd.f32 %v13637_v0, %v9816_v5  ;;  %v10407_v32 = vpop.permute.xlu0 %2184  ;;  %v3745_v59 = vrot.slane %v3739_v8, 7  ;;  %v3213_v48 = vmul.f32 %v10213_v58, %v3211_v6  ;;  %v13641_v5 = vld [vmem:[#allocation71_spill] sm:$0xff] }
 0x31d   : > { %13638 = vst [vmem:[#allocation24_spill] sm:$0xff] %v10407_v32  ;;  %v3116_v33 = vadd.f32 %v3109_v23, %v2994_v28  ;;  %v10413_v9 = vsel %vm3953_vm14, %v3950_v35, %v3958_v49  ;;  %v3646_v39 = vadd.f32 %v3643_v63, %v3535_v54  ;;  %v3642_v46 = vmul.f32 %v10380_v52, %v10181_v10  ;;  %v10430_v54 = vpop.permute.xlu2 %2262 }
 0x31e   : > { %13640 = vst [vmem:[#allocation142_spill] sm:$0xff] %v10413_v9  ;;  %v3430_v34 = vstv %s10357_s9  ;;  %v10420_v0 = vadd.f32 %v13641_v5, %v9808_v25  ;;  %v13642_v8 = vrot.slane %v10162_v26, 7  ;;  %v3336_v28 = vadd.f32 %v3330_v38, %v3217_v51  ;;  %s10851_s9 = sld [smem:[#allocation9 + $0x4]] }
 0x31f   : > { %v3433_v32 = vmul.f32 %v10118_v30, %v3430_v34  ;;  %v13643_v29 = vrot.slane %v10278_v40, 7  ;;  %v3546_v63 = vrot.slane %v10395_v42, 7  ;;  %v3548_v49 = vrot.slane %v3541_v24, 7  ;;  %13644 = vst [vmem:[#allocation112_spill] sm:$0xff] %v10430_v54  ;;  %v13647_v54 = vld [vmem:[#allocation198_spill] sm:$0xff] }
 0x320   : > { %v3747_v23 = vsel %vm564_vm3, %v3745_v59, %v13642_v8  ;;  %v3326_v10 = vrot.slane %v10399_v62, 7  ;;  %v3757_v26 = vstv %s10384_s10  ;;  %v3216_v5 = vadd.f32 %v3213_v48, %v3116_v33  ;;  %s10860_s10 = sld [smem:[#allocation8 + $0x5]] }
 0x321   : > { %v3534_v35 = vadd.f32 %v13643_v29, %v3426_v45  ;;  %v2993_v51 = vmul.f32 %v10261_v55, %v10316_v3  ;;  %v3754_v38 = vadd.f32 %v3747_v23, %v3646_v39  ;;  %v10437_v40 = vmul.f32 %v10158_v57, %v3757_v26  ;;  %v13646_v23 = vld [vmem:[#allocation193_spill] sm:$0xff] }
 0x322   : > { %v3328_v45 = vsel %vm564_vm3, %v3326_v10, %v3327_v44  ;;  %v3436_v42 = vadd.f32 %v3433_v32, %v3336_v28  ;;  %v3760_v24 = vmul.f32 %v10195_v18, %v3757_v26  ;;  %v3212_v29 = vmul.f32 %v10280_v20, %v3211_v6  ;;  %v10469_v28 = vpop.permute.xlu1 %2206 }
 0x323   : > { %v3645_v8 = vadd.f32 %v3642_v46, %v3534_v35  ;;  %v3115_v62 = vadd.f32 %v3107_v12, %v2993_v51  ;;  %v3549_v33 = vsel %vm564_vm3, %v3546_v63, %v3548_v49  ;;  %v10446_v48 = vstv %s10389_s12  ;;  %s6707_s12 = smov 33  }
 0x324   : > { %v10449_v3 = vmul.f32 %v9863_v21, %v3538_v53  ;;  %v10452_v46 = vstv %s10401_s13  ;;  %v10456_v44 = vpop.permute.xlu0 %2204  ;;  %v3335_v32 = vadd.f32 %v3328_v45, %v3216_v5  ;;  %v3432_v12 = vmul.f32 %v9881_v16, %v3430_v34  ;;  %s10876_s13 = sld [smem:[#allocation9 + $0x5]] }
 0x325   : > { %13645 = vst [vmem:[#allocation113_spill] sm:$0xff] %v10456_v44  ;;  %v10461_v6 = vmul.f32 %v10201_v17, %v10452_v46  ;;  %v3122_v39 = vmul.f32 %v10014_v47, %v10452_v46  ;;  %v10467_v53 = vadd.f32 %v13646_v23, %v9966_v61  ;;  %v3949_v35 = vadd.f32 %v10290_v27, %v3754_v38  ;;  %v13648_v61 = vld [vmem:[#allocation194_spill] sm:$0xff] }
 0x326   : > { %v3753_v49 = vadd.f32 %v3745_v59, %v3645_v8  ;;  %v3652_v5 = vmul.f32 %v10195_v18, %v10446_v48  ;;  %v3555_v51 = vadd.f32 %v3549_v33, %v3436_v42  ;;  %v3765_v45 = vrot.slane %v10437_v40, 7  ;;  %v13649_v59 = vld [vmem:[#allocation127_spill] sm:$0xff]  ;;  %v13650_v40 = vld [vmem:[#allocation65_spill] sm:$0xff] }
 0x327   : > { %v3767_v25 = vrot.slane %v3760_v24, 7  ;;  %v3215_v20 = vadd.f32 %v3212_v29, %v3115_v62  ;;  %v10479_v44 = vadd.f32 %v13647_v54, %v9962_v2  ;;  %v10483_v23 = vadd.f32 %v13648_v61, %v9978_v7  ;;  %v10500_v29 = vpop.permute.xlu2 %2282 }
 0x328   : > { %v10487_v38 = vadd.f32 %v13649_v59, %v10124_v43  ;;  %v3545_v8 = vrot.slane %v10449_v3, 7  ;;  %v10492_v42 = vadd.f32 %v13650_v40, %v10128_v19  ;;  %v3435_v24 = vadd.f32 %v3432_v12, %v3335_v32 }
 0x329   : > { %v12914_v62 = vrot.slane %v10461_v6, 7  ;;  %v3129_v2 = vrot.slane %v3122_v39, 7  ;;  %vm3952_vm15 = vcmp.gt.f32.partialorder %v3949_v35, 0.0  ;;  %v3957_v7 = vmul.f32 %v10344_v37, %v3949_v35 }
 0x32a   : > { %v3948_v54 = vadd.f32 %v10290_v27, %v3753_v49  ;;  %v3547_v43 = vsel %vm564_vm3, %v3545_v8, %v3546_v63  ;;  %v3655_v33 = vadd.f32 %v3652_v5, %v3555_v51  ;;  %v3768_v19 = vsel %vm564_vm3, %v3765_v45, %v3767_v25  ;;  %v13655_v5 = vld [vmem:[#allocation42_spill] sm:$0xff]  ;;  %v10536_v61 = vpop.permute.xlu1 %2226 }
 0x32b   : > { %v3334_v3 = vadd.f32 %v3326_v10, %v3215_v20  ;;  %v3431_v32 = vmul.f32 %v9863_v21, %v3430_v34  ;;  %v3651_v12 = vmul.f32 %v10158_v57, %v10446_v48  ;;  %v3758_v27 = vmul.f32 %v10380_v52, %v3757_v26  ;;  %v13654_v10 = vld [vmem:[#allocation87_spill] sm:$0xff] }
 0x32c   : > { %v10512_v39 = vstv %s10442_s14  ;;  %v10515_v63 = vstv %s10454_s15  ;;  %v10517_v49 = vpop.permute.xlu0 %2224  ;;  %v3554_v25 = vadd.f32 %v3547_v43, %v3435_v24  ;;  %v3130_v20 = vsel %vm564_vm3, %v12914_v62, %v3129_v2  ;;  %s10885_s14 = sld [smem:[#allocation8 + $0x6]]  ;;  %s6708_s15 = smov 50  }
 0x32d   : > { %13651 = vst [vmem:[#allocation41_spill] sm:$0xff] %v10512_v39  ;;  %v10524_v21 = vmul.f32 %v10213_v58, %v10515_v63  ;;  %v3341_v34 = vmul.f32 %v10327_v4, %v10515_v63  ;;  %v10530_v26 = vadd.f32 %v13654_v10, %v10111_v60  ;;  %v10534_v51 = vadd.f32 %v13655_v5, %v10237_v22 }
 0x32e   : > { %13652 = vst [vmem:[#allocation117_spill] sm:$0xff] %v10515_v63  ;;  %v3960_v59 = vsel %vm3952_vm15, %v3949_v35, %v3957_v7  ;;  %v3003_v40 = vmul.f32 %v10014_v47, %v10512_v39  ;;  %v3956_v58 = vmul.f32 %v10344_v37, %v3948_v54  ;;  %v3774_v24 = vadd.f32 %v3768_v19, %v3655_v33  ;;  %v13657_v19 = vld [vmem:[#allocation143_spill] sm:$0xff] }
 0x32f   : > { %13653 = vst [vmem:[#allocation172_spill] sm:$0xff] %v10524_v21  ;;  %v3434_v2 = vadd.f32 %v3431_v32, %v3334_v3  ;;  %v10543_v43 = vstv %s10475_s21  ;;  %vm3951_vm0 = vcmp.gt.f32.partialorder %v3948_v54, 0.0  ;;  %v3764_v60 = vrot.slane %v3758_v27, 7  ;;  %s10900_s21 = sld [smem:[#allocation9 + $0x6]] }
 0x330   : > { %13656 = vst [vmem:[#allocation165_spill] sm:$0xff] %v10543_v43  ;;  %v3136_v22 = vadd.f32 %v3130_v20, %v3003_v40  ;;  %v3222_v35 = vmul.f32 %v10327_v4, %v10543_v43  ;;  %v3654_v7 = vadd.f32 %v3651_v12, %v3554_v25  ;;  %v3650_v47 = vmul.f32 %v10380_v52, %v10446_v48  ;;  %v13659_v4 = vld [vmem:[#allocation138_spill] sm:$0xff] }
 0x331   : > { %v12915_v37 = vrot.slane %v10524_v21, 7  ;;  %v3348_v33 = vrot.slane %v3341_v34, 7  ;;  %v10554_v3 = vadd.f32 %v13657_v19, %v10221_v31  ;;  %v3966_v32 = vrot.slane %v3960_v59, 1  ;;  %v13674_v21 = vld [vmem:[#allocation139_spill] sm:$0xff] }
 0x332   : > { %v3985_v10 = vstv %s10497_s24  ;;  %v3766_v27 = vsel %vm564_vm3, %v3764_v60, %v3765_v45  ;;  %v3959_v20 = vsel %vm3951_vm0, %v3948_v54, %v3956_v58  ;;  %v3553_v40 = vadd.f32 %v3545_v8, %v3434_v2  ;;  %v10573_v45 = vpop.permute.xlu2 %2459  ;;  %v13662_v58 = vld [vmem:[#allocation88_spill] sm:$0xff]  ;;  %s10908_s24 = sld [smem:[#allocation8 + $0x7]] }
 0x333   : > { %v3988_v5 = vadd.f32 %v3985_v10, %v3774_v24  ;;  %v10559_v62 = vstv %s10504_s22  ;;  %v13660_v52 = vrot.slane %v13659_v4, 7  ;;  %v3993_v12 = vstv %s10506_s23  ;;  %s6709_s22 = smov 67   ;;  %s10914_s23 = sld [smem:[#allocation8 + $0x5]] }
 0x334   : > { %13658 = vst [vmem:[#allocation37_spill] sm:$0xff] %v10559_v62  ;;  %v3225_v25 = vadd.f32 %v3222_v35, %v3136_v22  ;;  %v10571_v31 = vmul.f32 %v9881_v16, %v10559_v62  ;;  %v10575_v54 = vpop.permute.xlu0 %2244  ;;  %v3773_v8 = vadd.f32 %v3766_v27, %v3654_v7  ;;  %v3653_v34 = vadd.f32 %v3650_v47, %v3553_v40  ;;  %v13663_v16 = vld [vmem:[#allocation86_spill] sm:$0xff]  ;;  %v10588_v22 = vpop.permute.xlu1 %2246  ;;  %v13667_v27 = vld [vmem:[#allocation145_spill] sm:$0xff] }
 0x335   : > { %v10566_v48 = vadd.f32 %v13660_v52, %v10225_v56  ;;  %v3349_v59 = vsel %vm564_vm3, %v12915_v37, %v3348_v33  ;;  %v3560_v56 = vmul.f32 %v10118_v30, %v10559_v62  ;;  %v10584_v24 = vadd.f32 %v13662_v58, %v10188_v41  ;;  %v13666_v33 = vld [vmem:[#allocation21_spill] sm:$0xff] }
 0x336   : > { %13661 = vst [vmem:[#allocation152_spill] sm:$0xff] %v10571_v31  ;;  %v1889_v2 = vadd.f32 %v13663_v16, %v10193_v13  ;;  %v13664_v35 = vrot.slane %v10413_v9, 1  ;;  %v3965_v47 = vrot.slane %v3959_v20, 1  ;;  %v1654_v19 = vadd.f32 %v13666_v33, %v10175_v1  ;;  %v13669_v13 = vld [vmem:[#allocation146_spill] sm:$0xff]  ;;  %v13673_v62 = vld [vmem:[#allocation157_spill] sm:$0xff] }
 0x337   : > { %v1733_v41 = vadd.f32 %v13667_v27, %v10295_v14  ;;  %v3996_v40 = vmul.f32 %v3993_v12, %v3988_v5  ;;  %v10602_v4 = vstv %s10545_s25  ;;  %v1732_v52 = vadd.f32 %v13669_v13, %v10299_v11  ;;  %v13670_v33 = vld [vmem:[#allocation90_spill] sm:$0xff]  ;;  %s10930_s25 = sld [smem:[#allocation9 + $0x7]] }
 0x338   : > { %v10593_v7 = vsel %vm2665_vm7, %v3966_v32, %v13664_v35  ;;  %13668 = vst [vmem:[#allocation153_spill] sm:$0xff] %v10602_v4  ;;  %vm3991_vm1 = vcmp.gt.f32.partialorder %v3988_v5, 0.0  ;;  %v3355_v58 = vadd.f32 %v3349_v59, %v3225_v25  ;;  %v3441_v20 = vmul.f32 %v10118_v30, %v10602_v4  ;;  %v13671_v27 = vld [vmem:[#allocation158_spill] sm:$0xff]  ;;  %v13677_v59 = vld [vmem:[#allocation67_spill] sm:$0xff]  ;;  %v13678_v30 = vld [vmem:[#allocation40_spill] sm:$0xff] }
 0x339   : > { %13665 = vst [vmem:[#allocation75_spill] sm:$0xff] %v10593_v7  ;;  %v3987_v16 = vadd.f32 %v3985_v10, %v3773_v8  ;;  %v3772_v35 = vadd.f32 %v3764_v60, %v3653_v34  ;;  %v12922_v37 = vrot.slane %v10571_v31, 7  ;;  %v3567_v1 = vrot.slane %v3560_v56, 7  ;;  %v13672_v7 = vld [vmem:[#allocation89_spill] sm:$0xff]  ;;  %v13679_v60 = vld [vmem:[#allocation66_spill] sm:$0xff]  ;;  %v13695_v4 = vld [vmem:[#allocation148_spill] sm:$0xff] }
 0x33a   : > { %v1673_v14 = vadd.f32 %v13670_v33, %v10251_v15  ;;  %v1914_v9 = vadd.f32 %v13672_v7, %v13671_v27  ;;  %v13675_v43 = vrot.slane %v13674_v21, 7  ;;  %v10617_v25 = vsel %vm2665_vm7, %v3965_v47, %v3966_v32  ;;  %v13681_v7 = vld [vmem:[#allocation44_spill] sm:$0xff]  ;;  %v13687_v27 = vld [vmem:[#allocation155_spill] sm:$0xff] }
 0x33b   : > { %13676 = vst [vmem:[#allocation55_spill] sm:$0xff] %v10617_v25  ;;  %v1674_v8 = vadd.f32 %v13678_v30, %v13677_v59  ;;  %v1752_v34 = vadd.f32 %v13679_v60, %v10420_v0  ;;  %v10623_v56 = vsel %vm3991_vm1, %v3988_v5, %v3996_v40  ;;  %v10626_v15 = vstv %s10561_s26  ;;  %v13693_v25 = vld [vmem:[#allocation43_spill] sm:$0xff]  ;;  %s6710_s26 = smov 84  }
 0x33c   : > { %v1807_v11 = vadd.f32 %v13675_v43, %v13673_v62  ;;  %13680 = vst [vmem:[#allocation95_spill] sm:$0xff] %v10626_v15  ;;  %v1751_v13 = vadd.f32 %v13681_v7, %v10373_v50  ;;  %v3444_v33 = vadd.f32 %v3441_v20, %v3355_v58  ;;  %v10632_v62 = vmul.f32 %v10158_v57, %v10626_v15  ;;  %v13683_v43 = vld [vmem:[#allocation38_spill] sm:$0xff]  ;;  %v10639_v47 = vpop.permute.xlu0 %2264  ;;  %v13685_v58 = vld [vmem:[#allocation47_spill] sm:$0xff]  ;;  %v13686_v20 = vld [vmem:[#allocation36_spill] sm:$0xff]  ;;  %v10649_v30 = vpop.permute.xlu1 %2266 }
 0x33d   : > { %v3779_v21 = vmul.f32 %v10195_v18, %v10626_v15  ;;  %v13684_v32 = vrot.slane %v13683_v43, 7  ;;  %v3995_v5 = vmul.f32 %v3993_v12, %v3987_v16  ;;  %v10641_v40 = vadd.f32 %v3985_v10, %v3772_v35  ;;  %v13690_v7 = vld [vmem:[#allocation91_spill] sm:$0xff]  ;;  %v13692_v10 = vld [vmem:[#allocation22_spill] sm:$0xff] }
 0x33e   : > { %13682 = vst [vmem:[#allocation156_spill] sm:$0xff] %v10632_v62  ;;  %v3568_v50 = vsel %vm564_vm3, %v12922_v37, %v3567_v1  ;;  %v1693_v57 = vadd.f32 %v13686_v20, %v13685_v58  ;;  %v2075_v59 = vadd.f32 %v13687_v27, %v1889_v2  ;;  %vm3990_vm2 = vcmp.gt.f32.partialorder %v3987_v16, 0.0  ;;  %v10660_v1 = vpop.permute.xlu2 %2484  ;;  %v13694_v2 = vld [vmem:[#allocation30_spill] sm:$0xff] }
 0x33f   : > { %v1826_v0 = vadd.f32 %v13684_v32, %v10405_v36  ;;  %v10652_v60 = vstv %s10595_s27  ;;  %v13689_v36 = vld [vmem:[#allocation31_spill] sm:$0xff]  ;;  %v1771_v31 = vadd.f32 %v13693_v25, %v10479_v44  ;;  %v3574_v27 = vadd.f32 %v3568_v50, %v3444_v33  ;;  %v13701_v33 = vld [vmem:[#allocation93_spill] sm:$0xff]  ;;  %s10945_s27 = sld [smem:[#allocation7 + $0x3d]] }
 0x340   : > { %13688 = vst [vmem:[#allocation64_spill] sm:$0xff] %v10652_v60  ;;  %v1694_v43 = vadd.f32 %v13690_v7, %v13689_v36  ;;  %v13691_v32 = vld [vmem:[#allocation163_spill] sm:$0xff]  ;;  %v3660_v58 = vmul.f32 %v10195_v18, %v10652_v60  ;;  %v2151_v20 = vadd.f32 %v13694_v2, %v2075_v59  ;;  %v3786_v15 = vrot.slane %v3779_v21, 7  ;;  %v13700_v18 = vld [vmem:[#allocation45_spill] sm:$0xff] }
 0x341   : > { %v1939_v35 = vadd.f32 %v13692_v10, %v13691_v32  ;;  %v1770_v36 = vadd.f32 %v13695_v4, %v10467_v53  ;;  %v13696_v7 = vld [vmem:[#allocation147_spill] sm:$0xff]  ;;  %v10671_v63 = vsel %vm3990_vm2, %v3987_v16, %v3995_v5  ;;  %v10674_v44 = vmul.f32 %v3993_v12, %v10641_v40  ;;  %v13702_v59 = vld [vmem:[#allocation53_spill] sm:$0xff]  ;;  %v13704_v4 = vld [vmem:[#allocation94_spill] sm:$0xff] }
 0x342   : > { %v13697_v32 = vrot.slane %v13696_v7, 7  ;;  %13698 = vst [vmem:[#allocation114_spill] sm:$0xff] %v10671_v63  ;;  %v1713_v25 = vadd.f32 %v13700_v18, %v10554_v3  ;;  %v1964_v50 = vadd.f32 %v13701_v33, %v10566_v48  ;;  %v1890_v21 = vadd.f32 %v13702_v59, %v1732_v52  ;;  %v13703_v2 = vld [vmem:[#allocation161_spill] sm:$0xff]  ;;  %v13706_v5 = vld [vmem:[#allocation162_spill] sm:$0xff]  ;;  %v13709_v18 = vld [vmem:[#allocation195_spill] sm:$0xff] }
 0x343   : > { %13699 = vst [vmem:[#allocation118_spill] sm:$0xff] %v10674_v44  ;;  %v1790_v53 = vadd.f32 %v13703_v2, %v10530_v26  ;;  %v1714_v7 = vadd.f32 %v13704_v4, %v10534_v51  ;;  %v1789_v12 = vadd.f32 %v13706_v5, %v10487_v38  ;;  %v13710_v60 = vrot.slane %v13709_v18, 7  ;;  %v13715_v59 = vld [vmem:[#allocation50_spill] sm:$0xff]  ;;  %v13721_v18 = vld [vmem:[#allocation17_spill] sm:$0xff] }
 0x344   : > { %v1845_v10 = vadd.f32 %v13697_v32, %v10483_v23  ;;  %v13705_v23 = vld [vmem:[#allocation128_spill] sm:$0xff]  ;;  %v10693_v33 = vadd.f32 %v3660_v58, %v3574_v27  ;;  %v13712_v52 = vrot.slane %v10632_v62, 7  ;;  %v10702_v51 = vmul.f32 %v10201_v17, %v10512_v39  ;;  %v10708_v4 = vpop.permute.xlu0 %2284 }
 0x345   : > { %v1891_v16 = vadd.f32 %v13705_v23, %v1733_v41  ;;  %v13707_v32 = vld [vmem:[#allocation48_spill] sm:$0xff]  ;;  %v2310_v48 = vadd.f32 %v13710_v60, %v2151_v20  ;;  %v13714_v41 = vld [vmem:[#allocation33_spill] sm:$0xff]  ;;  %v1809_v2 = vadd.f32 %v13715_v59, %v1654_v19  ;;  %v10712_v60 = vmul.f32 %v10261_v55, %v10452_v46  ;;  %v13718_v20 = vld [vmem:[#allocation159_spill] sm:$0xff] }
 0x346   : > { %v13708_v37 = vrot.slane %v13707_v32, 7  ;;  %13711 = vst [vmem:[#allocation110_spill] sm:$0xff] %v10693_v33  ;;  %v10698_v26 = vsel %vm564_vm3, %v13712_v52, %v3786_v15  ;;  %v1989_v38 = vadd.f32 %v13714_v41, %v1807_v11  ;;  %v13717_v58 = vld [vmem:[#allocation16_spill] sm:$0xff]  ;;  %v2083_v27 = vadd.f32 %v13718_v20, %v1914_v9  ;;  %v13719_v23 = vld [vmem:[#allocation79_spill] sm:$0xff]  ;;  %v10718_v11 = vpop.permute.xlu1 %2286  ;;  %v13720_v19 = vld [vmem:[#allocation77_spill] sm:$0xff] }
 0x347   : > { %13713 = vst [vmem:[#allocation18_spill] sm:$0xff] %v10698_v26  ;;  %v1915_v15 = vadd.f32 %v13717_v58, %v1751_v13  ;;  %v2076_v17 = vadd.f32 %v13719_v23, %v1890_v21  ;;  %v2468_v5 = vadd.f32 %v10573_v45, %v2310_v48  ;;  %v1916_v32 = vadd.f32 %v13720_v19, %v1752_v34  ;;  %v13722_v52 = vld [vmem:[#allocation167_spill] sm:$0xff]  ;;  %v13723_v59 = vld [vmem:[#allocation166_spill] sm:$0xff]  ;;  %v13724_v55 = vld [vmem:[#allocation76_spill] sm:$0xff] }
 0x348   : > { %v1864_v3 = vadd.f32 %v13708_v37, %v10492_v42  ;;  %v13716_v42 = vld [vmem:[#allocation27_spill] sm:$0xff]  ;;  %v1828_v41 = vadd.f32 %v13722_v52, %v1674_v8  ;;  %v1940_v46 = vadd.f32 %v13724_v55, %v1770_v36  ;;  %v13725_v62 = vld [vmem:[#allocation168_spill] sm:$0xff]  ;;  %v13727_v20 = vld [vmem:[#allocation134_spill] sm:$0xff]  ;;  %v2510_v8 = vpop.permute.xlu2 %2509 }
 0x349   : > { %v1808_v37 = vadd.f32 %v13716_v42, %v10584_v24  ;;  %v2014_v24 = vadd.f32 %v13721_v18, %v1826_v0  ;;  %v2077_v42 = vadd.f32 %v13723_v59, %v1891_v16  ;;  %v1827_v13 = vadd.f32 %v13725_v62, %v1673_v14  ;;  %v13726_v58 = vld [vmem:[#allocation104_spill] sm:$0xff]  ;;  %v13728_v23 = vld [vmem:[#allocation82_spill] sm:$0xff]  ;;  %v13729_v48 = vld [vmem:[#allocation19_spill] sm:$0xff] }
 0x34a   : > { %v2171_v9 = vadd.f32 %v13726_v58, %v2083_v27  ;;  %v2152_v21 = vadd.f32 %v13727_v20, %v2076_v17  ;;  %v1941_v45 = vadd.f32 %v13728_v23, %v1771_v31  ;;  %v10730_v63 = vadd.f32 %v13729_v48, %v1845_v10  ;;  %v13730_v34 = vld [vmem:[#allocation56_spill] sm:$0xff]  ;;  %v13731_v0 = vld [vmem:[#allocation78_spill] sm:$0xff]  ;;  %v13733_v36 = vld [vmem:[#allocation173_spill] sm:$0xff] }
 0x34b   : > { %v1847_v19 = vadd.f32 %v13730_v34, %v1694_v43  ;;  %v2153_v18 = vadd.f32 %v13731_v0, %v2077_v42  ;;  %v13732_v52 = vld [vmem:[#allocation54_spill] sm:$0xff]  ;;  %v1846_v59 = vadd.f32 %v13733_v36, %v1693_v57  ;;  %v13734_v14 = vld [vmem:[#allocation51_spill] sm:$0xff]  ;;  %v13736_v17 = vld [vmem:[#allocation73_spill] sm:$0xff] }
 0x34c   : > { %v10735_v16 = vadd.f32 %v13732_v52, %v1789_v12  ;;  %v2091_v62 = vadd.f32 %v13734_v14, %v1939_v35  ;;  %v13735_v27 = vld [vmem:[#allocation111_spill] sm:$0xff]  ;;  %v10741_v58 = vadd.f32 %v13736_v17, %v1790_v53  ;;  %v13737_v31 = vld [vmem:[#allocation72_spill] sm:$0xff]  ;;  %v13738_v20 = vld [vmem:[#allocation61_spill] sm:$0xff] }
 0x34d   : > { %v2648_v55 = vadd.f32 %v13735_v27, %v2468_v5  ;;  %v10744_v10 = vadd.f32 %v13737_v31, %v1864_v3  ;;  %v10747_v43 = vadd.f32 %v13738_v20, %v1714_v7  ;;  %v13739_v42 = vld [vmem:[#allocation186_spill] sm:$0xff]  ;;  %v13740_v12 = vld [vmem:[#allocation29_spill] sm:$0xff]  ;;  %v13742_v35 = vld [vmem:[#allocation35_spill] sm:$0xff] }
 0x34e   : > { %v10750_v23 = vadd.f32 %v13739_v42, %v1713_v25  ;;  %v10753_v48 = vadd.f32 %v13740_v12, %v1808_v37  ;;  %v13741_v57 = vld [vmem:[#allocation169_spill] sm:$0xff]  ;;  %v13743_v0 = vrot.slane %v13742_v35, 7  ;;  %v13744_v52 = vld [vmem:[#allocation28_spill] sm:$0xff]  ;;  %v13746_v3 = vld [vmem:[#allocation103_spill] sm:$0xff]  ;;  %v2462_v37 = vpop.permute.xlu0 %2461  ;;  %v2464_v35 = vpop.permute.xlu1 %2463 }
 0x34f   : > { %v2099_v34 = vadd.f32 %v13741_v57, %v1964_v50  ;;  %v2311_v53 = vadd.f32 %v13744_v52, %v2152_v21  ;;  %v13745_v36 = vld [vmem:[#allocation140_spill] sm:$0xff]  ;;  %v10763_v17 = vadd.f32 %v13746_v3, %v1827_v13  ;;  %v13747_v7 = vld [vmem:[#allocation175_spill] sm:$0xff]  ;;  %v13748_v25 = vld [vmem:[#allocation97_spill] sm:$0xff]  ;;  %vm2651_vm4 = vcmp.gt.f32.partialorder %v2648_v55, 0.0 }
 0x350   : > { %v2329_v5 = vadd.f32 %v13743_v0, %v2171_v9  ;;  %v10760_v14 = vadd.f32 %v13745_v36, %v1809_v2  ;;  %v10766_v31 = vadd.f32 %v13747_v7, %v1989_v38  ;;  %v2312_v20 = vadd.f32 %v13748_v25, %v2153_v18  ;;  %v13749_v42 = vld [vmem:[#allocation180_spill] sm:$0xff]  ;;  %v13751_v0 = vld [vmem:[#allocation105_spill] sm:$0xff]  ;;  %v13752_v52 = vld [vmem:[#allocation179_spill] sm:$0xff] }
 0x351   : > { %v2084_v12 = vadd.f32 %v13749_v42, %v1915_v15  ;;  %v13750_v50 = vld [vmem:[#allocation196_spill] sm:$0xff]  ;;  %v2469_v21 = vadd.f32 %v2462_v37, %v2311_v53  ;;  %v10773_v2 = vadd.f32 %v13751_v0, %v1828_v41  ;;  %v2085_v13 = vadd.f32 %v13752_v52, %v1916_v32  ;;  %v13755_v15 = vld [vmem:[#allocation183_spill] sm:$0xff]  ;;  %v13758_v42 = vld [vmem:[#allocation185_spill] sm:$0xff] }
 0x352   : > { %v2656_v57 = vmul.f32 %v13750_v50, %v2648_v55  ;;  %v2493_v9 = vadd.f32 %v10660_v1, %v2329_v5  ;;  %v2470_v38 = vadd.f32 %v2464_v35, %v2312_v20  ;;  %v13753_v36 = vld [vmem:[#allocation116_spill] sm:$0xff]  ;;  %v10781_v25 = vadd.f32 %v13755_v15, %v2014_v24  ;;  %v13756_v5 = vld [vmem:[#allocation115_spill] sm:$0xff]  ;;  %v13759_v52 = vld [vmem:[#allocation197_spill] sm:$0xff] }
 0x353   : > { %v2191_v18 = vadd.f32 %v13753_v36, %v2091_v62  ;;  %v13754_v3 = vld [vmem:[#allocation32_spill] sm:$0xff]  ;;  %v2649_v1 = vadd.f32 %v13735_v27, %v2469_v21  ;;  %v10785_v53 = vadd.f32 %v13756_v5, %v1846_v59  ;;  %v2093_v32 = vadd.f32 %v13758_v42, %v1941_v45  ;;  %v13760_v35 = vld [vmem:[#allocation137_spill] sm:$0xff]  ;;  %v13761_v36 = vld [vmem:[#allocation187_spill] sm:$0xff]  ;;  %v2535_v59 = vpop.permute.xlu2 %2534 }
 0x354   : > { %v2172_v7 = vadd.f32 %v13754_v3, %v2084_v12  ;;  %v13757_v41 = vld [vmem:[#allocation164_spill] sm:$0xff]  ;;  %v2650_v0 = vadd.f32 %v13735_v27, %v2470_v38  ;;  %v2687_v20 = vadd.f32 %v13759_v52, %v2493_v9  ;;  %v2659_v12 = vsel %vm2651_vm4, %v2648_v55, %v2656_v57  ;;  %v13762_v45 = vld [vmem:[#allocation154_spill] sm:$0xff]  ;;  %v13763_v38 = vld [vmem:[#allocation133_spill] sm:$0xff] }
 0x355   : > { %v2173_v37 = vadd.f32 %v13757_v41, %v2085_v13  ;;  %vm2652_vm5 = vcmp.gt.f32.partialorder %v2649_v1, 0.0  ;;  %v2657_v62 = vmul.f32 %v13750_v50, %v2649_v1  ;;  %v10793_v24 = vadd.f32 %v13760_v35, %v1847_v19  ;;  %v13765_v15 = vld [vmem:[#allocation52_spill] sm:$0xff]  ;;  %v13766_v57 = vld [vmem:[#allocation101_spill] sm:$0xff] }
 0x356   : > { %v2092_v21 = vadd.f32 %v13761_v36, %v1940_v46  ;;  %vm2653_vm6 = vcmp.gt.f32.partialorder %v2650_v0, 0.0  ;;  %v2658_v13 = vmul.f32 %v13750_v50, %v2650_v0  ;;  %v2211_v27 = vadd.f32 %v13762_v45, %v2099_v34  ;;  %v2487_v41 = vpop.permute.xlu0 %2486  ;;  %v13767_v36 = vld [vmem:[#allocation199_spill] sm:$0xff]  ;;  %v2489_v44 = vpop.permute.xlu1 %2488 }
 0x357   : > { %v13764_v9 = vrot.slane %v13763_v38, 7  ;;  %v2330_v5 = vadd.f32 %v13765_v15, %v2172_v7  ;;  %v2660_v55 = vsel %vm2652_vm5, %v2649_v1, %v2657_v62  ;;  %v2331_v19 = vadd.f32 %v13766_v57, %v2173_v37  ;;  %v13768_v1 = vld [vmem:[#allocation24_spill] sm:$0xff] }
 0x358   : > { %v2661_v42 = vsel %vm2653_vm6, %v2650_v0, %v2658_v13  ;;  %v2667_v46 = vrot.slane %v2660_v55, 1  ;;  %v2666_v35 = vrot.slane %v2659_v12, 1  ;;  %v2695_v26 = vmul.f32 %v13767_v36, %v2687_v20  ;;  %v13770_v13 = vld [vmem:[#allocation190_spill] sm:$0xff] }
 0x359   : > { %v2348_v3 = vadd.f32 %v13764_v9, %v2191_v18  ;;  %v2494_v50 = vadd.f32 %v2487_v41, %v2330_v5  ;;  %v2669_v39 = vrot.slane %v2661_v42, 1  ;;  %vm2690_vm8 = vcmp.gt.f32.partialorder %v2687_v20, 0.0 }
 0x35a   : > { %v2724_v34 = vstv %s10776_s28  ;;  %v2495_v18 = vadd.f32 %v2489_v44, %v2331_v19  ;;  %v2668_v7 = vsel %vm2665_vm7, %v2666_v35, %v2667_v46  ;;  %v2192_v62 = vadd.f32 %v13768_v1, %v2092_v21  ;;  %v13771_v44 = vld [vmem:[#allocation188_spill] sm:$0xff]  ;;  %v13776_v19 = vld [vmem:[#allocation130_spill] sm:$0xff]  ;;  %s10958_s28 = sld [smem:[#allocation9 + $0x5]] }
 0x35b   : > { %v2518_v33 = vadd.f32 %v2510_v8, %v2348_v3  ;;  %v2688_v37 = vadd.f32 %v13759_v52, %v2494_v50  ;;  %2675 = vrot.lane.b32.xlu1 %v2669_v39, %s6705_s18  ;;  %v2670_v0 = vsel %vm2665_vm7, %v2667_v46, %v2669_v39  ;;  %2671 = vrot.lane.b32.xlu2 %v2668_v7, %s6705_s18  ;;  %v13769_v8 = vld [vmem:[#allocation144_spill] sm:$0xff]  ;;  %v13772_v39 = vld [vmem:[#allocation191_spill] sm:$0xff] }
 0x35c   : > { %v2193_v12 = vadd.f32 %v13769_v8, %v2093_v32  ;;  %v10815_v45 = vadd.f32 %v13770_v13, %v10730_v63  ;;  %v2101_v38 = vadd.f32 %v13771_v44, %v10741_v58  ;;  %v2689_v9 = vadd.f32 %v13759_v52, %v2495_v18  ;;  %2673 = vrot.lane.b32.xlu0 %v2670_v0, %s6705_s18  ;;  %v13773_v58 = vld [vmem:[#allocation135_spill] sm:$0xff]  ;;  %s10996_s18 = sld [smem:[#allocation7 + $0x85]] }
 0x35d   : > { %v2725_v21 = vadd.f32 %v2724_v34, %v2518_v33  ;;  %vm2691_vm9 = vcmp.gt.f32.partialorder %v2688_v37, 0.0  ;;  %v2696_v3 = vmul.f32 %v13767_v36, %v2688_v37  ;;  %v2698_v15 = vsel %vm2690_vm8, %v2687_v20, %v2695_v26  ;;  %v13774_v52 = vld [vmem:[#allocation59_spill] sm:$0xff]  ;;  %v2560_v26 = vpop.permute.xlu2 %2559 }
 0x35e   : > { %v2100_v5 = vadd.f32 %v13772_v39, %v10735_v16  ;;  %v2732_v32 = vstv %s10796_s29  ;;  %vm2692_vm10 = vcmp.gt.f32.partialorder %v2689_v9, 0.0  ;;  %v2697_v63 = vmul.f32 %v13767_v36, %v2689_v9  ;;  %v13777_v20 = vld [vmem:[#allocation39_spill] sm:$0xff]  ;;  %v2512_v16 = vpop.permute.xlu0 %2511  ;;  %v2514_v36 = vpop.permute.xlu1 %2513  ;;  %s6711_s29 = smov 101  }
 0x35f   : > { %v2231_v55 = vadd.f32 %v13773_v58, %v10766_v31  ;;  %v13775_v57 = vrot.slane %v13774_v52, 7  ;;  %v2349_v41 = vadd.f32 %v13776_v19, %v2192_v62  ;;  %v2699_v42 = vsel %vm2691_vm9, %v2688_v37, %v2696_v3  ;;  %v13778_v37 = vld [vmem:[#allocation113_spill] sm:$0xff] }
 0x360   : > { %v2350_v46 = vadd.f32 %v13777_v20, %v2193_v12  ;;  %v2700_v35 = vsel %vm2692_vm10, %v2689_v9, %v2697_v63  ;;  %v2705_v50 = vrot.slane %v2699_v42, 1  ;;  %v2704_v18 = vrot.slane %v2698_v15, 1  ;;  %v13780_v15 = vld [vmem:[#allocation85_spill] sm:$0xff]  ;;  %v13785_v42 = vld [vmem:[#allocation184_spill] sm:$0xff] }
 0x361   : > { %v2367_v33 = vadd.f32 %v13775_v57, %v2211_v27  ;;  %v2733_v7 = vmul.f32 %v2732_v32, %v2725_v21  ;;  %v2519_v0 = vadd.f32 %v2512_v16, %v2349_v41  ;;  %v2707_v8 = vrot.slane %v2700_v35, 1  ;;  %v13781_v57 = vld [vmem:[#allocation80_spill] sm:$0xff]  ;;  %v13786_v16 = vld [vmem:[#allocation181_spill] sm:$0xff] }
 0x362   : > { %vm2728_vm11 = vcmp.gt.f32.partialorder %v2725_v21, 0.0  ;;  %v2762_v31 = vstv %s10806_s30  ;;  %v2520_v27 = vadd.f32 %v2514_v36, %v2350_v46  ;;  %v2706_v62 = vsel %vm2665_vm7, %v2704_v18, %v2705_v50  ;;  %s10978_s30 = sld [smem:[#allocation7 + $0x37]] }
 0x363   : > { %v2543_v1 = vadd.f32 %v2535_v59, %v2367_v33  ;;  %v2212_v13 = vadd.f32 %v13778_v37, %v2100_v5  ;;  %v2726_v12 = vadd.f32 %v2724_v34, %v2519_v0  ;;  %2713 = vrot.lane.b32.xlu1 %v2707_v8, %s6706_s7  ;;  %v2708_v44 = vsel %vm2665_vm7, %v2705_v50, %v2707_v8  ;;  %v13779_v59 = vld [vmem:[#allocation108_spill] sm:$0xff] }
 0x364   : > { %2709 = vrot.lane.b32.xlu2 %v2706_v62, %s6706_s7  ;;  %v10842_v9 = vadd.f32 %v13779_v59, %v10750_v23  ;;  %v2213_v3 = vadd.f32 %v10469_v28, %v2101_v38  ;;  %v2109_v39 = vadd.f32 %v13780_v15, %v10760_v14  ;;  %v2727_v63 = vadd.f32 %v2724_v34, %v2520_v27  ;;  %v13782_v28 = vld [vmem:[#allocation46_spill] sm:$0xff]  ;;  %v13783_v14 = vld [vmem:[#allocation25_spill] sm:$0xff]  ;;  %v13788_v59 = vld [vmem:[#allocation96_spill] sm:$0xff] }
 0x365   : > { %2711 = vrot.lane.b32.xlu0 %v2708_v44, %s6706_s7  ;;  %v2763_v58 = vadd.f32 %v2762_v31, %v2543_v1  ;;  %vm2729_vm12 = vcmp.gt.f32.partialorder %v2726_v12, 0.0  ;;  %v2734_v5 = vmul.f32 %v2732_v32, %v2726_v12  ;;  %v2736_v52 = vsel %vm2728_vm11, %v2725_v21, %v2733_v7  ;;  %s11028_s7 = sld [smem:[#allocation7 + $0xcd]] }
 0x366   : > { %v2108_v33 = vadd.f32 %v13781_v57, %v10753_v48  ;;  %v2770_v19 = vstv %s10825_s5  ;;  %vm2730_vm13 = vcmp.gt.f32.partialorder %v2727_v63, 0.0  ;;  %v2735_v23 = vmul.f32 %v2732_v32, %v2727_v63  ;;  %v2537_v35 = vpop.permute.xlu0 %2536  ;;  %v2539_v36 = vpop.permute.xlu1 %2538  ;;  %s11011_s5 = sld [smem:[#allocation7 + $0x7f]] }
 0x367   : > { %v2251_v38 = vadd.f32 %v13782_v28, %v10781_v25  ;;  %v13784_v34 = vrot.slane %v13783_v14, 7  ;;  %v2368_v20 = vadd.f32 %v13785_v42, %v2212_v13  ;;  %v2737_v46 = vsel %vm2729_vm12, %v2726_v12, %v2734_v5  ;;  %v2585_v25 = vpop.permute.xlu2 %2584  ;;  %v13793_v28 = vld [vmem:[#allocation192_spill] sm:$0xff] }
 0x368   : > { %v2369_v21 = vadd.f32 %v13786_v16, %v2213_v3  ;;  %v2738_v50 = vsel %vm2730_vm13, %v2727_v63, %v2735_v23  ;;  %v2743_v48 = vrot.slane %v2737_v46, 1  ;;  %v2742_v18 = vrot.slane %v2736_v52, 1  ;;  %v13789_v52 = vld [vmem:[#allocation81_spill] sm:$0xff] }
 0x369   : > { %v2386_v41 = vadd.f32 %v13784_v34, %v2231_v55  ;;  %v2771_v7 = vmul.f32 %v2770_v19, %v2763_v58  ;;  %v2544_v32 = vadd.f32 %v2537_v35, %v2368_v20  ;;  %v2745_v0 = vrot.slane %v2738_v50, 1 }
 0x36a   : > { %vm2766_vm14 = vcmp.gt.f32.partialorder %v2763_v58, 0.0  ;;  %v2800_v8 = vstv %s10835_s6  ;;  %v2545_v55 = vadd.f32 %v2539_v36, %v2369_v21  ;;  %v2744_v27 = vsel %vm2665_vm7, %v2742_v18, %v2743_v48  ;;  %s11021_s6 = sld [smem:[#allocation7 + $0xc7]] }
 0x36b   : > { %v2568_v1 = vadd.f32 %v2560_v26, %v2386_v41  ;;  %v2232_v62 = vadd.f32 %v10517_v49, %v2108_v33  ;;  %v2764_v37 = vadd.f32 %v2762_v31, %v2544_v32  ;;  %2751 = vrot.lane.b32.xlu1 %v2745_v0, %s6707_s12  ;;  %v2746_v13 = vsel %vm2665_vm7, %v2743_v48, %v2745_v0  ;;  %v13787_v26 = vld [vmem:[#allocation151_spill] sm:$0xff]  ;;  %v13794_v41 = vld [vmem:[#allocation60_spill] sm:$0xff] }
 0x36c   : > { %2747 = vrot.lane.b32.xlu2 %v2744_v27, %s6707_s12  ;;  %v10867_v12 = vadd.f32 %v13787_v26, %v10747_v43  ;;  %v2233_v44 = vadd.f32 %v10536_v61, %v2109_v39  ;;  %v2117_v3 = vadd.f32 %v13788_v59, %v10773_v2  ;;  %v2765_v15 = vadd.f32 %v2762_v31, %v2545_v55  ;;  %v13790_v61 = vld [vmem:[#allocation112_spill] sm:$0xff]  ;;  %v13791_v2 = vld [vmem:[#allocation99_spill] sm:$0xff] }
 0x36d   : > { %2749 = vrot.lane.b32.xlu0 %v2746_v13, %s6707_s12  ;;  %v2801_v63 = vadd.f32 %v2800_v8, %v2568_v1  ;;  %vm2767_vm15 = vcmp.gt.f32.partialorder %v2764_v37, 0.0  ;;  %v2772_v49 = vmul.f32 %v2770_v19, %v2764_v37  ;;  %v2774_v5 = vsel %vm2766_vm14, %v2763_v58, %v2771_v7  ;;  %v13795_v32 = vld [vmem:[#allocation84_spill] sm:$0xff]  ;;  %s11053_s12 = sld [smem:[#allocation7 + $0x10f]] }
 0x36e   : > { %v2116_v57 = vadd.f32 %v13789_v52, %v10763_v17  ;;  %v2808_v33 = vstv %s10851_s9  ;;  %vm2768_vm0 = vcmp.gt.f32.partialorder %v2765_v15, 0.0  ;;  %v2773_v43 = vmul.f32 %v2770_v19, %v2765_v15  ;;  %v2562_v42 = vpop.permute.xlu0 %2561  ;;  %v2564_v35 = vpop.permute.xlu1 %2563  ;;  %v13796_v55 = vld [vmem:[#allocation132_spill] sm:$0xff]  ;;  %s6712_s9 = smov 118  }
 0x36f   : > { %v2271_v39 = vadd.f32 %v13790_v61, %v10815_v45  ;;  %v13792_v31 = vrot.slane %v13791_v2, 7  ;;  %v2387_v14 = vadd.f32 %v13793_v28, %v2232_v62  ;;  %v2775_v34 = vsel %vm2767_vm15, %v2764_v37, %v2772_v49  ;;  %v2610_v62 = vpop.permute.xlu2 %2609  ;;  %v13800_v49 = vld [vmem:[#allocation189_spill] sm:$0xff] }
 0x370   : > { %v2388_v58 = vadd.f32 %v13794_v41, %v2233_v44  ;;  %v2776_v20 = vsel %vm2768_vm0, %v2765_v15, %v2773_v43  ;;  %v2781_v17 = vrot.slane %v2775_v34, 1  ;;  %v2780_v46 = vrot.slane %v2774_v5, 1  ;;  %v13797_v44 = vld [vmem:[#allocation49_spill] sm:$0xff] }
 0x371   : > { %v2405_v23 = vadd.f32 %v13792_v31, %v2251_v38  ;;  %v2809_v16 = vmul.f32 %v2808_v33, %v2801_v63  ;;  %v2569_v19 = vadd.f32 %v2562_v42, %v2387_v14  ;;  %v2783_v50 = vrot.slane %v2776_v20, 1 }
 0x372   : > { %vm2804_vm1 = vcmp.gt.f32.partialorder %v2801_v63, 0.0  ;;  %v2838_v48 = vstv %s10860_s10  ;;  %v2570_v45 = vadd.f32 %v2564_v35, %v2388_v58  ;;  %v2782_v38 = vsel %vm2665_vm7, %v2780_v46, %v2781_v17  ;;  %v13804_v35 = vld [vmem:[#allocation136_spill] sm:$0xff]  ;;  %s11038_s10 = sld [smem:[#allocation7 + $0x46]] }
 0x373   : > { %v2593_v21 = vadd.f32 %v2585_v25, %v2405_v23  ;;  %v2252_v18 = vadd.f32 %v10575_v54, %v2116_v57  ;;  %v2802_v7 = vadd.f32 %v2800_v8, %v2569_v19  ;;  %2789 = vrot.lane.b32.xlu1 %v2783_v50, %s6708_s15  ;;  %v2784_v1 = vsel %vm2665_vm7, %v2781_v17, %v2783_v50  ;;  %v13801_v57 = vld [vmem:[#allocation150_spill] sm:$0xff] }
 0x374   : > { %2785 = vrot.lane.b32.xlu2 %v2782_v38, %s6708_s15  ;;  %v3126_v36 = vrot.slane %v10712_v60, 7  ;;  %v2131_v0 = vadd.f32 %v13795_v32, %v10744_v10  ;;  %v2253_v25 = vadd.f32 %v10588_v22, %v2117_v3  ;;  %v2125_v27 = vadd.f32 %v13796_v55, %v10793_v24  ;;  %v13798_v24 = vld [vmem:[#allocation83_spill] sm:$0xff] }
 0x375   : > { %v2803_v37 = vadd.f32 %v2800_v8, %v2570_v45  ;;  %2787 = vrot.lane.b32.xlu0 %v2784_v1, %s6708_s15  ;;  %v2839_v54 = vadd.f32 %v2838_v48, %v2593_v21  ;;  %vm2805_vm2 = vcmp.gt.f32.partialorder %v2802_v7, 0.0  ;;  %v2810_v13 = vmul.f32 %v2808_v33, %v2802_v7  ;;  %v13803_v21 = vld [vmem:[#allocation117_spill] sm:$0xff]  ;;  %v13806_v1 = vld [vmem:[#allocation63_spill] sm:$0xff]  ;;  %s11101_s15 = sld [smem:[#allocation7 + $0x8e]] }
 0x376   : > { %v2812_v26 = vsel %vm2804_vm1, %v2801_v63, %v2809_v16  ;;  %v2124_v59 = vadd.f32 %v13797_v44, %v10785_v53  ;;  %v2846_v15 = vstv %s10876_s13  ;;  %v2291_v22 = vadd.f32 %v10500_v29, %v2131_v0  ;;  %v2587_v63 = vpop.permute.xlu0 %2586  ;;  %v2589_v28 = vpop.permute.xlu1 %2588  ;;  %v13807_v0 = vld [vmem:[#allocation102_spill] sm:$0xff]  ;;  %s11058_s13 = sld [smem:[#allocation7 + $0x115]] }
 0x377   : > { %vm2806_vm4 = vcmp.gt.f32.partialorder %v2803_v37, 0.0  ;;  %v2811_v10 = vmul.f32 %v2808_v33, %v2803_v37  ;;  %v13799_v3 = vrot.slane %v13798_v24, 7  ;;  %v2406_v5 = vadd.f32 %v13800_v49, %v2252_v18  ;;  %v13805_v18 = vld [vmem:[#allocation26_spill] sm:$0xff] }
 0x378   : > { %v2813_v52 = vsel %vm2805_vm2, %v2802_v7, %v2810_v13  ;;  %v2407_v43 = vadd.f32 %v13801_v57, %v2253_v25  ;;  %v2818_v53 = vrot.slane %v2812_v26, 1  ;;  %v2847_v31 = vmul.f32 %v2846_v15, %v2839_v54 }
 0x379   : > { %v2424_v8 = vadd.f32 %v13799_v3, %v2271_v39  ;;  %v2814_v61 = vsel %vm2806_vm4, %v2803_v37, %v2811_v10  ;;  %v2819_v2 = vrot.slane %v2813_v52, 1  ;;  %v2594_v14 = vadd.f32 %v2587_v63, %v2406_v5 }
 0x37a   : > { %v2821_v33 = vrot.slane %v2814_v61, 1  ;;  %vm2842_vm5 = vcmp.gt.f32.partialorder %v2839_v54, 0.0  ;;  %v2876_v34 = vstv %s10885_s14  ;;  %v2595_v29 = vadd.f32 %v2589_v28, %v2407_v43  ;;  %s6713_s14 = smov 7  }
 0x37b   : > { %v2618_v23 = vadd.f32 %v2610_v62, %v2424_v8  ;;  %v2820_v39 = vsel %vm2665_vm7, %v2818_v53, %v2819_v2  ;;  %v2272_v41 = vadd.f32 %v10639_v47, %v2124_v59  ;;  %v2840_v58 = vadd.f32 %v2838_v48, %v2594_v14 }
 0x37c   : > { %2827 = vrot.lane.b32.xlu1 %v2821_v33, %s6709_s22  ;;  %v2822_v42 = vsel %vm2665_vm7, %v2819_v2, %v2821_v33  ;;  %2823 = vrot.lane.b32.xlu2 %v2820_v39, %s6709_s22  ;;  %v4006_v20 = vrot.slane %v10623_v56, 1  ;;  %v2273_v17 = vadd.f32 %v10649_v30, %v2125_v27  ;;  %v2841_v46 = vadd.f32 %v2838_v48, %v2595_v29  ;;  %v13809_v27 = vld [vmem:[#allocation121_spill] sm:$0xff]  ;;  %v10949_v2 = vld [vmem:[#allocation2 + $0x20] sm:$0xff] }
 0x37d   : > { %2825 = vrot.lane.b32.xlu0 %v2822_v42, %s6709_s22  ;;  %v13802_v16 = vrot.slane %v10461_v6, 7  ;;  %v10924_v19 = vmul.f32 %v13804_v35, %v13803_v21  ;;  %v2877_v50 = vadd.f32 %v2876_v34, %v2618_v23  ;;  %vm2843_vm6 = vcmp.gt.f32.partialorder %v2840_v58, 0.0  ;;  %v2635_v6 = vpop.permute.xlu2 %2634  ;;  %v13813_v42 = vld [vmem:[#allocation41_spill] sm:$0xff]  ;;  %s6714_s22 = smov 24  }
 0x37e   : > { %v2848_v45 = vmul.f32 %v2846_v15, %v2840_v58  ;;  %v2850_v38 = vsel %vm2842_vm5, %v2839_v54, %v2847_v31  ;;  %v2133_v30 = vadd.f32 %v13805_v18, %v10867_v12  ;;  %v2884_v48 = vstv %s10900_s21  ;;  %v13810_v54 = vld [vmem:[#allocation74_spill] sm:$0xff]  ;;  %v2612_v26 = vpop.permute.xlu0 %2611  ;;  %v13814_v21 = vld [vmem:[#allocation149_spill] sm:$0xff]  ;;  %s11105_s21 = sld [smem:[#allocation7 + $0x40]] }
 0x37f   : > { %v3128_v47 = vsel %vm564_vm3, %v3126_v36, %v13802_v16  ;;  %vm2844_vm8 = vcmp.gt.f32.partialorder %v2841_v46, 0.0  ;;  %v2849_v7 = vmul.f32 %v2846_v15, %v2841_v46  ;;  %v2132_v32 = vadd.f32 %v13806_v1, %v10842_v9  ;;  %v2614_v15 = vpop.permute.xlu1 %2613 }
 0x380   : > { %v13808_v25 = vrot.slane %v13807_v0, 7  ;;  %v2425_v62 = vadd.f32 %v13809_v27, %v2272_v41  ;;  %v2851_v37 = vsel %vm2843_vm6, %v2840_v58, %v2848_v45  ;;  %v2426_v13 = vadd.f32 %v13810_v54, %v2273_v17  ;;  %v10960_v58 = vld [vmem:[#allocation2] sm:$0xff]  ;;  %v13817_v54 = vld [vmem:[#allocation153_spill] sm:$0xff] }
 0x381   : > { %v2852_v12 = vsel %vm2844_vm8, %v2841_v46, %v2849_v7  ;;  %v2857_v44 = vrot.slane %v2851_v37, 1  ;;  %v2856_v59 = vrot.slane %v2850_v38, 1  ;;  %v2885_v10 = vmul.f32 %v2884_v48, %v2877_v50  ;;  %v10964_v46 = vld [vmem:[#allocation2 + $0x18] sm:$0xff] }
 0x382   : > { %v2443_v55 = vadd.f32 %v13808_v25, %v2291_v22  ;;  %v2619_v3 = vadd.f32 %v2612_v26, %v2425_v62  ;;  %v2859_v8 = vrot.slane %v2852_v12, 1  ;;  %vm2880_vm9 = vcmp.gt.f32.partialorder %v2877_v50, 0.0  ;;  %v10981_v37 = vld [vmem:[#allocation2 + $0x38] sm:$0xff]  ;;  %v10985_v26 = vld [vmem:[#allocation2 + $0x30] sm:$0xff] }
 0x383   : > { %v2914_v9 = vstv %s10908_s24  ;;  %v2620_v49 = vadd.f32 %v2614_v15, %v2426_v13  ;;  %v2858_v22 = vsel %vm2665_vm7, %v2856_v59, %v2857_v44  ;;  %v2292_v5 = vadd.f32 %v10708_v4, %v2132_v32  ;;  %v13811_v4 = vld [vmem:[#allocation165_spill] sm:$0xff]  ;;  %v10991_v59 = vld [vmem:[#allocation2 + $0x8] sm:$0xff]  ;;  %s11118_s24 = sld [smem:[#allocation7 + $0x88]] }
 0x384   : > { %v2643_v24 = vadd.f32 %v2635_v6, %v2443_v55  ;;  %v2878_v52 = vadd.f32 %v2876_v34, %v2619_v3  ;;  %2865 = vrot.lane.b32.xlu1 %v2859_v8, %s6710_s26  ;;  %v2860_v57 = vsel %vm2665_vm7, %v2857_v44, %v2859_v8  ;;  %2861 = vrot.lane.b32.xlu2 %v2858_v22, %s6710_s26  ;;  %v10943_v43 = vstv %s10914_s23  ;;  %v13815_v55 = vld [vmem:[#allocation172_spill] sm:$0xff]  ;;  %v13818_v12 = vld [vmem:[#allocation37_spill] sm:$0xff]  ;;  %s11153_s23 = sld [smem:[#allocation7 + $0xd6]] }
 0x385   : > { %v2293_v63 = vadd.f32 %v10718_v11, %v2133_v30  ;;  %v2879_v61 = vadd.f32 %v2876_v34, %v2620_v49  ;;  %2863 = vrot.lane.b32.xlu0 %v2860_v57, %s6710_s26  ;;  %vm3989_vm10 = vcmp.gt.f32.partialorder %v10641_v40, 0.0  ;;  %v3221_v53 = vmul.f32 %v10949_v2, %v13811_v4  ;;  %v13812_v34 = vld [vmem:[#allocation107_spill] sm:$0xff]  ;;  %v10999_v3 = vld [vmem:[#allocation2 + $0x10] sm:$0x3]  ;;  %s11184_s26 = sld [smem:[#allocation7 + $0x11e]] }
 0x386   : > { %v3345_v31 = vrot.slane %v10924_v19, 7  ;;  %v2915_v23 = vadd.f32 %v2914_v9, %v2643_v24  ;;  %vm2881_vm11 = vcmp.gt.f32.partialorder %v2878_v52, 0.0  ;;  %v2886_v28 = vmul.f32 %v2884_v48, %v2878_v52 }
 0x387   : > { %v2888_v14 = vsel %vm2880_vm9, %v2877_v50, %v2885_v10  ;;  %v2922_v33 = vstv %s10930_s25  ;;  %vm2882_vm12 = vcmp.gt.f32.partialorder %v2879_v61, 0.0  ;;  %v2887_v29 = vmul.f32 %v2884_v48, %v2879_v61  ;;  %v2637_v50 = vpop.permute.xlu0 %2636  ;;  %v2639_v18 = vpop.permute.xlu1 %2638  ;;  %s11166_s25 = sld [smem:[#allocation7 + $0xd0]] }
 0x388   : > { %v3135_v11 = vadd.f32 %v3128_v47, %v10702_v51  ;;  %v2444_v39 = vadd.f32 %v13812_v34, %v2292_v5  ;;  %v2889_v41 = vsel %vm2881_vm11, %v2878_v52, %v2886_v28  ;;  %v3001_v17 = vmul.f32 %v10960_v58, %v13813_v42  ;;  %v13819_v52 = vld [vmem:[#allocation118_spill] sm:$0xff] }
 0x389   : > { %v3220_v16 = vmul.f32 %v10964_v46, %v13811_v4  ;;  %v2445_v35 = vadd.f32 %v13814_v21, %v2293_v63  ;;  %v2890_v45 = vsel %vm2882_vm12, %v2879_v61, %v2887_v29  ;;  %v2895_v51 = vrot.slane %v2889_v41, 1  ;;  %v13820_v63 = vld [vmem:[#allocation110_spill] sm:$0xff]  ;;  %v11013_v29 = vld [vmem:[#allocation2 + $0x48] sm:$0xff] }
 0x38a   : > { %v2894_v47 = vrot.slane %v2888_v14, 1  ;;  %v2923_v38 = vmul.f32 %v2922_v33, %v2915_v23  ;;  %v2644_v30 = vadd.f32 %v2637_v50, %v2444_v39  ;;  %v2897_v48 = vrot.slane %v2890_v45, 1  ;;  %v13821_v61 = vld [vmem:[#allocation18_spill] sm:$0xff] }
 0x38b   : > { %v3134_v6 = vadd.f32 %v3126_v36, %v3001_v17  ;;  %vm2918_vm13 = vcmp.gt.f32.partialorder %v2915_v23, 0.0  ;;  %v2645_v7 = vadd.f32 %v2639_v18, %v2445_v35  ;;  %v3224_v32 = vadd.f32 %v3221_v53, %v3135_v11  ;;  %v13823_v50 = vld [vmem:[#allocation114_spill] sm:$0xff]  ;;  %v11040_v18 = vld [vmem:[#allocation2 + $0x50] sm:$0xff] }
 0x38c   : > { %v2896_v1 = vsel %vm2665_vm7, %v2894_v47, %v2895_v51  ;;  %v2916_v0 = vadd.f32 %v2914_v9, %v2644_v30  ;;  %2903 = vrot.lane.b32.xlu1 %v2897_v48, %s6711_s29  ;;  %v2898_v25 = vsel %vm2665_vm7, %v2895_v51, %v2897_v48  ;;  %v13816_v27 = vrot.slane %v13815_v55, 7  ;;  %v13824_v47 = vld [vmem:[#allocation152_spill] sm:$0xff] }
 0x38d   : > { %2899 = vrot.lane.b32.xlu2 %v2896_v1, %s6711_s29  ;;  %v3138_v60 = vstv %s10945_s27  ;;  %v2917_v36 = vadd.f32 %v2914_v9, %v2645_v7  ;;  %2901 = vrot.lane.b32.xlu0 %v2898_v25, %s6711_s29  ;;  %v3440_v13 = vmul.f32 %v10981_v37, %v13817_v54  ;;  %v10989_v44 = vmul.f32 %v10985_v26, %v13818_v12  ;;  %v13826_v30 = vld [vmem:[#allocation64_spill] sm:$0xff]  ;;  %s6715_s27 = smov 41   ;;  %s6403_s29 = smul.u32 120, %s13960_s19 }
 0x38e   : > { %v3347_v62 = vsel %vm564_vm3, %v3345_v31, %v13816_v27  ;;  %v10994_v10 = vmul.f32 %v10991_v59, %v3138_v60  ;;  %vm2919_vm14 = vcmp.gt.f32.partialorder %v2916_v0, 0.0  ;;  %v2924_v24 = vmul.f32 %v2922_v33, %v2916_v0  ;;  %s11221_s19 = sld [smem:[#allocation8 + $0x6]] }
 0x38f   : > { %v2926_v15 = vsel %vm2918_vm13, %v2915_v23, %v2923_v38  ;;  %v3141_v8 = vmul.f32 %v10999_v3, %v3138_v60  ;;  %vm2920_vm15 = vcmp.gt.f32.partialorder %v2917_v36, 0.0  ;;  %v2925_v9 = vmul.f32 %v2922_v33, %v2917_v36  ;;  %v13822_v33 = vld [vmem:[#allocation95_spill] sm:$0xff] }
 0x390   : > { %v3354_v49 = vadd.f32 %v3347_v62, %v3224_v32  ;;  %v3223_v22 = vadd.f32 %v3220_v16, %v3134_v6  ;;  %v2927_v5 = vsel %vm2919_vm14, %v2916_v0, %v2924_v24  ;;  %v3997_v57 = vsel %vm3989_vm10, %v10641_v40, %v13819_v52  ;;  %v11050_v0 = vld [vmem:[#allocation2 + $0x28] sm:$0x3] }
 0x391   : > { %v3793_v4 = vadd.f32 %v13821_v61, %v13820_v63  ;;  %v11009_v53 = vstv %s10958_s28  ;;  %v2928_v23 = vsel %vm2920_vm15, %v2917_v36, %v2925_v9  ;;  %v2933_v28 = vrot.slane %v2927_v5, 1  ;;  %s11207_s28 = sld [smem:[#allocation7 + $0x118]] }
 0x392   : > { %v2932_v14 = vrot.slane %v2926_v15, 1  ;;  %v11017_v11 = vmul.f32 %v11013_v29, %v13822_v33  ;;  %v2935_v34 = vrot.slane %v2928_v23, 1  ;;  %v3564_v39 = vrot.slane %v10989_v44, 7 }
 0x393   : > { %v3146_v40 = vrot.slane %v10994_v10, 7  ;;  %v3148_v41 = vrot.slane %v3141_v8, 7  ;;  %v3443_v17 = vadd.f32 %v3440_v13, %v3354_v49  ;;  %v3353_v16 = vadd.f32 %v3345_v31, %v3223_v22  ;;  %v13827_v10 = vld [vmem:[#allocation156_spill] sm:$0xff] }
 0x394   : > { %v2934_v42 = vsel %vm2665_vm7, %v2932_v14, %v2933_v28  ;;  %v3439_v21 = vmul.f32 %v10985_v26, %v13817_v54  ;;  %2941 = vrot.lane.b32.xlu1 %v2935_v34, %s6712_s9  ;;  %v2936_v35 = vsel %vm2665_vm7, %v2933_v28, %v2935_v34  ;;  %v4004_v45 = vrot.slane %v13823_v50, 1  ;;  %v13829_v14 = vld [vmem:[#allocation92_spill] sm:$0xff] }
 0x395   : > { %2937 = vrot.lane.b32.xlu2 %v2934_v42, %s6712_s9  ;;  %v11033_v51 = vadd.f32 %v10943_v43, %v3793_v4  ;;  %v13825_v19 = vrot.slane %v13824_v47, 7  ;;  %2939 = vrot.lane.b32.xlu0 %v2936_v35, %s6712_s9  ;;  %v4003_v38 = vrot.slane %v3997_v57, 1  ;;  %v3659_v48 = vmul.f32 %v11040_v18, %v13826_v30  ;;  %v11083_v4 = vld [vmem:[#allocation2 + $0x40] sm:$0x3]  ;;  %s11260_s9 = sld [smem:[#allocation8 + $0x7]] }
 0x396   : > { %v3008_v6 = vstv %s10978_s30  ;;  %v3357_v7 = vstv %s10996_s18  ;;  %v3149_v1 = vsel %vm564_vm3, %v3146_v40, %v3148_v41  ;;  %v3139_v55 = vmul.f32 %v10960_v58, %v3138_v60  ;;  %s6716_s30 = smov 58   ;;  %s6303_s18 = sld [smem:[#allocation7 + $0x68]] }
 0x397   : > { %v3566_v31 = vsel %vm564_vm3, %v3564_v39, %v13825_v19  ;;  %v11048_v32 = vmul.f32 %v10949_v2, %v3357_v7  ;;  %v3360_v25 = vmul.f32 %v11050_v0, %v3357_v7  ;;  %v3783_v62 = vrot.slane %v11017_v11, 7  ;;  %v13831_v11 = vld [vmem:[#allocation58_spill] sm:$0xff] }
 0x398   : > { %v3573_v27 = vadd.f32 %v3566_v31, %v3443_v17  ;;  %v3442_v36 = vadd.f32 %v3439_v21, %v3353_v16  ;;  %v3011_v54 = vmul.f32 %v10999_v3, %v3008_v6  ;;  %v11063_v13 = vsel %vm2665_vm7, %v4004_v45, %v4006_v20  ;;  %v13832_v17 = vld [vmem:[#allocation126_spill] sm:$0xff] }
 0x399   : > { %v11066_v12 = vsel %vm2665_vm7, %v4003_v38, %v4004_v45  ;;  %v11070_v60 = vmul.f32 %v11009_v53, %v11033_v51  ;;  %v3227_v44 = vstv %s11011_s5  ;;  %v13828_v24 = vrot.slane %v13827_v10, 7  ;;  %s6304_s5 = sld [smem:[#allocation7 + $0x71]] }
 0x39a   : > { %v3658_v8 = vmul.f32 %v11013_v29, %v13826_v30  ;;  %v3155_v9 = vadd.f32 %v3149_v1, %v3011_v54  ;;  %v3230_v49 = vmul.f32 %v11050_v0, %v3227_v44  ;;  %v3365_v22 = vrot.slane %v11048_v32, 7 }
 0x39b   : > { %v3785_v15 = vsel %vm564_vm3, %v3783_v62, %v13828_v24  ;;  %v3367_v5 = vrot.slane %v3360_v25, 7  ;;  %v11081_v52 = vstv %s11021_s6  ;;  %v3145_v57 = vrot.slane %v3139_v55, 7  ;;  %v11125_v55 = vld [vmem:[#allocation2 + $0x58] sm:$0x3]  ;;  %s11231_s6 = scalar_lea.vmem %s12829_s4, %s6403_s29  ;;  %s6300_s29 = sld [smem:[#allocation7 + $0x4d]] }
 0x39c   : > { %v3662_v63 = vadd.f32 %v3659_v48, %v3573_v27  ;;  %v3572_v61 = vadd.f32 %v3564_v39, %v3442_v36  ;;  %v11087_v23 = vmul.f32 %v11083_v4, %v11081_v52  ;;  %v3576_v28 = vstv %s11028_s7  ;;  %s11246_s7 = sld [smem:[#allocation9 + $0x6]] }
 0x39d   : > { %v13830_v33 = vrot.slane %v13829_v14, 1  ;;  %3856 = vrot.lane.b32.xlu2 %v13831_v11, %s6713_s14  ;;  %v11094_v34 = vmul.f32 %v10981_v37, %v3576_v28  ;;  %v11097_v39 = vmul.f32 %v11083_v4, %v3576_v28  ;;  %v3147_v41 = vsel %vm564_vm3, %v3145_v57, %v3146_v40  ;;  %3858 = vrot.lane.b32.xlu0 %v13832_v17, %s6713_s14  ;;  %v13835_v14 = vld [vmem:[#allocation20_spill] sm:$0xff] }
 0x39e   : > { %v3157_v42 = vstv %s11038_s10  ;;  %v3661_v16 = vadd.f32 %v3658_v8, %v3572_v61  ;;  %v3233_v21 = vadd.f32 %v3230_v49, %v3155_v9  ;;  %v3010_v35 = vmul.f32 %v10991_v59, %v3008_v6  ;;  %s6717_s10 = smov 75  }
 0x39f   : > { %3860 = vrot.lane.b32.xlu1 %v13830_v33, %s6713_s14  ;;  %v3159_v50 = vmul.f32 %v10991_v59, %v3157_v42  ;;  %v3368_v45 = vsel %vm564_vm3, %v3365_v22, %v3367_v5  ;;  %v11110_v47 = vstv %s11053_s12  ;;  %v3358_v19 = vmul.f32 %v10964_v46, %v3357_v7  ;;  %s6275_s12 = sld [smem:[#allocation9 + $0x7]]  ;;  %s6719_s14 = smov 109  }
 0x3a0   : > { %v3160_v40 = vmul.f32 %v10999_v3, %v3157_v42  ;;  %v11115_v31 = vstv %s11058_s13  ;;  %v3154_v38 = vadd.f32 %v3147_v41, %v3010_v35  ;;  %v3229_v30 = vmul.f32 %v10949_v2, %v3227_v44  ;;  %s6718_s13 = smov 92  }
 0x3a1   : > { %v11121_v48 = vmul.f32 %v10960_v58, %v3157_v42  ;;  %v3792_v1 = vadd.f32 %v3785_v15, %v3662_v63  ;;  %v3584_v32 = vrot.slane %v11094_v34, 7  ;;  %v3586_v25 = vrot.slane %v11097_v39, 7 }
 0x3a2   : > { %v11129_v7 = vmul.f32 %v11125_v55, %v11110_v47  ;;  %v3791_v27 = vadd.f32 %v3783_v62, %v3661_v16  ;;  %v3374_v36 = vadd.f32 %v3368_v45, %v3233_v21  ;;  %v3009_v54 = vmul.f32 %v10960_v58, %v3008_v6  ;;  %v13833_v6 = vld [vmem:[#allocation34_spill] sm:$0xff] }
 0x3a3   : > { %v3165_v10 = vrot.slane %v3159_v50, 7  ;;  %v11134_v24 = vmul.f32 %v11040_v18, %v11115_v31  ;;  %v11138_v15 = vmul.f32 %v11125_v55, %v11115_v31  ;;  %v3364_v8 = vrot.slane %v3358_v19, 7 }
 0x3a4   : > { %v3167_v9 = vrot.slane %v3160_v40, 7  ;;  %v3232_v49 = vadd.f32 %v3229_v30, %v3154_v38  ;;  %v3153_v5 = vadd.f32 %v3145_v57, %v3009_v54  ;;  %v3228_v62 = vmul.f32 %v10964_v46, %v3227_v44  ;;  %v13836_v44 = vld [vmem:[#allocation131_spill] sm:$0xff] }
 0x3a5   : > { %v3164_v63 = vrot.slane %v11121_v48, 7  ;;  %v13834_v61 = vrot.slane %v13833_v6, 1  ;;  %3894 = vrot.lane.b32.xlu2 %v13835_v14, %s6714_s22  ;;  %v11146_v33 = vadd.f32 %v10943_v43, %v3792_v1  ;;  %v3366_v11 = vsel %vm564_vm3, %v3364_v8, %v3365_v22  ;;  %3896 = vrot.lane.b32.xlu0 %v13836_v44, %s6714_s22  ;;  %v13840_v14 = vld [vmem:[#allocation109_spill] sm:$0xff] }
 0x3a6   : > { %v11150_v34 = vmul.f32 %v10985_v26, %v3576_v28  ;;  %v3376_v57 = vstv %s11101_s15  ;;  %v3448_v39 = vmul.f32 %v10981_v37, %v11081_v52  ;;  %v3016_v41 = vstv %s11105_s21  ;;  %s6284_s15 = sld [smem:[#allocation7 + $0x5]]  ;;  %s6720_s21 = smov 126  }
 0x3a7   : > { %3898 = vrot.lane.b32.xlu1 %v13834_v61, %s6714_s22  ;;  %v3378_v42 = vmul.f32 %v10949_v2, %v3376_v57  ;;  %v3166_v17 = vsel %vm564_vm3, %v3164_v63, %v3165_v10  ;;  %v3019_v16 = vmul.f32 %v10999_v3, %v3016_v41  ;;  %v3168_v22 = vsel %vm564_vm3, %v3165_v10, %v3167_v9  ;;  %v13839_v61 = vld [vmem:[#allocation141_spill] sm:$0xff]  ;;  %s6286_s22 = sld [smem:[#allocation7 + $0x17]] }
 0x3a8   : > { %v3379_v28 = vmul.f32 %v11050_v0, %v3376_v57  ;;  %v3018_v21 = vmul.f32 %v10991_v59, %v3016_v41  ;;  %v3373_v35 = vadd.f32 %v3366_v11, %v3232_v49  ;;  %v3231_v50 = vadd.f32 %v3228_v62, %v3153_v5 }
 0x3a9   : > { %v3235_v45 = vstv %s11118_s24  ;;  %v11169_v19 = vmul.f32 %v10964_v46, %v3376_v57  ;;  %v11173_v40 = vadd.f32 %v10943_v43, %v3791_v27  ;;  %v3583_v3 = vrot.slane %v11150_v34, 7  ;;  %s6285_s24 = sld [smem:[#allocation7 + $0xe]] }
 0x3aa   : > { %v3173_v38 = vadd.f32 %v3166_v17, %v3018_v21  ;;  %v3237_v30 = vmul.f32 %v10949_v2, %v3235_v45  ;;  %v3452_v48 = vadd.f32 %v11087_v23, %v3374_v36  ;;  %v3174_v1 = vadd.f32 %v3168_v22, %v3019_v16  ;;  %v13837_v36 = vld [vmem:[#allocation106_spill] sm:$0xff] }
 0x3ab   : > { %v3238_v54 = vmul.f32 %v11050_v0, %v3235_v45  ;;  %v3384_v10 = vrot.slane %v3378_v42, 7  ;;  %v3587_v9 = vsel %vm564_vm3, %v3584_v32, %v3586_v25  ;;  %v3585_v49 = vsel %vm564_vm3, %v3583_v3, %v3584_v32 }
 0x3ac   : > { %v3386_v43 = vrot.slane %v3379_v28, 7  ;;  %v3017_v27 = vmul.f32 %v10960_v58, %v3016_v41  ;;  %v3451_v5 = vadd.f32 %v3448_v39, %v3373_v35  ;;  %v3372_v62 = vadd.f32 %v3364_v8, %v3231_v50 }
 0x3ad   : > { %v3447_v6 = vmul.f32 %v10985_v26, %v11081_v52  ;;  %v3383_v23 = vrot.slane %v11169_v19, 7  ;;  %v13838_v0 = vrot.slane %v13837_v36, 1  ;;  %3932 = vrot.lane.b32.xlu2 %v13839_v61, %s6715_s27  ;;  %v3595_v32 = vstv %s11153_s23  ;;  %3934 = vrot.lane.b32.xlu0 %v13840_v14, %s6715_s27  ;;  %s6287_s23 = sld [smem:[#allocation7 + $0x20]] }
 0x3ae   : > { %v3240_v25 = vadd.f32 %v3237_v30, %v3173_v38  ;;  %v3172_v8 = vadd.f32 %v3164_v63, %v3017_v27  ;;  %v3236_v52 = vmul.f32 %v10964_v46, %v3235_v45  ;;  %v3593_v11 = vadd.f32 %v3587_v9, %v3452_v48  ;;  %v13844_v27 = vld [vmem:[#allocation75_spill] sm:$0xff] }
 0x3af   : > { %3936 = vrot.lane.b32.xlu1 %v13838_v0, %s6715_s27  ;;  %v3241_v34 = vadd.f32 %v3238_v54, %v3174_v1  ;;  %v3597_v57 = vmul.f32 %v10981_v37, %v3595_v32  ;;  %v3385_v44 = vsel %vm564_vm3, %v3383_v23, %v3384_v10  ;;  %v3667_v39 = vmul.f32 %v11040_v18, %v11110_v47  ;;  %s6290_s27 = sld [smem:[#allocation7 + $0x3b]] }
 0x3b0   : > { %v3796_v41 = vmul.f32 %v11013_v29, %v11115_v31  ;;  %v3387_v42 = vsel %vm564_vm3, %v3384_v10, %v3386_v43  ;;  %v3598_v63 = vmul.f32 %v11083_v4, %v3595_v32  ;;  %v3592_v17 = vadd.f32 %v3585_v49, %v3451_v5  ;;  %v13841_v49 = vld [vmem:[#allocation142_spill] sm:$0xff]  ;;  %v13843_v43 = vld [vmem:[#allocation55_spill] sm:$0xff] }
 0x3b1   : > { %v3450_v16 = vadd.f32 %v3447_v6, %v3372_v62  ;;  %v3454_v22 = vstv %s11166_s25  ;;  %v11210_v28 = vmul.f32 %v10985_v26, %v3595_v32  ;;  %v3803_v21 = vrot.slane %v11134_v24, 7  ;;  %s6288_s25 = sld [smem:[#allocation7 + $0x29]] }
 0x3b2   : > { %v3392_v35 = vadd.f32 %v3385_v44, %v3240_v25  ;;  %v3456_v50 = vmul.f32 %v10981_v37, %v3454_v22  ;;  %v3239_v31 = vadd.f32 %v3236_v52, %v3172_v8  ;;  %v3805_v45 = vrot.slane %v11138_v15, 7 }
 0x3b3   : > { %v3393_v19 = vadd.f32 %v3387_v42, %v3241_v34  ;;  %v3457_v38 = vmul.f32 %v11083_v4, %v3454_v22  ;;  %v3603_v30 = vrot.slane %v3597_v57, 7  ;;  %vm4029_vm0 = vcmp.gt.f32.partialorder %v11033_v51, 0.0 }
 0x3b4   : > { %v3671_v48 = vadd.f32 %v11129_v7, %v3593_v11  ;;  %v3802_v1 = vrot.slane %v3796_v41, 7  ;;  %v3666_v54 = vmul.f32 %v11013_v29, %v11110_v47  ;;  %v3605_v24 = vrot.slane %v3598_v63, 7 }
 0x3b5   : > { %v3670_v10 = vadd.f32 %v3667_v39, %v3592_v17  ;;  %v3591_v37 = vadd.f32 %v3583_v3, %v3450_v16  ;;  %v3814_v9 = vstv %s11184_s26  ;;  %v3602_v15 = vrot.slane %v11210_v28, 7  ;;  %3970 = vrot.lane.b32.xlu2 %v13843_v43, %s6716_s30  ;;  %3972 = vrot.lane.b32.xlu0 %v13844_v27, %s6716_s30  ;;  %v2672_v0 = vpop.permute.xlu2 %2671  ;;  %s6289_s26 = sld [smem:[#allocation7 + $0x32]] }
 0x3b6   : > { %v13842_v4 = vrot.slane %v13841_v49, 1  ;;  %vm2680_vm1 = vcmask 138240   ;;  %v3459_v47 = vadd.f32 %v3456_v50, %v3392_v35  ;;  %v3391_v7 = vadd.f32 %v3383_v23, %v3239_v31 }
 0x3b7   : > { %v3455_v3 = vmul.f32 %v10985_v26, %v3454_v22  ;;  %v3804_v5 = vsel %vm564_vm3, %v3802_v1, %v3803_v21  ;;  %v3460_v62 = vadd.f32 %v3457_v38, %v3393_v19  ;;  %v3816_v6 = vmul.f32 %v11040_v18, %v3814_v9  ;;  %2681 = vst.msk [vmem:[%s11231_s6] sm:$0xff] %vm2680_vm1, %v2672_v0 }
 0x3b8   : > { %3974 = vrot.lane.b32.xlu1 %v13842_v4, %s6716_s30  ;;  %v3604_v36 = vsel %vm564_vm3, %v3602_v15, %v3603_v30  ;;  %v3806_v61 = vsel %vm564_vm3, %v3803_v21, %v3805_v45  ;;  %v3669_v32 = vadd.f32 %v3666_v54, %v3591_v37  ;;  %v3606_v25 = vsel %vm564_vm3, %v3603_v30, %v3605_v24  ;;  %s6302_s30 = sld [smem:[#allocation7 + $0x5f]] }
 0x3b9   : > { %v3817_v23 = vmul.f32 %v11125_v55, %v3814_v9  ;;  %vm4028_vm2 = vcmp.gt.f32.partialorder %v11146_v33, 0.0  ;;  %v4033_v26 = vmul.f32 %v11009_v53, %v11146_v33  ;;  %v3673_v8 = vstv %s11207_s28  ;;  %s6291_s28 = sld [smem:[#allocation7 + $0x44]] }
 0x3ba   : > { %v3815_v52 = vmul.f32 %v11013_v29, %v3814_v9  ;;  %v3811_v14 = vadd.f32 %v3804_v5, %v3670_v10  ;;  %v3611_v11 = vadd.f32 %v3604_v36, %v3459_v47  ;;  %v3675_v34 = vmul.f32 %v11040_v18, %v3673_v8 }
 0x3bb   : > { %v3458_v57 = vadd.f32 %v3455_v3, %v3391_v7  ;;  %v3812_v44 = vadd.f32 %v3806_v61, %v3671_v48  ;;  %v3612_v39 = vadd.f32 %v3606_v25, %v3460_v62  ;;  %v3676_v41 = vmul.f32 %v11125_v55, %v3673_v8 }
 0x3bc   : > { %v3822_v42 = vrot.slane %v3816_v6, 7  ;;  %v4032_v63 = vmul.f32 %v11009_v53, %v11173_v40  ;;  %v3810_v17 = vadd.f32 %v3802_v1, %v3669_v32  ;;  %v3824_v16 = vrot.slane %v3817_v23, 7 }
 0x3bd   : > { %v3674_v22 = vmul.f32 %v11013_v29, %v3673_v8  ;;  %v4036_v28 = vsel %vm4028_vm2, %v11146_v33, %v4033_v26  ;;  %vm4027_vm4 = vcmp.gt.f32.partialorder %v11173_v40, 0.0  ;;  %v4061_v18 = vstv %s11221_s19  ;;  %4008 = vrot.lane.b32.xlu2 %v11066_v12, %s6717_s10  ;;  %4010 = vrot.lane.b32.xlu0 %v11063_v13, %s6717_s10  ;;  %s6301_s19 = sld [smem:[#allocation7 + $0x56]] }
 0x3be   : > { %v3821_v21 = vrot.slane %v3815_v52, 7  ;;  %vm2718_vm5 = vcmask 277640   ;;  %v4063_v53 = vadd.f32 %v4061_v18, %v3811_v14  ;;  %v3678_v29 = vadd.f32 %v3675_v34, %v3611_v11 }
 0x3bf   : > { %v3610_v55 = vadd.f32 %v3602_v15, %v3458_v57  ;;  %v4037_v33 = vsel %vm4029_vm0, %v11033_v51, %v11070_v60  ;;  %v4064_v35 = vadd.f32 %v4061_v18, %v3812_v44  ;;  %v3679_v50 = vadd.f32 %v3676_v41, %v3612_v39 }
 0x3c0   : > { %4012 = vrot.lane.b32.xlu1 %v4006_v20, %s6717_s10  ;;  %v3823_v56 = vsel %vm564_vm3, %v3821_v21, %v3822_v42  ;;  %v2710_v20 = vpop.permute.xlu2 %2709  ;;  %v4035_v12 = vsel %vm4027_vm4, %v11173_v40, %v4032_v63  ;;  %v4062_v31 = vadd.f32 %v4061_v18, %v3810_v17  ;;  %v3825_v45 = vsel %vm564_vm3, %v3822_v42, %v3824_v16  ;;  %v11292_v17 = vld [vmem:[#allocation2 + $0x10] sm:$0x3]  ;;  %s6276_s10 = sld [smem:[#allocation7 + $0x3]] }
 0x3c1   : > { %v3677_v19 = vadd.f32 %v3674_v22, %v3610_v55  ;;  %2719 = vst.msk [vmem:[%s11231_s6] sm:$0xff] %vm2718_vm5, %v2710_v20  ;;  %v4042_v13 = vrot.slane %v4036_v28, 1  ;;  %v4069_v38 = vstv %s11246_s7  ;;  %v4044_v51 = vrot.slane %v4037_v33, 1  ;;  %s6305_s7 = sld [smem:[#allocation7 + $0x7a]] }
 0x3c2   : > { %v4071_v60 = vmul.f32 %v4069_v38, %v4063_v53  ;;  %v3830_v30 = vadd.f32 %v3823_v56, %v3678_v29  ;;  %v4041_v48 = vrot.slane %v4035_v12, 1  ;;  %v4072_v1 = vmul.f32 %v4069_v38, %v4064_v35 }
 0x3c3   : > { %vm4066_vm6 = vcmp.gt.f32.partialorder %v4063_v53, 0.0  ;;  %v3831_v54 = vadd.f32 %v3825_v45, %v3679_v50  ;;  %vm4067_vm8 = vcmp.gt.f32.partialorder %v4064_v35, 0.0  ;;  %v4070_v24 = vmul.f32 %v4069_v38, %v4062_v31 }
 0x3c4   : > { %v3829_v40 = vadd.f32 %v3821_v21, %v3677_v19  ;;  %v4043_v10 = vsel %vm2665_vm7, %v4041_v48, %v4042_v13  ;;  %vm4065_vm3 = vcmp.gt.f32.partialorder %v4062_v31, 0.0  ;;  %v4099_v37 = vstv %s11260_s9  ;;  %s6306_s9 = sld [smem:[#allocation7 + $0x83]] }
 0x3c5   : > { %v4045_v9 = vsel %vm2665_vm7, %v4042_v13, %v4044_v51  ;;  %4046 = vrot.lane.b32.xlu2 %v4043_v10, %s6718_s13  ;;  %vm2756_vm9 = vcmask 417040   ;;  %v4074_v15 = vsel %vm4066_vm6, %v4063_v53, %v4071_v60  ;;  %v4101_v49 = vadd.f32 %v4099_v37, %v3830_v30 }
 0x3c6   : > { %4048 = vrot.lane.b32.xlu0 %v4045_v9, %s6718_s13  ;;  %v4075_v4 = vsel %vm4067_vm8, %v4064_v35, %v4072_v1  ;;  %v4102_v43 = vadd.f32 %v4099_v37, %v3831_v54  ;;  %v4073_v7 = vsel %vm4065_vm3, %v4062_v31, %v4070_v24  ;;  %v4100_v3 = vadd.f32 %v4099_v37, %v3829_v40 }
 0x3c7   : > { %v4080_v27 = vrot.slane %v4074_v15, 1  ;;  %v4107_v5 = vstv %s6275_s12  ;;  %v4082_v62 = vrot.slane %v4075_v4, 1  ;;  %v4079_v36 = vrot.slane %v4073_v7, 1  ;;  %s6307_s12 = sld [smem:[#allocation7 + $0x8c]] }
 0x3c8   : > { %4050 = vrot.lane.b32.xlu1 %v4044_v51, %s6718_s13  ;;  %v2748_v47 = vpop.permute.xlu2 %2747  ;;  %v4109_v6 = vmul.f32 %v4107_v5, %v4101_v49  ;;  %v4110_v0 = vmul.f32 %v4107_v5, %v4102_v43  ;;  %vm4104_vm10 = vcmp.gt.f32.partialorder %v4101_v49, 0.0  ;;  %vm4105_vm11 = vcmp.gt.f32.partialorder %v4102_v43, 0.0  ;;  %s6277_s13 = sld [smem:[#allocation7 + $0xc]] }
 0x3c9   : > { %2757 = vst.msk [vmem:[%s11231_s6] sm:$0xff] %vm2756_vm9, %v2748_v47  ;;  %v4108_v61 = vmul.f32 %v4107_v5, %v4100_v3  ;;  %v4081_v32 = vsel %vm2665_vm7, %v4079_v36, %v4080_v27  ;;  %vm4103_vm12 = vcmp.gt.f32.partialorder %v4100_v3, 0.0  ;;  %v4083_v25 = vsel %vm2665_vm7, %v4080_v27, %v4082_v62 }
 0x3ca   : > { %vm2683_vm13 = vcmask 131072   ;;  %v4112_v23 = vsel %vm4104_vm10, %v4101_v49, %v4109_v6  ;;  %v4113_v26 = vsel %vm4105_vm11, %v4102_v43, %v4110_v0  ;;  %vm2794_vm14 = vcmask 556440  }
 0x3cb   : > { %v4111_v14 = vsel %vm4103_vm12, %v4100_v3, %v4108_v61  ;;  %v4118_v34 = vrot.slane %v4112_v23, 1  ;;  %v4120_v57 = vrot.slane %v4113_v26, 1  ;;  %vm2721_vm15 = vcmask 270472  }
 0x3cc   : > { %v4117_v44 = vrot.slane %v4111_v14, 1  ;;  %vm2832_vm0 = vcmask 695840   ;;  %v4209_v22 = vstv %s6284_s15  ;;  %vm2870_vm2 = vcmask 835240   ;;  %s6278_s15 = sld [smem:[#allocation7 + $0x15]] }
 0x3cd   : > { %4084 = vrot.lane.b32.xlu2 %v4081_v32, %s6719_s14  ;;  %v2676_v8 = vpop.permute.xlu1 %2675  ;;  %v4121_v41 = vsel %vm2665_vm7, %v4118_v34, %v4120_v57  ;;  %v4212_v28 = vmul.f32 %v4209_v22, %v11292_v17  ;;  %v4210_v18 = vmul.f32 %v10960_v58, %v4209_v22  ;;  %v4211_v21 = vmul.f32 %v10991_v59, %v4209_v22 }
 0x3ce   : > { %4086 = vrot.lane.b32.xlu0 %v4083_v25, %s6719_s14  ;;  %2684 = vst.msk [vmem:[%s11231_s6 + $0x50] sm:$0x1] %vm2683_vm13, %v2676_v8  ;;  %v2674_v11 = vpop.permute.xlu0 %2673  ;;  %v4119_v39 = vsel %vm2665_vm7, %v4117_v44, %v4118_v34  ;;  %v4229_v33 = vstv %s6285_s24  ;;  %vm2797_vm4 = vcmask 549272   ;;  %v4249_v45 = vstv %s6286_s22  ;;  %s6279_s24 = sld [smem:[#allocation7 + $0x1e]] }
 0x3cf   : > { %2682 = vst.msk [vmem:[%s11231_s6 + $0x28] sm:$0xff] %vm2680_vm1, %v2674_v11  ;;  %vm2759_vm1 = vcmask 409872   ;;  %v4232_v35 = vmul.f32 %v4229_v33, %v11292_v17  ;;  %v4230_v50 = vmul.f32 %v10960_v58, %v4229_v33  ;;  %v4231_v56 = vmul.f32 %v10991_v59, %v4229_v33  ;;  %s6318_s22 = sld [smem:[#allocation7 + $0xa7]] }
 0x3d0   : > { %4088 = vrot.lane.b32.xlu1 %v4082_v62, %s6719_s14  ;;  %v2786_v52 = vpop.permute.xlu2 %2785  ;;  %v4252_v19 = vmul.f32 %v4249_v45, %v11292_v17  ;;  %v4250_v13 = vmul.f32 %v10960_v58, %v4249_v45  ;;  %v4251_v38 = vmul.f32 %v10991_v59, %v4249_v45  ;;  %vm2835_vm6 = vcmask 688672   ;;  %s6316_s14 = sld [smem:[#allocation7 + $0x95]] }
 0x3d1   : > { %2795 = vst.msk [vmem:[%s11231_s6] sm:$0xff] %vm2794_vm14, %v2786_v52  ;;  %vm2946_vm8 = vcmask 1048504   ;;  %vm2948_vm3 = vcmask 64512   ;;  %v4269_v48 = vstv %s6287_s23  ;;  %vm3865_vm10 = vcmask 203840   ;;  %s6292_s23 = sld [smem:[#allocation7 + $0x4b]] }
 0x3d2   : > { %v4272_v1 = vmul.f32 %v4269_v48, %v11292_v17  ;;  %v4270_v54 = vmul.f32 %v10960_v58, %v4269_v48  ;;  %v4271_v24 = vmul.f32 %v10991_v59, %v4269_v48  ;;  %v4289_v9 = vstv %s6288_s25  ;;  %s6280_s25 = sld [smem:[#allocation7 + $0x27]] }
 0x3d3   : > { %v4292_v15 = vmul.f32 %v4289_v9, %v11292_v17  ;;  %v4290_v49 = vmul.f32 %v10960_v58, %v4289_v9  ;;  %v4291_v4 = vmul.f32 %v10991_v59, %v4289_v9  ;;  %vm2911_vm11 = vcmask 967472  }
 0x3d4   : > { %vm3903_vm12 = vcmask 343240   ;;  %v4309_v3 = vstv %s6289_s26  ;;  %vm2952_vm13 = vcmask 1041336   ;;  %v4329_v61 = vstv %s6290_s27  ;;  %s6319_s26 = sld [smem:[#allocation7 + $0xb0]] }
 0x3d5   : > { %4122 = vrot.lane.b32.xlu2 %v4119_v39, %s6720_s21  ;;  %v2714_v42 = vpop.permute.xlu1 %2713  ;;  %v4312_v27 = vmul.f32 %v4309_v3, %v11292_v17  ;;  %v4310_v5 = vmul.f32 %v10960_v58, %v4309_v3  ;;  %v4311_v62 = vmul.f32 %v10991_v59, %v4309_v3  ;;  %v4332_v32 = vmul.f32 %v4329_v61, %v11292_v17  ;;  %s6293_s27 = sld [smem:[#allocation7 + $0x54]] }
 0x3d6   : > { %4124 = vrot.lane.b32.xlu0 %v4121_v41, %s6720_s21  ;;  %2722 = vst.msk [vmem:[%s11231_s6 + $0x50] sm:$0x1] %vm2721_vm15, %v2714_v42  ;;  %vm3941_vm15 = vcmask 482640   ;;  %v4330_v25 = vmul.f32 %v10960_v58, %v4329_v61  ;;  %v4331_v23 = vmul.f32 %v10991_v59, %v4329_v61  ;;  %v4349_v14 = vstv %s6291_s28  ;;  %v11387_v41 = vld [vmem:[#allocation2 + $0x28] sm:$0x3]  ;;  %s6281_s28 = sld [smem:[#allocation7 + $0x30]] }
 0x3d7   : > { %v2712_v16 = vpop.permute.xlu0 %2711  ;;  %v4352_v11 = vmul.f32 %v4349_v14, %v11292_v17  ;;  %v4350_v34 = vmul.f32 %v10960_v58, %v4349_v14  ;;  %v11472_v61 = vstv %s6276_s10  ;;  %s6296_s10 = sld [smem:[#allocation7 + $0x6f]] }
 0x3d8   : > { %4126 = vrot.lane.b32.xlu1 %v4120_v57, %s6720_s21  ;;  %v2824_v63 = vpop.permute.xlu2 %2823  ;;  %2720 = vst.msk [vmem:[%s11231_s6 + $0x28] sm:$0xff] %vm2718_vm5, %v2712_v16  ;;  %vm2908_vm5 = vcmask 974640   ;;  %v4351_v57 = vmul.f32 %v10991_v59, %v4349_v14  ;;  %s6317_s21 = sld [smem:[#allocation7 + $0x9e]] }
 0x3d9   : > { %2833 = vst.msk [vmem:[%s11231_s6] sm:$0xff] %vm2832_vm0, %v2824_v63  ;;  %v4436_v63 = vstv %s6300_s29  ;;  %s6320_s29 = sld [smem:[#allocation7 + $0xb9]] }
 0x3da   : > { %v4439_v58 = vmul.f32 %v4436_v63, %v11387_v41  ;;  %v4437_v59 = vmul.f32 %v10964_v46, %v4436_v63  ;;  %v4438_v16 = vmul.f32 %v10949_v2, %v4436_v63  ;;  %v11497_v63 = vld [vmem:[#allocation2 + $0x40] sm:$0x3] }
 0x3dd   : > { %4216 = vrot.lane.b32.xlu2 %v4210_v18, %s6703_s20  ;;  %v2752_v53 = vpop.permute.xlu1 %2751 }
 0x3de   : > { %4218 = vrot.lane.b32.xlu0 %v4211_v21, %s6703_s20  ;;  %2760 = vst.msk [vmem:[%s11231_s6 + $0x50] sm:$0x1] %vm2759_vm1, %v2752_v53  ;;  %vm3979_vm1 = vcmask 622040   ;;  %v4456_v21 = vstv %s6301_s19  ;;  %s6294_s19 = sld [smem:[#allocation7 + $0x5d]] }
 0x3df   : > { %v2750_v55 = vpop.permute.xlu0 %2749  ;;  %v4459_v2 = vmul.f32 %v4456_v21, %v11387_v41  ;;  %v4457_v53 = vmul.f32 %v10964_v46, %v4456_v21 }
 0x3e0   : > { %4220 = vrot.lane.b32.xlu1 %v4212_v28, %s6703_s20  ;;  %v2862_v29 = vpop.permute.xlu2 %2861  ;;  %2758 = vst.msk [vmem:[%s11231_s6 + $0x28] sm:$0xff] %vm2756_vm9, %v2750_v55  ;;  %vm2873_vm9 = vcmask 828072  }
 0x3e1   : > { %2871 = vst.msk [vmem:[%s11231_s6] sm:$0xff] %vm2870_vm2, %v2862_v29  ;;  %v11407_v29 = vld [vmem:[#allocation2 + $0x20] sm:$0xff] }
 0x3e2   : > { %v4458_v55 = vmul.f32 %v11407_v29, %v4456_v21  ;;  %v11507_v21 = vld [vmem:[#allocation2 + $0x38] sm:$0xff] }
 0x3e5   : > { %4236 = vrot.lane.b32.xlu2 %v4230_v50, %s6703_s20  ;;  %v2790_v20 = vpop.permute.xlu1 %2789 }
 0x3e6   : > { %4238 = vrot.lane.b32.xlu0 %v4231_v56, %s6703_s20  ;;  %2798 = vst.msk [vmem:[%s11231_s6 + $0x50] sm:$0x1] %vm2797_vm4, %v2790_v20  ;;  %vm4017_vm4 = vcmask 761440   ;;  %v4476_v56 = vstv %s6302_s30  ;;  %v11419_v20 = vld [vmem:[#allocation2 + $0x18] sm:$0xff]  ;;  %s6282_s30 = sld [smem:[#allocation7 + $0x39]] }
 0x3e7   : > { %v2788_v31 = vpop.permute.xlu0 %2787  ;;  %v4479_v46 = vmul.f32 %v4476_v56, %v11387_v41 }
 0x3e8   : > { %4240 = vrot.lane.b32.xlu1 %v4232_v35, %s6703_s20  ;;  %v2900_v12 = vpop.permute.xlu2 %2899  ;;  %2796 = vst.msk [vmem:[%s11231_s6 + $0x28] sm:$0xff] %vm2794_vm14, %v2788_v31  ;;  %vm2954_vm14 = vcmask 57344   ;;  %v4478_v31 = vmul.f32 %v11407_v29, %v4476_v56 }
 0x3e9   : > { %2909 = vst.msk [vmem:[%s11231_s6] sm:$0xff] %vm2908_vm5, %v2900_v12  ;;  %v4477_v12 = vmul.f32 %v11419_v20, %v4476_v56 }
 0x3ed   : > { %4256 = vrot.lane.b32.xlu2 %v4250_v13, %s6703_s20 }
 0x3ee   : > { %4258 = vrot.lane.b32.xlu0 %v4251_v38, %s6703_s20  ;;  %v2828_v51 = vpop.permute.xlu1 %2827  ;;  %v4496_v38 = vstv %s6303_s18  ;;  %s6321_s18 = sld [smem:[#allocation7 + $0xc2]] }
 0x3ef   : > { %2836 = vst.msk [vmem:[%s11231_s6 + $0x50] sm:$0x1] %vm2835_vm6, %v2828_v51  ;;  %v2826_v30 = vpop.permute.xlu0 %2825  ;;  %vm4055_vm6 = vcmask 900840   ;;  %v4499_v51 = vmul.f32 %v4496_v38, %v11387_v41 }
 0x3f0   : > { %4260 = vrot.lane.b32.xlu1 %v4252_v19, %s6703_s20  ;;  %v2938_v60 = vpop.permute.xlu2 %2937  ;;  %2834 = vst.msk [vmem:[%s11231_s6 + $0x28] sm:$0xff] %vm2832_vm0, %v2826_v30  ;;  %vm3868_vm0 = vcmask 196672   ;;  %v4498_v30 = vmul.f32 %v11407_v29, %v4496_v38 }
 0x3f1   : > { %2947 = vst.msk [vmem:[%s11231_s6] sm:$0xff] %vm2946_vm8, %v2938_v60 }
 0x3f2   : > { %2949 = vst.msk [vmem:[%s11231_s6 + $0x8] sm:$0xff] %vm2948_vm3, %v2938_v60  ;;  %v4497_v60 = vmul.f32 %v11419_v20, %v4496_v38 }
 0x3f5   : > { %4276 = vrot.lane.b32.xlu2 %v4270_v54, %s6703_s20 }
 0x3f6   : > { %4278 = vrot.lane.b32.xlu0 %v4271_v24, %s6703_s20  ;;  %v2866_v40 = vpop.permute.xlu1 %2865  ;;  %v4516_v24 = vstv %s6304_s5  ;;  %s6295_s5 = sld [smem:[#allocation7 + $0x66]] }
 0x3f7   : > { %2874 = vst.msk [vmem:[%s11231_s6 + $0x50] sm:$0x1] %vm2873_vm9, %v2866_v40  ;;  %v2864_v37 = vpop.permute.xlu0 %2863  ;;  %vm4020_vm9 = vcmask 754272   ;;  %v4519_v40 = vmul.f32 %v4516_v24, %v11387_v41 }
 0x3f8   : > { %4280 = vrot.lane.b32.xlu1 %v4272_v1, %s6703_s20  ;;  %v3857_v10 = vpop.permute.xlu2 %3856  ;;  %2872 = vst.msk [vmem:[%s11231_s6 + $0x28] sm:$0xff] %vm2870_vm2, %v2864_v37  ;;  %vm3906_vm2 = vcmask 336072   ;;  %v4518_v37 = vmul.f32 %v11407_v29, %v4516_v24 }
 0x3f9   : > { %3866 = vst.msk [vmem:[%s11231_s6 + $0x8] sm:$0xff] %vm3865_vm10, %v3857_v10  ;;  %v4517_v10 = vmul.f32 %v11419_v20, %v4516_v24 }
 0x3fd   : > { %4296 = vrot.lane.b32.xlu2 %v4290_v49, %s6703_s20 }
 0x3fe   : > { %4298 = vrot.lane.b32.xlu0 %v4291_v4, %s6703_s20  ;;  %v2904_v43 = vpop.permute.xlu1 %2903  ;;  %v4536_v4 = vstv %s6305_s7  ;;  %s6283_s7 = sld [smem:[#allocation7 + $0x42]] }
 0x3ff   : > { %2912 = vst.msk [vmem:[%s11231_s6 + $0x50] sm:$0x1] %vm2911_vm11, %v2904_v43  ;;  %v2902_v7 = vpop.permute.xlu0 %2901  ;;  %vm4133_vm11 = vcmask 130048   ;;  %v4539_v43 = vmul.f32 %v4536_v4, %v11387_v41 }
 0x400   : > { %4300 = vrot.lane.b32.xlu1 %v4292_v15, %s6703_s20  ;;  %v3895_v47 = vpop.permute.xlu2 %3894  ;;  %2910 = vst.msk [vmem:[%s11231_s6 + $0x28] sm:$0xff] %vm2908_vm5, %v2902_v7  ;;  %vm3944_vm5 = vcmask 475472   ;;  %v4538_v7 = vmul.f32 %v11407_v29, %v4536_v4 }
 0x401   : > { %3904 = vst.msk [vmem:[%s11231_s6 + $0x8] sm:$0xff] %vm3903_vm12, %v3895_v47  ;;  %v4537_v47 = vmul.f32 %v11419_v20, %v4536_v4 }
 0x405   : > { %4316 = vrot.lane.b32.xlu2 %v4310_v5, %s6703_s20 }
 0x406   : > { %4318 = vrot.lane.b32.xlu0 %v4311_v62, %s6703_s20  ;;  %v2942_v6 = vpop.permute.xlu1 %2941  ;;  %v4556_v62 = vstv %s6306_s9  ;;  %s6322_s9 = sld [smem:[#allocation7 + $0xcb]] }
 0x407   : > { %2953 = vst.msk [vmem:[%s11231_s6 + $0x50] sm:$0x1] %vm2952_vm13, %v2942_v6  ;;  %v2940_v0 = vpop.permute.xlu0 %2939  ;;  %vm4096_vm13 = vcmask 1033072  }
 0x408   : > { %4320 = vrot.lane.b32.xlu1 %v4312_v27, %s6703_s20  ;;  %v3933_v36 = vpop.permute.xlu2 %3932  ;;  %2955 = vst.msk [vmem:[%s11231_s6 + $0x58] sm:$0x1] %vm2954_vm14, %v2942_v6  ;;  %vm4137_vm14 = vcmask 1041400   ;;  %v4559_v6 = vmul.f32 %v4556_v62, %v11387_v41 }
 0x409   : > { %2950 = vst.msk [vmem:[%s11231_s6 + $0x28] sm:$0xff] %vm2946_vm8, %v2940_v0  ;;  %vm3982_vm8 = vcmask 614872  }
 0x40a   : > { %2951 = vst.msk [vmem:[%s11231_s6 + $0x30] sm:$0xff] %vm2948_vm3, %v2940_v0  ;;  %vm4093_vm3 = vcmask 1040240   ;;  %v4558_v0 = vmul.f32 %v11407_v29, %v4556_v62 }
 0x40b   : > { %3942 = vst.msk [vmem:[%s11231_s6 + $0x8] sm:$0xff] %vm3941_vm15, %v3933_v36  ;;  %v4557_v36 = vmul.f32 %v11419_v20, %v4556_v62 }
 0x40d   : > { %4336 = vrot.lane.b32.xlu2 %v4330_v25, %s6703_s20 }
 0x40e   : > { %4338 = vrot.lane.b32.xlu0 %v4331_v23, %s6703_s20 }
 0x40f   : > { %v3859_v52 = vpop.permute.xlu0 %3858 }
 0x410   : > { %4340 = vrot.lane.b32.xlu1 %v4332_v32, %s6703_s20  ;;  %v3971_v8 = vpop.permute.xlu2 %3970  ;;  %3867 = vst.msk [vmem:[%s11231_s6 + $0x30] sm:$0xff] %vm3865_vm10, %v3859_v52  ;;  %vm4131_vm10 = vcmask 1048568   ;;  %v4148_v32 = vmul.f32 %v11472_v61, %v11292_v17  ;;  %v4576_v52 = vstv %s6307_s12  ;;  %s6323_s12 = sld [smem:[#allocation7 + $0xd4]] }
 0x411   : > { %v3861_v26 = vpop.permute.xlu1 %3860  ;;  %3980 = vst.msk [vmem:[%s11231_s6 + $0x8] sm:$0xff] %vm3979_vm1, %v3971_v8  ;;  %v4579_v14 = vmul.f32 %v4576_v52, %v11387_v41 }
 0x412   : > { %3869 = vst.msk [vmem:[%s11231_s6 + $0x58] sm:$0x1] %vm3868_vm0, %v3861_v26 }
 0x415   : > { %4356 = vrot.lane.b32.xlu2 %v4350_v34, %s6703_s20  ;;  %v4578_v34 = vmul.f32 %v11407_v29, %v4576_v52 }
 0x416   : > { %4358 = vrot.lane.b32.xlu0 %v4351_v57, %s6703_s20  ;;  %v11488_v57 = vstv %s6277_s13  ;;  %s6297_s13 = sld [smem:[#allocation7 + $0x78]] }
 0x417   : > { %v3897_v42 = vpop.permute.xlu0 %3896 }
 0x418   : > { %4360 = vrot.lane.b32.xlu1 %v4352_v11, %s6703_s20  ;;  %v4009_v39 = vpop.permute.xlu2 %4008  ;;  %3905 = vst.msk [vmem:[%s11231_s6 + $0x30] sm:$0xff] %vm3903_vm12, %v3897_v42  ;;  %vm4058_vm12 = vcmask 893672   ;;  %v4577_v11 = vmul.f32 %v11419_v20, %v4576_v52 }
 0x419   : > { %v3899_v44 = vpop.permute.xlu1 %3898  ;;  %4018 = vst.msk [vmem:[%s11231_s6 + $0x8] sm:$0xff] %vm4017_vm4, %v4009_v39 }
 0x41a   : > { %3907 = vst.msk [vmem:[%s11231_s6 + $0x58] sm:$0x1] %vm3906_vm2, %v3899_v44  ;;  %v4156_v44 = vmul.f32 %v11488_v57, %v11292_v17 }
 0x41d   : > { %4443 = vrot.lane.b32.xlu2 %v4437_v59, %s6703_s20 }
 0x41e   : > { %4445 = vrot.lane.b32.xlu0 %v4438_v16, %s6703_s20  ;;  %v4663_v16 = vstv %s6316_s14  ;;  %s6332_s14 = sld [smem:[#allocation7 + $0xdd]] }
 0x41f   : > { %v3935_v18 = vpop.permute.xlu0 %3934 }
 0x420   : > { %4447 = vrot.lane.b32.xlu1 %v4439_v58, %s6703_s20  ;;  %v4047_v28 = vpop.permute.xlu2 %4046  ;;  %3943 = vst.msk [vmem:[%s11231_s6 + $0x30] sm:$0xff] %vm3941_vm15, %v3935_v18  ;;  %vm4139_vm15 = vcmask 122880  }
 0x421   : > { %v3937_v22 = vpop.permute.xlu1 %3936  ;;  %4056 = vst.msk [vmem:[%s11231_s6 + $0x8] sm:$0xff] %vm4055_vm6, %v4047_v28  ;;  %v11504_v28 = vld [vmem:[#allocation2 + $0x30] sm:$0xff] }
 0x422   : > { %3945 = vst.msk [vmem:[%s11231_s6 + $0x58] sm:$0x1] %vm3944_vm5, %v3937_v22  ;;  %v4666_v22 = vmul.f32 %v4663_v16, %v11497_v63  ;;  %v4664_v18 = vmul.f32 %v11504_v28, %v4663_v16 }
 0x425   : > { %4463 = vrot.lane.b32.xlu2 %v4457_v53, %s6703_s20  ;;  %v11510_v53 = vstv %s6278_s15  ;;  %s6298_s15 = sld [smem:[#allocation7 + $0x81]] }
 0x426   : > { %4465 = vrot.lane.b32.xlu0 %v4458_v55, %s6703_s20  ;;  %v4164_v55 = vmul.f32 %v11510_v53, %v11292_v17 }
 0x427   : > { %v3973_v50 = vpop.permute.xlu0 %3972 }
 0x428   : > { %4467 = vrot.lane.b32.xlu1 %v4459_v2, %s6703_s20  ;;  %v4085_v35 = vpop.permute.xlu2 %4084  ;;  %3981 = vst.msk [vmem:[%s11231_s6 + $0x30] sm:$0xff] %vm3979_vm1, %v3973_v50  ;;  %v4665_v2 = vmul.f32 %v11507_v21, %v4663_v16 }
 0x429   : > { %4094 = vst.msk [vmem:[%s11231_s6 + $0x8] sm:$0xff] %vm4093_vm3, %v4085_v35 }
 0x42a   : > { %v3975_v33 = vpop.permute.xlu1 %3974 }
 0x42b   : > { %3983 = vst.msk [vmem:[%s11231_s6 + $0x58] sm:$0x1] %vm3982_vm8, %v3975_v33 }
 0x42d   : > { %4483 = vrot.lane.b32.xlu2 %v4477_v12, %s6703_s20 }
 0x42e   : > { %4485 = vrot.lane.b32.xlu0 %v4478_v31, %s6703_s20 }
 0x42f   : > { %v4011_v13 = vpop.permute.xlu0 %4010 }
 0x430   : > { %4487 = vrot.lane.b32.xlu1 %v4479_v46, %s6703_s20  ;;  %v4123_v19 = vpop.permute.xlu2 %4122  ;;  %4019 = vst.msk [vmem:[%s11231_s6 + $0x30] sm:$0xff] %vm4017_vm4, %v4011_v13  ;;  %v4683_v46 = vstv %s6317_s21  ;;  %s6333_s21 = sld [smem:[#allocation7 + $0xe6]] }
 0x431   : > { %4132 = vst.msk [vmem:[%s11231_s6 + $0x8] sm:$0xff] %vm4131_vm10, %v4123_v19  ;;  %v4686_v12 = vmul.f32 %v4683_v46, %v11497_v63  ;;  %v4684_v31 = vmul.f32 %v11504_v28, %v4683_v46 }
 0x432   : > { %v4013_v45 = vpop.permute.xlu1 %4012  ;;  %4134 = vst.msk [vmem:[%s11231_s6 + $0x10] sm:$0xff] %vm4133_vm11, %v4123_v19  ;;  %v11526_v19 = vstv %s6279_s24  ;;  %s6299_s24 = sld [smem:[#allocation7 + $0x8a]] }
 0x433   : > { %4021 = vst.msk [vmem:[%s11231_s6 + $0x58] sm:$0x1] %vm4020_vm9, %v4013_v45  ;;  %v4685_v45 = vmul.f32 %v11507_v21, %v4683_v46  ;;  %v4172_v13 = vmul.f32 %v11526_v19, %v11292_v17 }
 0x435   : > { %4503 = vrot.lane.b32.xlu2 %v4497_v60, %s6703_s20 }
 0x436   : > { %4505 = vrot.lane.b32.xlu0 %v4498_v30, %s6703_s20 }
 0x438   : > { %4507 = vrot.lane.b32.xlu1 %v4499_v51, %s6703_s20  ;;  %v11439_v1 = vpop.permute.xlu2 %4216  ;;  %v4049_v54 = vpop.permute.xlu0 %4048 }
 0x439   : > { %4057 = vst.msk [vmem:[%s11231_s6 + $0x30] sm:$0xff] %vm4055_vm6, %v4049_v54 }
 0x43a   : > { %v4051_v48 = vpop.permute.xlu1 %4050 }
 0x43b   : > { %4059 = vst.msk [vmem:[%s11231_s6 + $0x58] sm:$0x1] %vm4058_vm12, %v4051_v48  ;;  %v4703_v48 = vstv %s6318_s22  ;;  %s6334_s22 = sld [smem:[#allocation7 + $0xef]] }
 0x43c   : > { %v4706_v54 = vmul.f32 %v4703_v48, %v11497_v63  ;;  %v4704_v24 = vmul.f32 %v11504_v28, %v4703_v48 }
 0x43d   : > { %4523 = vrot.lane.b32.xlu2 %v4517_v10, %s6703_s20  ;;  %v4705_v10 = vmul.f32 %v11507_v21, %v4703_v48  ;;  %v11604_v48 = vstv %s6282_s30  ;;  %s6312_s30 = sld [smem:[#allocation7 + $0xb7]] }
 0x43e   : > { %4525 = vrot.lane.b32.xlu0 %v4518_v37, %s6703_s20 }
 0x440   : > { %4527 = vrot.lane.b32.xlu1 %v4519_v40, %s6703_s20  ;;  %v11450_v15 = vpop.permute.xlu2 %4236  ;;  %v4087_v49 = vpop.permute.xlu0 %4086  ;;  %v11541_v40 = vstv %s6292_s23  ;;  %s6308_s23 = sld [smem:[#allocation7 + $0x93]] }
 0x441   : > { %4095 = vst.msk [vmem:[%s11231_s6 + $0x30] sm:$0xff] %vm4093_vm3, %v4087_v49  ;;  %v4375_v37 = vmul.f32 %v11541_v40, %v11387_v41  ;;  %v4373_v52 = vmul.f32 %v11419_v20, %v11541_v40 }
 0x442   : > { %v4089_v9 = vpop.permute.xlu1 %4088 }
 0x443   : > { %4097 = vst.msk [vmem:[%s11231_s6 + $0x58] sm:$0x1] %vm4096_vm13, %v4089_v9  ;;  %v11546_v9 = vstv %s6280_s25  ;;  %s6335_s25 = sld [smem:[#allocation7 + $0xf8]] }
 0x444   : > { %v4180_v49 = vmul.f32 %v11546_v9, %v11292_v17 }
 0x445   : > { %4543 = vrot.lane.b32.xlu2 %v4537_v47, %s6703_s20 }
 0x446   : > { %4545 = vrot.lane.b32.xlu0 %v4538_v7, %s6703_s20  ;;  %v11558_v7 = vld [vmem:[#allocation2] sm:$0xff] }
 0x448   : > { %4547 = vrot.lane.b32.xlu1 %v4539_v43, %s6703_s20  ;;  %v11461_v27 = vpop.permute.xlu2 %4256  ;;  %v4125_v5 = vpop.permute.xlu0 %4124 }
 0x449   : > { %4135 = vst.msk [vmem:[%s11231_s6 + $0x30] sm:$0xff] %vm4131_vm10, %v4125_v5 }
 0x44a   : > { %v4127_v3 = vpop.permute.xlu1 %4126  ;;  %4136 = vst.msk [vmem:[%s11231_s6 + $0x38] sm:$0xff] %vm4133_vm11, %v4125_v5 }
 0x44b   : > { %4138 = vst.msk [vmem:[%s11231_s6 + $0x58] sm:$0x1] %vm4137_vm14, %v4127_v3 }
 0x44c   : > { %4140 = vst.msk [vmem:[%s11231_s6 + $0x60] sm:$0x1] %vm4139_vm15, %v4127_v3  ;;  %v4146_v3 = vmul.f32 %v11558_v7, %v11472_v61 }
 0x44d   : > { %4563 = vrot.lane.b32.xlu2 %v4557_v36, %s6703_s20 }
 0x44e   : > { %4565 = vrot.lane.b32.xlu0 %v4558_v0, %s6703_s20  ;;  %v4225_v36 = vadd.f32 %v11439_v1, %v4146_v3 }
 0x450   : > { %4567 = vrot.lane.b32.xlu1 %v4559_v6, %s6703_s20  ;;  %v11479_v23 = vpop.permute.xlu2 %4276  ;;  %v11483_v8 = vpop.permute.xlu0 %4218  ;;  %v4723_v6 = vstv %s6319_s26  ;;  %s6309_s26 = sld [smem:[#allocation7 + $0x9c]] }
 0x451   : > { %v4726_v0 = vmul.f32 %v4723_v6, %v11497_v63 }
 0x452   : > { %v4221_v25 = vpop.permute.xlu1 %4220 }
 0x453   : > { %v11481_v26 = vadd.f32 %v4221_v25, %v4148_v32  ;;  %v4724_v32 = vmul.f32 %v11504_v28, %v4723_v6  ;;  %v11569_v25 = vstv %s6293_s27  ;;  %s6310_s27 = sld [smem:[#allocation7 + $0xa5]] }
 0x455   : > { %4583 = vrot.lane.b32.xlu2 %v4577_v11, %s6703_s20  ;;  %v11554_v4 = vadd.f32 %v4375_v37, %v11481_v26  ;;  %v4725_v26 = vmul.f32 %v11507_v21, %v4723_v6  ;;  %v11576_v11 = vstv %s6281_s28  ;;  %s6336_s28 = sld [smem:[#allocation7 + $0x101]] }
 0x456   : > { %4585 = vrot.lane.b32.xlu0 %v4578_v34, %s6703_s20  ;;  %v4188_v1 = vmul.f32 %v11576_v11, %v11292_v17  ;;  %v4376_v34 = vadd.f32 %v4373_v52, %v4225_v36  ;;  %v4763_v36 = vstv %s6321_s18  ;;  %s6338_s18 = sld [smem:[#allocation7 + $0x113]] }
 0x457   : > { %v4765_v52 = vmul.f32 %v11507_v21, %v4763_v36 }
 0x458   : > { %4587 = vrot.lane.b32.xlu1 %v4579_v14, %s6703_s20  ;;  %v11495_v42 = vpop.permute.xlu2 %4296  ;;  %v11501_v59 = vpop.permute.xlu0 %4238  ;;  %v4383_v14 = vmul.f32 %v11569_v25, %v11387_v41 }
 0x45a   : > { %v4241_v39 = vpop.permute.xlu1 %4240 }
 0x45b   : > { %v11499_v58 = vadd.f32 %v4241_v39, %v4156_v44 }
 0x45d   : > { %4670 = vrot.lane.b32.xlu2 %v4664_v18, %s6703_s20  ;;  %v11584_v44 = vadd.f32 %v4383_v14, %v11499_v58 }
 0x45e   : > { %4672 = vrot.lane.b32.xlu0 %v4665_v2, %s6703_s20 }
 0x460   : > { %4674 = vrot.lane.b32.xlu1 %v4666_v22, %s6703_s20  ;;  %v11517_v35 = vpop.permute.xlu2 %4316  ;;  %v11521_v56 = vpop.permute.xlu0 %4258  ;;  %v4154_v22 = vmul.f32 %v11558_v7, %v11488_v57 }
 0x462   : > { %v4261_v33 = vpop.permute.xlu1 %4260  ;;  %v4245_v46 = vadd.f32 %v11450_v15, %v4154_v22  ;;  %v4196_v15 = vmul.f32 %v11604_v48, %v11292_v17 }
 0x463   : > { %v11519_v50 = vadd.f32 %v4261_v33, %v4164_v55  ;;  %v4743_v33 = vstv %s6320_s29  ;;  %s6311_s29 = sld [smem:[#allocation7 + $0xae]] }
 0x464   : > { %v4744_v58 = vmul.f32 %v11504_v28, %v4743_v33 }
 0x465   : > { %4690 = vrot.lane.b32.xlu2 %v4684_v31, %s6703_s20  ;;  %v11597_v31 = vstv %s6294_s19  ;;  %s6337_s19 = sld [smem:[#allocation7 + $0x10a]] }
 0x466   : > { %4692 = vrot.lane.b32.xlu0 %v4685_v45, %s6703_s20  ;;  %v4745_v45 = vmul.f32 %v11507_v21, %v4743_v33  ;;  %v4389_v14 = vmul.f32 %v11419_v20, %v11597_v31 }
 0x468   : > { %4694 = vrot.lane.b32.xlu1 %v4686_v12, %s6703_s20  ;;  %v11533_v51 = vpop.permute.xlu2 %4336  ;;  %v11537_v30 = vpop.permute.xlu0 %4278  ;;  %v4746_v12 = vmul.f32 %v4743_v33, %v11497_v63 }
 0x46a   : > { %v4281_v38 = vpop.permute.xlu1 %4280 }
 0x46b   : > { %v11535_v60 = vadd.f32 %v4281_v38, %v4172_v13  ;;  %v4381_v13 = vmul.f32 %v11419_v20, %v11569_v25  ;;  %v4391_v38 = vmul.f32 %v11597_v31, %v11387_v41 }
 0x46d   : > { %4710 = vrot.lane.b32.xlu2 %v4704_v24, %s6703_s20  ;;  %v11612_v24 = vadd.f32 %v4391_v38, %v11519_v50  ;;  %v4764_v50 = vmul.f32 %v11504_v28, %v4763_v36  ;;  %v11650_v38 = vld [vmem:[#allocation2 + $0x8] sm:$0xff] }
 0x46e   : > { %4712 = vrot.lane.b32.xlu0 %v4705_v10, %s6703_s20 }
 0x470   : > { %4714 = vrot.lane.b32.xlu1 %v4706_v54, %s6703_s20  ;;  %v11556_v47 = vpop.permute.xlu2 %4356  ;;  %v11564_v62 = vpop.permute.xlu0 %4298  ;;  %v4384_v54 = vadd.f32 %v4381_v13, %v4245_v46  ;;  %v4170_v46 = vmul.f32 %v11558_v7, %v11526_v19  ;;  %v4783_v13 = vstv %s6322_s9  ;;  %s6314_s9 = sld [smem:[#allocation7 + $0xc9]] }
 0x472   : > { %v4301_v43 = vpop.permute.xlu1 %4300 }
 0x473   : > { %v11562_v5 = vadd.f32 %v4301_v43, %v4180_v49  ;;  %v4162_v49 = vmul.f32 %v11558_v7, %v11510_v53 }
 0x475   : > { %4730 = vrot.lane.b32.xlu2 %v4724_v32, %s6703_s20  ;;  %v4766_v32 = vmul.f32 %v4763_v36, %v11497_v63 }
 0x476   : > { %4732 = vrot.lane.b32.xlu0 %v4725_v26, %s6703_s20  ;;  %v11625_v26 = vstv %s6295_s5  ;;  %s6313_s5 = sld [smem:[#allocation7 + $0xc0]] }
 0x477   : > { %v4397_v36 = vmul.f32 %v11419_v20, %v11625_v26 }
 0x478   : > { %4734 = vrot.lane.b32.xlu1 %v4726_v0, %s6703_s20  ;;  %v4444_v16 = vpop.permute.xlu2 %4443  ;;  %v11590_v2 = vpop.permute.xlu0 %4318  ;;  %v4265_v0 = vadd.f32 %v11461_v27, %v4162_v49  ;;  %v4785_v49 = vmul.f32 %v11507_v21, %v4783_v13 }
 0x479   : > { %v11592_v55 = vadd.f32 %v4444_v16, %v4376_v34  ;;  %v11632_v34 = vstv %s6283_s7  ;;  %s6339_s7 = sld [smem:[#allocation7 + $0x11c]] }
 0x47a   : > { %v4321_v39 = vpop.permute.xlu1 %4320  ;;  %v4204_v27 = vmul.f32 %v11632_v34, %v11292_v17  ;;  %v4147_v17 = vmul.f32 %v11650_v38, %v11472_v61  ;;  %v4374_v61 = vmul.f32 %v11407_v29, %v11541_v40  ;;  %v4155_v40 = vmul.f32 %v11650_v38, %v11488_v57 }
 0x47b   : > { %v11588_v18 = vadd.f32 %v4321_v39, %v4188_v1  ;;  %v4399_v1 = vmul.f32 %v11625_v26, %v11387_v41  ;;  %v4392_v39 = vadd.f32 %v4389_v14, %v4265_v0  ;;  %v4178_v14 = vmul.f32 %v11558_v7, %v11546_v9 }
 0x47d   : > { %4750 = vrot.lane.b32.xlu2 %v4744_v58, %s6703_s20  ;;  %v11640_v16 = vadd.f32 %v4399_v1, %v11535_v60  ;;  %v4285_v60 = vadd.f32 %v11479_v23, %v4170_v46  ;;  %v4246_v46 = vadd.f32 %v11501_v59, %v4155_v40  ;;  %v11722_v40 = vstv %s6298_s15  ;;  %s11914_s15 = sld [smem:[#allocation7 + $0xd]] }
 0x47e   : > { %4752 = vrot.lane.b32.xlu0 %v4745_v45, %s6703_s20 }
 0x47f   : > { %v4400_v23 = vadd.f32 %v4397_v36, %v4285_v60  ;;  %v11703_v36 = vld [vmem:[#allocation2 + $0x58] sm:$0x3] }
 0x480   : > { %4754 = vrot.lane.b32.xlu1 %v4746_v12, %s6703_s20  ;;  %v4464_v37 = vpop.permute.xlu2 %4463  ;;  %v11618_v3 = vpop.permute.xlu0 %4338 }
 0x481   : > { %v11620_v6 = vadd.f32 %v4464_v37, %v4384_v54  ;;  %v4786_v54 = vmul.f32 %v4783_v13, %v11497_v63  ;;  %v11658_v37 = vstv %s6296_s10  ;;  %s6354_s10 = sld [smem:[#allocation7 + $0x4]] }
 0x482   : > { %v4341_v10 = vpop.permute.xlu1 %4340  ;;  %v4407_v0 = vmul.f32 %v11658_v37, %v11387_v41 }
 0x483   : > { %v11616_v43 = vadd.f32 %v4341_v10, %v4196_v15  ;;  %v4226_v15 = vadd.f32 %v11483_v8, %v4147_v17  ;;  %v4784_v10 = vmul.f32 %v11504_v28, %v4783_v13 }
 0x484   : > { %v11671_v8 = vadd.f32 %v4407_v0, %v11562_v5  ;;  %v4305_v5 = vadd.f32 %v11495_v42, %v4178_v14  ;;  %v4382_v42 = vmul.f32 %v11407_v29, %v11569_v25  ;;  %v4186_v0 = vmul.f32 %v11558_v7, %v11576_v11 }
 0x485   : > { %4770 = vrot.lane.b32.xlu2 %v4764_v50, %s6703_s20  ;;  %v4377_v50 = vadd.f32 %v4374_v61, %v4226_v15  ;;  %v4405_v15 = vmul.f32 %v11419_v20, %v11658_v37  ;;  %v4890_v25 = vstv %s6332_s14  ;;  %s6370_s14 = sld [smem:[#allocation7 + $0x94]] }
 0x486   : > { %4772 = vrot.lane.b32.xlu0 %v4765_v52, %s6703_s20 }
 0x487   : > { %v4408_v59 = vadd.f32 %v4405_v15, %v4305_v5  ;;  %v11724_v5 = vld [vmem:[#allocation2 + $0x50] sm:$0xff] }
 0x488   : > { %4774 = vrot.lane.b32.xlu1 %v4766_v32, %s6703_s20  ;;  %v4484_v33 = vpop.permute.xlu2 %4483  ;;  %v11646_v58 = vpop.permute.xlu0 %4358 }
 0x489   : > { %v11648_v45 = vadd.f32 %v4484_v33, %v4392_v39 }
 0x48a   : > { %v4361_v22 = vpop.permute.xlu1 %4360 }
 0x48b   : > { %v11644_v12 = vadd.f32 %v4361_v22, %v4204_v27  ;;  %13845 = vst [vmem:[#allocation68_spill] sm:$0xff] %v11648_v45  ;;  %v4803_v22 = vstv %s6323_s12  ;;  %s6362_s12 = sld [smem:[#allocation7 + $0x4c]] }
 0x48c   : > { %v4806_v13 = vmul.f32 %v4803_v22, %v11497_v63  ;;  %v4804_v17 = vmul.f32 %v11504_v28, %v4803_v22  ;;  %v4805_v60 = vmul.f32 %v11507_v21, %v4803_v22  ;;  %v11719_v22 = vld [vmem:[#allocation2 + $0x48] sm:$0xff] }
 0x48d   : > { %4790 = vrot.lane.b32.xlu2 %v4784_v10, %s6703_s20  ;;  %v4385_v10 = vadd.f32 %v4382_v42, %v4246_v46  ;;  %v4892_v46 = vmul.f32 %v11724_v5, %v4890_v25  ;;  %v4194_v42 = vmul.f32 %v11558_v7, %v11604_v48 }
 0x48e   : > { %4792 = vrot.lane.b32.xlu0 %v4785_v49, %s6703_s20 }
 0x490   : > { %4794 = vrot.lane.b32.xlu1 %v4786_v54, %s6703_s20  ;;  %v4504_v52 = vpop.permute.xlu2 %4503  ;;  %v4446_v27 = vpop.permute.xlu0 %4445 }
 0x491   : > { %v11678_v39 = vadd.f32 %v4504_v52, %v4400_v23  ;;  %v11682_v33 = vadd.f32 %v4446_v27, %v4377_v50  ;;  %v4325_v52 = vadd.f32 %v11517_v35, %v4186_v0  ;;  %v4893_v27 = vmul.f32 %v4890_v25, %v11703_v36 }
 0x492   : > { %v4448_v32 = vpop.permute.xlu1 %4447  ;;  %v4423_v35 = vmul.f32 %v11722_v40, %v11387_v41 }
 0x493   : > { %v11676_v1 = vadd.f32 %v4448_v32, %v11554_v4  ;;  %13846 = vst [vmem:[#allocation129_spill] sm:$0xff] %v11678_v39  ;;  %v11688_v4 = vstv %s6297_s13  ;;  %s6315_s13 = sld [smem:[#allocation7 + $0xd2]] }
 0x494   : > { %v4415_v57 = vmul.f32 %v11688_v4, %v11387_v41 }
 0x495   : > { %4810 = vrot.lane.b32.xlu2 %v4804_v17, %s6703_s20  ;;  %v11737_v17 = vadd.f32 %v4423_v35, %v11616_v43  ;;  %v4345_v43 = vadd.f32 %v11533_v51, %v4194_v42  ;;  %v4398_v51 = vmul.f32 %v11407_v29, %v11625_v26  ;;  %v4202_v35 = vmul.f32 %v11558_v7, %v11632_v34 }
 0x496   : > { %4812 = vrot.lane.b32.xlu0 %v4805_v60, %s6703_s20  ;;  %v11701_v54 = vadd.f32 %v4415_v57, %v11588_v18  ;;  %v4163_v18 = vmul.f32 %v11650_v38, %v11510_v53  ;;  %v4413_v53 = vmul.f32 %v11419_v20, %v11688_v4  ;;  %v4179_v26 = vmul.f32 %v11650_v38, %v11546_v9 }
 0x498   : > { %4814 = vrot.lane.b32.xlu1 %v4806_v13, %s6703_s20  ;;  %v4524_v49 = vpop.permute.xlu2 %4523  ;;  %v4466_v23 = vpop.permute.xlu0 %4465  ;;  %v4266_v14 = vadd.f32 %v11521_v56, %v4163_v18  ;;  %v4390_v56 = vmul.f32 %v11407_v29, %v11597_v31  ;;  %v4416_v13 = vadd.f32 %v4413_v53, %v4325_v52  ;;  %v4171_v31 = vmul.f32 %v11650_v38, %v11526_v19 }
 0x499   : > { %v11710_v32 = vadd.f32 %v4524_v49, %v4408_v59  ;;  %v11714_v50 = vadd.f32 %v4466_v23, %v4385_v10  ;;  %v4910_v49 = vstv %s6333_s21  ;;  %s11924_s21 = sld [smem:[#allocation7 + $0x55]] }
 0x49a   : > { %v4468_v21 = vpop.permute.xlu1 %4467  ;;  %v4393_v15 = vadd.f32 %v4390_v56, %v4266_v14  ;;  %v4286_v23 = vadd.f32 %v11537_v30, %v4171_v31  ;;  %v4911_v18 = vmul.f32 %v11719_v22, %v4910_v49  ;;  %v4912_v52 = vmul.f32 %v11724_v5, %v4910_v49 }
 0x49b   : > { %v11708_v61 = vadd.f32 %v4468_v21, %v11584_v44  ;;  %13847 = vst [vmem:[#allocation160_spill] sm:$0xff] %v11710_v32  ;;  %v4891_v44 = vmul.f32 %v11719_v22, %v4890_v25  ;;  %v4913_v25 = vmul.f32 %v4910_v49, %v11703_v36  ;;  %v4421_v14 = vmul.f32 %v11419_v20, %v11722_v40 }
 0x49c   : > { %13848 = vst [vmem:[#allocation174_spill] sm:$0xff] %v11714_v50 }
 0x49d   : > { %4897 = vrot.lane.b32.xlu2 %v4891_v44, %s6703_s20  ;;  %v4424_v30 = vadd.f32 %v4421_v14, %v4345_v43 }
 0x49e   : > { %4899 = vrot.lane.b32.xlu0 %v4892_v46, %s6703_s20  ;;  %v4401_v46 = vadd.f32 %v4398_v51, %v4286_v23  ;;  %v4950_v51 = vstv %s6335_s25  ;;  %s11936_s25 = sld [smem:[#allocation9]] }
 0x4a0   : > { %4901 = vrot.lane.b32.xlu1 %v4893_v27, %s6703_s20  ;;  %v4544_v57 = vpop.permute.xlu2 %4543  ;;  %v4486_v21 = vpop.permute.xlu0 %4485 }
 0x4a1   : > { %v11744_v10 = vadd.f32 %v4544_v57, %v4416_v13  ;;  %v11748_v0 = vadd.f32 %v4486_v21, %v4393_v15  ;;  %v4306_v57 = vadd.f32 %v11564_v62, %v4179_v26 }
 0x4a2   : > { %v4488_v60 = vpop.permute.xlu1 %4487 }
 0x4a3   : > { %v11742_v59 = vadd.f32 %v4488_v60, %v11612_v24  ;;  %13849 = vst [vmem:[#allocation171_spill] sm:$0xff] %v11744_v10  ;;  %v11754_v24 = vstv %s6299_s24  ;;  %v4930_v60 = vstv %s6334_s22  ;;  %s11930_s24 = sld [smem:[#allocation8]] }
 0x4a4   : > { %13850 = vst [vmem:[#allocation100_spill] sm:$0xff] %v11748_v0  ;;  %v4431_v19 = vmul.f32 %v11754_v24, %v11387_v41  ;;  %v4933_v42 = vmul.f32 %v4930_v60, %v11703_v36  ;;  %v4931_v21 = vmul.f32 %v11719_v22, %v4930_v60  ;;  %v4932_v49 = vmul.f32 %v11724_v5, %v4930_v60  ;;  %s6324_s22 = sld [smem:[#allocation7 + $0xdb]] }
 0x4a5   : > { %4917 = vrot.lane.b32.xlu2 %v4911_v18, %s6703_s20  ;;  %v4429_v31 = vmul.f32 %v11419_v20, %v11754_v24 }
 0x4a6   : > { %4919 = vrot.lane.b32.xlu0 %v4912_v52, %s6703_s20  ;;  %v11767_v27 = vadd.f32 %v4431_v19, %v11644_v12  ;;  %v4365_v12 = vadd.f32 %v11556_v47, %v4202_v35  ;;  %v4406_v47 = vmul.f32 %v11407_v29, %v11658_v37  ;;  %v4187_v37 = vmul.f32 %v11650_v38, %v11576_v11 }
 0x4a7   : > { %v4414_v11 = vmul.f32 %v11407_v29, %v11688_v4  ;;  %v4195_v4 = vmul.f32 %v11650_v38, %v11604_v48  ;;  %v4422_v48 = vmul.f32 %v11407_v29, %v11722_v40  ;;  %v4203_v40 = vmul.f32 %v11650_v38, %v11632_v34 }
 0x4a8   : > { %4921 = vrot.lane.b32.xlu1 %v4913_v25, %s6703_s20  ;;  %v4564_v53 = vpop.permute.xlu2 %4563  ;;  %v4506_v56 = vpop.permute.xlu0 %4505  ;;  %v4432_v62 = vadd.f32 %v4429_v31, %v4365_v12  ;;  %v4409_v25 = vadd.f32 %v4406_v47, %v4306_v57  ;;  %v4430_v34 = vmul.f32 %v11407_v29, %v11754_v24 }
 0x4a9   : > { %v11774_v13 = vadd.f32 %v4564_v53, %v4424_v30  ;;  %v11778_v15 = vadd.f32 %v4506_v56, %v4401_v46  ;;  %v4951_v46 = vmul.f32 %v11719_v22, %v4950_v51  ;;  %v11811_v53 = vstv %s6309_s26  ;;  %s11940_s26 = sld [smem:[#allocation9 + $0x1]] }
 0x4aa   : > { %v4508_v44 = vpop.permute.xlu1 %4507  ;;  %v4610_v35 = vmul.f32 %v11811_v53, %v11497_v63 }
 0x4ab   : > { %v11772_v41 = vadd.f32 %v4508_v44, %v11640_v16  ;;  %13851 = vst [vmem:[#allocation15_spill] sm:$0xff] %v11774_v13  ;;  %v11784_v16 = vstv %s6308_s23  ;;  %v4326_v44 = vadd.f32 %v11590_v2, %v4187_v37  ;;  %v11821_v2 = vstv %s6310_s27  ;;  %s11932_s23 = sld [smem:[#allocation8 + $0x1]] }
 0x4ac   : > { %13852 = vst [vmem:[#allocation119_spill] sm:$0xff] %v11778_v15  ;;  %v4602_v9 = vmul.f32 %v11784_v16, %v11497_v63  ;;  %v11824_v56 = vadd.f32 %v4610_v35, %v11708_v61  ;;  %v4618_v57 = vmul.f32 %v11821_v2, %v11497_v63  ;;  %v4990_v37 = vstv %s6337_s19  ;;  %s11946_s27 = sld [smem:[#allocation8 + $0x2]] }
 0x4ad   : > { %4937 = vrot.lane.b32.xlu2 %v4931_v21, %s6703_s20  ;;  %v4417_v26 = vadd.f32 %v4414_v11, %v4326_v44  ;;  %v4991_v35 = vmul.f32 %v11719_v22, %v4990_v37  ;;  %v4992_v11 = vmul.f32 %v11724_v5, %v4990_v37  ;;  %s11967_s19 = sld [smem:[#allocation7 + $0x9d]] }
 0x4ae   : > { %4939 = vrot.lane.b32.xlu0 %v4932_v49, %s6703_s20  ;;  %v11797_v43 = vadd.f32 %v4602_v9, %v11676_v1  ;;  %v4953_v1 = vmul.f32 %v4950_v51, %v11703_v36  ;;  %v4970_v49 = vstv %s6336_s28  ;;  %v11836_v61 = vadd.f32 %v4618_v57, %v11742_v59  ;;  %s11954_s28 = sld [smem:[#allocation9 + $0x2]] }
 0x4af   : > { %v4346_v9 = vadd.f32 %v11618_v3, %v4195_v4  ;;  %v4973_v47 = vmul.f32 %v4970_v49, %v11703_v36 }
 0x4b0   : > { %4941 = vrot.lane.b32.xlu1 %v4933_v42, %s6703_s20  ;;  %v4584_v18 = vpop.permute.xlu2 %4583  ;;  %v4526_v14 = vpop.permute.xlu0 %4525 }
 0x4b1   : > { %v11802_v19 = vadd.f32 %v4584_v18, %v4432_v62  ;;  %v11806_v30 = vadd.f32 %v4526_v14, %v4409_v25  ;;  %v4971_v62 = vmul.f32 %v11719_v22, %v4970_v49  ;;  %v4425_v3 = vadd.f32 %v4422_v48, %v4346_v9 }
 0x4b2   : > { %v4528_v23 = vpop.permute.xlu1 %4527 }
 0x4b3   : > { %v11800_v52 = vadd.f32 %v4528_v23, %v11671_v8  ;;  %13853 = vst [vmem:[#allocation178_spill] sm:$0xff] %v11802_v19  ;;  %v4952_v8 = vmul.f32 %v11724_v5, %v4950_v51  ;;  %v4972_v23 = vmul.f32 %v11724_v5, %v4970_v49  ;;  %v5010_v49 = vstv %s6338_s18  ;;  %s11975_s18 = sld [smem:[#allocation7 + $0xe4]] }
 0x4b4   : > { %13854 = vst [vmem:[#allocation122_spill] sm:$0xff] %v11806_v30  ;;  %v5013_v9 = vmul.f32 %v5010_v49, %v11703_v36 }
 0x4b5   : > { %4957 = vrot.lane.b32.xlu2 %v4951_v46, %s6703_s20  ;;  %v4366_v46 = vadd.f32 %v11646_v58, %v4203_v40 }
 0x4b6   : > { %4959 = vrot.lane.b32.xlu0 %v4952_v8, %s6703_s20  ;;  %v4993_v8 = vmul.f32 %v4990_v37, %v11703_v36 }
 0x4b7   : > { %v4433_v58 = vadd.f32 %v4430_v34, %v4366_v46 }
 0x4b8   : > { %4961 = vrot.lane.b32.xlu1 %v4953_v1, %s6703_s20  ;;  %v11826_v12 = vpop.permute.xlu2 %4670  ;;  %v4546_v21 = vpop.permute.xlu0 %4545 }
 0x4b9   : > { %v11833_v31 = vadd.f32 %v4546_v21, %v4417_v26 }
 0x4ba   : > { %v4548_v60 = vpop.permute.xlu1 %4547 }
 0x4bb   : > { %v4554_v42 = vadd.f32 %v4548_v60, %v11701_v54  ;;  %13855 = vst [vmem:[#allocation120_spill] sm:$0xff] %v11833_v31  ;;  %v11847_v54 = vstv %s6311_s29  ;;  %s11960_s29 = sld [smem:[#allocation8 + $0x3]] }
 0x4bc   : > { %13856 = vst [vmem:[#allocation98_spill] sm:$0xff] %v11847_v54  ;;  %v4626_v18 = vmul.f32 %v11847_v54, %v11497_v63  ;;  %v5504_v54 = vstv %s11967_s19  ;;  %s12343_s19 = sld [smem:[#allocation9 + $0x6]] }
 0x4bd   : > { %4977 = vrot.lane.b32.xlu2 %v4971_v62, %s6703_s20  ;;  %v5012_v62 = vmul.f32 %v11724_v5, %v5010_v49 }
 0x4be   : > { %4979 = vrot.lane.b32.xlu0 %v4972_v23, %s6703_s20  ;;  %v11859_v1 = vadd.f32 %v4626_v18, %v11772_v41 }
 0x4c0   : > { %4981 = vrot.lane.b32.xlu1 %v4973_v47, %s6703_s20  ;;  %v11849_v25 = vpop.permute.xlu2 %4690  ;;  %v4566_v51 = vpop.permute.xlu0 %4565  ;;  %v5011_v47 = vmul.f32 %v11719_v22, %v5010_v49  ;;  %v11928_v49 = vld [vmem:[#allocation2 + $0x10] sm:$0x3] }
 0x4c1   : > { %v11856_v44 = vadd.f32 %v4566_v51, %v4425_v3  ;;  %v5030_v3 = vstv %s6339_s7  ;;  %13871 = vst [vmem:[#allocation198_spill] sm:$0xff] %v11928_v49  ;;  %s11986_s7 = sld [smem:[#allocation7 + $0xe5]]  ;;  %v12018_v15 = vstv %s11960_s29  ;;  %s6722_s29 = smov 32  }
 0x4c2   : > { %v4568_v59 = vpop.permute.xlu1 %4567  ;;  %v5033_v51 = vmul.f32 %v5030_v3, %v11703_v36  ;;  %v5031_v37 = vmul.f32 %v11719_v22, %v5030_v3  ;;  %v5032_v40 = vmul.f32 %v11724_v5, %v5030_v3  ;;  %13884 = vst [vmem:[#allocation90_spill] sm:$0xff] %v12018_v15  ;;  %v12048_v15 = vld [vmem:[#allocation2 + $0x18] sm:$0xff] }
 0x4c3   : > { %v4574_v14 = vadd.f32 %v4568_v59, %v11737_v17  ;;  %13857 = vst [vmem:[#allocation69_spill] sm:$0xff] %v11856_v44  ;;  %v11870_v17 = vstv %s6312_s30  ;;  %v11956_v44 = vld [vmem:[#allocation2 + $0x58] sm:$0x3]  ;;  %s11971_s30 = sld [smem:[#allocation9 + $0x3]] }
 0x4c4   : > { %13858 = vst [vmem:[#allocation62_spill] sm:$0xff] %v11870_v17  ;;  %v4634_v26 = vmul.f32 %v11870_v17, %v11497_v63  ;;  %v12023_v17 = vld [vmem:[#allocation2 + $0x48] sm:$0xff] }
 0x4c5   : > { %4997 = vrot.lane.b32.xlu2 %v4991_v35, %s6703_s20  ;;  %13876 = vst [vmem:[#allocation42_spill] sm:$0xff] %v11956_v44 }
 0x4c6   : > { %4999 = vrot.lane.b32.xlu0 %v4992_v11, %s6703_s20  ;;  %v11880_v24 = vadd.f32 %v4634_v26, %v11800_v52  ;;  %13885 = vst [vmem:[#allocation158_spill] sm:$0xff] %v12023_v17 }
 0x4c8   : > { %5001 = vrot.lane.b32.xlu1 %v4993_v8, %s6703_s20  ;;  %v11872_v60 = vpop.permute.xlu2 %4710  ;;  %v4586_v21 = vpop.permute.xlu0 %4585 }
 0x4c9   : > { %13859 = vst [vmem:[#allocation57_spill] sm:$0xff] %v11872_v60  ;;  %v11877_v4 = vadd.f32 %v4586_v21, %v4433_v58  ;;  %v11926_v21 = vld [vmem:[#allocation2 + $0x28] sm:$0x3] }
 0x4ca   : > { %v4588_v41 = vpop.permute.xlu1 %4587  ;;  %13870 = vst [vmem:[#allocation193_spill] sm:$0xff] %v11926_v21 }
 0x4cb   : > { %v4594_v57 = vadd.f32 %v4588_v41, %v11767_v27  ;;  %13860 = vst [vmem:[#allocation23_spill] sm:$0xff] %v11877_v4  ;;  %v11888_v27 = vstv %s6313_s5  ;;  %v5496_v4 = vstv %s6370_s14  ;;  %s11979_s5 = sld [smem:[#allocation8 + $0x4]] }
 0x4cc   : > { %13861 = vst [vmem:[#allocation170_spill] sm:$0xff] %v11888_v27  ;;  %v4642_v52 = vmul.f32 %v11888_v27, %v11497_v63  ;;  %s12058_s14 = sld [smem:[#allocation7 + $0xee]] }
 0x4cd   : > { %5017 = vrot.lane.b32.xlu2 %v5011_v47, %s6703_s20  ;;  %v5429_v47 = vstv %s6362_s12  ;;  %s12037_s12 = sld [smem:[#allocation7 + $0xed]] }
 0x4ce   : > { %5019 = vrot.lane.b32.xlu0 %v5012_v62, %s6703_s20  ;;  %v11896_v18 = vadd.f32 %v4642_v52, %v4554_v42  ;;  %v11910_v42 = vstv %s6314_s9  ;;  %v11934_v62 = vstv %s6315_s13  ;;  %v5432_v52 = vmul.f32 %v5429_v47, %v11926_v21  ;;  %s12020_s9 = sld [smem:[#allocation7 + $0x16]] }
 0x4cf   : > { %13866 = vst [vmem:[#allocation125_spill] sm:$0xff] %v11910_v42  ;;  %v4650_v11 = vmul.f32 %v11910_v42, %v11497_v63  ;;  %v4658_v3 = vmul.f32 %v11934_v62, %v11497_v63  ;;  %v5431_v42 = vmul.f32 %v11407_v29, %v5429_v47  ;;  %s12051_s13 = sld [smem:[#allocation7 + $0xa6]] }
 0x4d0   : > { %5021 = vrot.lane.b32.xlu1 %v5013_v9, %s6703_s20  ;;  %v11890_v48 = vpop.permute.xlu2 %4730  ;;  %v11894_v59 = vpop.permute.xlu0 %4672  ;;  %13863 = vst [vmem:[#allocation70_spill] sm:$0xff] %v11896_v18  ;;  %v5362_v9 = vstv %s6354_s10  ;;  %s12027_s10 = sld [smem:[#allocation7 + $0x5e]] }
 0x4d1   : > { %13862 = vst [vmem:[#allocation182_spill] sm:$0xff] %v11890_v48  ;;  %v11920_v58 = vadd.f32 %v4650_v11, %v4574_v14  ;;  %v5365_v14 = vmul.f32 %v5362_v9, %v11928_v49  ;;  %v11952_v11 = vadd.f32 %v4658_v3, %v4594_v57  ;;  %v5364_v13 = vmul.f32 %v11650_v38, %v5362_v9 }
 0x4d2   : > { %v4675_v23 = vpop.permute.xlu1 %4674  ;;  %13872 = vst [vmem:[#allocation194_spill] sm:$0xff] %v11934_v62  ;;  %v11969_v57 = vstv %s6324_s22  ;;  %v12054_v39 = vstv %s11979_s5  ;;  %s12139_s22 = sld [smem:[#allocation8 + $0x6]]  ;;  %s6724_s5 = smov 66  }
 0x4d3   : > { %13868 = vst [vmem:[#allocation177_spill] sm:$0xff] %v11920_v58  ;;  %v5435_v63 = vadd.f32 %v5432_v52, %v5365_v14  ;;  %v11977_v14 = vld [vmem:[#allocation2 + $0x50] sm:$0xff]  ;;  %v5434_v52 = vadd.f32 %v5431_v42, %v5364_v13  ;;  %v4829_v10 = vmul.f32 %v11969_v57, %v11703_v36 }
 0x4d4   : > { %13875 = vst [vmem:[#allocation87_spill] sm:$0xff] %v11952_v11  ;;  %v11989_v11 = vstv %s11930_s24  ;;  %v11992_v13 = vld [vmem:[#allocation2 + $0x30] sm:$0xff]  ;;  %s12100_s24 = sld [smem:[#allocation7 + $0xf6]] }
 0x4d5   : > { %5037 = vrot.lane.b32.xlu2 %v5031_v37, %s6703_s20  ;;  %13879 = vst [vmem:[#allocation88_spill] sm:$0xff] %v11977_v14  ;;  %v5497_v58 = vmul.f32 %v5496_v4, %v11992_v13  ;;  %v5505_v45 = vmul.f32 %v5504_v54, %v11992_v13 }
 0x4d6   : > { %5039 = vrot.lane.b32.xlu0 %v5032_v40, %s6703_s20  ;;  %13880 = vst [vmem:[#allocation86_spill] sm:$0xff] %v11992_v13  ;;  %v12112_v13 = vstv %s12058_s14  ;;  %s12461_s14 = sld [smem:[#allocation7 + $0xf7]] }
 0x4d7   : > { %13888 = vst [vmem:[#allocation139_spill] sm:$0xff] %v12054_v39 }
 0x4d8   : > { %5041 = vrot.lane.b32.xlu1 %v5033_v51, %s6703_s20  ;;  %v11906_v8 = vpop.permute.xlu2 %4750  ;;  %v11908_v35 = vpop.permute.xlu0 %4692  ;;  %s6378_s20 = sld [smem:[#allocation7 + $0xdc]]  ;;  %v11944_v51 = vld [vmem:[#allocation2 + $0x40] sm:$0x3]  ;;  %13893 = vst [vmem:[#allocation38_spill] sm:$0xff] %v12112_v13 }
 0x4d9   : > { %13864 = vst [vmem:[#allocation123_spill] sm:$0xff] %v11906_v8  ;;  %v5499_v62 = vmul.f32 %v5496_v4, %v11944_v51  ;;  %v12015_v8 = vstv %s11954_s28  ;;  %s12316_s28 = sld [smem:[#allocation7 + $0x11a]] }
 0x4da   : > { %v11904_v46 = vpop.permute.xlu1 %4694  ;;  %13865 = vst [vmem:[#allocation124_spill] sm:$0xff] %v11908_v35  ;;  %v5571_v35 = vstv %s11986_s7  ;;  %s6725_s7 = smov 83  }
 0x4db   : > { %13873 = vst [vmem:[#allocation127_spill] sm:$0xff] %v11944_v51  ;;  %v5502_v29 = vadd.f32 %v5499_v62, %v5435_v63 }
 0x4de   : > { %v5563_v19 = vstv %s6378_s20  ;;  %s12068_s20 = sld [smem:[#allocation8 + $0x5]] }
 0x4df   : > { %v5566_v3 = vmul.f32 %v5563_v19, %v11956_v44  ;;  %v5565_v62 = vmul.f32 %v5563_v19, %v11977_v14 }
 0x4e0   : > { %v11918_v41 = vpop.permute.xlu2 %4770  ;;  %v11922_v26 = vpop.permute.xlu0 %4712 }
 0x4e1   : > { %13867 = vst [vmem:[#allocation176_spill] sm:$0xff] %v11918_v41  ;;  %v4681_v41 = vadd.f32 %v4675_v23, %v11797_v43  ;;  %v5363_v43 = vmul.f32 %v11558_v7, %v5362_v9  ;;  %v5430_v23 = vmul.f32 %v11419_v20, %v5429_v47  ;;  %v5569_v27 = vadd.f32 %v5566_v3, %v5502_v29 }
 0x4e2   : > { %v11916_v34 = vpop.permute.xlu1 %4714  ;;  %13869 = vst [vmem:[#allocation71_spill] sm:$0xff] %v11922_v26  ;;  %v12002_v9 = vstv %s11932_s23  ;;  %v12005_v20 = vstv %s11940_s26  ;;  %v12012_v29 = vstv %s11946_s27  ;;  %v5370_v26 = vstv %s11914_s15  ;;  %s12062_s15 = sld [smem:[#allocation9 + $0x4]]  ;;  %s6721_s27 = smov 15  }
 0x4e3   : > { %v12007_v47 = vadd.f32 %v4829_v10, %v4681_v41  ;;  %v5437_v10 = vstv %s11924_s21  ;;  %v12030_v41 = vstv %s11971_s30  ;;  %s12078_s21 = sld [smem:[#allocation9 + $0x5]]  ;;  %s6723_s30 = smov 49  }
 0x4e4   : > { %13886 = vst [vmem:[#allocation89_spill] sm:$0xff] %v12030_v41  ;;  %v5438_v0 = vmul.f32 %v12048_v15, %v5437_v10  ;;  %s12158_s23 = sld [smem:[#allocation7 + $0xff]] }
 0x4e5   : > { %13882 = vst [vmem:[#allocation145_spill] sm:$0xff] %v12007_v47  ;;  %s12288_s26 = sld [smem:[#allocation7 + $0x111]] }
 0x4e8   : > { %v11950_v40 = vpop.permute.xlu2 %4790  ;;  %v11958_v31 = vpop.permute.xlu0 %4732 }
 0x4e9   : > { %13874 = vst [vmem:[#allocation65_spill] sm:$0xff] %v11950_v40  ;;  %v11965_v40 = vld [vmem:[#allocation2 + $0x38] sm:$0xff] }
 0x4ea   : > { %v11948_v37 = vpop.permute.xlu1 %4734  ;;  %13877 = vst [vmem:[#allocation143_spill] sm:$0xff] %v11958_v31  ;;  %v5498_v30 = vmul.f32 %v5496_v4, %v11965_v40  ;;  %v11999_v31 = vstv %s11936_s25  ;;  %v5440_v4 = vmul.f32 %v5437_v10, %v11926_v21  ;;  %v5506_v39 = vmul.f32 %v5504_v54, %v11965_v40  ;;  %s12199_s25 = sld [smem:[#allocation7 + $0x108]] }
 0x4eb   : > { %13878 = vst [vmem:[#allocation138_spill] sm:$0xff] %v11965_v40 }
 0x4ec   : > { %v5501_v32 = vadd.f32 %v5498_v30, %v5434_v52  ;;  %v5373_v30 = vmul.f32 %v5370_v26, %v11928_v49  ;;  %v12035_v52 = vstv %s11975_s18  ;;  %s12376_s18 = sld [smem:[#allocation8 + $0x7]] }
 0x4ee   : > { %v5568_v48 = vadd.f32 %v5565_v62, %v5501_v32  ;;  %v5564_v32 = vmul.f32 %v5563_v19, %v12023_v17  ;;  %v5371_v62 = vmul.f32 %v11558_v7, %v5370_v26 }
 0x4f0   : > { %v11996_v63 = vpop.permute.xlu2 %4810  ;;  %v12009_v3 = vpop.permute.xlu0 %4752 }
 0x4f1   : > { %13881 = vst [vmem:[#allocation21_spill] sm:$0xff] %v11996_v63  ;;  %v5433_v63 = vadd.f32 %v5430_v23, %v5363_v43  ;;  %v5372_v43 = vmul.f32 %v11650_v38, %v5370_v26  ;;  %v12041_v23 = vld [vmem:[#allocation2 + $0x20] sm:$0xff] }
 0x4f2   : > { %v11994_v42 = vpop.permute.xlu1 %4754  ;;  %13883 = vst [vmem:[#allocation146_spill] sm:$0xff] %v12009_v3  ;;  %v5630_v3 = vadd.f32 %v5569_v27, %v11989_v11  ;;  %v5439_v41 = vmul.f32 %v12041_v23, %v5437_v10  ;;  %v4701_v27 = vadd.f32 %v11904_v46, %v11824_v56  ;;  %v4837_v56 = vmul.f32 %v12035_v52, %v11703_v36 }
 0x4f3   : > { %13887 = vst [vmem:[#allocation157_spill] sm:$0xff] %v12041_v23  ;;  %v5500_v18 = vadd.f32 %v5497_v58, %v5433_v63  ;;  %v5629_v46 = vadd.f32 %v5568_v48, %v11989_v11  ;;  %v5443_v58 = vadd.f32 %v5440_v4, %v5373_v30  ;;  %v5507_v63 = vmul.f32 %v5504_v54, %v11944_v51 }
 0x4f4   : > { %vm5633_vm0 = vcmp.gt.f32.partialorder %v5630_v3, 0.0  ;;  %v5638_v19 = vmul.f32 %v5630_v3, %v11999_v31  ;;  %v5442_v10 = vadd.f32 %v5439_v41, %v5372_v43  ;;  %v12076_v47 = vadd.f32 %v4837_v56, %v4701_v27 }
 0x4f5   : > { %v5567_v48 = vadd.f32 %v5564_v32, %v5500_v18  ;;  %v5574_v30 = vmul.f32 %v5571_v35, %v11956_v44  ;;  %v5573_v4 = vmul.f32 %v5571_v35, %v11977_v14  ;;  %v12084_v41 = vstv %s12020_s9  ;;  %s12431_s9 = sld [smem:[#allocation7 + $0x1f]] }
 0x4f6   : > { %v12087_v43 = vstv %s12027_s10  ;;  %v5572_v27 = vmul.f32 %v5571_v35, %v12023_v17  ;;  %v12098_v18 = vstv %s12037_s12  ;;  %vm5632_vm1 = vcmp.gt.f32.partialorder %v5629_v46, 0.0  ;;  %s12437_s10 = sld [smem:[#allocation7 + $0x67]] }
 0x4f7   : > { %v5448_v54 = vmul.f32 %v12087_v43, %v11926_v21  ;;  %v5510_v32 = vadd.f32 %v5507_v63, %v5443_v58  ;;  %v5637_v56 = vmul.f32 %v5629_v46, %v11999_v31  ;;  %v12106_v35 = vadd.f32 %v5567_v48, %v11989_v11  ;;  %s12444_s12 = sld [smem:[#allocation7 + $0xaf]] }
 0x4f8   : > { %v12072_v60 = vpop.permute.xlu0 %4772  ;;  %v12074_v50 = vpop.permute.xlu2 %4897  ;;  %v12109_v17 = vstv %s12051_s13  ;;  %v5447_v48 = vmul.f32 %v12041_v23, %v12087_v43  ;;  %s12451_s13 = sld [smem:[#allocation9 + $0x7]] }
 0x4f9   : > { %13890 = vst [vmem:[#allocation40_spill] sm:$0xff] %v12072_v60  ;;  %v12090_v60 = vsel %vm5633_vm0, %v5630_v3, %v5638_v19  ;;  %v4721_v3 = vadd.f32 %v11916_v34, %v11836_v61  ;;  %v5515_v61 = vmul.f32 %v12109_v17, %v11944_v51  ;;  %v4600_v34 = vmul.f32 %v11504_v28, %v11784_v16 }
 0x4fa   : > { %v12066_v26 = vpop.permute.xlu1 %4774  ;;  %13891 = vst [vmem:[#allocation66_spill] sm:$0xff] %v12090_v60  ;;  %v5582_v28 = vmul.f32 %v12112_v13, %v11956_v44  ;;  %vm5631_vm2 = vcmp.gt.f32.partialorder %v12106_v35, 0.0  ;;  %v12156_v51 = vstv %s12100_s24  ;;  %s12490_s24 = sld [smem:[#allocation7 + $0x70]] }
 0x4fb   : > { %13889 = vst [vmem:[#allocation67_spill] sm:$0xff] %v12066_v26  ;;  %v5441_v26 = vadd.f32 %v5438_v0, %v5371_v62  ;;  %v5381_v0 = vmul.f32 %v12084_v41, %v11928_v49  ;;  %v5509_v62 = vadd.f32 %v5506_v39, %v5442_v10  ;;  %v5577_v49 = vadd.f32 %v5574_v30, %v5510_v32 }
 0x4fc   : > { %13892 = vst [vmem:[#allocation44_spill] sm:$0xff] %v12109_v17  ;;  %v4845_v39 = vmul.f32 %v12098_v18, %v11703_v36  ;;  %v5380_v10 = vmul.f32 %v11650_v38, %v12084_v41  ;;  %v12146_v32 = vsel %vm5632_vm1, %v5629_v46, %v5637_v56  ;;  %v5514_v46 = vmul.f32 %v12109_v17, %v11965_v40 }
 0x4fd   : > { %v5508_v19 = vadd.f32 %v5505_v45, %v5441_v26  ;;  %v5576_v21 = vadd.f32 %v5573_v4, %v5509_v62  ;;  %v5451_v63 = vadd.f32 %v5448_v54, %v5381_v0  ;;  %v12123_v26 = vstv %s12062_s15  ;;  %13896 = vst [vmem:[#allocation155_spill] sm:$0xff] %v12146_v32  ;;  %s6726_s15 = smov 100  }
 0x4fe   : > { %v12131_v4 = vadd.f32 %v4845_v39, %v4721_v3  ;;  %v12137_v0 = vstv %s12078_s21  ;;  %v4603_v54 = vadd.f32 %v4600_v34, %v11592_v55  ;;  %v5668_v62 = vadd.f32 %v5577_v49, %v12002_v9  ;;  %s6727_s21 = smov 117  }
 0x4ff   : > { %v5575_v58 = vadd.f32 %v5572_v27, %v5508_v19  ;;  %v12134_v27 = vstv %s12068_s20  ;;  %13895 = vst [vmem:[#allocation36_spill] sm:$0xff] %v12137_v0  ;;  %v5667_v19 = vadd.f32 %v5576_v21, %v12002_v9  ;;  %v5518_v23 = vadd.f32 %v5515_v61, %v5451_v63  ;;  %s12484_s20 = sld [smem:[#allocation7 + $0x28]] }
 0x500   : > { %v12129_v30 = vpop.permute.xlu0 %4792  ;;  %v12149_v3 = vpop.permute.xlu2 %4917  ;;  %v4679_v44 = vadd.f32 %v11826_v12, %v4603_v54  ;;  %v5450_v55 = vadd.f32 %v5447_v48, %v5380_v10  ;;  %v4741_v49 = vadd.f32 %v11948_v37, %v11859_v1  ;;  %v5636_v21 = vmul.f32 %v12106_v35, %v11999_v31  ;;  %v12176_v10 = vld [vmem:[#allocation2 + $0x30] sm:$0xff]  ;;  %v12180_v48 = vld [vmem:[#allocation2 + $0x38] sm:$0xff] }
 0x501   : > { %13894 = vst [vmem:[#allocation47_spill] sm:$0xff] %v12129_v30  ;;  %v5666_v39 = vadd.f32 %v5575_v58, %v12002_v9  ;;  %v5585_v58 = vadd.f32 %v5582_v28, %v5518_v23  ;;  %v4827_v12 = vmul.f32 %v11719_v22, %v11969_v57  ;;  %vm5671_vm4 = vcmp.gt.f32.partialorder %v5668_v62, 0.0 }
 0x502   : > { %v12120_v45 = vpop.permute.xlu1 %4794  ;;  %v5676_v63 = vmul.f32 %v5668_v62, %v12005_v20  ;;  %v5581_v61 = vmul.f32 %v12112_v13, %v11977_v14  ;;  %v4853_v34 = vmul.f32 %v12156_v51, %v11703_v36  ;;  %vm5670_vm5 = vcmp.gt.f32.partialorder %v5667_v19, 0.0 }
 0x503   : > { %v5675_v1 = vmul.f32 %v5667_v19, %v12005_v20  ;;  %v5674_v37 = vmul.f32 %v5666_v39, %v12005_v20  ;;  %v4608_v23 = vmul.f32 %v12176_v10, %v11811_v53  ;;  %v4601_v28 = vmul.f32 %v12180_v48, %v11784_v16 }
 0x504   : > { %v4830_v54 = vadd.f32 %v4827_v12, %v4679_v44  ;;  %v5517_v38 = vadd.f32 %v5514_v46, %v5450_v55  ;;  %v12188_v40 = vadd.f32 %v4853_v34, %v4741_v49  ;;  %v12191_v13 = vstv %s12139_s22  ;;  %s12503_s22 = sld [smem:[#allocation7 + $0xb8]] }
 0x505   : > { %vm5669_vm6 = vcmp.gt.f32.partialorder %v5666_v39, 0.0  ;;  %v12194_v30 = vadd.f32 %v5585_v58, %v12012_v29  ;;  %v4611_v0 = vadd.f32 %v4608_v23, %v11620_v6  ;;  %v4604_v17 = vadd.f32 %v4601_v28, %v11682_v33  ;;  %v13901_v28 = vld [vmem:[#allocation145_spill] sm:$0xff] }
 0x506   : > { %v4906_v16 = vadd.f32 %v12074_v50, %v4830_v54  ;;  %v5584_v44 = vadd.f32 %v5581_v61, %v5517_v38  ;;  %v13897_v55 = vrot.slane %v12090_v60, 1  ;;  %v13898_v46 = vrot.slane %v12146_v32, 1 }
 0x507   : > { %v12211_v58 = vsel %vm5631_vm2, %v12106_v35, %v5636_v21  ;;  %v12214_v6 = vsel %vm5671_vm4, %v5668_v62, %v5676_v63  ;;  %v12217_v33 = vsel %vm5670_vm5, %v5667_v19, %v5675_v1  ;;  %v4699_v50 = vadd.f32 %v11849_v25, %v4611_v0  ;;  %v13900_v1 = vld [vmem:[#allocation68_spill] sm:$0xff] }
 0x508   : > { %v12186_v14 = vpop.permute.xlu0 %4812  ;;  %v12206_v49 = vsel %vm2665_vm7, %v13898_v46, %v13897_v55  ;;  %v4680_v38 = vadd.f32 %v11894_v59, %v4604_v17  ;;  %v12222_v12 = vstv %s12158_s23  ;;  %v12224_v61 = vsel %vm5669_vm6, %v5666_v39, %v5674_v37  ;;  %v4938_v23 = vpop.permute.xlu2 %4937  ;;  %v13902_v46 = vld [vmem:[#allocation174_spill] sm:$0xff]  ;;  %s12510_s23 = sld [smem:[#allocation7 + $0x100]] }
 0x509   : > { %13899 = vst [vmem:[#allocation31_spill] sm:$0xff] %v12206_v49  ;;  %v4761_v34 = vadd.f32 %v11994_v42, %v11880_v24  ;;  %v12230_v35 = vmul.f32 %v12194_v30, %v12015_v8  ;;  %v12234_v62 = vmul.f32 %v11558_v7, %v12084_v41  ;;  %v12238_v25 = vmul.f32 %v12048_v15, %v12087_v43 }
 0x50a   : > { %v12184_v56 = vpop.permute.xlu1 %4814  ;;  %v5051_v17 = vadd.f32 %v11989_v11, %v4906_v16  ;;  %v4835_v59 = vmul.f32 %v11719_v22, %v12035_v52  ;;  %v4828_v24 = vmul.f32 %v11724_v5, %v11969_v57  ;;  %v12246_v42 = vadd.f32 %v5584_v44, %v12012_v29 }
 0x50b   : > { %v4616_v0 = vmul.f32 %v12176_v10, %v11821_v2  ;;  %v4843_v7 = vmul.f32 %v11719_v22, %v12098_v18  ;;  %v12254_v41 = vmul.f32 %v11719_v22, %v12156_v51  ;;  %v4861_v43 = vmul.f32 %v12222_v12, %v11703_v36 }
 0x50c   : > { %v4609_v19 = vmul.f32 %v12180_v48, %v11811_v53  ;;  %v4838_v57 = vadd.f32 %v4835_v59, %v4699_v50  ;;  %v4831_v21 = vadd.f32 %v4828_v24, %v4680_v38  ;;  %v4836_v63 = vmul.f32 %v11724_v5, %v12035_v52 }
 0x50d   : > { %v4619_v37 = vadd.f32 %v4616_v0, %v13900_v1  ;;  %v12266_v44 = vmul.f32 %v11719_v22, %v12222_v12  ;;  %v12268_v55 = vadd.f32 %v4861_v43, %v4761_v34  ;;  %v5059_v50 = vmul.f32 %v11999_v31, %v5051_v17  ;;  %v13903_v22 = vld [vmem:[#allocation57_spill] sm:$0xff]  ;;  %v13904_v34 = vld [vmem:[#allocation124_spill] sm:$0xff] }
 0x50e   : > { %v4612_v53 = vadd.f32 %v4609_v19, %v13902_v46  ;;  %v4926_v38 = vadd.f32 %v12149_v3, %v4838_v57  ;;  %vm5054_vm8 = vcmp.gt.f32.partialorder %v5051_v17, 0.0  ;;  %v12276_v24 = vmul.f32 %v11724_v5, %v12098_v18  ;;  %v13905_v3 = vld [vmem:[#allocation98_spill] sm:$0xff]  ;;  %v13907_v18 = vld [vmem:[#allocation67_spill] sm:$0xff]  ;;  %v13908_v46 = vld [vmem:[#allocation129_spill] sm:$0xff] }
 0x50f   : > { %v12279_v0 = vstv %s12199_s25  ;;  %v12286_v1 = vmul.f32 %v11724_v5, %v12156_v51  ;;  %v4624_v57 = vmul.f32 %v12176_v10, %v13905_v3  ;;  %v4617_v51 = vmul.f32 %v12180_v48, %v11821_v2  ;;  %s6728_s25 = smov 6  }
 0x510   : > { %v4900_v16 = vpop.permute.xlu0 %4899  ;;  %v4700_v43 = vadd.f32 %v13904_v34, %v4612_v53 }
 0x511   : > { %v4907_v59 = vadd.f32 %v4900_v16, %v4831_v21  ;;  %v13906_v21 = vld [vmem:[#allocation70_spill] sm:$0xff]  ;;  %v5089_v16 = vadd.f32 %v12002_v9, %v4926_v38  ;;  %v4627_v5 = vadd.f32 %v4624_v57, %v13908_v46 }
 0x512   : > { %v4902_v39 = vpop.permute.xlu1 %4901 }
 0x513   : > { %v4908_v54 = vadd.f32 %v4902_v39, %v13901_v28  ;;  %v4719_v39 = vadd.f32 %v13903_v22, %v4619_v37  ;;  %v5052_v19 = vadd.f32 %v11989_v11, %v4907_v59  ;;  %v4781_v28 = vadd.f32 %v13907_v18, %v13906_v21  ;;  %v4958_v59 = vpop.permute.xlu2 %4957 }
 0x514   : > { %v5062_v37 = vsel %vm5054_vm8, %v5051_v17, %v5059_v50  ;;  %v4869_v22 = vmul.f32 %v12279_v0, %v11703_v36  ;;  %v4839_v17 = vadd.f32 %v4836_v63, %v4700_v43  ;;  %v13909_v50 = vld [vmem:[#allocation100_spill] sm:$0xff]  ;;  %v5097_v2 = vmul.f32 %v12005_v20, %v5089_v16  ;;  %v13910_v43 = vld [vmem:[#allocation182_spill] sm:$0xff] }
 0x515   : > { %v5053_v52 = vadd.f32 %v11989_v11, %v4908_v54  ;;  %vm5055_vm9 = vcmp.gt.f32.partialorder %v5052_v19, 0.0  ;;  %v5060_v11 = vmul.f32 %v11999_v31, %v5052_v19  ;;  %v4846_v34 = vadd.f32 %v4843_v7, %v4719_v39 }
 0x516   : > { %v4620_v38 = vadd.f32 %v4617_v51, %v13909_v50  ;;  %v5068_v60 = vrot.slane %v5062_v37, 1  ;;  %v12305_v46 = vadd.f32 %v4869_v22, %v4781_v28  ;;  %vm5092_vm10 = vcmp.gt.f32.partialorder %v5089_v16, 0.0  ;;  %v13912_v28 = vld [vmem:[#allocation62_spill] sm:$0xff]  ;;  %v13913_v51 = vld [vmem:[#allocation177_spill] sm:$0xff]  ;;  %v13914_v22 = vld [vmem:[#allocation160_spill] sm:$0xff] }
 0x517   : > { %vm5056_vm3 = vcmp.gt.f32.partialorder %v5053_v52, 0.0  ;;  %v5061_v54 = vmul.f32 %v11999_v31, %v5053_v52  ;;  %v5063_v18 = vsel %vm5055_vm9, %v5052_v19, %v5060_v11  ;;  %v4739_v19 = vadd.f32 %v13910_v43, %v4627_v5 }
 0x518   : > { %v5069_v32 = vrot.slane %v5063_v18, 1  ;;  %v4920_v57 = vpop.permute.xlu0 %4919  ;;  %v4632_v11 = vmul.f32 %v12176_v10, %v13912_v28 }
 0x519   : > { %v5064_v53 = vsel %vm5056_vm3, %v5053_v52, %v5061_v54  ;;  %v4946_v52 = vadd.f32 %v4938_v23, %v4846_v34  ;;  %v4927_v54 = vadd.f32 %v4920_v57, %v4839_v17  ;;  %v12314_v23 = vstv %s12288_s26  ;;  %s12527_s26 = sld [smem:[#allocation7 + $0x31]] }
 0x51a   : > { %v5071_v21 = vrot.slane %v5064_v53, 1  ;;  %v4922_v49 = vpop.permute.xlu1 %4921  ;;  %v5070_v39 = vsel %vm2665_vm7, %v5068_v60, %v5069_v32  ;;  %v4801_v53 = vadd.f32 %v12120_v45, %v13913_v51  ;;  %v4635_v34 = vadd.f32 %v4632_v11, %v13914_v22 }
 0x51b   : > { %v4928_v31 = vadd.f32 %v4922_v49, %v12076_v47  ;;  %v13911_v47 = vld [vmem:[#allocation71_spill] sm:$0xff]  ;;  %v5090_v37 = vadd.f32 %v12002_v9, %v4927_v54  ;;  %5073 = vrot.lane.b32.xlu2 %v5070_v39, %s6721_s27  ;;  %v5127_v5 = vadd.f32 %v12012_v29, %v4946_v52  ;;  %v4877_v17 = vmul.f32 %v12314_v23, %v11703_v36  ;;  %v4978_v52 = vpop.permute.xlu2 %4977 }
 0x51c   : > { %5077 = vrot.lane.b32.xlu1 %v5071_v21, %s6721_s27  ;;  %v5072_v63 = vsel %vm2665_vm7, %v5069_v32, %v5071_v21  ;;  %v4720_v49 = vadd.f32 %v13911_v47, %v4620_v38  ;;  %v5100_v32 = vsel %vm5092_vm10, %v5089_v16, %v5097_v2  ;;  %v4625_v21 = vmul.f32 %v12180_v48, %v13905_v3  ;;  %v13915_v3 = vld [vmem:[#allocation119_spill] sm:$0xff] }
 0x51d   : > { %v5091_v7 = vadd.f32 %v12002_v9, %v4928_v31  ;;  %5075 = vrot.lane.b32.xlu0 %v5072_v63, %s6721_s27  ;;  %vm5093_vm12 = vcmp.gt.f32.partialorder %v5090_v37, 0.0  ;;  %v5098_v9 = vmul.f32 %v12005_v20, %v5090_v37  ;;  %v4854_v45 = vadd.f32 %v12254_v41, %v4739_v19  ;;  %s12543_s27 = sld [smem:[#allocation7 + $0x79]] }
 0x51e   : > { %v4847_v16 = vadd.f32 %v12276_v24, %v4720_v49  ;;  %v5106_v57 = vrot.slane %v5100_v32, 1  ;;  %v12333_v63 = vadd.f32 %v4877_v17, %v4801_v53  ;;  %v5135_v39 = vmul.f32 %v12015_v8, %v5127_v5  ;;  %v13918_v53 = vld [vmem:[#allocation170_spill] sm:$0xff]  ;;  %v13919_v32 = vld [vmem:[#allocation87_spill] sm:$0xff] }
 0x51f   : > { %vm5094_vm11 = vcmp.gt.f32.partialorder %v5091_v7, 0.0  ;;  %v5099_v60 = vmul.f32 %v12005_v20, %v5091_v7  ;;  %v5101_v38 = vsel %vm5093_vm12, %v5090_v37, %v5098_v9  ;;  %v4966_v43 = vadd.f32 %v4958_v59, %v4854_v45  ;;  %v13917_v37 = vld [vmem:[#allocation143_spill] sm:$0xff] }
 0x520   : > { %v5107_v2 = vrot.slane %v5101_v38, 1  ;;  %v4940_v54 = vpop.permute.xlu0 %4939  ;;  %vm5130_vm13 = vcmp.gt.f32.partialorder %v5127_v5, 0.0  ;;  %v12346_v59 = vstv %s12316_s28  ;;  %v4821_v9 = vadd.f32 %v12184_v56, %v13919_v32  ;;  %v13921_v45 = vld [vmem:[#allocation171_spill] sm:$0xff]  ;;  %s12557_s28 = sld [smem:[#allocation7 + $0xc1]] }
 0x521   : > { %v5102_v18 = vsel %vm5094_vm11, %v5091_v7, %v5099_v60  ;;  %v4628_v7 = vadd.f32 %v4625_v21, %v13915_v3  ;;  %v4947_v41 = vadd.f32 %v4940_v54, %v4847_v16  ;;  %v4640_v60 = vmul.f32 %v12176_v10, %v13918_v53  ;;  %v13920_v21 = vld [vmem:[#allocation90_spill] sm:$0xff] }
 0x522   : > { %v5109_v50 = vrot.slane %v5102_v18, 1  ;;  %v4942_v31 = vpop.permute.xlu1 %4941  ;;  %v5108_v47 = vsel %vm2665_vm7, %v5106_v57, %v5107_v2  ;;  %v5165_v18 = vadd.f32 %v13920_v21, %v4966_v43  ;;  %v4633_v38 = vmul.f32 %v12180_v48, %v13912_v28  ;;  %v13922_v28 = vld [vmem:[#allocation122_spill] sm:$0xff] }
 0x523   : > { %v4948_v20 = vadd.f32 %v4942_v31, %v12131_v4  ;;  %v13916_v4 = vld [vmem:[#allocation123_spill] sm:$0xff]  ;;  %v4740_v11 = vadd.f32 %v13917_v37, %v4628_v7  ;;  %v5128_v51 = vadd.f32 %v12012_v29, %v4947_v41  ;;  %5111 = vrot.lane.b32.xlu2 %v5108_v47, %s6722_s29  ;;  %v4885_v16 = vmul.f32 %v12346_v59, %v11703_v36 }
 0x524   : > { %5115 = vrot.lane.b32.xlu1 %v5109_v50, %s6722_s29  ;;  %v5110_v19 = vsel %vm2665_vm7, %v5107_v2, %v5109_v50  ;;  %v4759_v49 = vadd.f32 %v13916_v4, %v4635_v34  ;;  %v5138_v34 = vsel %vm5130_vm13, %v5127_v5, %v5135_v39  ;;  %v4643_v50 = vadd.f32 %v4640_v60, %v13921_v45 }
 0x525   : > { %v5129_v24 = vadd.f32 %v12012_v29, %v4948_v20  ;;  %5113 = vrot.lane.b32.xlu0 %v5110_v19, %s6722_s29  ;;  %vm5131_vm15 = vcmp.gt.f32.partialorder %v5128_v51, 0.0  ;;  %v5136_v17 = vmul.f32 %v12015_v8, %v5128_v51  ;;  %v4855_v5 = vadd.f32 %v12286_v1, %v4740_v11  ;;  %v13925_v11 = vld [vmem:[#allocation146_spill] sm:$0xff]  ;;  %s12569_s29 = sld [smem:[#allocation7 + $0x109]] }
 0x526   : > { %v4862_v56 = vadd.f32 %v12266_v44, %v4759_v49  ;;  %v5144_v54 = vrot.slane %v5138_v34, 1  ;;  %v12363_v43 = vadd.f32 %v4885_v16, %v4821_v9  ;;  %v4636_v41 = vadd.f32 %v4633_v38, %v13922_v28  ;;  %v4998_v44 = vpop.permute.xlu2 %4997  ;;  %v13924_v49 = vld [vmem:[#allocation176_spill] sm:$0xff]  ;;  %v12383_v34 = vld [vmem:[#allocation2 + $0x50] sm:$0xff] }
 0x527   : > { %vm5132_vm14 = vcmp.gt.f32.partialorder %v5129_v24, 0.0  ;;  %v5137_v22 = vmul.f32 %v12015_v8, %v5129_v24  ;;  %v5139_v2 = vsel %vm5131_vm15, %v5128_v51, %v5136_v17  ;;  %vm5168_vm0 = vcmp.gt.f32.partialorder %v5165_v18, 0.0  ;;  %v13927_v16 = vld [vmem:[#allocation125_spill] sm:$0xff] }
 0x528   : > { %v5145_v3 = vrot.slane %v5139_v2, 1  ;;  %v4960_v39 = vpop.permute.xlu0 %4959  ;;  %v4986_v36 = vadd.f32 %v4978_v52, %v4862_v56  ;;  %v4779_v37 = vadd.f32 %v13924_v49, %v4643_v50  ;;  %v4760_v51 = vadd.f32 %v13925_v11, %v4636_v41  ;;  %v12378_v52 = vld [vmem:[#allocation2 + $0x48] sm:$0xff]  ;;  %v13926_v50 = vld [vmem:[#allocation139_spill] sm:$0xff] }
 0x529   : > { %v5140_v31 = vsel %vm5132_vm14, %v5129_v24, %v5137_v22  ;;  %v13923_v24 = vld [vmem:[#allocation89_spill] sm:$0xff]  ;;  %v4967_v47 = vadd.f32 %v4960_v39, %v4855_v5  ;;  %v12374_v32 = vstv %s12343_s19  ;;  %v4867_v9 = vmul.f32 %v12378_v52, %v12279_v0  ;;  %s6729_s19 = smov 23  }
 0x52a   : > { %v5147_v57 = vrot.slane %v5140_v31, 1  ;;  %v4962_v20 = vpop.permute.xlu1 %4961  ;;  %v5173_v19 = vmul.f32 %v13923_v24, %v5165_v18  ;;  %v4860_v17 = vmul.f32 %v12383_v34, %v12222_v12  ;;  %v5203_v38 = vadd.f32 %v13926_v50, %v4986_v36 }
 0x52b   : > { %v4968_v7 = vadd.f32 %v4962_v20, %v12188_v40  ;;  %v5146_v40 = vsel %vm2665_vm7, %v5144_v54, %v5145_v3  ;;  %v5166_v60 = vadd.f32 %v13920_v21, %v4967_v47  ;;  %v4648_v56 = vmul.f32 %v12176_v10, %v13927_v16  ;;  %v13929_v47 = vld [vmem:[#allocation120_spill] sm:$0xff] }
 0x52c   : > { %5153 = vrot.lane.b32.xlu1 %v5147_v57, %s6723_s30  ;;  %v5148_v4 = vsel %vm2665_vm7, %v5145_v3, %v5147_v57  ;;  %5149 = vrot.lane.b32.xlu2 %v5146_v40, %s6723_s30  ;;  %v5176_v45 = vsel %vm5168_vm0, %v5165_v18, %v5173_v19  ;;  %v4641_v57 = vmul.f32 %v12180_v48, %v13918_v53  ;;  %vm5206_vm4 = vcmp.gt.f32.partialorder %v5203_v38, 0.0 }
 0x52d   : > { %v5167_v1 = vadd.f32 %v13920_v21, %v4968_v7  ;;  %5151 = vrot.lane.b32.xlu0 %v5148_v4, %s6723_s30  ;;  %vm5169_vm2 = vcmp.gt.f32.partialorder %v5166_v60, 0.0  ;;  %v5174_v31 = vmul.f32 %v13923_v24, %v5166_v60  ;;  %v12396_v20 = vadd.f32 %v12238_v25, %v12234_v62  ;;  %v13928_v7 = vld [vmem:[#allocation15_spill] sm:$0xff]  ;;  %s12606_s30 = sld [smem:[#allocation7 + $0x3a]] }
 0x52e   : > { %v4870_v5 = vadd.f32 %v4867_v9, %v4779_v37  ;;  %v4863_v3 = vadd.f32 %v4860_v17, %v4760_v51  ;;  %v4651_v39 = vadd.f32 %v4648_v56, %v13928_v7  ;;  %v5182_v28 = vrot.slane %v5176_v45, 1  ;;  %v13930_v37 = vld [vmem:[#allocation65_spill] sm:$0xff]  ;;  %v13931_v51 = vld [vmem:[#allocation40_spill] sm:$0xff] }
 0x52f   : > { %vm5170_vm1 = vcmp.gt.f32.partialorder %v5167_v1, 0.0  ;;  %v5175_v22 = vmul.f32 %v13923_v24, %v5167_v1  ;;  %v5177_v54 = vsel %vm5169_vm2, %v5166_v60, %v5174_v31  ;;  %v4644_v53 = vadd.f32 %v4641_v57, %v13929_v47 }
 0x530   : > { %v5183_v41 = vrot.slane %v5177_v54, 1  ;;  %v4980_v36 = vpop.permute.xlu0 %4979  ;;  %v5006_v4 = vadd.f32 %v4998_v44, %v4870_v5  ;;  %v4799_v11 = vadd.f32 %v13930_v37, %v4651_v39  ;;  %v12409_v9 = vstv %s12376_s18  ;;  %s12611_s18 = sld [smem:[#allocation7 + $0x82]] }
 0x531   : > { %v5178_v2 = vsel %vm5170_vm1, %v5167_v1, %v5175_v22  ;;  %v5211_v1 = vmul.f32 %v12123_v26, %v5203_v38  ;;  %v4987_v62 = vadd.f32 %v4980_v36, %v4863_v3  ;;  %v4875_v44 = vmul.f32 %v12378_v52, %v12314_v23  ;;  %v5018_v22 = vpop.permute.xlu2 %5017  ;;  %v13934_v3 = vld [vmem:[#allocation44_spill] sm:$0xff] }
 0x532   : > { %v5185_v12 = vrot.slane %v5178_v2, 1  ;;  %v4982_v18 = vpop.permute.xlu1 %4981  ;;  %v5184_v49 = vsel %vm2665_vm7, %v5182_v28, %v5183_v41  ;;  %v4868_v45 = vmul.f32 %v12383_v34, %v12279_v0  ;;  %v5241_v56 = vadd.f32 %v12134_v27, %v5006_v4  ;;  %v13932_v2 = vld [vmem:[#allocation194_spill] sm:$0xff] }
 0x533   : > { %v4988_v19 = vadd.f32 %v4982_v18, %v12268_v55  ;;  %v4780_v55 = vadd.f32 %v13931_v51, %v4644_v53  ;;  %v5204_v60 = vadd.f32 %v13926_v50, %v4987_v62  ;;  %v5214_v31 = vsel %vm5206_vm4, %v5203_v38, %v5211_v1  ;;  %v13933_v18 = vld [vmem:[#allocation86_spill] sm:$0xff] }
 0x534   : > { %5191 = vrot.lane.b32.xlu1 %v5185_v12, %s6724_s5  ;;  %v5186_v40 = vsel %vm2665_vm7, %v5183_v41, %v5185_v12  ;;  %5187 = vrot.lane.b32.xlu2 %v5184_v49, %s6724_s5  ;;  %v4656_v5 = vmul.f32 %v12176_v10, %v13932_v2  ;;  %v4649_v12 = vmul.f32 %v12180_v48, %v13927_v16  ;;  %v5220_v47 = vrot.slane %v5214_v31, 1  ;;  %v13936_v10 = vld [vmem:[#allocation69_spill] sm:$0xff] }
 0x535   : > { %v5205_v25 = vadd.f32 %v13926_v50, %v4988_v19  ;;  %5189 = vrot.lane.b32.xlu0 %v5186_v40, %s6724_s5  ;;  %vm5207_vm6 = vcmp.gt.f32.partialorder %v5204_v60, 0.0  ;;  %v5212_v57 = vmul.f32 %v12123_v26, %v5204_v60  ;;  %v5513_v7 = vmul.f32 %v13934_v3, %v13933_v18  ;;  %v13935_v19 = vld [vmem:[#allocation178_spill] sm:$0xff]  ;;  %v13937_v40 = vld [vmem:[#allocation36_spill] sm:$0xff]  ;;  %s6730_s5 = smov 40  }
 0x536   : > { %v4878_v39 = vadd.f32 %v4875_v44, %v4799_v11  ;;  %v4871_v38 = vadd.f32 %v4868_v45, %v4780_v55  ;;  %v4659_v36 = vadd.f32 %v4656_v5, %v13935_v19  ;;  %v4652_v62 = vadd.f32 %v4649_v12, %v13936_v10  ;;  %v13938_v55 = vld [vmem:[#allocation21_spill] sm:$0xff] }
 0x537   : > { %vm5208_vm5 = vcmp.gt.f32.partialorder %v5205_v25, 0.0  ;;  %v5213_v17 = vmul.f32 %v12123_v26, %v5205_v25  ;;  %v5215_v41 = vsel %vm5207_vm6, %v5204_v60, %v5212_v57  ;;  %v5249_v16 = vmul.f32 %v13937_v40, %v5241_v56  ;;  %v13939_v60 = vld [vmem:[#allocation47_spill] sm:$0xff] }
 0x538   : > { %v5221_v53 = vrot.slane %v5215_v41, 1  ;;  %v5000_v4 = vpop.permute.xlu0 %4999  ;;  %vm5244_vm8 = vcmp.gt.f32.partialorder %v5241_v56, 0.0  ;;  %v4800_v44 = vadd.f32 %v13939_v60, %v4652_v62  ;;  %v4883_v45 = vmul.f32 %v12378_v52, %v12346_v59 }
 0x539   : > { %v5216_v54 = vsel %vm5208_vm5, %v5205_v25, %v5213_v17  ;;  %v5026_v25 = vadd.f32 %v5018_v22, %v4878_v39  ;;  %v5007_v49 = vadd.f32 %v5000_v4, %v4871_v38  ;;  %v5645_v22 = vrot.slane %v12211_v58, 1  ;;  %v5038_v52 = vpop.permute.xlu2 %5037 }
 0x53a   : > { %v5223_v28 = vrot.slane %v5216_v54, 1  ;;  %v5002_v0 = vpop.permute.xlu1 %5001  ;;  %v5222_v51 = vsel %vm2665_vm7, %v5220_v47, %v5221_v53  ;;  %v4876_v57 = vmul.f32 %v12383_v34, %v12314_v23  ;;  %v5252_v5 = vsel %vm5244_vm8, %v5241_v56, %v5249_v16 }
 0x53b   : > { %v5008_v1 = vadd.f32 %v5002_v0, %v12305_v46  ;;  %v4819_v46 = vadd.f32 %v13938_v55, %v4659_v36  ;;  %v5242_v17 = vadd.f32 %v12134_v27, %v5007_v49  ;;  %v5279_v12 = vadd.f32 %v12191_v13, %v5026_v25  ;;  %v13941_v25 = vld [vmem:[#allocation158_spill] sm:$0xff] }
 0x53c   : > { %5229 = vrot.lane.b32.xlu1 %v5223_v28, %s6725_s7  ;;  %v5224_v11 = vsel %vm2665_vm7, %v5221_v53, %v5223_v28  ;;  %5225 = vrot.lane.b32.xlu2 %v5222_v51, %s6725_s7  ;;  %v4657_v3 = vmul.f32 %v12180_v48, %v13932_v2  ;;  %v12455_v28 = vmul.f32 %v12246_v42, %v12015_v8  ;;  %v5258_v36 = vrot.slane %v5252_v5, 1  ;;  %v13942_v49 = vld [vmem:[#allocation38_spill] sm:$0xff]  ;;  %v13944_v5 = vld [vmem:[#allocation193_spill] sm:$0xff] }
 0x53d   : > { %v5243_v37 = vadd.f32 %v12134_v27, %v5008_v1  ;;  %5227 = vrot.lane.b32.xlu0 %v5224_v11, %s6725_s7  ;;  %vm5245_vm9 = vcmp.gt.f32.partialorder %v5242_v17, 0.0  ;;  %v5250_v54 = vmul.f32 %v13937_v40, %v5242_v17  ;;  %v5516_v23 = vadd.f32 %v5513_v7, %v12396_v20  ;;  %v13940_v1 = vld [vmem:[#allocation23_spill] sm:$0xff]  ;;  %s12625_s7 = sld [smem:[#allocation7 + $0xca]] }
 0x53e   : > { %v4886_v41 = vadd.f32 %v4883_v45, %v4819_v46  ;;  %v4879_v19 = vadd.f32 %v4876_v57, %v4800_v44  ;;  %v4884_v2 = vmul.f32 %v12383_v34, %v12346_v59  ;;  %v4660_v4 = vadd.f32 %v4657_v3, %v13940_v1 }
 0x53f   : > { %vm5246_vm3 = vcmp.gt.f32.partialorder %v5243_v37, 0.0  ;;  %v5251_v31 = vmul.f32 %v13937_v40, %v5243_v37  ;;  %v5253_v0 = vsel %vm5245_vm9, %v5242_v17, %v5250_v54  ;;  %v5287_v20 = vmul.f32 %v12374_v32, %v5279_v12 }
 0x540   : > { %v5259_v47 = vrot.slane %v5253_v0, 1  ;;  %v5020_v48 = vpop.permute.xlu0 %5019  ;;  %v5046_v7 = vadd.f32 %v5038_v52, %v4886_v41  ;;  %vm5282_vm10 = vcmp.gt.f32.partialorder %v5279_v12, 0.0  ;;  %v4820_v34 = vadd.f32 %v12186_v14, %v4660_v4  ;;  %v12487_v4 = vld [vmem:[#allocation2 + $0x8] sm:$0xff] }
 0x541   : > { %v5254_v39 = vsel %vm5246_vm3, %v5243_v37, %v5251_v31  ;;  %v5027_v10 = vadd.f32 %v5020_v48, %v4879_v19  ;;  %v5580_v37 = vmul.f32 %v13942_v49, %v13941_v25  ;;  %v5386_v11 = vstv %s12431_s9  ;;  %v13943_v31 = vld [vmem:[#allocation198_spill] sm:$0xff]  ;;  %v12499_v49 = vld [vmem:[#allocation2] sm:$0xff]  ;;  %s12629_s9 = sld [smem:[#allocation7 + $0x112]] }
 0x542   : > { %v5261_v56 = vrot.slane %v5254_v39, 1  ;;  %v5022_v38 = vpop.permute.xlu1 %5021  ;;  %v5260_v59 = vsel %vm2665_vm7, %v5258_v36, %v5259_v47  ;;  %v5453_v55 = vstv %s12437_s10  ;;  %v5520_v46 = vstv %s12444_s12  ;;  %s6731_s10 = smov 57   ;;  %s12647_s12 = sld [smem:[#allocation7 + $0x43]] }
 0x543   : > { %v5028_v53 = vadd.f32 %v5022_v38, %v12333_v63  ;;  %v5280_v16 = vadd.f32 %v12191_v13, %v5027_v10  ;;  %v5290_v60 = vsel %vm5282_vm10, %v5279_v12, %v5287_v20  ;;  %v5322_v44 = vadd.f32 %v12409_v9, %v5046_v7 }
 0x544   : > { %5267 = vrot.lane.b32.xlu1 %v5261_v56, %s6726_s15  ;;  %v5262_v62 = vsel %vm2665_vm7, %v5259_v47, %v5261_v56  ;;  %5263 = vrot.lane.b32.xlu2 %v5260_v59, %s6726_s15  ;;  %v5329_v17 = vstv %s12451_s13  ;;  %v5389_v57 = vmul.f32 %v5386_v11, %v13943_v31  ;;  %v5456_v54 = vmul.f32 %v5453_v55, %v13944_v5  ;;  %v13945_v56 = vld [vmem:[#allocation127_spill] sm:$0xff]  ;;  %s12656_s13 = sld [smem:[#allocation7 + $0x8b]] }
 0x545   : > { %v5281_v63 = vadd.f32 %v12191_v13, %v5028_v53  ;;  %5265 = vrot.lane.b32.xlu0 %v5262_v62, %s6726_s15  ;;  %vm5283_vm12 = vcmp.gt.f32.partialorder %v5280_v16, 0.0  ;;  %v5288_v14 = vmul.f32 %v12374_v32, %v5280_v16  ;;  %v4887_v41 = vadd.f32 %v4884_v2, %v4820_v34  ;;  %v13947_v34 = vld [vmem:[#allocation42_spill] sm:$0xff]  ;;  %s12678_s15 = sld [smem:[#allocation7 + $0x11b]] }
 0x546   : > { %v5523_v0 = vmul.f32 %v5520_v46, %v13945_v56  ;;  %v5296_v38 = vrot.slane %v5290_v60, 1  ;;  %v5587_v47 = vstv %s12461_s14  ;;  %v5330_v53 = vmul.f32 %v5329_v17, %v5322_v44  ;;  %s12671_s14 = sld [smem:[#allocation7 + $0xd3]] }
 0x547   : > { %vm5284_vm11 = vcmp.gt.f32.partialorder %v5281_v63, 0.0  ;;  %v5289_v51 = vmul.f32 %v12374_v32, %v5281_v63  ;;  %v5291_v52 = vsel %vm5283_vm12, %v5280_v16, %v5288_v14  ;;  %vm5709_vm13 = vcmp.gt.f32.partialorder %v12194_v30, 0.0 }
 0x548   : > { %v5297_v12 = vrot.slane %v5291_v52, 1  ;;  %v5040_v36 = vpop.permute.xlu0 %5039  ;;  %v5583_v1 = vadd.f32 %v5580_v37, %v5516_v23  ;;  %v5388_v2 = vmul.f32 %v12487_v4, %v5386_v11  ;;  %vm5325_vm14 = vcmp.gt.f32.partialorder %v5322_v44, 0.0 }
 0x549   : > { %v5292_v45 = vsel %vm5284_vm11, %v5281_v63, %v5289_v51  ;;  %v5047_v48 = vadd.f32 %v5040_v36, %v4887_v41  ;;  %vm5708_vm15 = vcmp.gt.f32.partialorder %v12246_v42, 0.0  ;;  %v5459_v23 = vadd.f32 %v5456_v54, %v5389_v57  ;;  %v13946_v63 = vld [vmem:[#allocation157_spill] sm:$0xff]  ;;  %v13948_v57 = vld [vmem:[#allocation138_spill] sm:$0xff]  ;;  %v13949_v54 = vld [vmem:[#allocation88_spill] sm:$0xff] }
 0x54a   : > { %v5299_v3 = vrot.slane %v5292_v45, 1  ;;  %v5042_v39 = vpop.permute.xlu1 %5041  ;;  %v5298_v7 = vsel %vm2665_vm7, %v5296_v38, %v5297_v12  ;;  %v5455_v62 = vmul.f32 %v13946_v63, %v5453_v55  ;;  %v5590_v16 = vmul.f32 %v5587_v47, %v13947_v34  ;;  %v12551_v34 = vld [vmem:[#allocation2 + $0x40] sm:$0x3] }
 0x54b   : > { %v5048_v19 = vadd.f32 %v5042_v39, %v12363_v43  ;;  %v5323_v10 = vadd.f32 %v12409_v9, %v5047_v48  ;;  %v5387_v37 = vmul.f32 %v12499_v49, %v5386_v11  ;;  %v5333_v51 = vsel %vm5325_vm14, %v5322_v44, %v5330_v53  ;;  %v12518_v48 = vld [vmem:[#allocation2 + $0x10] sm:$0x3] }
 0x54c   : > { %5305 = vrot.lane.b32.xlu1 %v5299_v3, %s6727_s21  ;;  %v5300_v20 = vsel %vm2665_vm7, %v5297_v12, %v5299_v3  ;;  %5301 = vrot.lane.b32.xlu2 %v5298_v7, %s6727_s21  ;;  %v5454_v14 = vmul.f32 %v12048_v15, %v5453_v55  ;;  %v12506_v31 = vadd.f32 %v5583_v1, %v12012_v29  ;;  %v5339_v39 = vrot.slane %v5333_v51, 1  ;;  %v12521_v1 = vld [vmem:[#allocation2 + $0x28] sm:$0x3] }
 0x54d   : > { %v5324_v43 = vadd.f32 %v12409_v9, %v5048_v19  ;;  %5303 = vrot.lane.b32.xlu0 %v5300_v20, %s6727_s21  ;;  %vm5326_vm1 = vcmp.gt.f32.partialorder %v5323_v10, 0.0  ;;  %v5331_v60 = vmul.f32 %v5329_v17, %v5323_v10  ;;  %v5522_v5 = vmul.f32 %v5520_v46, %v13948_v57  ;;  %s6733_s21 = smov 91  }
 0x54e   : > { %v5589_v3 = vmul.f32 %v5587_v47, %v13949_v54  ;;  %v5526_v52 = vadd.f32 %v5523_v0, %v5459_v23  ;;  %v5521_v41 = vmul.f32 %v5520_v46, %v13933_v18  ;;  %v5588_v56 = vmul.f32 %v5587_v47, %v13941_v25 }
 0x54f   : > { %vm5327_vm0 = vcmp.gt.f32.partialorder %v5324_v43, 0.0  ;;  %v5332_v59 = vmul.f32 %v5329_v17, %v5324_v43  ;;  %v5334_v44 = vsel %vm5326_vm1, %v5323_v10, %v5331_v60  ;;  %v5458_v17 = vadd.f32 %v5455_v62, %v5388_v2 }
 0x550   : > { %v5340_v55 = vrot.slane %v5334_v44, 1  ;;  %v5593_v29 = vadd.f32 %v5590_v16, %v5526_v52  ;;  %v5457_v38 = vadd.f32 %v5454_v14, %v5387_v37  ;;  %v5394_v12 = vstv %s12484_s20  ;;  %v12554_v16 = vld [vmem:[#allocation2 + $0x38] sm:$0xff]  ;;  %s6732_s20 = smov 74  }
 0x551   : > { %v5335_v45 = vsel %vm5327_vm0, %v5324_v43, %v5332_v59  ;;  %v5461_v19 = vstv %s12490_s24  ;;  %v5397_v0 = vmul.f32 %v12518_v48, %v5394_v12  ;;  %v5686_v25 = vrot.slane %v12214_v6, 1  ;;  %v12581_v52 = vld [vmem:[#allocation2 + $0x58] sm:$0x3]  ;;  %s6399_s24 = sld [smem:[#allocation9 + $0x7]] }
 0x552   : > { %v5342_v11 = vrot.slane %v5335_v45, 1  ;;  %v5341_v53 = vsel %vm2665_vm7, %v5339_v39, %v5340_v55  ;;  %v5464_v18 = vmul.f32 %v12521_v1, %v5461_v19  ;;  %v5525_v46 = vadd.f32 %v5522_v5, %v5458_v17  ;;  %v13952_v5 = vld [vmem:[#allocation66_spill] sm:$0xff]  ;;  %v12584_v39 = vld [vmem:[#allocation2 + $0x50] sm:$0xff] }
 0x553   : > { %v5396_v47 = vmul.f32 %v12487_v4, %v5394_v12  ;;  %v5463_v2 = vmul.f32 %v13946_v63, %v5461_v19  ;;  %v5684_v43 = vrot.slane %v12217_v33, 1  ;;  %v5683_v20 = vrot.slane %v12224_v61, 1 }
 0x554   : > { %5348 = vrot.lane.b32.xlu1 %v5342_v11, %s6728_s25  ;;  %v5343_v36 = vsel %vm2665_vm7, %v5340_v55, %v5342_v11  ;;  %5344 = vrot.lane.b32.xlu2 %v5341_v53, %s6728_s25  ;;  %v12535_v7 = vsel %vm5709_vm13, %v12194_v30, %v12230_v35  ;;  %v12541_v10 = vsel %vm5708_vm15, %v12246_v42, %v12455_v28  ;;  %vm5707_vm2 = vcmp.gt.f32.partialorder %v12506_v31, 0.0 }
 0x555   : > { %5346 = vrot.lane.b32.xlu0 %v5343_v36, %s6728_s25  ;;  %v5712_v33 = vmul.f32 %v12506_v31, %v12015_v8  ;;  %v5592_v61 = vadd.f32 %v5589_v3, %v5525_v46  ;;  %v5524_v23 = vadd.f32 %v5521_v41, %v5457_v38  ;;  %v5744_v63 = vadd.f32 %v5593_v29, %v13920_v21  ;;  %v13950_v8 = vld [vmem:[#allocation155_spill] sm:$0xff]  ;;  %s6736_s25 = smov 14  }
 0x556   : > { %v5467_v62 = vadd.f32 %v5464_v18, %v5397_v0  ;;  %v5528_v30 = vstv %s12503_s22  ;;  %v5595_v35 = vstv %s12510_s23  ;;  %v5466_v28 = vadd.f32 %v5463_v2, %v5396_v47  ;;  %v13954_v41 = vld [vmem:[#allocation31_spill] sm:$0xff]  ;;  %s6734_s22 = smov 108   ;;  %s6735_s23 = smov 125  }
 0x557   : > { %v5591_v59 = vadd.f32 %v5588_v56, %v5524_v23  ;;  %v5531_v42 = vmul.f32 %v12551_v34, %v5528_v30  ;;  %v5530_v37 = vmul.f32 %v12554_v16, %v5528_v30  ;;  %v13951_v51 = vrot.slane %v13950_v8, 1 }
 0x558   : > { %v5687_v14 = vsel %vm2665_vm7, %v5684_v43, %v5686_v25  ;;  %v5395_v45 = vmul.f32 %v12499_v49, %v5394_v12  ;;  %v5462_v57 = vmul.f32 %v12048_v15, %v5461_v19  ;;  %v13953_v54 = vrot.slane %v13952_v5, 1  ;;  %v12589_v12 = vld [vmem:[#allocation2 + $0x30] sm:$0xff] }
 0x559   : > { %v5647_v60 = vsel %vm2665_vm7, %v5645_v22, %v13951_v51  ;;  %v5685_v3 = vsel %vm2665_vm7, %v5683_v20, %v5684_v43  ;;  %v5724_v58 = vrot.slane %v12535_v7, 1  ;;  %v5722_v22 = vrot.slane %v12541_v10, 1  ;;  %v12598_v43 = vld [vmem:[#allocation2 + $0x48] sm:$0xff] }
 0x55a   : > { %v5743_v11 = vadd.f32 %v5592_v61, %v13920_v21  ;;  %v5715_v44 = vsel %vm5707_vm2, %v12506_v31, %v5712_v33  ;;  %v5752_v15 = vmul.f32 %v5744_v63, %v13923_v24  ;;  %v5598_v17 = vmul.f32 %v12581_v52, %v5595_v35  ;;  %v12603_v61 = vld [vmem:[#allocation2 + $0x20] sm:$0xff] }
 0x55b   : > { %v5597_v55 = vmul.f32 %v12584_v39, %v5595_v35  ;;  %vm5747_vm4 = vcmp.gt.f32.partialorder %v5744_v63, 0.0  ;;  %v5742_v56 = vadd.f32 %v5591_v59, %v13920_v21  ;;  %v5534_v29 = vadd.f32 %v5531_v42, %v5467_v62 }
 0x55c   : > { %5654 = vrot.lane.b32.xlu1 %v13953_v54, %s6729_s19  ;;  %5650 = vrot.lane.b32.xlu2 %v5647_v60, %s6729_s19  ;;  %v5533_v38 = vadd.f32 %v5530_v37, %v5466_v28  ;;  %v5465_v31 = vadd.f32 %v5462_v57, %v5395_v45  ;;  %v5529_v19 = vmul.f32 %v12589_v12, %v5528_v30  ;;  %v5402_v36 = vstv %s12527_s26  ;;  %v12617_v37 = vld [vmem:[#allocation2 + $0x18] sm:$0xff] }
 0x55d   : > { %5652 = vrot.lane.b32.xlu0 %v13954_v41, %s6729_s19  ;;  %v5469_v53 = vstv %s12543_s27  ;;  %v5721_v0 = vrot.slane %v5715_v44, 1  ;;  %vm5746_vm5 = vcmp.gt.f32.partialorder %v5743_v11, 0.0  ;;  %v5405_v18 = vmul.f32 %v12518_v48, %v5402_v36 }
 0x55e   : > { %v5472_v46 = vmul.f32 %v12521_v1, %v5469_v53  ;;  %v12596_v47 = vsel %vm5747_vm4, %v5744_v63, %v5752_v15  ;;  %v5601_v21 = vadd.f32 %v5598_v17, %v5534_v29  ;;  %v5600_v2 = vadd.f32 %v5597_v55, %v5533_v38 }
 0x55f   : > { %v5596_v20 = vmul.f32 %v12598_v43, %v5595_v35  ;;  %v5751_v10 = vmul.f32 %v5743_v11, %v13923_v24  ;;  %vm5745_vm6 = vcmp.gt.f32.partialorder %v5742_v56, 0.0  ;;  %v5404_v33 = vmul.f32 %v12487_v4, %v5402_v36 }
 0x560   : > { %v5471_v23 = vmul.f32 %v12603_v61, %v5469_v53  ;;  %v5750_v63 = vmul.f32 %v5742_v56, %v13923_v24  ;;  %v5532_v62 = vadd.f32 %v5529_v19, %v5465_v31  ;;  %v5536_v30 = vstv %s12557_s28 }
 0x561   : > { %v5603_v59 = vstv %s12569_s29  ;;  %v5475_v35 = vadd.f32 %v5472_v46, %v5405_v18  ;;  %v5539_v42 = vmul.f32 %v12551_v34, %v5536_v30  ;;  %v5403_v28 = vmul.f32 %v12499_v49, %v5402_v36 }
 0x562   : > { %v5470_v8 = vmul.f32 %v12617_v37, %v5469_v53  ;;  %v5725_v24 = vsel %vm2665_vm7, %v5722_v22, %v5724_v58  ;;  %v5782_v51 = vadd.f32 %v5601_v21, %v13926_v50  ;;  %v5781_v60 = vadd.f32 %v5600_v2, %v13926_v50 }
 0x563   : > { %v5599_v45 = vadd.f32 %v5596_v20, %v5532_v62  ;;  %v5606_v6 = vmul.f32 %v12581_v52, %v5603_v59  ;;  %v5538_v57 = vmul.f32 %v12554_v16, %v5536_v30  ;;  %v5723_v5 = vsel %vm2665_vm7, %v5721_v0, %v5722_v22 }
 0x564   : > { %5692 = vrot.lane.b32.xlu1 %v5686_v25, %s6730_s5  ;;  %5688 = vrot.lane.b32.xlu2 %v5685_v3, %s6730_s5  ;;  %v5474_v25 = vadd.f32 %v5471_v23, %v5404_v33  ;;  %v5762_v54 = vrot.slane %v12596_v47, 1  ;;  %v5754_v44 = vsel %vm5746_vm5, %v5743_v11, %v5751_v10  ;;  %v5753_v15 = vsel %vm5745_vm6, %v5742_v56, %v5750_v63 }
 0x565   : > { %5690 = vrot.lane.b32.xlu0 %v5687_v14, %s6730_s5  ;;  %v5542_v17 = vadd.f32 %v5539_v42, %v5475_v35  ;;  %v5605_v14 = vmul.f32 %v12584_v39, %v5603_v59  ;;  %v5473_v3 = vadd.f32 %v5470_v8, %v5403_v28  ;;  %v5537_v55 = vmul.f32 %v12589_v12, %v5536_v30 }
 0x566   : > { %vm5785_vm8 = vcmp.gt.f32.partialorder %v5782_v51, 0.0  ;;  %v5790_v41 = vmul.f32 %v5782_v51, %v12123_v26  ;;  %v5789_v29 = vmul.f32 %v5781_v60, %v12123_v26  ;;  %v5780_v22 = vadd.f32 %v5599_v45, %v13926_v50 }
 0x567   : > { %vm5784_vm3 = vcmp.gt.f32.partialorder %v5781_v60, 0.0  ;;  %v5609_v38 = vadd.f32 %v5606_v6, %v5542_v17  ;;  %v5541_v11 = vadd.f32 %v5538_v57, %v5474_v25  ;;  %v5604_v31 = vmul.f32 %v12598_v43, %v5603_v59 }
 0x568   : > { %v5760_v56 = vrot.slane %v5754_v44, 1  ;;  %v5759_v19 = vrot.slane %v5753_v15, 1  ;;  %v5410_v36 = vstv %s12606_s30  ;;  %v5477_v53 = vstv %s12611_s18 }
 0x569   : > { %v5608_v0 = vadd.f32 %v5605_v14, %v5541_v11  ;;  %v5540_v18 = vadd.f32 %v5537_v55, %v5473_v3  ;;  %v5413_v46 = vmul.f32 %v12518_v48, %v5410_v36  ;;  %v5480_v50 = vmul.f32 %v12521_v1, %v5477_v53 }
 0x56a   : > { %v12650_v47 = vsel %vm5785_vm8, %v5782_v51, %v5790_v41  ;;  %v12653_v21 = vsel %vm5784_vm3, %v5781_v60, %v5789_v29  ;;  %vm5783_vm9 = vcmp.gt.f32.partialorder %v5780_v22, 0.0  ;;  %v5788_v7 = vmul.f32 %v5780_v22, %v12123_v26 }
 0x56b   : > { %v5607_v2 = vadd.f32 %v5604_v31, %v5540_v18  ;;  %v5544_v20 = vstv %s12625_s7  ;;  %v5611_v10 = vstv %s12629_s9  ;;  %v5412_v33 = vmul.f32 %v12487_v4, %v5410_v36 }
 0x56c   : > { %5730 = vrot.lane.b32.xlu1 %v5724_v58, %s6731_s10  ;;  %5726 = vrot.lane.b32.xlu2 %v5723_v5, %s6731_s10  ;;  %v5820_v58 = vadd.f32 %v5609_v38, %v12134_v27  ;;  %v5479_v23 = vmul.f32 %v12603_v61, %v5477_v53  ;;  %v5411_v63 = vmul.f32 %v12499_v49, %v5410_v36  ;;  %v5800_v28 = vrot.slane %v12650_v47, 1 }
 0x56d   : > { %5728 = vrot.lane.b32.xlu0 %v5725_v24, %s6731_s10  ;;  %v5478_v62 = vmul.f32 %v12617_v37, %v5477_v53  ;;  %v5819_v30 = vadd.f32 %v5608_v0, %v12134_v27  ;;  %v5483_v26 = vadd.f32 %v5480_v50, %v5413_v46  ;;  %v5547_v59 = vmul.f32 %v12551_v34, %v5544_v20 }
 0x56e   : > { %v5763_v35 = vsel %vm2665_vm7, %v5760_v56, %v5762_v54  ;;  %v5761_v42 = vsel %vm2665_vm7, %v5759_v19, %v5760_v56  ;;  %v5798_v8 = vrot.slane %v12653_v21, 1  ;;  %v5791_v24 = vsel %vm5783_vm9, %v5780_v22, %v5788_v7 }
 0x56f   : > { %vm5823_vm10 = vcmp.gt.f32.partialorder %v5820_v58, 0.0  ;;  %v5818_v51 = vadd.f32 %v5607_v2, %v12134_v27  ;;  %v5614_v60 = vmul.f32 %v12581_v52, %v5611_v10  ;;  %v5482_v45 = vadd.f32 %v5479_v23, %v5412_v33 }
 0x570   : > { %v5546_v6 = vmul.f32 %v12554_v16, %v5544_v20  ;;  %v5481_v25 = vadd.f32 %v5478_v62, %v5411_v63  ;;  %v5545_v57 = vmul.f32 %v12589_v12, %v5544_v20  ;;  %v5828_v5 = vmul.f32 %v5820_v58, %v13937_v40 }
 0x571   : > { %vm5822_vm11 = vcmp.gt.f32.partialorder %v5819_v30, 0.0  ;;  %v5827_v44 = vmul.f32 %v5819_v30, %v13937_v40  ;;  %v5550_v15 = vadd.f32 %v5547_v59, %v5483_v26  ;;  %v5613_v27 = vmul.f32 %v12584_v39, %v5611_v10 }
 0x572   : > { %v5612_v17 = vmul.f32 %v12598_v43, %v5611_v10  ;;  %v5418_v14 = vstv %s12647_s12  ;;  %v5485_v3 = vstv %s12656_s13  ;;  %vm5082_vm12 = vcmask 269440  }
 0x573   : > { %vm5821_vm13 = vcmp.gt.f32.partialorder %v5818_v51, 0.0  ;;  %v5617_v55 = vadd.f32 %v5614_v60, %v5550_v15  ;;  %v5549_v41 = vadd.f32 %v5546_v6, %v5482_v45  ;;  %v5548_v29 = vadd.f32 %v5545_v57, %v5481_v25 }
 0x574   : > { %5768 = vrot.lane.b32.xlu1 %v5762_v54, %s6732_s20  ;;  %5764 = vrot.lane.b32.xlu2 %v5761_v42, %s6732_s20  ;;  %v5826_v54 = vmul.f32 %v5818_v51, %v13937_v40  ;;  %v5421_v22 = vmul.f32 %v12518_v48, %v5418_v14  ;;  %v5488_v38 = vmul.f32 %v12521_v1, %v5485_v3  ;;  %v5797_v40 = vrot.slane %v5791_v24, 1 }
 0x575   : > { %5766 = vrot.lane.b32.xlu0 %v5763_v35, %s6732_s20  ;;  %v5074_v11 = vpop.permute.xlu2 %5073  ;;  %v5420_v31 = vmul.f32 %v12487_v4, %v5418_v14  ;;  %v5487_v56 = vmul.f32 %v12603_v61, %v5485_v3  ;;  %v5419_v19 = vmul.f32 %v12499_v49, %v5418_v14  ;;  %v5486_v36 = vmul.f32 %v12617_v37, %v5485_v3 }
 0x576   : > { %5083 = vst.msk [vmem:[%s11231_s6 + $0x10] sm:$0xff] %vm5082_vm12, %v5074_v11  ;;  %v5616_v53 = vadd.f32 %v5613_v27, %v5549_v41  ;;  %v5615_v0 = vadd.f32 %v5612_v17, %v5548_v29  ;;  %v5552_v18 = vstv %s12671_s14  ;;  %v5831_v48 = vsel %vm5823_vm10, %v5820_v58, %v5828_v5 }
 0x577   : > { %v5830_v1 = vsel %vm5822_vm11, %v5819_v30, %v5827_v44  ;;  %v5829_v46 = vsel %vm5821_vm13, %v5818_v51, %v5826_v54  ;;  %v5858_v4 = vadd.f32 %v5617_v55, %v12191_v13  ;;  %v5491_v50 = vadd.f32 %v5488_v38, %v5421_v22 }
 0x578   : > { %v5555_v61 = vmul.f32 %v12551_v34, %v5552_v18  ;;  %v5619_v49 = vstv %s12678_s15  ;;  %v5490_v37 = vadd.f32 %v5487_v56, %v5420_v31  ;;  %v5554_v47 = vmul.f32 %v12554_v16, %v5552_v18 }
 0x579   : > { %v5489_v21 = vadd.f32 %v5486_v36, %v5419_v19  ;;  %v5553_v7 = vmul.f32 %v12589_v12, %v5552_v18  ;;  %v5801_v58 = vsel %vm2665_vm7, %v5798_v8, %v5800_v28  ;;  %v5799_v2 = vsel %vm2665_vm7, %v5797_v40, %v5798_v8 }
 0x57a   : > { %v5857_v20 = vadd.f32 %v5616_v53, %v12191_v13  ;;  %v5856_v10 = vadd.f32 %v5615_v0, %v12191_v13  ;;  %vm5120_vm14 = vcmask 408840   ;;  %v5622_v34 = vmul.f32 %v12581_v52, %v5619_v49 }
 0x57b   : > { %v5621_v33 = vmul.f32 %v12584_v39, %v5619_v49  ;;  %v5620_v16 = vmul.f32 %v12598_v43, %v5619_v49  ;;  %v5838_v23 = vrot.slane %v5831_v48, 1  ;;  %v5836_v12 = vrot.slane %v5830_v1, 1 }
 0x57c   : > { %5806 = vrot.lane.b32.xlu1 %v5800_v28, %s6733_s21  ;;  %5802 = vrot.lane.b32.xlu2 %v5799_v2, %s6733_s21  ;;  %v5835_v63 = vrot.slane %v5829_v46, 1  ;;  %vm5861_vm15 = vcmp.gt.f32.partialorder %v5858_v4, 0.0  ;;  %v5558_v30 = vadd.f32 %v5555_v61, %v5491_v50  ;;  %v5557_v26 = vadd.f32 %v5554_v47, %v5490_v37 }
 0x57d   : > { %5804 = vrot.lane.b32.xlu0 %v5801_v58, %s6733_s21  ;;  %v5112_v62 = vpop.permute.xlu2 %5111  ;;  %v5556_v59 = vadd.f32 %v5553_v7, %v5489_v21  ;;  %v5866_v13 = vmul.f32 %v5858_v4, %v12374_v32  ;;  %vm5860_vm0 = vcmp.gt.f32.partialorder %v5857_v20, 0.0  ;;  %v5865_v52 = vmul.f32 %v5857_v20, %v12374_v32 }
 0x57e   : > { %5121 = vst.msk [vmem:[%s11231_s6 + $0x10] sm:$0xff] %vm5120_vm14, %v5112_v62  ;;  %v5864_v39 = vmul.f32 %v5856_v10, %v12374_v32  ;;  %vm5859_vm1 = vcmp.gt.f32.partialorder %v5856_v10, 0.0  ;;  %v5625_v43 = vadd.f32 %v5622_v34, %v5558_v30  ;;  %v5624_v35 = vadd.f32 %v5621_v33, %v5557_v26 }
 0x57f   : > { %v5623_v42 = vadd.f32 %v5620_v16, %v5556_v59  ;;  %v5839_v28 = vsel %vm2665_vm7, %v5836_v12, %v5838_v23  ;;  %v5837_v8 = vsel %vm2665_vm7, %v5835_v63, %v5836_v12  ;;  %v5869_v24 = vsel %vm5861_vm15, %v5858_v4, %v5866_v13 }
 0x580   : > { %v5868_v51 = vsel %vm5860_vm0, %v5857_v20, %v5865_v52  ;;  %v5867_v60 = vsel %vm5859_vm1, %v5856_v10, %v5864_v39  ;;  %vm5158_vm2 = vcmask 548240   ;;  %v5901_v32 = vadd.f32 %v5625_v43, %v12409_v9 }
 0x581   : > { %v5900_v45 = vadd.f32 %v5624_v35, %v12409_v9  ;;  %v5899_v6 = vadd.f32 %v5623_v42, %v12409_v9  ;;  %v5906_v25 = vstv %s6399_s24  ;;  %v5876_v5 = vrot.slane %v5869_v24, 1 }
 0x582   : > { %v5874_v44 = vrot.slane %v5868_v51, 1  ;;  %v5873_v15 = vrot.slane %v5867_v60, 1  ;;  %v5909_v27 = vmul.f32 %v5906_v25, %v5901_v32  ;;  %vm5904_vm4 = vcmp.gt.f32.partialorder %v5901_v32, 0.0 }
 0x583   : > { %v5908_v17 = vmul.f32 %v5906_v25, %v5900_v45  ;;  %v5907_v14 = vmul.f32 %v5906_v25, %v5899_v6  ;;  %vm5903_vm5 = vcmp.gt.f32.partialorder %v5900_v45, 0.0  ;;  %vm5902_vm6 = vcmp.gt.f32.partialorder %v5899_v6, 0.0 }
 0x584   : > { %5844 = vrot.lane.b32.xlu1 %v5838_v23, %s6734_s22  ;;  %5840 = vrot.lane.b32.xlu2 %v5837_v8, %s6734_s22  ;;  %vm5085_vm8 = vcmask 262272   ;;  %v5877_v9 = vsel %vm2665_vm7, %v5874_v44, %v5876_v5  ;;  %v5875_v3 = vsel %vm2665_vm7, %v5873_v15, %v5874_v44  ;;  %v5912_v55 = vsel %vm5904_vm4, %v5901_v32, %v5909_v27 }
 0x585   : > { %5842 = vrot.lane.b32.xlu0 %v5839_v28, %s6734_s22  ;;  %v5911_v41 = vsel %vm5903_vm5, %v5900_v45, %v5908_v17  ;;  %v5910_v29 = vsel %vm5902_vm6, %v5899_v6, %v5907_v14  ;;  %vm5196_vm3 = vcmask 687640   ;;  %v5919_v11 = vrot.slane %v5912_v55, 1 }
 0x586   : > { %v5150_v57 = vpop.permute.xlu2 %5149  ;;  %v5917_v31 = vrot.slane %v5911_v41, 1  ;;  %v5916_v56 = vrot.slane %v5910_v29, 1  ;;  %vm5123_vm9 = vcmask 401672   ;;  %vm5234_vm10 = vcmask 827040  }
 0x587   : > { %5159 = vst.msk [vmem:[%s11231_s6 + $0x10] sm:$0xff] %vm5158_vm2, %v5150_v57  ;;  %vm5161_vm11 = vcmask 541072   ;;  %vm5310_vm13 = vcmask 1048496   ;;  %vm5237_vm15 = vcmask 819872   ;;  %vm5353_vm0 = vcmask 195640  }
 0x588   : > { %v5920_v19 = vsel %vm2665_vm7, %v5917_v31, %v5919_v11  ;;  %v5918_v36 = vsel %vm2665_vm7, %v5916_v56, %v5917_v31  ;;  %vm5272_vm7 = vcmask 966440   ;;  %vm5275_vm1 = vcmask 959272  }
 0x589   : > { %vm5316_vm4 = vcmask 1041328   ;;  %vm5318_vm5 = vcmask 49152   ;;  %vm5697_vm6 = vcmask 474440  }
 0x58c   : > { %5882 = vrot.lane.b32.xlu1 %v5876_v5, %s6735_s23  ;;  %5878 = vrot.lane.b32.xlu2 %v5875_v3, %s6735_s23 }
 0x58d   : > { %5880 = vrot.lane.b32.xlu0 %v5877_v9, %s6735_s23 }
 0x58e   : > { %v5078_v54 = vpop.permute.xlu1 %5077  ;;  %v5188_v38 = vpop.permute.xlu2 %5187 }
 0x58f   : > { %5086 = vst.msk [vmem:[%s11231_s6 + $0x60] sm:$0x1] %vm5085_vm8, %v5078_v54  ;;  %v5076_v22 = vpop.permute.xlu0 %5075  ;;  %vm5356_vm8 = vcmask 188472  }
 0x590   : > { %5084 = vst.msk [vmem:[%s11231_s6 + $0x38] sm:$0xff] %vm5082_vm12, %v5076_v22  ;;  %vm5199_vm12 = vcmask 680472  }
 0x591   : > { %5197 = vst.msk [vmem:[%s11231_s6 + $0x10] sm:$0xff] %vm5196_vm3, %v5188_v38 }
 0x594   : > { %5925 = vrot.lane.b32.xlu1 %v5919_v11, %s6736_s25  ;;  %5921 = vrot.lane.b32.xlu2 %v5918_v36, %s6736_s25 }
 0x595   : > { %5923 = vrot.lane.b32.xlu0 %v5920_v19, %s6736_s25 }
 0x596   : > { %v5116_v40 = vpop.permute.xlu1 %5115  ;;  %v5226_v0 = vpop.permute.xlu2 %5225 }
 0x597   : > { %5124 = vst.msk [vmem:[%s11231_s6 + $0x60] sm:$0x1] %vm5123_vm9, %v5116_v40  ;;  %v5114_v53 = vpop.permute.xlu0 %5113  ;;  %vm5662_vm9 = vcmask 327872  }
 0x598   : > { %5122 = vst.msk [vmem:[%s11231_s6 + $0x38] sm:$0xff] %vm5120_vm14, %v5114_v53  ;;  %vm5312_vm14 = vcmask 56320  }
 0x599   : > { %5235 = vst.msk [vmem:[%s11231_s6 + $0x10] sm:$0xff] %vm5234_vm10, %v5226_v0 }
 0x59e   : > { %v5154_v18 = vpop.permute.xlu1 %5153  ;;  %v5264_v1 = vpop.permute.xlu2 %5263 }
 0x59f   : > { %5162 = vst.msk [vmem:[%s11231_s6 + $0x60] sm:$0x1] %vm5161_vm11, %v5154_v18  ;;  %v5152_v48 = vpop.permute.xlu0 %5151  ;;  %vm5700_vm11 = vcmask 467272  }
 0x5a0   : > { %5160 = vst.msk [vmem:[%s11231_s6 + $0x38] sm:$0xff] %vm5158_vm2, %v5152_v48  ;;  %vm5659_vm2 = vcmask 335040  }
 0x5a1   : > { %5273 = vst.msk [vmem:[%s11231_s6 + $0x10] sm:$0xff] %vm5272_vm7, %v5264_v1 }
 0x5a6   : > { %v5192_v46 = vpop.permute.xlu1 %5191  ;;  %v5302_v50 = vpop.permute.xlu2 %5301 }
 0x5a7   : > { %5200 = vst.msk [vmem:[%s11231_s6 + $0x60] sm:$0x1] %vm5199_vm12, %v5192_v46  ;;  %v5190_v4 = vpop.permute.xlu0 %5189  ;;  %vm5738_vm12 = vcmask 606672  }
 0x5a8   : > { %5198 = vst.msk [vmem:[%s11231_s6 + $0x38] sm:$0xff] %vm5196_vm3, %v5190_v4  ;;  %vm5735_vm3 = vcmask 613840  }
 0x5a9   : > { %5311 = vst.msk [vmem:[%s11231_s6 + $0x10] sm:$0xff] %vm5310_vm13, %v5302_v50 }
 0x5aa   : > { %5313 = vst.msk [vmem:[%s11231_s6 + $0x18] sm:$0xff] %vm5312_vm14, %v5302_v50 }
 0x5ae   : > { %v5230_v61 = vpop.permute.xlu1 %5229  ;;  %v5345_v37 = vpop.permute.xlu2 %5344 }
 0x5af   : > { %5238 = vst.msk [vmem:[%s11231_s6 + $0x60] sm:$0x1] %vm5237_vm15, %v5230_v61  ;;  %v5228_v49 = vpop.permute.xlu0 %5227  ;;  %vm5887_vm15 = vcmask 1048560  }
 0x5b0   : > { %5236 = vst.msk [vmem:[%s11231_s6 + $0x38] sm:$0xff] %vm5234_vm10, %v5228_v49  ;;  %vm5773_vm10 = vcmask 753240  }
 0x5b1   : > { %5354 = vst.msk [vmem:[%s11231_s6 + $0x18] sm:$0xff] %vm5353_vm0, %v5345_v37 }
 0x5b6   : > { %v5268_v47 = vpop.permute.xlu1 %5267  ;;  %v5651_v7 = vpop.permute.xlu2 %5650 }
 0x5b7   : > { %5276 = vst.msk [vmem:[%s11231_s6 + $0x60] sm:$0x1] %vm5275_vm1, %v5268_v47  ;;  %v5266_v21 = vpop.permute.xlu0 %5265  ;;  %vm5814_vm1 = vcmask 885472  }
 0x5b8   : > { %5274 = vst.msk [vmem:[%s11231_s6 + $0x38] sm:$0xff] %vm5272_vm7, %v5266_v21  ;;  %vm5811_vm7 = vcmask 892640  }
 0x5b9   : > { %5660 = vst.msk [vmem:[%s11231_s6 + $0x18] sm:$0xff] %vm5659_vm2, %v5651_v7 }
 0x5be   : > { %v5306_v58 = vpop.permute.xlu1 %5305  ;;  %v5689_v20 = vpop.permute.xlu2 %5688 }
 0x5bf   : > { %5317 = vst.msk [vmem:[%s11231_s6 + $0x60] sm:$0x1] %vm5316_vm4, %v5306_v58  ;;  %v5304_v2 = vpop.permute.xlu0 %5303  ;;  %vm5852_vm4 = vcmask 1024872  }
 0x5c0   : > { %5319 = vst.msk [vmem:[%s11231_s6 + $0x68] sm:$0x1] %vm5318_vm5, %v5306_v58  ;;  %vm5893_vm5 = vcmask 1041392  }
 0x5c1   : > { %5314 = vst.msk [vmem:[%s11231_s6 + $0x38] sm:$0xff] %vm5310_vm13, %v5304_v2  ;;  %vm5849_vm13 = vcmask 1032040  }
 0x5c2   : > { %5315 = vst.msk [vmem:[%s11231_s6 + $0x40] sm:$0xff] %vm5312_vm14, %v5304_v2  ;;  %vm5776_vm14 = vcmask 746072  }
 0x5c3   : > { %5698 = vst.msk [vmem:[%s11231_s6 + $0x18] sm:$0xff] %vm5697_vm6, %v5689_v20 }
 0x5c6   : > { %v5349_v10 = vpop.permute.xlu1 %5348  ;;  %v5727_v33 = vpop.permute.xlu2 %5726 }
 0x5c7   : > { %5357 = vst.msk [vmem:[%s11231_s6 + $0x68] sm:$0x1] %vm5356_vm8, %v5349_v10  ;;  %v5347_v34 = vpop.permute.xlu0 %5346  ;;  %vm5933_vm8 = vcmask 254072  }
 0x5c8   : > { %5355 = vst.msk [vmem:[%s11231_s6 + $0x40] sm:$0xff] %vm5353_vm0, %v5347_v34  ;;  %vm5889_vm0 = vcmask 121856  }
 0x5c9   : > { %5736 = vst.msk [vmem:[%s11231_s6 + $0x18] sm:$0xff] %vm5735_vm3, %v5727_v33 }
 0x5ce   : > { %v5655_v16 = vpop.permute.xlu1 %5654  ;;  %v5765_v12 = vpop.permute.xlu2 %5764 }
 0x5cf   : > { %5663 = vst.msk [vmem:[%s11231_s6 + $0x68] sm:$0x1] %vm5662_vm9, %v5655_v16  ;;  %v5653_v23 = vpop.permute.xlu0 %5652 }
 0x5d0   : > { %5661 = vst.msk [vmem:[%s11231_s6 + $0x40] sm:$0xff] %vm5659_vm2, %v5653_v23  ;;  %vm5930_vm2 = vcmask 261240  }
 0x5d1   : > { %5774 = vst.msk [vmem:[%s11231_s6 + $0x18] sm:$0xff] %vm5773_vm10, %v5765_v12 }
 0x5d6   : > { %v5693_v63 = vpop.permute.xlu1 %5692  ;;  %v5803_v30 = vpop.permute.xlu2 %5802 }
 0x5d7   : > { %5701 = vst.msk [vmem:[%s11231_s6 + $0x68] sm:$0x1] %vm5700_vm11, %v5693_v63  ;;  %v5691_v62 = vpop.permute.xlu0 %5690 }
 0x5d8   : > { %5699 = vst.msk [vmem:[%s11231_s6 + $0x40] sm:$0xff] %vm5697_vm6, %v5691_v62  ;;  %vm5895_vm6 = vcmask 114688  }
 0x5d9   : > { %5812 = vst.msk [vmem:[%s11231_s6 + $0x18] sm:$0xff] %vm5811_vm7, %v5803_v30 }
 0x5de   : > { %v5731_v26 = vpop.permute.xlu1 %5730  ;;  %v5841_v13 = vpop.permute.xlu2 %5840 }
 0x5df   : > { %5739 = vst.msk [vmem:[%s11231_s6 + $0x68] sm:$0x1] %vm5738_vm12, %v5731_v26  ;;  %v5729_v59 = vpop.permute.xlu0 %5728 }
 0x5e0   : > { %5737 = vst.msk [vmem:[%s11231_s6 + $0x40] sm:$0xff] %vm5735_vm3, %v5729_v59 }
 0x5e1   : > { %5850 = vst.msk [vmem:[%s11231_s6 + $0x18] sm:$0xff] %vm5849_vm13, %v5841_v13 }
 0x5e6   : > { %v5769_v52 = vpop.permute.xlu1 %5768  ;;  %v5879_v43 = vpop.permute.xlu2 %5878 }
 0x5e7   : > { %5777 = vst.msk [vmem:[%s11231_s6 + $0x68] sm:$0x1] %vm5776_vm14, %v5769_v52  ;;  %v5767_v39 = vpop.permute.xlu0 %5766 }
 0x5e8   : > { %5775 = vst.msk [vmem:[%s11231_s6 + $0x40] sm:$0xff] %vm5773_vm10, %v5767_v39 }
 0x5e9   : > { %5888 = vst.msk [vmem:[%s11231_s6 + $0x18] sm:$0xff] %vm5887_vm15, %v5879_v43 }
 0x5ea   : > { %5890 = vst.msk [vmem:[%s11231_s6 + $0x20] sm:$0xff] %vm5889_vm0, %v5879_v43 }
 0x5ee   : > { %v5807_v35 = vpop.permute.xlu1 %5806  ;;  %v5922_v28 = vpop.permute.xlu2 %5921 }
 0x5ef   : > { %5815 = vst.msk [vmem:[%s11231_s6 + $0x68] sm:$0x1] %vm5814_vm1, %v5807_v35  ;;  %v5805_v42 = vpop.permute.xlu0 %5804 }
 0x5f0   : > { %5813 = vst.msk [vmem:[%s11231_s6 + $0x40] sm:$0xff] %vm5811_vm7, %v5805_v42 }
 0x5f1   : > { %5931 = vst.msk [vmem:[%s11231_s6 + $0x20] sm:$0xff] %vm5930_vm2, %v5922_v28 }
 0x5f6   : > { %v5845_v8 = vpop.permute.xlu1 %5844 }
 0x5f7   : > { %5853 = vst.msk [vmem:[%s11231_s6 + $0x68] sm:$0x1] %vm5852_vm4, %v5845_v8  ;;  %v5843_v24 = vpop.permute.xlu0 %5842 }
 0x5f8   : > { %5851 = vst.msk [vmem:[%s11231_s6 + $0x40] sm:$0xff] %vm5849_vm13, %v5843_v24 }
 0x5fe   : > { %v5883_v51 = vpop.permute.xlu1 %5882 }
 0x5ff   : > { %5894 = vst.msk [vmem:[%s11231_s6 + $0x68] sm:$0x1] %vm5893_vm5, %v5883_v51  ;;  %v5881_v60 = vpop.permute.xlu0 %5880 }
 0x600   : > { %5896 = vst.msk [vmem:[%s11231_s6 + $0x70] sm:$0x1] %vm5895_vm6, %v5883_v51 }
 0x601   : > { %5891 = vst.msk [vmem:[%s11231_s6 + $0x40] sm:$0xff] %vm5887_vm15, %v5881_v60 }
 0x602   : > { %5892 = vst.msk [vmem:[%s11231_s6 + $0x48] sm:$0xff] %vm5889_vm0, %v5881_v60 }
 0x606   : > { %v5926_v32 = vpop.permute.xlu1 %5925 }
 0x607   : > { %5934 = vst.msk [vmem:[%s11231_s6 + $0x70] sm:$0x1] %vm5933_vm8, %v5926_v32  ;;  %v5924_v45 = vpop.permute.xlu0 %5923 }
 0x608   : > { %5932 = vst.msk [vmem:[%s11231_s6 + $0x48] sm:$0xff] %vm5930_vm2, %v5924_v45 }
 0x609 PF: > { %p17_p4 = scmp.ge.s32.totalorder %s6811_s8, 4   ;;  %s13955_s15 = smov %s6688_s16 }
 0x60a   : > { %s13956_s16 = smov %s6692_s17  ;;  %s13957_s17 = smov %s6821_s11 }
 0x60b   : > { %s13958_s18 = smov %s6811_s8  ;;  %19 = sbr.rel (!%p17_p4) target bundleno = 6 (0x6), region = 96 }
 0x610   :  { %5956 = vsyncpa [#allocation4], 1 }
 0x611   :  { %5958 = vsyncpa [#allocation4 + $0x1], 1 }
 0x612   :  { %5959 = vsyncpa [#allocation5], 1 }
 0x613   :  { %5961 = vsyncpa [#allocation5 + $0x1], 1 }
 0x614   :  { %5962 = vsyncpa [#allocation10], 1 }
 0x615   :  { %5963 = vsyncpa [#allocation6], 1 }
 0x616   :  { %5965 = vsyncpa [#allocation6 + $0x1], 1 }

</bundles_post_ra>
